<compile_context>
chip_gen: v7x
topology: tpu7x:2x2x1
jax: 0.10.0
libtpu: 0.0.40
codegen_flags: <defaults>
</compile_context>

<pallas_src>
import math
import functools

import numpy as np
import jax
import jax.numpy as jnp
from jax.experimental import pallas as pl
from jax.experimental.pallas import tpu as pltpu

DEFAULT_TM = 256
SCORE_LANES = 128          # lane-dense scores slab; real heads occupy the first Hc cols


# --------------------------------------------------------------------------
# Generation-aware compiler parameters
# --------------------------------------------------------------------------

@functools.lru_cache(maxsize=None)
def _vmem_capacity_bytes():
    try:
        return int(pltpu.get_tpu_info().vmem_capacity_bytes)
    except Exception:
        return 128 * 1024 * 1024       # v5e / v6e default


@functools.lru_cache(maxsize=None)
def _compiler_params():
    cap = _vmem_capacity_bytes()
    # v7x: 64 MiB VMEM / TensorCore -> cap scoped VMEM at ~40 MiB; v5e/v6e: 96 MiB.
    limit = 40 * 1024 * 1024 if cap <= 64 * 1024 * 1024 else 96 * 1024 * 1024
    return pltpu.CompilerParams(
        dimension_semantics=("parallel",),      # row grid is embarrassingly parallel
        vmem_limit_bytes=limit,
    )


def _edge_tile(D, tm):
    # v7x only: halve the GAT edge-kernel row tile for large D so the f32
    # key/msg/query/qk temporaries fit comfortably; no MXU penalty.
    if _vmem_capacity_bytes() <= 64 * 1024 * 1024 and D >= 768:
        return min(tm, 128)
    return tm


# --------------------------------------------------------------------------
# Small helpers
# --------------------------------------------------------------------------

def _gelu(x):
    # QAGNN's GELU == tanh approximation
    c = math.sqrt(2.0 / math.pi)
    return 0.5 * x * (1.0 + jnp.tanh(c * (x + 0.044715 * x * x * x)))


def _round_up(n, m):
    return ((n + m - 1) // m) * m


def _pad_rows(a, tm):
    M = a.shape[0]
    Mp = _round_up(max(M, tm), tm)
    if Mp == M:
        return a
    return jnp.zeros((Mp,) + a.shape[1:], a.dtype).at[:M].set(a)


def _bf16(a):
    return a.astype(jnp.bfloat16)


def _row_spec(tm, n):
    return pl.BlockSpec((tm, n), lambda i: (i, 0))


def _const_spec(shape):
    # constant-index operand (weight / bias / selector): single VMEM buffer.
    return pl.BlockSpec(shape, lambda i: (0, 0), pipeline_mode=pl.Buffered(1))


def _itemsize(dt):
    return np.dtype(dt).itemsize


# --------------------------------------------------------------------------
# Pallas kernels
# --------------------------------------------------------------------------

def _linear_kernel(x_ref, w_ref, b_ref, o_ref, *, act):
    """out = act(x @ w + b); x cast to bf16 in-kernel, f32 accumulation."""
    x = x_ref[...].astype(jnp.bfloat16)
    y = jnp.dot(x, w_ref[...], preferred_element_type=jnp.float32) + b_ref[...]
    if act == "relu":
        y = jnp.maximum(y, 0.0)
    elif act == "gelu":
        y = _gelu(y)
    o_ref[...] = y.astype(o_ref.dtype)


def linear_pallas(x, w_bf16, b_f32, act="none", out_dtype=jnp.float32, tm=DEFAULT_TM):
    M, K = x.shape
    N = w_bf16.shape[1]
    assert M % tm == 0, "rows must be pre-padded to a multiple of tm"
    ce = pl.CostEstimate(
        flops=2 * M * K * N,
        transcendentals=M * N if act == "gelu" else 0,
        bytes_accessed=M * K * _itemsize(x.dtype) + K * N * 2 + N * 4
        + M * N * _itemsize(out_dtype))
    return pl.pallas_call(
        functools.partial(_linear_kernel, act=act),
        out_shape=jax.ShapeDtypeStruct((M, N), out_dtype),
        grid=(M // tm,),
        in_specs=[_row_spec(tm, K), _const_spec((K, N)), _const_spec((1, N))],
        out_specs=_row_spec(tm, N),
        compiler_params=_compiler_params(),
        cost_estimate=ce,
    )(x, w_bf16, b_f32)


def _addmm_kernel(a_ref, x_ref, w_ref, b_ref, o_ref, *, act):
    """out = act(a + x @ w + b)  — used for the fused node_feature_extra."""
    x = x_ref[...].astype(jnp.bfloat16)
    y = (a_ref[...].astype(jnp.float32)
         + jnp.dot(x, w_ref[...], preferred_element_type=jnp.float32)
         + b_ref[...])
    if act == "gelu":
        y = _gelu(y)
    o_ref[...] = y.astype(o_ref.dtype)


def addmm_pallas(a, x, w_bf16, b_f32, act="none", out_dtype=jnp.float32, tm=DEFAULT_TM):
    M, N = a.shape
    K = x.shape[1]
    assert M % tm == 0 and x.shape[0] == M and w_bf16.shape == (K, N)
    ce = pl.CostEstimate(
        flops=2 * M * K * N + M * N,
        transcendentals=M * N if act == "gelu" else 0,
        bytes_accessed=(M * N * _itemsize(a.dtype) + M * K * _itemsize(x.dtype)
                        + K * N * 2 + N * 4 + M * N * _itemsize(out_dtype)))
    return pl.pallas_call(
        functools.partial(_addmm_kernel, act=act),
        out_shape=jax.ShapeDtypeStruct((M, N), out_dtype),
        grid=(M // tm,),
        in_specs=[_row_spec(tm, N), _row_spec(tm, K),
                  _const_spec((K, N)), _const_spec((1, N))],
        out_specs=_row_spec(tm, N),
        compiler_params=_compiler_params(),
        cost_estimate=ce,
    )(a, x, w_bf16, b_f32)


def _dual_mm_kernel(x1_ref, w1_ref, x2_ref, w2_ref, b_ref, o_ref, *, act):
    """out = act(x1 @ w1 + x2 @ w2 + b) — node-side GAT projections and Vh+Vx."""
    x1 = x1_ref[...].astype(jnp.bfloat16)
    x2 = x2_ref[...].astype(jnp.bfloat16)
    y = (jnp.dot(x1, w1_ref[...], preferred_element_type=jnp.float32)
         + jnp.dot(x2, w2_ref[...], preferred_element_type=jnp.float32)
         + b_ref[...])
    if act == "gelu":
        y = _gelu(y)
    o_ref[...] = y.astype(o_ref.dtype)


def dual_mm_pallas(x1, w1_bf16, x2, w2_bf16, b_f32, act="none",
                   out_dtype=jnp.float32, tm=DEFAULT_TM):
    M, K1 = x1.shape
    K2 = x2.shape[1]
    N = w1_bf16.shape[1]
    assert M % tm == 0 and x2.shape[0] == M and w2_bf16.shape == (K2, N)
    ce = pl.CostEstimate(
        flops=2 * M * (K1 + K2) * N,
        transcendentals=M * N if act == "gelu" else 0,
        bytes_accessed=(M * K1 * _itemsize(x1.dtype) + M * K2 * _itemsize(x2.dtype)
                        + (K1 + K2) * N * 2 + N * 4 + M * N * _itemsize(out_dtype)))
    return pl.pallas_call(
        functools.partial(_dual_mm_kernel, act=act),
        out_shape=jax.ShapeDtypeStruct((M, N), out_dtype),
        grid=(M // tm,),
        in_specs=[_row_spec(tm, K1), _const_spec((K1, N)),
                  _row_spec(tm, K2), _const_spec((K2, N)),
                  _const_spec((1, N))],
        out_specs=_row_spec(tm, N),
        compiler_params=_compiler_params(),
        cost_estimate=ce,
    )(x1, w1_bf16, x2, w2_bf16, b_f32)


def _mlp2_kernel(x_ref, w1_ref, b1_ref, w2_ref, b2_ref, o_ref, *, act2):
    """out = act2( relu(x@w1 + b1) @ w2 + b2 )   (BN already folded into w1/b1)."""
    x = x_ref[...].astype(jnp.bfloat16)
    h = jnp.dot(x, w1_ref[...], preferred_element_type=jnp.float32) + b1_ref[...]
    h = jnp.maximum(h, 0.0)
    y = jnp.dot(h.astype(jnp.bfloat16), w2_ref[...],
                preferred_element_type=jnp.float32) + b2_ref[...]
    if act2 == "gelu":
        y = _gelu(y)
    o_ref[...] = y.astype(o_ref.dtype)


def mlp2_pallas(x, w1_bf16, b1_f32, w2_bf16, b2_f32, act2="none",
                out_dtype=jnp.float32, tm=DEFAULT_TM):
    M, K = x.shape
    Dh = w1_bf16.shape[1]
    N = w2_bf16.shape[1]
    assert M % tm == 0
    ce = pl.CostEstimate(
        flops=2 * M * K * Dh + 2 * M * Dh * N,
        transcendentals=M * N if act2 == "gelu" else 0,
        bytes_accessed=(M * K * _itemsize(x.dtype) + K * Dh * 2 + Dh * N * 2
                        + (Dh + N) * 4 + M * N * _itemsize(out_dtype)))
    return pl.pallas_call(
        functools.partial(_mlp2_kernel, act2=act2),
        out_shape=jax.ShapeDtypeStruct((M, N), out_dtype),
        grid=(M // tm,),
        in_specs=[_row_spec(tm, K),
                  _const_spec((K, Dh)), _const_spec((1, Dh)),
                  _const_spec((Dh, N)), _const_spec((1, N))],
        out_specs=_row_spec(tm, N),
        compiler_params=_compiler_params(),
        cost_estimate=ce,
    )(x, w1_bf16, b1_f32, w2_bf16, b2_f32)


def _gat_edge_kernel(kd_ref, ms_ref, qs_ref, ea_ref,
                     wkea_ref, wmea_ref, bk_ref, bm_ref, bq_ref, sel_ref,
                     msg_ref, scores_ref):
    """Edge-level part of GATConvE.message (node-side projections pre-gathered)."""
    ea = ea_ref[...]
    key = (kd_ref[...].astype(jnp.float32)
           + jnp.dot(ea, wkea_ref[...], preferred_element_type=jnp.float32)
           + bk_ref[...])
    msg = (ms_ref[...].astype(jnp.float32)
           + jnp.dot(ea, wmea_ref[...], preferred_element_type=jnp.float32)
           + bm_ref[...])
    query = qs_ref[...].astype(jnp.float32) + bq_ref[...]
    qk = (query * key).astype(jnp.bfloat16)
    # per-head reduction via bf16 selector matmul (1/sqrt(dim_per_head) folded into sel);
    # output is a lane-dense 128-wide slab, real heads live in the first Hc columns.
    scores_ref[...] = jnp.dot(qk, sel_ref[...], preferred_element_type=jnp.float32)
    msg_ref[...] = msg.astype(msg_ref.dtype)


def gat_edge_pallas(kd, ms, qs, edge_emb, wkea, wmea, bk, bm, bq, sel, tm=DEFAULT_TM):
    Ep, D = edge_emb.shape
    SC = sel.shape[1]
    assert Ep % tm == 0
    ce = pl.CostEstimate(
        flops=2 * Ep * D * (2 * D + SC) + 6 * Ep * D,
        transcendentals=0,
        bytes_accessed=(4 * Ep * D * 2 + 2 * D * D * 2 + D * SC * 2 + 3 * D * 4
                        + Ep * D * 2 + Ep * SC * 4))
    return pl.pallas_call(
        _gat_edge_kernel,
        out_shape=(jax.ShapeDtypeStruct((Ep, D), jnp.bfloat16),
                   jax.ShapeDtypeStruct((Ep, SC), jnp.float32)),
        grid=(Ep // tm,),
        in_specs=[_row_spec(tm, D), _row_spec(tm, D), _row_spec(tm, D), _row_spec(tm, D),
                  _const_spec((D, D)), _const_spec((D, D)),
                  _const_spec((1, D)), _const_spec((1, D)), _const_spec((1, D)),
                  _const_spec((D, SC))],
        out_specs=(_row_spec(tm, D), _row_spec(tm, SC)),
        compiler_params=_compiler_params(),
        cost_estimate=ce,
    )(kd, ms, qs, edge_emb, wkea, wmea, bk, bm, bq, sel)


# --------------------------------------------------------------------------
# Parameter init (deterministic, PyTorch-like Linear init) + one-time prep
# --------------------------------------------------------------------------

def _init_linear(key, fan_in, fan_out):
    kw, kb = jax.random.split(key)
    bound = 1.0 / math.sqrt(fan_in)
    w = jax.random.uniform(kw, (fan_in, fan_out), jnp.float32, -bound, bound)
    b = jax.random.uniform(kb, (fan_out,), jnp.float32, -bound, bound)
    return w, b


def _init_bn(key, dim):
    k1, k2, k3, k4 = jax.random.split(key, 4)
    gamma = jax.random.uniform(k1, (dim,), jnp.float32, 0.8, 1.2)
    beta = jax.random.uniform(k2, (dim,), jnp.float32, -0.1, 0.1)
    rmean = jax.random.uniform(k3, (dim,), jnp.float32, -0.1, 0.1)
    rvar = jax.random.uniform(k4, (dim,), jnp.float32, 0.9, 1.1)
    eps = 1e-5
    scale = gamma / jnp.sqrt(rvar + eps)
    shift = beta - rmean * scale
    return scale, shift


def init_params(key, D, n_ntype, n_etype, k, head_count):
    keys = jax.random.split(key, 7 + k)
    it = iter(keys)
    p = {"D": D, "n_ntype": n_ntype, "n_etype": n_etype,
         "k": k, "head_count": head_count}
    p["w_ent"], p["b_ent"] = _init_linear(next(it), n_ntype, D // 2)      # emb_node_type
    p["w_esc"], p["b_esc"] = _init_linear(next(it), D // 2, D // 2)       # emb_score (sin)
    p["w_ee1"], p["b_ee1"] = _init_linear(next(it), n_etype + 1 + 2 * n_ntype, D)
    p["ee_bn_scale"], p["ee_bn_shift"] = _init_bn(next(it), D)
    p["w_ee2"], p["b_ee2"] = _init_linear(next(it), D, D)
    p["w_vh"], p["b_vh"] = _init_linear(next(it), D, D)
    p["w_vx"], p["b_vx"] = _init_linear(next(it), D, D)
    layers = []
    for _ in range(k):
        lk = jax.random.split(next(it), 6)
        lp = {}
        lp["wk"], lp["bk"] = _init_linear(lk[0], 3 * D, D)
        lp["wm"], lp["bm"] = _init_linear(lk[1], 3 * D, D)
        lp["wq"], lp["bq"] = _init_linear(lk[2], 2 * D, D)
        lp["w_mlp1"], lp["b_mlp1"] = _init_linear(lk[3], D, D)
        lp["mlp_bn_scale"], lp["mlp_bn_shift"] = _init_bn(lk[4], D)
        lp["w_mlp2"], lp["b_mlp2"] = _init_linear(lk[5], D, D)
        layers.append(lp)
    p["layers"] = layers
    return p


def prepare_params(p):
    """One-time prep: fold eval-mode BN, fold 1/sqrt(dph), convert weights to bf16,
    reshape biases to (1,N), build gather tables and the per-head selector."""
    D, n_ntype, n_etype = p["D"], p["n_ntype"], p["n_etype"]
    Hc = p["head_count"]
    dph = D // Hc
    assert Hc <= SCORE_LANES
    prep = {"D": D, "n_ntype": n_ntype, "n_etype": n_etype, "k": p["k"],
            "head_count": Hc, "dph": dph}

    # node-type embedding table (rows = w_ent[t] + b_ent), zero-padded to width D
    ent_table = jnp.zeros((n_ntype, D), jnp.float32)
    ent_table = ent_table.at[:, :D // 2].set(p["w_ent"] + p["b_ent"][None, :])
    prep["ent_table"] = ent_table

    # score embedding: (D/2, D/2) weight embedded into the second half of a (D/2, D) slab
    w_esc_full = jnp.zeros((D // 2, D), jnp.float32).at[:, D // 2:].set(p["w_esc"])
    b_esc_full = jnp.zeros((D,), jnp.float32).at[D // 2:].set(p["b_esc"])
    prep["w_esc_full"] = _bf16(w_esc_full)
    prep["b_esc_full"] = b_esc_full.reshape(1, D)

    # edge encoder layer 1: the one-hot matmul becomes row gathers from this table;
    # fold BatchNorm scale into the table and shift+bias into b_ee1_fold (eval mode)
    s, t = p["ee_bn_scale"], p["ee_bn_shift"]
    prep["ee1_table"] = p["w_ee1"] * s[None, :]
    prep["b_ee1_fold"] = (p["b_ee1"] * s + t).reshape(1, D)
    prep["w_ee2"] = _bf16(p["w_ee2"])
    prep["b_ee2"] = p["b_ee2"].reshape(1, D)

    # per-head selector with 1/sqrt(dim_per_head) folded in (bf16, lane-dense 128 wide)
    sel = (jnp.arange(D)[:, None] // dph
           == jnp.arange(SCORE_LANES)[None, :]).astype(jnp.float32)
    prep["sel"] = _bf16(sel / math.sqrt(dph))

    prep["w_vh"] = _bf16(p["w_vh"])
    prep["w_vx"] = _bf16(p["w_vx"])
    prep["b_vhx"] = (p["b_vh"] + p["b_vx"]).reshape(1, D)

    layers = []
    for lp in p["layers"]:
        wk, wm, wq = lp["wk"], lp["wm"], lp["wq"]
        l = {}
        # node-side projection weights: [key | msg | query] blocks for X and for extra
        l["Wn"] = _bf16(jnp.concatenate([wk[:D], wm[:D], wq[:D]], axis=1))            # (D,3D)
        l["We"] = _bf16(jnp.concatenate([wk[D:2 * D], wm[D:2 * D], wq[D:2 * D]], axis=1))
        l["wkea"] = _bf16(wk[2 * D:])                                                 # (D,D)
        l["wmea"] = _bf16(wm[2 * D:])
        l["bk"] = lp["bk"].reshape(1, D)
        l["bm"] = lp["bm"].reshape(1, D)
        l["bq"] = lp["bq"].reshape(1, D)
        l["zeros3"] = jnp.zeros((1, 3 * D), jnp.float32)
        # GAT mlp: fold BN into layer-1 weight/bias
        s1, t1 = lp["mlp_bn_scale"], lp["mlp_bn_shift"]
        l["w_mlp1"] = _bf16(lp["w_mlp1"] * s1[None, :])
        l["b_mlp1"] = (lp["b_mlp1"] * s1 + t1).reshape(1, D)
        l["w_mlp2"] = _bf16(lp["w_mlp2"])
        l["b_mlp2"] = lp["b_mlp2"].reshape(1, D)
        layers.append(l)
    prep["layers"] = layers
    return prep


# --------------------------------------------------------------------------
# Forward pass (scatter/segment/gather glue in plain JAX; dense hot paths in Pallas)
# --------------------------------------------------------------------------

def qagnn_forward(prep, H, edge_index, edge_type, node_type, node_score,
                  tm=DEFAULT_TM):
    D = prep["D"]
    n_ntype, n_etype = prep["n_ntype"], prep["n_etype"]
    k, Hc, dph = prep["k"], prep["head_count"], prep["dph"]
    B, Nn, _ = H.shape
    BN = B * Nn
    nt_flat = node_type.reshape(-1)
    tm_e = _edge_tile(D, tm)

    # --- node_feature_extra = [GELU(emb_node_type) | GELU(emb_score)]  (lane-dense) ---
    t_full = prep["ent_table"][nt_flat]                                  # (BN, D) f32
    js = jnp.power(1.1, jnp.arange(D // 2, dtype=jnp.float32))
    Bsin = jnp.sin(js[None, None, :] * node_score).reshape(BN, D // 2)
    t_full_p = _pad_rows(t_full, tm)
    Bsin_p = _pad_rows(Bsin, tm)
    BNp = t_full_p.shape[0]
    extra_p = addmm_pallas(t_full_p, Bsin_p, prep["w_esc_full"], prep["b_esc_full"],
                           act="gelu", out_dtype=jnp.bfloat16, tm=tm)    # (BNp, D) bf16

    Hp = _pad_rows(H.reshape(BN, D).astype(jnp.float32), tm)             # (BNp, D) f32
    Xp = Hp                                                              # layer-0 node feats

    # --- edge embeddings (edge_encoder is shared across layers) ---
    E = edge_index.shape[1]
    src0, dst0 = edge_index[0], edge_index[1]
    tbl = prep["ee1_table"]            # one-hot matmul -> three row gathers + sum
    h_real = (tbl[edge_type]
              + tbl[n_etype + 1 + nt_flat[src0]]
              + tbl[n_etype + 1 + n_ntype + nt_flat[dst0]])
    h_self = (tbl[n_etype][None, :]
              + tbl[n_etype + 1 + nt_flat]
              + tbl[n_etype + 1 + n_ntype + nt_flat])
    h0 = jnp.maximum(jnp.concatenate([h_real, h_self], axis=0)
                     + prep["b_ee1_fold"], 0.0)                          # (Etot, D) f32
    h0_p = _pad_rows(h0, tm_e)
    Ep = h0_p.shape[0]
    edge_emb_p = linear_pallas(h0_p, prep["w_ee2"], prep["b_ee2"],
                               act="none", out_dtype=jnp.bfloat16, tm=tm_e)  # (Ep, D)

    loop_index = jnp.arange(BN, dtype=edge_index.dtype)
    full_ei = jnp.concatenate([edge_index, jnp.stack([loop_index, loop_index])], axis=1)
    src, dst = full_ei[0], full_ei[1]
    Etot = E + BN

    pad_n = Ep - Etot
    src_pad = jnp.concatenate([src, jnp.zeros((pad_n,), src.dtype)])
    dst_pad = jnp.concatenate([dst, jnp.zeros((pad_n,), dst.dtype)])

    # layer-invariant edge counts (hoisted out of the layer loop)
    count = jax.ops.segment_sum(jnp.ones((Etot,), jnp.float32), src,
                                num_segments=BN)[src]                    # (Etot,)

    all_edge_map, all_gnn_attn = [], []
    for li in range(k):
        lp = prep["layers"][li]
        # project-then-gather: node-side key/msg/query projections at node granularity
        nproj = dual_mm_pallas(Xp, lp["Wn"], extra_p, lp["We"], lp["zeros3"],
                               act="none", out_dtype=jnp.bfloat16, tm=tm)   # (BNp, 3D)
        Kd = nproj[:, :D][dst_pad]           # key contribution of x_i  (Ep, D) bf16
        Ms = nproj[:, D:2 * D][src_pad]      # msg contribution of x_j
        Qs = nproj[:, 2 * D:][src_pad]       # query contribution of x_j

        msg_p, scores_p = gat_edge_pallas(Kd, Ms, Qs, edge_emb_p,
                                          lp["wkea"], lp["wmea"],
                                          lp["bk"], lp["bm"], lp["bq"],
                                          prep["sel"], tm=tm_e)
        msg = msg_p[:Etot]                                               # (Etot, D) bf16
        scores = scores_p[:Etot, :Hc]                                    # (Etot, Hc) f32

        # segment softmax grouped by source node (PyG `softmax(scores, src)`)
        smax = jax.ops.segment_max(scores, src, num_segments=BN)
        ex = jnp.exp(scores - smax[src])
        ssum = jax.ops.segment_sum(ex, src, num_segments=BN)
        alpha = ex / (ssum[src] + 1e-16)                                 # attention weights
        out_e = (msg.astype(jnp.float32).reshape(Etot, Hc, dph)
                 * (alpha * count[:, None])[:, :, None]).reshape(Etot, D)
        # aggr='add' at target index; padded node rows never contribute / are never read
        aggr_p = jax.ops.segment_sum(out_e, dst, num_segments=BNp)
        # fused Linear + BN(folded) + ReLU + Linear, then mp_helper's GELU; bf16 output
        Xp = mlp2_pallas(aggr_p, lp["w_mlp1"], lp["b_mlp1"],
                         lp["w_mlp2"], lp["b_mlp2"],
                         act2="gelu", out_dtype=jnp.bfloat16, tm=tm)
        # dropout: identity (eval-mode semantics)
        all_gnn_attn.append(alpha[:500, -1])
        all_edge_map.append(full_ei[:, :500])

    # output = GELU(Vh(H) + Vx(X));  final dropout: identity (eval-mode)
    out_flat = dual_mm_pallas(Hp, prep["w_vh"], Xp, prep["w_vx"], prep["b_vhx"],
                              act="gelu", out_dtype=jnp.float32, tm=tm)
    output = out_flat[:BN].reshape(B, Nn, D)
    return output, (all_edge_map, all_gnn_attn)


# --------------------------------------------------------------------------

if __name__ == "__main__":
    B, Nn, D = 2, 8, 32
    n_ntype, n_etype, k, head_count = 4, 6, 2, 4
    E = 12

    root = jax.random.PRNGKey(0)
    kp, kH, kt, ks, ke, ket = jax.random.split(root, 6)

    params = init_params(kp, D, n_ntype, n_etype, k, head_count)
    prep = prepare_params(params)

    H = jax.random.normal(kH, (B, Nn, D), jnp.float32)
    node_type = jax.random.randint(kt, (B, Nn), 0, n_ntype)
    node_score = jax.random.uniform(ks, (B, Nn, 1), jnp.float32)
    edge_index = jax.random.randint(ke, (2, E), 0, B * Nn)
    edge_type = jax.random.randint(ket, (E,), 0, n_etype)

    fwd = jax.jit(lambda H_, ei, et, nt, ns: qagnn_forward(prep, H_, ei, et, nt, ns))
    output, (edge_maps, attns) = fwd(H, edge_index, edge_type, node_type, node_score)
    jax.block_until_ready(output)
    jax.block_until_ready(attns[-1])
    assert output.shape == (B, Nn, D)
    print("KERNEL_OK")
</pallas_src>

<mosaic_0001>
module attributes {stable_mosaic.version = 11 : i64} {
  func.func @_addmm_kernel(%arg0: i32, %arg1: memref<256x32xf32, #tpu.memory_space<vmem>>, %arg2: memref<256x16xf32, #tpu.memory_space<vmem>>, %arg3: memref<16x32xbf16, #tpu.memory_space<vmem>>, %arg4: memref<1x32xf32, #tpu.memory_space<vmem>>, %arg5: memref<256x32xbf16, #tpu.memory_space<vmem>>) attributes {dimension_semantics = [#tpu.dimension_semantics<parallel>], iteration_bounds = array<i64: 1>, scalar_prefetch = 0 : i64, scratch_operands = 0 : i64, tpu.core_type = #tpu.core_type<tc>, window_params = [{transform_indices = @transform_0, window_bounds = array<i64: 256, 32>}, {transform_indices = @transform_1, window_bounds = array<i64: 256, 16>}, {pipeline_mode = #tpu.pipeline_mode<synchronous>, transform_indices = @transform_2, window_bounds = array<i64: 16, 32>}, {pipeline_mode = #tpu.pipeline_mode<synchronous>, transform_indices = @transform_3, window_bounds = array<i64: 1, 32>}, {transform_indices = @transform_4, window_bounds = array<i64: 256, 32>}]} {
    %c0 = arith.constant 0 : index
    %c0_0 = arith.constant 0 : index
    %0 = vector.load %arg2[%c0, %c0_0] : memref<256x16xf32, #tpu.memory_space<vmem>>, vector<256x16xf32>
    %1 = arith.truncf %0 : vector<256x16xf32> to vector<256x16xbf16>
    %c0_1 = arith.constant 0 : index
    %c0_2 = arith.constant 0 : index
    %2 = vector.load %arg1[%c0_1, %c0_2] : memref<256x32xf32, #tpu.memory_space<vmem>>, vector<256x32xf32>
    %c0_3 = arith.constant 0 : index
    %c0_4 = arith.constant 0 : index
    %3 = vector.load %arg3[%c0_3, %c0_4] : memref<16x32xbf16, #tpu.memory_space<vmem>>, vector<16x32xbf16>
    %cst = arith.constant dense<0.000000e+00> : vector<256x32xf32>
    %4 = tpu.matmul %1, %3, %cst {dimension_numbers = #tpu.dot_dimension_numbers<[1], [0], [0], [1], [0, 0, 1, 1], [], []>} : vector<256x16xbf16>, vector<16x32xbf16>, vector<256x32xf32> -> vector<256x32xf32>
    %5 = arith.addf %2, %4 : vector<256x32xf32>
    %c0_5 = arith.constant 0 : index
    %c0_6 = arith.constant 0 : index
    %6 = vector.load %arg4[%c0_5, %c0_6] : memref<1x32xf32, #tpu.memory_space<vmem>>, vector<1x32xf32>
    %7 = vector.broadcast %6 : vector<1x32xf32> to vector<256x32xf32>
    %8 = arith.addf %5, %7 : vector<256x32xf32>
    %cst_7 = arith.constant 5.000000e-01 : f32
    %9 = vector.broadcast %cst_7 : f32 to vector<256x32xf32>
    %10 = arith.mulf %9, %8 : vector<256x32xf32>
    %cst_8 = arith.constant 4.471500e-02 : f32
    %11 = vector.broadcast %cst_8 : f32 to vector<256x32xf32>
    %12 = arith.mulf %11, %8 : vector<256x32xf32>
    %13 = arith.mulf %12, %8 : vector<256x32xf32>
    %14 = arith.mulf %13, %8 : vector<256x32xf32>
    %15 = arith.addf %8, %14 : vector<256x32xf32>
    %cst_9 = arith.constant 0.797884583 : f32
    %16 = vector.broadcast %cst_9 : f32 to vector<256x32xf32>
    %17 = arith.mulf %16, %15 : vector<256x32xf32>
    %18 = math.tanh %17 : vector<256x32xf32>
    %cst_10 = arith.constant 1.000000e+00 : f32
    %19 = vector.broadcast %cst_10 : f32 to vector<256x32xf32>
    %20 = arith.addf %19, %18 : vector<256x32xf32>
    %21 = arith.mulf %10, %20 : vector<256x32xf32>
    %22 = arith.truncf %21 : vector<256x32xf32> to vector<256x32xbf16>
    %c0_11 = arith.constant 0 : index
    %c0_12 = arith.constant 0 : index
    %23 = vector.load %arg5[%c0_11, %c0_12] : memref<256x32xbf16, #tpu.memory_space<vmem>>, vector<256x32xbf16>
    tpu.vector_store %arg5[%c0_11, %c0_12], %22 {strides = array<i32>} : memref<256x32xbf16, #tpu.memory_space<vmem>>, vector<256x32xbf16>,
    return
  }
  func.func @transform_0(%arg0: i32) -> (i32, i32) {
    %c0_i32 = arith.constant 0 : i32
    %c0_i32_0 = arith.constant 0 : i32
    return %arg0, %c0_i32 : i32, i32
  }
  func.func @transform_1(%arg0: i32) -> (i32, i32) {
    %c0_i32 = arith.constant 0 : i32
    %c0_i32_0 = arith.constant 0 : i32
    return %arg0, %c0_i32 : i32, i32
  }
  func.func @transform_2(%arg0: i32) -> (i32, i32) {
    %c0_i32 = arith.constant 0 : i32
    %c0_i32_0 = arith.constant 0 : i32
    %c0_i32_1 = arith.constant 0 : i32
    return %c0_i32, %c0_i32_0 : i32, i32
  }
  func.func @transform_3(%arg0: i32) -> (i32, i32) {
    %c0_i32 = arith.constant 0 : i32
    %c0_i32_0 = arith.constant 0 : i32
    %c0_i32_1 = arith.constant 0 : i32
    return %c0_i32, %c0_i32_0 : i32, i32
  }
  func.func @transform_4(%arg0: i32) -> (i32, i32) {
    %c0_i32 = arith.constant 0 : i32
    %c0_i32_0 = arith.constant 0 : i32
    return %arg0, %c0_i32 : i32, i32
  }
}

module attributes {stable_mosaic.version = 11 : i64} {
  func.func @_dual_mm_kernel(%arg0: i32, %arg1: memref<256x32xf32, #tpu.memory_space<vmem>>, %arg2: memref<32x96xbf16, #tpu.memory_space<vmem>>, %arg3: memref<256x32xbf16, #tpu.memory_space<vmem>>, %arg4: memref<32x96xbf16, #tpu.memory_space<vmem>>, %arg5: memref<1x96xf32, #tpu.memory_space<vmem>>, %arg6: memref<256x96xbf16, #tpu.memory_space<vmem>>) attributes {dimension_semantics = [#tpu.dimension_semantics<parallel>], iteration_bounds = array<i64: 1>, scalar_prefetch = 0 : i64, scratch_operands = 0 : i64, tpu.core_type = #tpu.core_type<tc>, window_params = [{transform_indices = @transform_0, window_bounds = array<i64: 256, 32>}, {pipeline_mode = #tpu.pipeline_mode<synchronous>, transform_indices = @transform_1, window_bounds = array<i64: 32, 96>}, {transform_indices = @transform_2, window_bounds = array<i64: 256, 32>}, {pipeline_mode = #tpu.pipeline_mode<synchronous>, transform_indices = @transform_3, window_bounds = array<i64: 32, 96>}, {pipeline_mode = #tpu.pipeline_mode<synchronous>, transform_indices = @transform_4, window_bounds = array<i64: 1, 96>}, {transform_indices = @transform_5, window_bounds = array<i64: 256, 96>}]} {
    %c0 = arith.constant 0 : index
    %c0_0 = arith.constant 0 : index
    %0 = vector.load %arg1[%c0, %c0_0] : memref<256x32xf32, #tpu.memory_space<vmem>>, vector<256x32xf32>
    %1 = arith.truncf %0 : vector<256x32xf32> to vector<256x32xbf16>
    %c0_1 = arith.constant 0 : index
    %c0_2 = arith.constant 0 : index
    %2 = vector.load %arg3[%c0_1, %c0_2] : memref<256x32xbf16, #tpu.memory_space<vmem>>, vector<256x32xbf16>
    %c0_3 = arith.constant 0 : index
    %c0_4 = arith.constant 0 : index
    %3 = vector.load %arg2[%c0_3, %c0_4] : memref<32x96xbf16, #tpu.memory_space<vmem>>, vector<32x96xbf16>
    %cst = arith.constant dense<0.000000e+00> : vector<256x96xf32>
    %4 = tpu.matmul %1, %3, %cst {dimension_numbers = #tpu.dot_dimension_numbers<[1], [0], [0], [1], [0, 0, 1, 1], [], []>} : vector<256x32xbf16>, vector<32x96xbf16>, vector<256x96xf32> -> vector<256x96xf32>
    %c0_5 = arith.constant 0 : index
    %c0_6 = arith.constant 0 : index
    %5 = vector.load %arg4[%c0_5, %c0_6] : memref<32x96xbf16, #tpu.memory_space<vmem>>, vector<32x96xbf16>
    %cst_7 = arith.constant dense<0.000000e+00> : vector<256x96xf32>
    %6 = tpu.matmul %2, %5, %cst_7 {dimension_numbers = #tpu.dot_dimension_numbers<[1], [0], [0], [1], [0, 0, 1, 1], [], []>} : vector<256x32xbf16>, vector<32x96xbf16>, vector<256x96xf32> -> vector<256x96xf32>
    %7 = arith.addf %4, %6 : vector<256x96xf32>
    %c0_8 = arith.constant 0 : index
    %c0_9 = arith.constant 0 : index
    %8 = vector.load %arg5[%c0_8, %c0_9] : memref<1x96xf32, #tpu.memory_space<vmem>>, vector<1x96xf32>
    %9 = vector.broadcast %8 : vector<1x96xf32> to vector<256x96xf32>
    %10 = arith.addf %7, %9 : vector<256x96xf32>
    %11 = arith.truncf %10 : vector<256x96xf32> to vector<256x96xbf16>
    %c0_10 = arith.constant 0 : index
    %c0_11 = arith.constant 0 : index
    %12 = vector.load %arg6[%c0_10, %c0_11] : memref<256x96xbf16, #tpu.memory_space<vmem>>, vector<256x96xbf16>
    tpu.vector_store %arg6[%c0_10, %c0_11], %11 {strides = array<i32>} : memref<256x96xbf16, #tpu.memory_space<vmem>>, vector<256x96xbf16>,
    return
  }
  func.func @transform_0(%arg0: i32) -> (i32, i32) {
    %c0_i32 = arith.constant 0 : i32
    %c0_i32_0 = arith.constant 0 : i32
    return %arg0, %c0_i32 : i32, i32
  }
  func.func @transform_1(%arg0: i32) -> (i32, i32) {
    %c0_i32 = arith.constant 0 : i32
    %c0_i32_0 = arith.constant 0 : i32
    %c0_i32_1 = arith.constant 0 : i32
    return %c0_i32, %c0_i32_0 : i32, i32
  }
  func.func @transform_2(%arg0: i32) -> (i32, i32) {
    %c0_i32 = arith.constant 0 : i32
    %c0_i32_0 = arith.constant 0 : i32
    return %arg0, %c0_i32 : i32, i32
  }
  func.func @transform_3(%arg0: i32) -> (i32, i32) {
    %c0_i32 = arith.constant 0 : i32
    %c0_i32_0 = arith.constant 0 : i32
    %c0_i32_1 = arith.constant 0 : i32
    return %c0_i32, %c0_i32_0 : i32, i32
  }
  func.func @transform_4(%arg0: i32) -> (i32, i32) {
    %c0_i32 = arith.constant 0 : i32
    %c0_i32_0 = arith.constant 0 : i32
    %c0_i32_1 = arith.constant 0 : i32
    return %c0_i32, %c0_i32_0 : i32, i32
  }
  func.func @transform_5(%arg0: i32) -> (i32, i32) {
    %c0_i32 = arith.constant 0 : i32
    %c0_i32_0 = arith.constant 0 : i32
    return %arg0, %c0_i32 : i32, i32
  }
}

module attributes {stable_mosaic.version = 11 : i64} {
  func.func @_linear_kernel(%arg0: i32, %arg1: memref<256x32xf32, #tpu.memory_space<vmem>>, %arg2: memref<32x32xbf16, #tpu.memory_space<vmem>>, %arg3: memref<1x32xf32, #tpu.memory_space<vmem>>, %arg4: memref<256x32xbf16, #tpu.memory_space<vmem>>) attributes {dimension_semantics = [#tpu.dimension_semantics<parallel>], iteration_bounds = array<i64: 1>, scalar_prefetch = 0 : i64, scratch_operands = 0 : i64, tpu.core_type = #tpu.core_type<tc>, window_params = [{transform_indices = @transform_0, window_bounds = array<i64: 256, 32>}, {pipeline_mode = #tpu.pipeline_mode<synchronous>, transform_indices = @transform_1, window_bounds = array<i64: 32, 32>}, {pipeline_mode = #tpu.pipeline_mode<synchronous>, transform_indices = @transform_2, window_bounds = array<i64: 1, 32>}, {transform_indices = @transform_3, window_bounds = array<i64: 256, 32>}]} {
    %c0 = arith.constant 0 : index
    %c0_0 = arith.constant 0 : index
    %0 = vector.load %arg1[%c0, %c0_0] : memref<256x32xf32, #tpu.memory_space<vmem>>, vector<256x32xf32>
    %1 = arith.truncf %0 : vector<256x32xf32> to vector<256x32xbf16>
    %c0_1 = arith.constant 0 : index
    %c0_2 = arith.constant 0 : index
    %2 = vector.load %arg2[%c0_1, %c0_2] : memref<32x32xbf16, #tpu.memory_space<vmem>>, vector<32x32xbf16>
    %cst = arith.constant dense<0.000000e+00> : vector<256x32xf32>
    %3 = tpu.matmul %1, %2, %cst {dimension_numbers = #tpu.dot_dimension_numbers<[1], [0], [0], [1], [0, 0, 1, 1], [], []>} : vector<256x32xbf16>, vector<32x32xbf16>, vector<256x32xf32> -> vector<256x32xf32>
    %c0_3 = arith.constant 0 : index
    %c0_4 = arith.constant 0 : index
    %4 = vector.load %arg3[%c0_3, %c0_4] : memref<1x32xf32, #tpu.memory_space<vmem>>, vector<1x32xf32>
    %5 = vector.broadcast %4 : vector<1x32xf32> to vector<256x32xf32>
    %6 = arith.addf %3, %5 : vector<256x32xf32>
    %7 = arith.truncf %6 : vector<256x32xf32> to vector<256x32xbf16>
    %c0_5 = arith.constant 0 : index
    %c0_6 = arith.constant 0 : index
    %8 = vector.load %arg4[%c0_5, %c0_6] : memref<256x32xbf16, #tpu.memory_space<vmem>>, vector<256x32xbf16>
    tpu.vector_store %arg4[%c0_5, %c0_6], %7 {strides = array<i32>} : memref<256x32xbf16, #tpu.memory_space<vmem>>, vector<256x32xbf16>,
    return
  }
  func.func @transform_0(%arg0: i32) -> (i32, i32) {
    %c0_i32 = arith.constant 0 : i32
    %c0_i32_0 = arith.constant 0 : i32
    return %arg0, %c0_i32 : i32, i32
  }
  func.func @transform_1(%arg0: i32) -> (i32, i32) {
    %c0_i32 = arith.constant 0 : i32
    %c0_i32_0 = arith.constant 0 : i32
    %c0_i32_1 = arith.constant 0 : i32
    return %c0_i32, %c0_i32_0 : i32, i32
  }
  func.func @transform_2(%arg0: i32) -> (i32, i32) {
    %c0_i32 = arith.constant 0 : i32
    %c0_i32_0 = arith.constant 0 : i32
    %c0_i32_1 = arith.constant 0 : i32
    return %c0_i32, %c0_i32_0 : i32, i32
  }
  func.func @transform_3(%arg0: i32) -> (i32, i32) {
    %c0_i32 = arith.constant 0 : i32
    %c0_i32_0 = arith.constant 0 : i32
    return %arg0, %c0_i32 : i32, i32
  }
}

module attributes {stable_mosaic.version = 11 : i64} {
  func.func @_gat_edge_kernel(%arg0: i32, %arg1: memref<256x32xbf16, #tpu.memory_space<vmem>>, %arg2: memref<256x32xbf16, #tpu.memory_space<vmem>>, %arg3: memref<256x32xbf16, #tpu.memory_space<vmem>>, %arg4: memref<256x32xbf16, #tpu.memory_space<vmem>>, %arg5: memref<32x32xbf16, #tpu.memory_space<vmem>>, %arg6: memref<32x32xbf16, #tpu.memory_space<vmem>>, %arg7: memref<1x32xf32, #tpu.memory_space<vmem>>, %arg8: memref<1x32xf32, #tpu.memory_space<vmem>>, %arg9: memref<1x32xf32, #tpu.memory_space<vmem>>, %arg10: memref<32x128xbf16, #tpu.memory_space<vmem>>, %arg11: memref<256x32xbf16, #tpu.memory_space<vmem>>, %arg12: memref<256x128xf32, #tpu.memory_space<vmem>>) attributes {dimension_semantics = [#tpu.dimension_semantics<parallel>], iteration_bounds = array<i64: 1>, scalar_prefetch = 0 : i64, scratch_operands = 0 : i64, tpu.core_type = #tpu.core_type<tc>, window_params = [{transform_indices = @transform_0, window_bounds = array<i64: 256, 32>}, {transform_indices = @transform_1, window_bounds = array<i64: 256, 32>}, {transform_indices = @transform_2, window_bounds = array<i64: 256, 32>}, {transform_indices = @transform_3, window_bounds = array<i64: 256, 32>}, {pipeline_mode = #tpu.pipeline_mode<synchronous>, transform_indices = @transform_4, window_bounds = array<i64: 32, 32>}, {pipeline_mode = #tpu.pipeline_mode<synchronous>, transform_indices = @transform_5, window_bounds = array<i64: 32, 32>}, {pipeline_mode = #tpu.pipeline_mode<synchronous>, transform_indices = @transform_6, window_bounds = array<i64: 1, 32>}, {pipeline_mode = #tpu.pipeline_mode<synchronous>, transform_indices = @transform_7, window_bounds = array<i64: 1, 32>}, {pipeline_mode = #tpu.pipeline_mode<synchronous>, transform_indices = @transform_8, window_bounds = array<i64: 1, 32>}, {pipeline_mode = #tpu.pipeline_mode<synchronous>, transform_indices = @transform_9, window_bounds = array<i64: 32, 128>}, {transform_indices = @transform_10, window_bounds = array<i64: 256, 32>}, {transform_indices = @transform_11, window_bounds = array<i64: 256, 128>}]} {
    %c0 = arith.constant 0 : index
    %c0_0 = arith.constant 0 : index
    %0 = vector.load %arg4[%c0, %c0_0] : memref<256x32xbf16, #tpu.memory_space<vmem>>, vector<256x32xbf16>
    %c0_1 = arith.constant 0 : index
    %c0_2 = arith.constant 0 : index
    %1 = vector.load %arg1[%c0_1, %c0_2] : memref<256x32xbf16, #tpu.memory_space<vmem>>, vector<256x32xbf16>
    %2 = arith.extf %1 : vector<256x32xbf16> to vector<256x32xf32>
    %c0_3 = arith.constant 0 : index
    %c0_4 = arith.constant 0 : index
    %3 = vector.load %arg5[%c0_3, %c0_4] : memref<32x32xbf16, #tpu.memory_space<vmem>>, vector<32x32xbf16>
    %cst = arith.constant dense<0.000000e+00> : vector<256x32xf32>
    %4 = tpu.matmul %0, %3, %cst {dimension_numbers = #tpu.dot_dimension_numbers<[1], [0], [0], [1], [0, 0, 1, 1], [], []>} : vector<256x32xbf16>, vector<32x32xbf16>, vector<256x32xf32> -> vector<256x32xf32>
    %5 = arith.addf %2, %4 : vector<256x32xf32>
    %c0_5 = arith.constant 0 : index
    %c0_6 = arith.constant 0 : index
    %6 = vector.load %arg7[%c0_5, %c0_6] : memref<1x32xf32, #tpu.memory_space<vmem>>, vector<1x32xf32>
    %7 = vector.broadcast %6 : vector<1x32xf32> to vector<256x32xf32>
    %8 = arith.addf %5, %7 : vector<256x32xf32>
    %c0_7 = arith.constant 0 : index
    %c0_8 = arith.constant 0 : index
    %9 = vector.load %arg2[%c0_7, %c0_8] : memref<256x32xbf16, #tpu.memory_space<vmem>>, vector<256x32xbf16>
    %10 = arith.extf %9 : vector<256x32xbf16> to vector<256x32xf32>
    %c0_9 = arith.constant 0 : index
    %c0_10 = arith.constant 0 : index
    %11 = vector.load %arg6[%c0_9, %c0_10] : memref<32x32xbf16, #tpu.memory_space<vmem>>, vector<32x32xbf16>
    %cst_11 = arith.constant dense<0.000000e+00> : vector<256x32xf32>
    %12 = tpu.matmul %0, %11, %cst_11 {dimension_numbers = #tpu.dot_dimension_numbers<[1], [0], [0], [1], [0, 0, 1, 1], [], []>} : vector<256x32xbf16>, vector<32x32xbf16>, vector<256x32xf32> -> vector<256x32xf32>
    %13 = arith.addf %10, %12 : vector<256x32xf32>
    %c0_12 = arith.constant 0 : index
    %c0_13 = arith.constant 0 : index
    %14 = vector.load %arg8[%c0_12, %c0_13] : memref<1x32xf32, #tpu.memory_space<vmem>>, vector<1x32xf32>
    %15 = vector.broadcast %14 : vector<1x32xf32> to vector<256x32xf32>
    %16 = arith.addf %13, %15 : vector<256x32xf32>
    %c0_14 = arith.constant 0 : index
    %c0_15 = arith.constant 0 : index
    %17 = vector.load %arg3[%c0_14, %c0_15] : memref<256x32xbf16, #tpu.memory_space<vmem>>, vector<256x32xbf16>
    %18 = arith.extf %17 : vector<256x32xbf16> to vector<256x32xf32>
    %c0_16 = arith.constant 0 : index
    %c0_17 = arith.constant 0 : index
    %19 = vector.load %arg9[%c0_16, %c0_17] : memref<1x32xf32, #tpu.memory_space<vmem>>, vector<1x32xf32>
    %20 = vector.broadcast %19 : vector<1x32xf32> to vector<256x32xf32>
    %21 = arith.addf %18, %20 : vector<256x32xf32>
    %22 = arith.mulf %21, %8 : vector<256x32xf32>
    %23 = arith.truncf %22 : vector<256x32xf32> to vector<256x32xbf16>
    %c0_18 = arith.constant 0 : index
    %c0_19 = arith.constant 0 : index
    %24 = vector.load %arg10[%c0_18, %c0_19] : memref<32x128xbf16, #tpu.memory_space<vmem>>, vector<32x128xbf16>
    %cst_20 = arith.constant dense<0.000000e+00> : vector<256x128xf32>
    %25 = tpu.matmul %23, %24, %cst_20 {dimension_numbers = #tpu.dot_dimension_numbers<[1], [0], [0], [1], [0, 0, 1, 1], [], []>} : vector<256x32xbf16>, vector<32x128xbf16>, vector<256x128xf32> -> vector<256x128xf32>
    %c0_21 = arith.constant 0 : index
    %c0_22 = arith.constant 0 : index
    %26 = vector.load %arg12[%c0_21, %c0_22] : memref<256x128xf32, #tpu.memory_space<vmem>>, vector<256x128xf32>
    tpu.vector_store %arg12[%c0_21, %c0_22], %25 {strides = array<i32>} : memref<256x128xf32, #tpu.memory_space<vmem>>, vector<256x128xf32>,
    %27 = arith.truncf %16 : vector<256x32xf32> to vector<256x32xbf16>
    %c0_23 = arith.constant 0 : index
    %c0_24 = arith.constant 0 : index
    %28 = vector.load %arg11[%c0_23, %c0_24] : memref<256x32xbf16, #tpu.memory_space<vmem>>, vector<256x32xbf16>
    tpu.vector_store %arg11[%c0_23, %c0_24], %27 {strides = array<i32>} : memref<256x32xbf16, #tpu.memory_space<vmem>>, vector<256x32xbf16>,
    return
  }
  func.func @transform_0(%arg0: i32) -> (i32, i32) {
    %c0_i32 = arith.constant 0 : i32
    %c0_i32_0 = arith.constant 0 : i32
    return %arg0, %c0_i32 : i32, i32
  }
  func.func @transform_1(%arg0: i32) -> (i32, i32) {
    %c0_i32 = arith.constant 0 : i32
    %c0_i32_0 = arith.constant 0 : i32
    return %arg0, %c0_i32 : i32, i32
  }
  func.func @transform_2(%arg0: i32) -> (i32, i32) {
    %c0_i32 = arith.constant 0 : i32
    %c0_i32_0 = arith.constant 0 : i32
    return %arg0, %c0_i32 : i32, i32
  }
  func.func @transform_3(%arg0: i32) -> (i32, i32) {
    %c0_i32 = arith.constant 0 : i32
    %c0_i32_0 = arith.constant 0 : i32
    return %arg0, %c0_i32 : i32, i32
  }
  func.func @transform_4(%arg0: i32) -> (i32, i32) {
    %c0_i32 = arith.constant 0 : i32
    %c0_i32_0 = arith.constant 0 : i32
    %c0_i32_1 = arith.constant 0 : i32
    return %c0_i32, %c0_i32_0 : i32, i32
  }
  func.func @transform_5(%arg0: i32) -> (i32, i32) {
    %c0_i32 = arith.constant 0 : i32
    %c0_i32_0 = arith.constant 0 : i32
    %c0_i32_1 = arith.constant 0 : i32
    return %c0_i32, %c0_i32_0 : i32, i32
  }
  func.func @transform_6(%arg0: i32) -> (i32, i32) {
    %c0_i32 = arith.constant 0 : i32
    %c0_i32_0 = arith.constant 0 : i32
    %c0_i32_1 = arith.constant 0 : i32
    return %c0_i32, %c0_i32_0 : i32, i32
  }
  func.func @transform_7(%arg0: i32) -> (i32, i32) {
    %c0_i32 = arith.constant 0 : i32
    %c0_i32_0 = arith.constant 0 : i32
    %c0_i32_1 = arith.constant 0 : i32
    return %c0_i32, %c0_i32_0 : i32, i32
  }
  func.func @transform_8(%arg0: i32) -> (i32, i32) {
    %c0_i32 = arith.constant 0 : i32
    %c0_i32_0 = arith.constant 0 : i32
    %c0_i32_1 = arith.constant 0 : i32
    return %c0_i32, %c0_i32_0 : i32, i32
  }
  func.func @transform_9(%arg0: i32) -> (i32, i32) {
    %c0_i32 = arith.constant 0 : i32
    %c0_i32_0 = arith.constant 0 : i32
    %c0_i32_1 = arith.constant 0 : i32
    return %c0_i32, %c0_i32_0 : i32, i32
  }
  func.func @transform_10(%arg0: i32) -> (i32, i32) {
    %c0_i32 = arith.constant 0 : i32
    %c0_i32_0 = arith.constant 0 : i32
    return %arg0, %c0_i32 : i32, i32
  }
  func.func @transform_11(%arg0: i32) -> (i32, i32) {
    %c0_i32 = arith.constant 0 : i32
    %c0_i32_0 = arith.constant 0 : i32
    return %arg0, %c0_i32 : i32, i32
  }
}

module attributes {stable_mosaic.version = 11 : i64} {
  func.func @_mlp2_kernel(%arg0: i32, %arg1: memref<256x32xf32, #tpu.memory_space<vmem>>, %arg2: memref<32x32xbf16, #tpu.memory_space<vmem>>, %arg3: memref<1x32xf32, #tpu.memory_space<vmem>>, %arg4: memref<32x32xbf16, #tpu.memory_space<vmem>>, %arg5: memref<1x32xf32, #tpu.memory_space<vmem>>, %arg6: memref<256x32xbf16, #tpu.memory_space<vmem>>) attributes {dimension_semantics = [#tpu.dimension_semantics<parallel>], iteration_bounds = array<i64: 1>, scalar_prefetch = 0 : i64, scratch_operands = 0 : i64, tpu.core_type = #tpu.core_type<tc>, window_params = [{transform_indices = @transform_0, window_bounds = array<i64: 256, 32>}, {pipeline_mode = #tpu.pipeline_mode<synchronous>, transform_indices = @transform_1, window_bounds = array<i64: 32, 32>}, {pipeline_mode = #tpu.pipeline_mode<synchronous>, transform_indices = @transform_2, window_bounds = array<i64: 1, 32>}, {pipeline_mode = #tpu.pipeline_mode<synchronous>, transform_indices = @transform_3, window_bounds = array<i64: 32, 32>}, {pipeline_mode = #tpu.pipeline_mode<synchronous>, transform_indices = @transform_4, window_bounds = array<i64: 1, 32>}, {transform_indices = @transform_5, window_bounds = array<i64: 256, 32>}]} {
    %c0 = arith.constant 0 : index
    %c0_0 = arith.constant 0 : index
    %0 = vector.load %arg1[%c0, %c0_0] : memref<256x32xf32, #tpu.memory_space<vmem>>, vector<256x32xf32>
    %1 = arith.truncf %0 : vector<256x32xf32> to vector<256x32xbf16>
    %c0_1 = arith.constant 0 : index
    %c0_2 = arith.constant 0 : index
    %2 = vector.load %arg2[%c0_1, %c0_2] : memref<32x32xbf16, #tpu.memory_space<vmem>>, vector<32x32xbf16>
    %cst = arith.constant dense<0.000000e+00> : vector<256x32xf32>
    %3 = tpu.matmul %1, %2, %cst {dimension_numbers = #tpu.dot_dimension_numbers<[1], [0], [0], [1], [0, 0, 1, 1], [], []>} : vector<256x32xbf16>, vector<32x32xbf16>, vector<256x32xf32> -> vector<256x32xf32>
    %c0_3 = arith.constant 0 : index
    %c0_4 = arith.constant 0 : index
    %4 = vector.load %arg3[%c0_3, %c0_4] : memref<1x32xf32, #tpu.memory_space<vmem>>, vector<1x32xf32>
    %5 = vector.broadcast %4 : vector<1x32xf32> to vector<256x32xf32>
    %6 = arith.addf %3, %5 : vector<256x32xf32>
    %cst_5 = arith.constant 0.000000e+00 : f32
    %7 = vector.broadcast %cst_5 : f32 to vector<256x32xf32>
    %8 = arith.maximumf %6, %7 : vector<256x32xf32>
    %9 = arith.truncf %8 : vector<256x32xf32> to vector<256x32xbf16>
    %c0_6 = arith.constant 0 : index
    %c0_7 = arith.constant 0 : index
    %10 = vector.load %arg4[%c0_6, %c0_7] : memref<32x32xbf16, #tpu.memory_space<vmem>>, vector<32x32xbf16>
    %cst_8 = arith.constant dense<0.000000e+00> : vector<256x32xf32>
    %11 = tpu.matmul %9, %10, %cst_8 {dimension_numbers = #tpu.dot_dimension_numbers<[1], [0], [0], [1], [0, 0, 1, 1], [], []>} : vector<256x32xbf16>, vector<32x32xbf16>, vector<256x32xf32> -> vector<256x32xf32>
    %c0_9 = arith.constant 0 : index
    %c0_10 = arith.constant 0 : index
    %12 = vector.load %arg5[%c0_9, %c0_10] : memref<1x32xf32, #tpu.memory_space<vmem>>, vector<1x32xf32>
    %13 = vector.broadcast %12 : vector<1x32xf32> to vector<256x32xf32>
    %14 = arith.addf %11, %13 : vector<256x32xf32>
    %cst_11 = arith.constant 5.000000e-01 : f32
    %15 = vector.broadcast %cst_11 : f32 to vector<256x32xf32>
    %16 = arith.mulf %15, %14 : vector<256x32xf32>
    %cst_12 = arith.constant 4.471500e-02 : f32
    %17 = vector.broadcast %cst_12 : f32 to vector<256x32xf32>
    %18 = arith.mulf %17, %14 : vector<256x32xf32>
    %19 = arith.mulf %18, %14 : vector<256x32xf32>
    %20 = arith.mulf %19, %14 : vector<256x32xf32>
    %21 = arith.addf %14, %20 : vector<256x32xf32>
    %cst_13 = arith.constant 0.797884583 : f32
    %22 = vector.broadcast %cst_13 : f32 to vector<256x32xf32>
    %23 = arith.mulf %22, %21 : vector<256x32xf32>
    %24 = math.tanh %23 : vector<256x32xf32>
    %cst_14 = arith.constant 1.000000e+00 : f32
    %25 = vector.broadcast %cst_14 : f32 to vector<256x32xf32>
    %26 = arith.addf %25, %24 : vector<256x32xf32>
    %27 = arith.mulf %16, %26 : vector<256x32xf32>
    %28 = arith.truncf %27 : vector<256x32xf32> to vector<256x32xbf16>
    %c0_15 = arith.constant 0 : index
    %c0_16 = arith.constant 0 : index
    %29 = vector.load %arg6[%c0_15, %c0_16] : memref<256x32xbf16, #tpu.memory_space<vmem>>, vector<256x32xbf16>
    tpu.vector_store %arg6[%c0_15, %c0_16], %28 {strides = array<i32>} : memref<256x32xbf16, #tpu.memory_space<vmem>>, vector<256x32xbf16>,
    return
  }
  func.func @transform_0(%arg0: i32) -> (i32, i32) {
    %c0_i32 = arith.constant 0 : i32
    %c0_i32_0 = arith.constant 0 : i32
    return %arg0, %c0_i32 : i32, i32
  }
  func.func @transform_1(%arg0: i32) -> (i32, i32) {
    %c0_i32 = arith.constant 0 : i32
    %c0_i32_0 = arith.constant 0 : i32
    %c0_i32_1 = arith.constant 0 : i32
    return %c0_i32, %c0_i32_0 : i32, i32
  }
  func.func @transform_2(%arg0: i32) -> (i32, i32) {
    %c0_i32 = arith.constant 0 : i32
    %c0_i32_0 = arith.constant 0 : i32
    %c0_i32_1 = arith.constant 0 : i32
    return %c0_i32, %c0_i32_0 : i32, i32
  }
  func.func @transform_3(%arg0: i32) -> (i32, i32) {
    %c0_i32 = arith.constant 0 : i32
    %c0_i32_0 = arith.constant 0 : i32
    %c0_i32_1 = arith.constant 0 : i32
    return %c0_i32, %c0_i32_0 : i32, i32
  }
  func.func @transform_4(%arg0: i32) -> (i32, i32) {
    %c0_i32 = arith.constant 0 : i32
    %c0_i32_0 = arith.constant 0 : i32
    %c0_i32_1 = arith.constant 0 : i32
    return %c0_i32, %c0_i32_0 : i32, i32
  }
  func.func @transform_5(%arg0: i32) -> (i32, i32) {
    %c0_i32 = arith.constant 0 : i32
    %c0_i32_0 = arith.constant 0 : i32
    return %arg0, %c0_i32 : i32, i32
  }
}

module attributes {stable_mosaic.version = 11 : i64} {
  func.func @_dual_mm_kernel(%arg0: i32, %arg1: memref<256x32xbf16, #tpu.memory_space<vmem>>, %arg2: memref<32x96xbf16, #tpu.memory_space<vmem>>, %arg3: memref<256x32xbf16, #tpu.memory_space<vmem>>, %arg4: memref<32x96xbf16, #tpu.memory_space<vmem>>, %arg5: memref<1x96xf32, #tpu.memory_space<vmem>>, %arg6: memref<256x96xbf16, #tpu.memory_space<vmem>>) attributes {dimension_semantics = [#tpu.dimension_semantics<parallel>], iteration_bounds = array<i64: 1>, scalar_prefetch = 0 : i64, scratch_operands = 0 : i64, tpu.core_type = #tpu.core_type<tc>, window_params = [{transform_indices = @transform_0, window_bounds = array<i64: 256, 32>}, {pipeline_mode = #tpu.pipeline_mode<synchronous>, transform_indices = @transform_1, window_bounds = array<i64: 32, 96>}, {transform_indices = @transform_2, window_bounds = array<i64: 256, 32>}, {pipeline_mode = #tpu.pipeline_mode<synchronous>, transform_indices = @transform_3, window_bounds = array<i64: 32, 96>}, {pipeline_mode = #tpu.pipeline_mode<synchronous>, transform_indices = @transform_4, window_bounds = array<i64: 1, 96>}, {transform_indices = @transform_5, window_bounds = array<i64: 256, 96>}]} {
    %c0 = arith.constant 0 : index
    %c0_0 = arith.constant 0 : index
    %0 = vector.load %arg1[%c0, %c0_0] : memref<256x32xbf16, #tpu.memory_space<vmem>>, vector<256x32xbf16>
    %c0_1 = arith.constant 0 : index
    %c0_2 = arith.constant 0 : index
    %1 = vector.load %arg3[%c0_1, %c0_2] : memref<256x32xbf16, #tpu.memory_space<vmem>>, vector<256x32xbf16>
    %c0_3 = arith.constant 0 : index
    %c0_4 = arith.constant 0 : index
    %2 = vector.load %arg2[%c0_3, %c0_4] : memref<32x96xbf16, #tpu.memory_space<vmem>>, vector<32x96xbf16>
    %cst = arith.constant dense<0.000000e+00> : vector<256x96xf32>
    %3 = tpu.matmul %0, %2, %cst {dimension_numbers = #tpu.dot_dimension_numbers<[1], [0], [0], [1], [0, 0, 1, 1], [], []>} : vector<256x32xbf16>, vector<32x96xbf16>, vector<256x96xf32> -> vector<256x96xf32>
    %c0_5 = arith.constant 0 : index
    %c0_6 = arith.constant 0 : index
    %4 = vector.load %arg4[%c0_5, %c0_6] : memref<32x96xbf16, #tpu.memory_space<vmem>>, vector<32x96xbf16>
    %cst_7 = arith.constant dense<0.000000e+00> : vector<256x96xf32>
    %5 = tpu.matmul %1, %4, %cst_7 {dimension_numbers = #tpu.dot_dimension_numbers<[1], [0], [0], [1], [0, 0, 1, 1], [], []>} : vector<256x32xbf16>, vector<32x96xbf16>, vector<256x96xf32> -> vector<256x96xf32>
    %6 = arith.addf %3, %5 : vector<256x96xf32>
    %c0_8 = arith.constant 0 : index
    %c0_9 = arith.constant 0 : index
    %7 = vector.load %arg5[%c0_8, %c0_9] : memref<1x96xf32, #tpu.memory_space<vmem>>, vector<1x96xf32>
    %8 = vector.broadcast %7 : vector<1x96xf32> to vector<256x96xf32>
    %9 = arith.addf %6, %8 : vector<256x96xf32>
    %10 = arith.truncf %9 : vector<256x96xf32> to vector<256x96xbf16>
    %c0_10 = arith.constant 0 : index
    %c0_11 = arith.constant 0 : index
    %11 = vector.load %arg6[%c0_10, %c0_11] : memref<256x96xbf16, #tpu.memory_space<vmem>>, vector<256x96xbf16>
    tpu.vector_store %arg6[%c0_10, %c0_11], %10 {strides = array<i32>} : memref<256x96xbf16, #tpu.memory_space<vmem>>, vector<256x96xbf16>,
    return
  }
  func.func @transform_0(%arg0: i32) -> (i32, i32) {
    %c0_i32 = arith.constant 0 : i32
    %c0_i32_0 = arith.constant 0 : i32
    return %arg0, %c0_i32 : i32, i32
  }
  func.func @transform_1(%arg0: i32) -> (i32, i32) {
    %c0_i32 = arith.constant 0 : i32
    %c0_i32_0 = arith.constant 0 : i32
    %c0_i32_1 = arith.constant 0 : i32
    return %c0_i32, %c0_i32_0 : i32, i32
  }
  func.func @transform_2(%arg0: i32) -> (i32, i32) {
    %c0_i32 = arith.constant 0 : i32
    %c0_i32_0 = arith.constant 0 : i32
    return %arg0, %c0_i32 : i32, i32
  }
  func.func @transform_3(%arg0: i32) -> (i32, i32) {
    %c0_i32 = arith.constant 0 : i32
    %c0_i32_0 = arith.constant 0 : i32
    %c0_i32_1 = arith.constant 0 : i32
    return %c0_i32, %c0_i32_0 : i32, i32
  }
  func.func @transform_4(%arg0: i32) -> (i32, i32) {
    %c0_i32 = arith.constant 0 : i32
    %c0_i32_0 = arith.constant 0 : i32
    %c0_i32_1 = arith.constant 0 : i32
    return %c0_i32, %c0_i32_0 : i32, i32
  }
  func.func @transform_5(%arg0: i32) -> (i32, i32) {
    %c0_i32 = arith.constant 0 : i32
    %c0_i32_0 = arith.constant 0 : i32
    return %arg0, %c0_i32 : i32, i32
  }
}

module attributes {stable_mosaic.version = 11 : i64} {
  func.func @_dual_mm_kernel(%arg0: i32, %arg1: memref<256x32xf32, #tpu.memory_space<vmem>>, %arg2: memref<32x32xbf16, #tpu.memory_space<vmem>>, %arg3: memref<256x32xbf16, #tpu.memory_space<vmem>>, %arg4: memref<32x32xbf16, #tpu.memory_space<vmem>>, %arg5: memref<1x32xf32, #tpu.memory_space<vmem>>, %arg6: memref<256x32xf32, #tpu.memory_space<vmem>>) attributes {dimension_semantics = [#tpu.dimension_semantics<parallel>], iteration_bounds = array<i64: 1>, scalar_prefetch = 0 : i64, scratch_operands = 0 : i64, tpu.core_type = #tpu.core_type<tc>, window_params = [{transform_indices = @transform_0, window_bounds = array<i64: 256, 32>}, {pipeline_mode = #tpu.pipeline_mode<synchronous>, transform_indices = @transform_1, window_bounds = array<i64: 32, 32>}, {transform_indices = @transform_2, window_bounds = array<i64: 256, 32>}, {pipeline_mode = #tpu.pipeline_mode<synchronous>, transform_indices = @transform_3, window_bounds = array<i64: 32, 32>}, {pipeline_mode = #tpu.pipeline_mode<synchronous>, transform_indices = @transform_4, window_bounds = array<i64: 1, 32>}, {transform_indices = @transform_5, window_bounds = array<i64: 256, 32>}]} {
    %c0 = arith.constant 0 : index
    %c0_0 = arith.constant 0 : index
    %0 = vector.load %arg1[%c0, %c0_0] : memref<256x32xf32, #tpu.memory_space<vmem>>, vector<256x32xf32>
    %1 = arith.truncf %0 : vector<256x32xf32> to vector<256x32xbf16>
    %c0_1 = arith.constant 0 : index
    %c0_2 = arith.constant 0 : index
    %2 = vector.load %arg3[%c0_1, %c0_2] : memref<256x32xbf16, #tpu.memory_space<vmem>>, vector<256x32xbf16>
    %c0_3 = arith.constant 0 : index
    %c0_4 = arith.constant 0 : index
    %3 = vector.load %arg2[%c0_3, %c0_4] : memref<32x32xbf16, #tpu.memory_space<vmem>>, vector<32x32xbf16>
    %cst = arith.constant dense<0.000000e+00> : vector<256x32xf32>
    %4 = tpu.matmul %1, %3, %cst {dimension_numbers = #tpu.dot_dimension_numbers<[1], [0], [0], [1], [0, 0, 1, 1], [], []>} : vector<256x32xbf16>, vector<32x32xbf16>, vector<256x32xf32> -> vector<256x32xf32>
    %c0_5 = arith.constant 0 : index
    %c0_6 = arith.constant 0 : index
    %5 = vector.load %arg4[%c0_5, %c0_6] : memref<32x32xbf16, #tpu.memory_space<vmem>>, vector<32x32xbf16>
    %cst_7 = arith.constant dense<0.000000e+00> : vector<256x32xf32>
    %6 = tpu.matmul %2, %5, %cst_7 {dimension_numbers = #tpu.dot_dimension_numbers<[1], [0], [0], [1], [0, 0, 1, 1], [], []>} : vector<256x32xbf16>, vector<32x32xbf16>, vector<256x32xf32> -> vector<256x32xf32>
    %7 = arith.addf %4, %6 : vector<256x32xf32>
    %c0_8 = arith.constant 0 : index
    %c0_9 = arith.constant 0 : index
    %8 = vector.load %arg5[%c0_8, %c0_9] : memref<1x32xf32, #tpu.memory_space<vmem>>, vector<1x32xf32>
    %9 = vector.broadcast %8 : vector<1x32xf32> to vector<256x32xf32>
    %10 = arith.addf %7, %9 : vector<256x32xf32>
    %cst_10 = arith.constant 5.000000e-01 : f32
    %11 = vector.broadcast %cst_10 : f32 to vector<256x32xf32>
    %12 = arith.mulf %11, %10 : vector<256x32xf32>
    %cst_11 = arith.constant 4.471500e-02 : f32
    %13 = vector.broadcast %cst_11 : f32 to vector<256x32xf32>
    %14 = arith.mulf %13, %10 : vector<256x32xf32>
    %15 = arith.mulf %14, %10 : vector<256x32xf32>
    %16 = arith.mulf %15, %10 : vector<256x32xf32>
    %17 = arith.addf %10, %16 : vector<256x32xf32>
    %cst_12 = arith.constant 0.797884583 : f32
    %18 = vector.broadcast %cst_12 : f32 to vector<256x32xf32>
    %19 = arith.mulf %18, %17 : vector<256x32xf32>
    %20 = math.tanh %19 : vector<256x32xf32>
    %cst_13 = arith.constant 1.000000e+00 : f32
    %21 = vector.broadcast %cst_13 : f32 to vector<256x32xf32>
    %22 = arith.addf %21, %20 : vector<256x32xf32>
    %23 = arith.mulf %12, %22 : vector<256x32xf32>
    %c0_14 = arith.constant 0 : index
    %c0_15 = arith.constant 0 : index
    %24 = vector.load %arg6[%c0_14, %c0_15] : memref<256x32xf32, #tpu.memory_space<vmem>>, vector<256x32xf32>
    tpu.vector_store %arg6[%c0_14, %c0_15], %23 {strides = array<i32>} : memref<256x32xf32, #tpu.memory_space<vmem>>, vector<256x32xf32>,
    return
  }
  func.func @transform_0(%arg0: i32) -> (i32, i32) {
    %c0_i32 = arith.constant 0 : i32
    %c0_i32_0 = arith.constant 0 : i32
    return %arg0, %c0_i32 : i32, i32
  }
  func.func @transform_1(%arg0: i32) -> (i32, i32) {
    %c0_i32 = arith.constant 0 : i32
    %c0_i32_0 = arith.constant 0 : i32
    %c0_i32_1 = arith.constant 0 : i32
    return %c0_i32, %c0_i32_0 : i32, i32
  }
  func.func @transform_2(%arg0: i32) -> (i32, i32) {
    %c0_i32 = arith.constant 0 : i32
    %c0_i32_0 = arith.constant 0 : i32
    return %arg0, %c0_i32 : i32, i32
  }
  func.func @transform_3(%arg0: i32) -> (i32, i32) {
    %c0_i32 = arith.constant 0 : i32
    %c0_i32_0 = arith.constant 0 : i32
    %c0_i32_1 = arith.constant 0 : i32
    return %c0_i32, %c0_i32_0 : i32, i32
  }
  func.func @transform_4(%arg0: i32) -> (i32, i32) {
    %c0_i32 = arith.constant 0 : i32
    %c0_i32_0 = arith.constant 0 : i32
    %c0_i32_1 = arith.constant 0 : i32
    return %c0_i32, %c0_i32_0 : i32, i32
  }
  func.func @transform_5(%arg0: i32) -> (i32, i32) {
    %c0_i32 = arith.constant 0 : i32
    %c0_i32_0 = arith.constant 0 : i32
    return %arg0, %c0_i32 : i32, i32
  }
}

</mosaic_0001>

<bundles_post_ra>
// kernel: _lambda_.11
= control target key start
LH: loop header
LB: loop body
LE: loop exit
PB: predicated region body
PF: predicated region fallthrough
CT: control target
= control target key end

     0   :  { %10 = vsyncpa [#allocation3], 0  ;;  %s1567_s0 = inlined_call_operand.hbm [shape: f32[256,32], index: 0, kind: input, shape index: {}]   ;;  %s1568_s1 = inlined_call_operand.hbm [shape: bf16[32,96], index: 1, kind: input, shape index: {}]   ;;  %s1569_s2 = inlined_call_operand.hbm [shape: bf16[256,32], index: 2, kind: input, shape index: {}]   ;;  %s1570_s3 = inlined_call_operand.hbm [shape: bf16[32,96], index: 3, kind: input, shape index: {}]   ;;  %s1571_s4 = inlined_call_operand.hbm [shape: f32[1,96], index: 4, kind: input, shape index: {}]   ;;  %s1572_s5 = inlined_call_operand.hbm [shape: bf16[256,96], index: 5, kind: output, shape index: {}]  }
   0x1   :  { %11 = vsyncpa [#allocation6], 0 }
   0x2   :  { %12 = vsyncpa [#allocation9], 0 }
   0x3   :  { %13 = vsyncpa [#allocation4], 0  ;;  %s1345_s18 = smov [#allocation5]   ;;  %s1205_s22 = scalar_lea.hbm %s1568_s1, 256 }
   0x4   :  { %s31_s19 = sshll.u32 %s1345_s18, 4  ;;  %p1206_p0 = scmp.ne.s32.totalorder %s1568_s1, %s1205_s22  ;;  %s32_s19 = int_to_ptr.vmem [resolvable:$true] %s31_s19 }
   0x5   :  { %p1209_p1 = scmp.lt.u32.totalorder %s1205_s22, %s1568_s1 }
   0x7   :  { %p1211_p2 = pnand %p1209_p1, %p1206_p0 }
   0x9   :  { %1214 = shalt.err (!%p1211_p2)
}
   0xa   :  { %s1215_s27 = scalar_lea.vmem %s32_s19, 256  ;;  %p1220_p4 = scmp.lt.s32.totalorder %s32_s19, %s32_s19 }
   0xb   :  { %p1216_p3 = scmp.ne.s32.totalorder %s32_s19, %s1215_s27  ;;  %p1221_p5 = scmp.lt.s32.totalorder %s1215_s27, %s1215_s27 }
   0xd   :  { %p1222_p6 = por %p1221_p5, %p1220_p4 }
   0xf   :  { %p1223_p7 = pnand %p1222_p6, %p1216_p3 }
  0x11   :  { %1226 = shalt.err (!%p1223_p7)
}
  0x12   :  { %s1346_s28 = smov 64   ;;  %s1347_s29 = smov 4  }
  0x13   :  { %37 = dma.hbm_to_vmem [thread:$0]  %s1568_s1, 256, %s32_s19, [#allocation6], %s1346_s28, %s1346_s28, %s1347_s29  }
  0x14   :  { %s1348_s7 = smov [#allocation8]   ;;  %s1349_s9 = smov [#allocation2]  }
  0x15   :  { %s55_s8 = sshll.u32 %s1348_s7, 4  ;;  %s19_s10 = sshll.u32 %s1349_s9, 4  ;;  %s56_s8 = int_to_ptr.vmem [resolvable:$true] %s55_s8  ;;  %s20_s10 = int_to_ptr.vmem [resolvable:$true] %s19_s10 }
  0x16   :  { %s1227_s13 = scalar_lea.hbm %s1570_s3, 256 }
  0x17   :  { %p1228_p8 = scmp.ne.s32.totalorder %s1570_s3, %s1227_s13  ;;  %p1231_p9 = scmp.lt.u32.totalorder %s1227_s13, %s1570_s3 }
  0x19   :  { %p1233_p10 = pnand %p1231_p9, %p1228_p8 }
  0x1b   :  { %1236 = shalt.err (!%p1233_p10)
}
  0x1c   :  { %s1237_s1 = scalar_lea.vmem %s56_s8, 256  ;;  %p1242_p12 = scmp.lt.s32.totalorder %s56_s8, %s56_s8 }
  0x1d   :  { %p1238_p11 = scmp.ne.s32.totalorder %s56_s8, %s1237_s1  ;;  %p1243_p13 = scmp.lt.s32.totalorder %s1237_s1, %s1237_s1 }
  0x1f   :  { %p1244_p0 = por %p1243_p13, %p1242_p12 }
  0x21   :  { %p1245_p1 = pnand %p1244_p0, %p1238_p11 }
  0x23   :  { %1248 = shalt.err (!%p1245_p1)
}
  0x24   :  { %61 = dma.hbm_to_vmem [thread:$0]  %s1570_s3, 256, %s56_s8, [#allocation9], %s1346_s28, %s1346_s28, %s1347_s29  }
  0x25   :  { %s1249_s22 = scalar_lea.hbm %s1567_s0, 4096 }
  0x26   :  { %p1250_p2 = scmp.ne.s32.totalorder %s1567_s0, %s1249_s22  ;;  %p1253_p3 = scmp.lt.u32.totalorder %s1249_s22, %s1567_s0 }
  0x28   :  { %p1255_p4 = pnand %p1253_p3, %p1250_p2 }
  0x2a   :  { %1258 = shalt.err (!%p1255_p4)
}
  0x2b   :  { %s1259_s27 = scalar_lea.vmem %s20_s10, 4096  ;;  %p1264_p6 = scmp.lt.s32.totalorder %s20_s10, %s20_s10 }
  0x2c   :  { %p1260_p5 = scmp.ne.s32.totalorder %s20_s10, %s1259_s27  ;;  %p1265_p7 = scmp.lt.s32.totalorder %s1259_s27, %s1259_s27 }
  0x2e   :  { %p1266_p8 = por %p1265_p7, %p1264_p6 }
  0x30   :  { %p1267_p9 = pnand %p1266_p8, %p1260_p5 }
  0x32   :  { %1270 = shalt.err (!%p1267_p9)
}
  0x33   :  { %s1350_s3 = smov 128   ;;  %s1351_s30 = smov 8  }
  0x34   :  { %25 = dma.hbm_to_vmem [thread:$0]  %s1567_s0, 4096, %s20_s10, [#allocation3], %s1350_s3, %s1350_s3, %s1351_s30  }
  0x35   :  { %s1352_s8 = smov [#allocation7]   ;;  %s1353_s11 = smov [#allocation10]  }
  0x36   :  { %s43_s9 = sshll.u32 %s1352_s8, 4  ;;  %s68_s12 = sshll.u32 %s1353_s11, 4  ;;  %s44_s9 = int_to_ptr.vmem [resolvable:$true] %s43_s9  ;;  %s69_s12 = int_to_ptr.vmem [resolvable:$true] %s68_s12 }
  0x37   :  { %s1271_s15 = scalar_lea.hbm %s1569_s2, 2048 }
  0x38   :  { %p1272_p10 = scmp.ne.s32.totalorder %s1569_s2, %s1271_s15  ;;  %p1275_p11 = scmp.lt.u32.totalorder %s1271_s15, %s1569_s2 }
  0x3a   :  { %p1277_p12 = pnand %p1275_p11, %p1272_p10 }
  0x3c   :  { %1280 = shalt.err (!%p1277_p12)
}
  0x3d   :  { %s1281_s0 = scalar_lea.vmem %s44_s9, 2048  ;;  %p1286_p0 = scmp.lt.s32.totalorder %s44_s9, %s44_s9 }
  0x3e   :  { %p1282_p13 = scmp.ne.s32.totalorder %s44_s9, %s1281_s0  ;;  %p1287_p1 = scmp.lt.s32.totalorder %s1281_s0, %s1281_s0 }
  0x40   :  { %p1288_p2 = por %p1287_p1, %p1286_p0 }
  0x42   :  { %p1289_p3 = pnand %p1288_p2, %p1282_p13 }
  0x44   :  { %1292 = shalt.err (!%p1289_p3)
}
  0x45   :  { %49 = dma.hbm_to_vmem [thread:$0]  %s1569_s2, 2048, %s44_s9, [#allocation6], %s1346_s28, %s1346_s28, %s1347_s29  }
  0x46   :  { %s1293_s22 = scalar_lea.hbm %s1571_s4, 16 }
  0x47   :  { %p1294_p4 = scmp.ne.s32.totalorder %s1571_s4, %s1293_s22  ;;  %p1297_p5 = scmp.lt.u32.totalorder %s1293_s22, %s1571_s4 }
  0x49   :  { %p1299_p6 = pnand %p1297_p5, %p1294_p4 }
  0x4b   :  { %1302 = shalt.err (!%p1299_p6)
}
  0x4c   :  { %s1303_s27 = scalar_lea.vmem %s69_s12, 16  ;;  %s1307_s3 = scalar_lea.vmem %s69_s12, 32 }
  0x4d   :  { %p1304_p7 = scmp.ne.s32.totalorder %s69_s12, %s1303_s27  ;;  %p1308_p8 = scmp.lt.s32.totalorder %s69_s12, %s69_s12 }
  0x4e   :  { %p1309_p9 = scmp.lt.s32.totalorder %s1307_s3, %s1303_s27 }
  0x50   :  { %p1310_p10 = por %p1309_p9, %p1308_p8 }
  0x52   :  { %p1311_p11 = pnand %p1310_p10, %p1304_p7 }
  0x54   :  { %1314 = shalt.err (!%p1311_p11)
}
  0x55   :  { %71 = dma.hbm_to_vmem [thread:$0]  %s1571_s4, 16, %s69_s12, [#allocation9]  }
  0x56   :  { %1337 = dma.done.wait [#allocation3], 4096  }
  0x57   :  { %1338 = vsyncadd [#allocation3], 4294963200 }
  0x58   :  { %1339 = dma.done.wait [#allocation6], 2304  }
  0x59   :  { %1340 = vsyncadd [#allocation6], 4294964992 }
  0x5a   :  { %1341 = dma.done.wait [#allocation9], 272  }
  0x5b   :  { %1342 = vsyncadd [#allocation9], 4294967024  ;;  %v1185_v0 = vld [vmem:[#allocation8] sm:$0xff]   ;;  %v1186_v1 = vld [vmem:[#allocation5] sm:$0xff]   ;;  %vm268_vm0 = vcmask 261120   ;;  %vm866_vm1 = vcmask 781312  }
  0x5c   :  { %1071 = vmatprep.subr.bf16.mxu1 %v1185_v0  ;;  %v1187_v2 = vld [vmem:[#allocation8 + $0x8] sm:$0xff]   ;;  %1107 = vmatprep.subr.bf16.mxu0 %v1186_v1  ;;  %v1188_v3 = vld [vmem:[#allocation5 + $0x8] sm:$0xff]   ;;  %v1189_v4 = vld [vmem:[#allocation7] sm:$0xff]   ;;  %s1354_s4 = smov [#allocation11]  }
  0x5d   :  { %1072 = vmatpush3.bf16.msra.mxu1 %v1185_v0  ;;  %1108 = vmatpush3.bf16.msra.mxu0 %v1186_v1  ;;  %v88_v5 = vld [vmem:[#allocation2] sm:$0xff]  ;;  %v89_v6 = vld [vmem:[#allocation2 + $0x8] sm:$0xff]  ;;  %v1190_v8 = vld [vmem:[#allocation7 + $0x8] sm:$0xff]   ;;  %s904_s6 = sshll.u32 %s1354_s4, 4  ;;  %s905_s6 = int_to_ptr.vmem [resolvable:$true] %s904_s6 }
  0x5e   :  { %1073 = vmatprep.subr.bf16.mxu1 %v1187_v2  ;;  %1109 = vmatprep.subr.bf16.mxu0 %v1188_v3  ;;  %v120_v7 = vpack.c.bf16 %v89_v6, %v88_v5  ;;  %v90_v9 = vld [vmem:[#allocation2 + $0x10] sm:$0xff]  ;;  %v91_v10 = vld [vmem:[#allocation2 + $0x18] sm:$0xff]  ;;  %v1191_v12 = vld [vmem:[#allocation7 + $0x10] sm:$0xff]   ;;  %s1315_s7 = scalar_lea.vmem %s905_s6, 2048  ;;  %p1320_p13 = scmp.lt.s32.totalorder %s905_s6, %s905_s6 }
  0x5f   :  { %1075 = vmatprep.mubr.msk.bf16.mxu1 %vm268_vm0, %v1189_v4  ;;  %v121_v11 = vpack.c.bf16 %v91_v10, %v90_v9  ;;  %v92_v13 = vld [vmem:[#allocation2 + $0x20] sm:$0xff]  ;;  %v93_v14 = vld [vmem:[#allocation2 + $0x28] sm:$0xff]  ;;  %v94_v16 = vld [vmem:[#allocation2 + $0x30] sm:$0xff]  ;;  %p1316_p12 = scmp.ne.s32.totalorder %s905_s6, %s1315_s7  ;;  %p1321_p0 = scmp.lt.s32.totalorder %s1315_s7, %s1315_s7 }
  0x60   :  { %1111 = vmatprep.mubr.msk.bf16.mxu0 %vm268_vm0, %v120_v7  ;;  %v122_v15 = vpack.c.bf16 %v93_v14, %v92_v13  ;;  %v95_v17 = vld [vmem:[#allocation2 + $0x38] sm:$0xff]  ;;  %v96_v18 = vld [vmem:[#allocation2 + $0x40] sm:$0xff]  ;;  %v97_v19 = vld [vmem:[#allocation2 + $0x48] sm:$0xff] }
  0x61   :  { %1074 = vmatpush3.bf16.msra.mxu1 %v1187_v2  ;;  %1110 = vmatpush3.bf16.msra.mxu0 %v1188_v3  ;;  %v1192_v20 = vld [vmem:[#allocation7 + $0x18] sm:$0xff]   ;;  %v123_v21 = vpack.c.bf16 %v95_v17, %v94_v16  ;;  %v1193_v22 = vld [vmem:[#allocation7 + $0x20] sm:$0xff]   ;;  %v124_v23 = vpack.c.bf16 %v97_v19, %v96_v18  ;;  %v99_v25 = vld [vmem:[#allocation2 + $0x58] sm:$0xff]  ;;  %p1322_p1 = por %p1321_p0, %p1320_p13 }
  0x62   :  { %v98_v24 = vld [vmem:[#allocation2 + $0x50] sm:$0xff]  ;;  %v100_v26 = vld [vmem:[#allocation2 + $0x60] sm:$0xff]  ;;  %v101_v27 = vld [vmem:[#allocation2 + $0x68] sm:$0xff] }
  0x63   :  { %v1194_v28 = vld [vmem:[#allocation7 + $0x28] sm:$0xff]   ;;  %v125_v29 = vpack.c.bf16 %v99_v25, %v98_v24  ;;  %v1195_v30 = vld [vmem:[#allocation7 + $0x30] sm:$0xff]   ;;  %v126_v31 = vpack.c.bf16 %v101_v27, %v100_v26  ;;  %v102_v32 = vld [vmem:[#allocation2 + $0x70] sm:$0xff]  ;;  %p1323_p2 = pnand %p1322_p1, %p1316_p12 }
  0x64   :  { %1076 = vmatmul.mubr.msk.bf16.vlgmr.msra.gmra.mrb[0].mxu1 %vm268_vm0, %v1190_v8  ;;  %1112 = vmatmul.mubr.msk.bf16.vlgmr.msra.gmra.mrb[0].mxu0 %vm268_vm0, %v121_v11  ;;  %v103_v33 = vld [vmem:[#allocation2 + $0x78] sm:$0xff]  ;;  %v104_v34 = vld [vmem:[#allocation2 + $0x80] sm:$0xff]  ;;  %v105_v35 = vld [vmem:[#allocation2 + $0x88] sm:$0xff] }
  0x65   :  { %1079 = vmatprep.mubr.msk.bf16.mxu1 %vm268_vm0, %v1191_v12  ;;  %1115 = vmatprep.mubr.msk.bf16.mxu0 %vm268_vm0, %v122_v15  ;;  %v1196_v36 = vld [vmem:[#allocation7 + $0x38] sm:$0xff]   ;;  %v127_v37 = vpack.c.bf16 %v103_v33, %v102_v32  ;;  %v1197_v38 = vld [vmem:[#allocation7 + $0x40] sm:$0xff]   ;;  %v128_v39 = vpack.c.bf16 %v105_v35, %v104_v34  ;;  %v107_v41 = vld [vmem:[#allocation2 + $0x98] sm:$0xff] }
  0x66   :  { %v106_v40 = vld [vmem:[#allocation2 + $0x90] sm:$0xff]  ;;  %v108_v42 = vld [vmem:[#allocation2 + $0xa0] sm:$0xff]  ;;  %v109_v43 = vld [vmem:[#allocation2 + $0xa8] sm:$0xff] }
  0x67   :  { %v1198_v44 = vld [vmem:[#allocation7 + $0x48] sm:$0xff]   ;;  %v129_v45 = vpack.c.bf16 %v107_v41, %v106_v40  ;;  %v1199_v46 = vld [vmem:[#allocation7 + $0x50] sm:$0xff]   ;;  %v130_v47 = vpack.c.bf16 %v109_v43, %v108_v42  ;;  %v110_v48 = vld [vmem:[#allocation2 + $0xb0] sm:$0xff] }
  0x68   :  { %v111_v49 = vld [vmem:[#allocation2 + $0xb8] sm:$0xff]  ;;  %v112_v50 = vld [vmem:[#allocation2 + $0xc0] sm:$0xff]  ;;  %v113_v51 = vld [vmem:[#allocation2 + $0xc8] sm:$0xff] }
  0x69   :  { %v1200_v52 = vld [vmem:[#allocation7 + $0x58] sm:$0xff]   ;;  %v131_v53 = vpack.c.bf16 %v111_v49, %v110_v48  ;;  %v1201_v54 = vld [vmem:[#allocation7 + $0x60] sm:$0xff]   ;;  %v132_v55 = vpack.c.bf16 %v113_v51, %v112_v50  ;;  %v115_v57 = vld [vmem:[#allocation2 + $0xd8] sm:$0xff] }
  0x6a   :  { %v114_v56 = vld [vmem:[#allocation2 + $0xd0] sm:$0xff]  ;;  %v116_v58 = vld [vmem:[#allocation2 + $0xe0] sm:$0xff]  ;;  %v117_v59 = vld [vmem:[#allocation2 + $0xe8] sm:$0xff] }
  0x6b   :  { %v1202_v60 = vld [vmem:[#allocation7 + $0x68] sm:$0xff]   ;;  %v133_v61 = vpack.c.bf16 %v115_v57, %v114_v56  ;;  %v1203_v62 = vld [vmem:[#allocation7 + $0x70] sm:$0xff]   ;;  %v134_v63 = vpack.c.bf16 %v117_v59, %v116_v58  ;;  %v118_v0 = vld [vmem:[#allocation2 + $0xf0] sm:$0xff] }
  0x6c   :  { %1080 = vmatmul.mubr.msk.bf16.gmra.mrb[4].mxu1 %vm268_vm0, %v1192_v20  ;;  %1116 = vmatmul.mubr.msk.bf16.gmra.mrb[4].mxu0 %vm268_vm0, %v123_v21  ;;  %v119_v1 = vld [vmem:[#allocation2 + $0xf8] sm:$0xff]  ;;  %v1204_v2 = vld [vmem:[#allocation7 + $0x78] sm:$0xff]   ;;  %v1486_v6 = vld [vmem:[#allocation10] ss:$0 sm:$0xff] }
  0x6d   :  { %1083 = vmatprep.mubr.msk.bf16.mxu1 %vm268_vm0, %v1193_v22  ;;  %1119 = vmatprep.mubr.msk.bf16.mxu0 %vm268_vm0, %v124_v23  ;;  %v135_v3 = vpack.c.bf16 %v119_v1, %v118_v0 }
  0x74   :  { %1084 = vmatmul.mubr.msk.bf16.gmra.mrb[8].mxu1 %vm268_vm0, %v1194_v28  ;;  %1120 = vmatmul.mubr.msk.bf16.gmra.mrb[8].mxu0 %vm268_vm0, %v125_v29 }
  0x75   :  { %1087 = vmatprep.mubr.msk.bf16.mxu1 %vm268_vm0, %v1195_v30  ;;  %1123 = vmatprep.mubr.msk.bf16.mxu0 %vm268_vm0, %v126_v31 }
  0x7c   :  { %1088 = vmatmul.mubr.msk.bf16.gmra.mrb[12].mxu1 %vm268_vm0, %v1196_v36  ;;  %1124 = vmatmul.mubr.msk.bf16.gmra.mrb[12].mxu0 %vm268_vm0, %v127_v37 }
  0x7d   :  { %1091 = vmatprep.mubr.msk.bf16.mxu1 %vm268_vm0, %v1197_v38  ;;  %1127 = vmatprep.mubr.msk.bf16.mxu0 %vm268_vm0, %v128_v39 }
  0x84   :  { %1092 = vmatmul.mubr.msk.bf16.gmra.mrb[16].mxu1 %vm268_vm0, %v1198_v44  ;;  %1128 = vmatmul.mubr.msk.bf16.gmra.mrb[16].mxu0 %vm268_vm0, %v129_v45 }
  0x85   :  { %1095 = vmatprep.mubr.msk.bf16.mxu1 %vm268_vm0, %v1199_v46  ;;  %1131 = vmatprep.mubr.msk.bf16.mxu0 %vm268_vm0, %v130_v47 }
  0x8c   :  { %1096 = vmatmul.mubr.msk.bf16.gmra.mrb[20].mxu1 %vm268_vm0, %v1200_v52  ;;  %1132 = vmatmul.mubr.msk.bf16.gmra.mrb[20].mxu0 %vm268_vm0, %v131_v53 }
  0x8d   :  { %1099 = vmatprep.mubr.msk.bf16.mxu1 %vm268_vm0, %v1201_v54  ;;  %1135 = vmatprep.mubr.msk.bf16.mxu0 %vm268_vm0, %v132_v55 }
  0x94   :  { %1100 = vmatmul.mubr.msk.bf16.gmra.mrb[24].mxu1 %vm268_vm0, %v1202_v60  ;;  %1136 = vmatmul.mubr.msk.bf16.gmra.mrb[24].mxu0 %vm268_vm0, %v133_v61 }
  0x95   :  { %1103 = vmatprep.mubr.msk.bf16.mxu1 %vm268_vm0, %v1203_v62  ;;  %1139 = vmatprep.mubr.msk.bf16.mxu0 %vm268_vm0, %v134_v63 }
  0x9c   :  { %1104 = vmatmul.mubr.msk.bf16.gmra.mrb[28].mxu1 %vm268_vm0, %v1204_v2  ;;  %1140 = vmatmul.mubr.msk.bf16.gmra.mrb[28].mxu0 %vm268_vm0, %v135_v3 }
 0x137   :  { %v1077_v4 = vpop.f32.mrb[0].mxu1  ;;  %v1113_v5 = vpop.f32.mrb[0].mxu0 }
 0x138   :  { %v351_v7 = vpop.f32.mrb[1].mxu1  ;;  %v581_v8 = vadd.f32 %v1113_v5, %v1077_v4  ;;  %v572_v9 = vpop.f32.mrb[1].mxu0 }
 0x139   :  { %v1078_v10 = vpop.f32.mrb[2].mxu1  ;;  %v573_v11 = vadd.f32 %v572_v9, %v351_v7  ;;  %v1114_v12 = vpop.f32.mrb[2].mxu0 }
 0x13a   :  { %v354_v13 = vpop.f32.mrb[3].mxu1  ;;  %v708_v14 = vadd.f32 %v1486_v6, %v581_v8  ;;  %v584_v15 = vadd.f32 %v1114_v12, %v1078_v10  ;;  %v575_v16 = vpop.f32.mrb[3].mxu0 }
 0x13b   :  { %v706_v17 = vadd.f32 %v1486_v6, %v573_v11  ;;  %v576_v18 = vadd.f32 %v575_v16, %v354_v13 }
 0x13c   :  { %v1005_v19 = vpack.c.bf16 %v708_v14, %v708_v14  ;;  %v709_v20 = vadd.f32 %v1486_v6, %v584_v15 }
 0x13d   :  { %v1003_v21 = vpack.c.bf16 %v706_v17, %v706_v17  ;;  %v707_v22 = vadd.f32 %v1486_v6, %v576_v18 }
 0x13e   :  { %869 = vst.msk [vmem:[#allocation11 + $0x8] sm:$0xf] %vm866_vm1, %v1005_v19  ;;  %v1006_v23 = vpack.c.bf16 %v709_v20, %v709_v20 }
 0x13f   :  { %v1081_v24 = vpop.f32.mrb[4].mxu1  ;;  %867 = vst.msk [vmem:[#allocation11] sm:$0xf] %vm866_vm1, %v1003_v21  ;;  %v1004_v25 = vpack.c.bf16 %v707_v22, %v707_v22  ;;  %v1117_v26 = vpop.f32.mrb[4].mxu0 }
 0x140   :  { %v367_v27 = vpop.f32.mrb[5].mxu1  ;;  %870 = vst.msk [vmem:[#allocation11 + $0xc] sm:$0xf] %vm866_vm1, %v1006_v23  ;;  %v597_v28 = vadd.f32 %v1117_v26, %v1081_v24  ;;  %v588_v29 = vpop.f32.mrb[5].mxu0 }
 0x141   :  { %v1082_v30 = vpop.f32.mrb[6].mxu1  ;;  %868 = vst.msk [vmem:[#allocation11 + $0x4] sm:$0xf] %vm866_vm1, %v1004_v25  ;;  %v589_v31 = vadd.f32 %v588_v29, %v367_v27  ;;  %v1118_v32 = vpop.f32.mrb[6].mxu0 }
 0x142   :  { %v370_v33 = vpop.f32.mrb[7].mxu1  ;;  %v712_v34 = vadd.f32 %v1486_v6, %v597_v28  ;;  %v600_v35 = vadd.f32 %v1118_v32, %v1082_v30  ;;  %v591_v36 = vpop.f32.mrb[7].mxu0 }
 0x143   :  { %v710_v37 = vadd.f32 %v1486_v6, %v589_v31  ;;  %v592_v38 = vadd.f32 %v591_v36, %v370_v33 }
 0x144   :  { %v1009_v39 = vpack.c.bf16 %v712_v34, %v712_v34  ;;  %v713_v40 = vadd.f32 %v1486_v6, %v600_v35 }
 0x145   :  { %v1007_v41 = vpack.c.bf16 %v710_v37, %v710_v37  ;;  %v711_v42 = vadd.f32 %v1486_v6, %v592_v38 }
 0x146   :  { %873 = vst.msk [vmem:[#allocation11 + $0x18] sm:$0xf] %vm866_vm1, %v1009_v39  ;;  %v1010_v43 = vpack.c.bf16 %v713_v40, %v713_v40 }
 0x147   :  { %v1085_v44 = vpop.f32.mrb[8].mxu1  ;;  %871 = vst.msk [vmem:[#allocation11 + $0x10] sm:$0xf] %vm866_vm1, %v1007_v41  ;;  %v1008_v45 = vpack.c.bf16 %v711_v42, %v711_v42  ;;  %v1121_v46 = vpop.f32.mrb[8].mxu0 }
 0x148   :  { %v383_v47 = vpop.f32.mrb[9].mxu1  ;;  %874 = vst.msk [vmem:[#allocation11 + $0x1c] sm:$0xf] %vm866_vm1, %v1010_v43  ;;  %v613_v48 = vadd.f32 %v1121_v46, %v1085_v44  ;;  %v604_v49 = vpop.f32.mrb[9].mxu0 }
 0x149   :  { %v1086_v50 = vpop.f32.mrb[10].mxu1  ;;  %872 = vst.msk [vmem:[#allocation11 + $0x14] sm:$0xf] %vm866_vm1, %v1008_v45  ;;  %v605_v51 = vadd.f32 %v604_v49, %v383_v47  ;;  %v1122_v52 = vpop.f32.mrb[10].mxu0 }
 0x14a   :  { %v386_v53 = vpop.f32.mrb[11].mxu1  ;;  %v716_v54 = vadd.f32 %v1486_v6, %v613_v48  ;;  %v616_v55 = vadd.f32 %v1122_v52, %v1086_v50  ;;  %v607_v56 = vpop.f32.mrb[11].mxu0 }
 0x14b   :  { %v714_v57 = vadd.f32 %v1486_v6, %v605_v51  ;;  %v608_v58 = vadd.f32 %v607_v56, %v386_v53 }
 0x14c   :  { %v1013_v59 = vpack.c.bf16 %v716_v54, %v716_v54  ;;  %v717_v60 = vadd.f32 %v1486_v6, %v616_v55 }
 0x14d   :  { %v1011_v61 = vpack.c.bf16 %v714_v57, %v714_v57  ;;  %v715_v62 = vadd.f32 %v1486_v6, %v608_v58 }
 0x14e   :  { %877 = vst.msk [vmem:[#allocation11 + $0x28] sm:$0xf] %vm866_vm1, %v1013_v59  ;;  %v1014_v63 = vpack.c.bf16 %v717_v60, %v717_v60 }
 0x14f   :  { %v1089_v0 = vpop.f32.mrb[12].mxu1  ;;  %875 = vst.msk [vmem:[#allocation11 + $0x20] sm:$0xf] %vm866_vm1, %v1011_v61  ;;  %v1012_v1 = vpack.c.bf16 %v715_v62, %v715_v62  ;;  %v1125_v2 = vpop.f32.mrb[12].mxu0 }
 0x150   :  { %v399_v3 = vpop.f32.mrb[13].mxu1  ;;  %878 = vst.msk [vmem:[#allocation11 + $0x2c] sm:$0xf] %vm866_vm1, %v1014_v63  ;;  %v629_v4 = vadd.f32 %v1125_v2, %v1089_v0  ;;  %v620_v5 = vpop.f32.mrb[13].mxu0 }
 0x151   :  { %v1090_v7 = vpop.f32.mrb[14].mxu1  ;;  %876 = vst.msk [vmem:[#allocation11 + $0x24] sm:$0xf] %vm866_vm1, %v1012_v1  ;;  %v621_v8 = vadd.f32 %v620_v5, %v399_v3  ;;  %v1126_v9 = vpop.f32.mrb[14].mxu0 }
 0x152   :  { %v402_v10 = vpop.f32.mrb[15].mxu1  ;;  %v720_v11 = vadd.f32 %v1486_v6, %v629_v4  ;;  %v632_v12 = vadd.f32 %v1126_v9, %v1090_v7  ;;  %v623_v13 = vpop.f32.mrb[15].mxu0 }
 0x153   :  { %v718_v14 = vadd.f32 %v1486_v6, %v621_v8  ;;  %v624_v15 = vadd.f32 %v623_v13, %v402_v10 }
 0x154   :  { %v1017_v16 = vpack.c.bf16 %v720_v11, %v720_v11  ;;  %v721_v17 = vadd.f32 %v1486_v6, %v632_v12 }
 0x155   :  { %v1015_v18 = vpack.c.bf16 %v718_v14, %v718_v14  ;;  %v719_v19 = vadd.f32 %v1486_v6, %v624_v15 }
 0x156   :  { %881 = vst.msk [vmem:[#allocation11 + $0x38] sm:$0xf] %vm866_vm1, %v1017_v16  ;;  %v1018_v20 = vpack.c.bf16 %v721_v17, %v721_v17 }
 0x157   :  { %v1093_v21 = vpop.f32.mrb[16].mxu1  ;;  %879 = vst.msk [vmem:[#allocation11 + $0x30] sm:$0xf] %vm866_vm1, %v1015_v18  ;;  %v1016_v22 = vpack.c.bf16 %v719_v19, %v719_v19  ;;  %v1129_v23 = vpop.f32.mrb[16].mxu0 }
 0x158   :  { %v415_v24 = vpop.f32.mrb[17].mxu1  ;;  %882 = vst.msk [vmem:[#allocation11 + $0x3c] sm:$0xf] %vm866_vm1, %v1018_v20  ;;  %v645_v25 = vadd.f32 %v1129_v23, %v1093_v21  ;;  %v636_v26 = vpop.f32.mrb[17].mxu0 }
 0x159   :  { %v1094_v27 = vpop.f32.mrb[18].mxu1  ;;  %880 = vst.msk [vmem:[#allocation11 + $0x34] sm:$0xf] %vm866_vm1, %v1016_v22  ;;  %v637_v28 = vadd.f32 %v636_v26, %v415_v24  ;;  %v1130_v29 = vpop.f32.mrb[18].mxu0 }
 0x15a   :  { %v418_v30 = vpop.f32.mrb[19].mxu1  ;;  %v724_v31 = vadd.f32 %v1486_v6, %v645_v25  ;;  %v648_v32 = vadd.f32 %v1130_v29, %v1094_v27  ;;  %v639_v33 = vpop.f32.mrb[19].mxu0 }
 0x15b   :  { %v722_v34 = vadd.f32 %v1486_v6, %v637_v28  ;;  %v640_v35 = vadd.f32 %v639_v33, %v418_v30 }
 0x15c   :  { %v1021_v36 = vpack.c.bf16 %v724_v31, %v724_v31  ;;  %v725_v37 = vadd.f32 %v1486_v6, %v648_v32 }
 0x15d   :  { %v1019_v38 = vpack.c.bf16 %v722_v34, %v722_v34  ;;  %v723_v39 = vadd.f32 %v1486_v6, %v640_v35 }
 0x15e   :  { %885 = vst.msk [vmem:[#allocation11 + $0x48] sm:$0xf] %vm866_vm1, %v1021_v36  ;;  %v1022_v40 = vpack.c.bf16 %v725_v37, %v725_v37 }
 0x15f   :  { %v1097_v41 = vpop.f32.mrb[20].mxu1  ;;  %883 = vst.msk [vmem:[#allocation11 + $0x40] sm:$0xf] %vm866_vm1, %v1019_v38  ;;  %v1020_v42 = vpack.c.bf16 %v723_v39, %v723_v39  ;;  %v1133_v43 = vpop.f32.mrb[20].mxu0 }
 0x160   :  { %v431_v44 = vpop.f32.mrb[21].mxu1  ;;  %886 = vst.msk [vmem:[#allocation11 + $0x4c] sm:$0xf] %vm866_vm1, %v1022_v40  ;;  %v661_v45 = vadd.f32 %v1133_v43, %v1097_v41  ;;  %v652_v46 = vpop.f32.mrb[21].mxu0 }
 0x161   :  { %v1098_v47 = vpop.f32.mrb[22].mxu1  ;;  %884 = vst.msk [vmem:[#allocation11 + $0x44] sm:$0xf] %vm866_vm1, %v1020_v42  ;;  %v653_v48 = vadd.f32 %v652_v46, %v431_v44  ;;  %v1134_v49 = vpop.f32.mrb[22].mxu0 }
 0x162   :  { %v434_v50 = vpop.f32.mrb[23].mxu1  ;;  %v728_v51 = vadd.f32 %v1486_v6, %v661_v45  ;;  %v664_v52 = vadd.f32 %v1134_v49, %v1098_v47  ;;  %v655_v53 = vpop.f32.mrb[23].mxu0 }
 0x163   :  { %v726_v54 = vadd.f32 %v1486_v6, %v653_v48  ;;  %v656_v55 = vadd.f32 %v655_v53, %v434_v50 }
 0x164   :  { %v1025_v56 = vpack.c.bf16 %v728_v51, %v728_v51  ;;  %v729_v57 = vadd.f32 %v1486_v6, %v664_v52 }
 0x165   :  { %v1023_v58 = vpack.c.bf16 %v726_v54, %v726_v54  ;;  %v727_v59 = vadd.f32 %v1486_v6, %v656_v55 }
 0x166   :  { %889 = vst.msk [vmem:[#allocation11 + $0x58] sm:$0xf] %vm866_vm1, %v1025_v56  ;;  %v1026_v60 = vpack.c.bf16 %v729_v57, %v729_v57 }
 0x167   :  { %v1101_v61 = vpop.f32.mrb[24].mxu1  ;;  %887 = vst.msk [vmem:[#allocation11 + $0x50] sm:$0xf] %vm866_vm1, %v1023_v58  ;;  %v1024_v62 = vpack.c.bf16 %v727_v59, %v727_v59  ;;  %v1137_v63 = vpop.f32.mrb[24].mxu0 }
 0x168   :  { %v447_v0 = vpop.f32.mrb[25].mxu1  ;;  %890 = vst.msk [vmem:[#allocation11 + $0x5c] sm:$0xf] %vm866_vm1, %v1026_v60  ;;  %v677_v1 = vadd.f32 %v1137_v63, %v1101_v61  ;;  %v668_v2 = vpop.f32.mrb[25].mxu0 }
 0x169   :  { %v1102_v3 = vpop.f32.mrb[26].mxu1  ;;  %888 = vst.msk [vmem:[#allocation11 + $0x54] sm:$0xf] %vm866_vm1, %v1024_v62  ;;  %v669_v4 = vadd.f32 %v668_v2, %v447_v0  ;;  %v1138_v5 = vpop.f32.mrb[26].mxu0 }
 0x16a   :  { %v450_v7 = vpop.f32.mrb[27].mxu1  ;;  %v732_v8 = vadd.f32 %v1486_v6, %v677_v1  ;;  %v680_v9 = vadd.f32 %v1138_v5, %v1102_v3  ;;  %v671_v10 = vpop.f32.mrb[27].mxu0 }
 0x16b   :  { %v730_v11 = vadd.f32 %v1486_v6, %v669_v4  ;;  %v672_v12 = vadd.f32 %v671_v10, %v450_v7 }
 0x16c   :  { %v1029_v13 = vpack.c.bf16 %v732_v8, %v732_v8  ;;  %v733_v14 = vadd.f32 %v1486_v6, %v680_v9 }
 0x16d   :  { %v1027_v15 = vpack.c.bf16 %v730_v11, %v730_v11  ;;  %v731_v16 = vadd.f32 %v1486_v6, %v672_v12 }
 0x16e   :  { %893 = vst.msk [vmem:[#allocation11 + $0x68] sm:$0xf] %vm866_vm1, %v1029_v13  ;;  %v1030_v17 = vpack.c.bf16 %v733_v14, %v733_v14 }
 0x16f   :  { %v1105_v18 = vpop.f32.mrb[28].mxu1  ;;  %891 = vst.msk [vmem:[#allocation11 + $0x60] sm:$0xf] %vm866_vm1, %v1027_v15  ;;  %v1028_v19 = vpack.c.bf16 %v731_v16, %v731_v16  ;;  %v1141_v20 = vpop.f32.mrb[28].mxu0 }
 0x170   :  { %v463_v21 = vpop.f32.mrb[29].mxu1  ;;  %894 = vst.msk [vmem:[#allocation11 + $0x6c] sm:$0xf] %vm866_vm1, %v1030_v17  ;;  %v693_v22 = vadd.f32 %v1141_v20, %v1105_v18  ;;  %v684_v23 = vpop.f32.mrb[29].mxu0 }
 0x171   :  { %v1106_v24 = vpop.f32.mrb[30].mxu1  ;;  %892 = vst.msk [vmem:[#allocation11 + $0x64] sm:$0xf] %vm866_vm1, %v1028_v19  ;;  %v685_v25 = vadd.f32 %v684_v23, %v463_v21  ;;  %v1142_v26 = vpop.f32.mrb[30].mxu0 }
 0x172   :  { %v466_v27 = vpop.f32.mrb[31].mxu1  ;;  %v736_v28 = vadd.f32 %v1486_v6, %v693_v22  ;;  %v696_v29 = vadd.f32 %v1142_v26, %v1106_v24  ;;  %v687_v30 = vpop.f32.mrb[31].mxu0 }
 0x173   :  { %v734_v31 = vadd.f32 %v1486_v6, %v685_v25  ;;  %v688_v32 = vadd.f32 %v687_v30, %v466_v27 }
 0x174   :  { %v1033_v33 = vpack.c.bf16 %v736_v28, %v736_v28  ;;  %v737_v34 = vadd.f32 %v1486_v6, %v696_v29 }
 0x175   :  { %v1031_v35 = vpack.c.bf16 %v734_v31, %v734_v31  ;;  %v735_v36 = vadd.f32 %v1486_v6, %v688_v32 }
 0x176   :  { %897 = vst.msk [vmem:[#allocation11 + $0x78] sm:$0xf] %vm866_vm1, %v1033_v33  ;;  %v1034_v37 = vpack.c.bf16 %v737_v34, %v737_v34 }
 0x177   :  { %895 = vst.msk [vmem:[#allocation11 + $0x70] sm:$0xf] %vm866_vm1, %v1031_v35  ;;  %v1032_v38 = vpack.c.bf16 %v735_v36, %v735_v36 }
 0x178   :  { %898 = vst.msk [vmem:[#allocation11 + $0x7c] sm:$0xf] %vm866_vm1, %v1034_v37 }
 0x179   :  { %896 = vst.msk [vmem:[#allocation11 + $0x74] sm:$0xf] %vm866_vm1, %v1032_v38 }
 0x17a   :  { %1326 = shalt.err (!%p1323_p2)
}
 0x17b   :  { %s1327_s11 = scalar_lea.hbm %s1572_s5, 2048 }
 0x17c   :  { %p1328_p3 = scmp.ne.s32.totalorder %s1572_s5, %s1327_s11  ;;  %p1331_p4 = scmp.lt.u32.totalorder %s1327_s11, %s1572_s5 }
 0x17e   :  { %p1333_p5 = pnand %p1331_p4, %p1328_p3 }
 0x180   :  { %1336 = shalt.err (!%p1333_p5)
}
 0x181   :  { %910 = dma.vmem_to_hbm [thread:$0]  %s905_s6, 2048, %s1572_s5, [#allocation4], %s1346_s28, %s1346_s28, %s1347_s29  }
 0x182   :  { %1343 = dma.done.wait [#allocation4], 2048  }
 0x183   :  { %1344 = vsyncadd [#allocation4], 4294965248 }
 0x184   :  { %914 = vsyncpa [#allocation3], 1 }
 0x185   :  { %915 = vsyncpa [#allocation6], 1 }
 0x186   :  { %916 = vsyncpa [#allocation9], 1 }
 0x187   :  { %917 = vsyncpa [#allocation4], 1 }

// kernel: _lambda_.9
= control target key start
LH: loop header
LB: loop body
LE: loop exit
PB: predicated region body
PF: predicated region fallthrough
CT: control target
= control target key end

     0   :  { %9 = vsyncpa [#allocation3], 0  ;;  %s1706_s0 = inlined_call_operand.hbm [shape: f32[256,32], index: 0, kind: input, shape index: {}]   ;;  %s1707_s1 = inlined_call_operand.hbm [shape: f32[256,16], index: 1, kind: input, shape index: {}]   ;;  %s1708_s2 = inlined_call_operand.hbm [shape: bf16[16,32], index: 2, kind: input, shape index: {}]   ;;  %s1709_s3 = inlined_call_operand.hbm [shape: f32[1,32], index: 3, kind: input, shape index: {}]   ;;  %s1710_s4 = inlined_call_operand.hbm [shape: bf16[256,32], index: 4, kind: output, shape index: {}]  }
   0x1   :  { %10 = vsyncpa [#allocation6], 0 }
   0x2   :  { %11 = vsyncpa [#allocation9], 0 }
   0x3   :  { %12 = vsyncpa [#allocation4], 0  ;;  %s1236_s15 = smov [#allocation5]   ;;  %s1237_s17 = smov [#allocation2]  }
   0x4   :  { %s30_s16 = sshll.u32 %s1236_s15, 4  ;;  %s18_s18 = sshll.u32 %s1237_s17, 4  ;;  %s31_s16 = int_to_ptr.vmem [resolvable:$true] %s30_s16  ;;  %s1270_s18 = int_to_ptr.vmem [resolvable:$true] %s18_s18 }
   0x5   :  { %s1118_s21 = scalar_lea.hbm %s1707_s1, 4096 }
   0x6   :  { %p1119_p0 = scmp.ne.s32.totalorder %s1707_s1, %s1118_s21  ;;  %p1122_p1 = scmp.lt.u32.totalorder %s1118_s21, %s1707_s1 }
   0x8   :  { %p1124_p2 = pnand %p1122_p1, %p1119_p0 }
   0xa   :  { %1127 = shalt.err (!%p1124_p2)
}
   0xb   :  { %s1128_s26 = scalar_lea.vmem %s31_s16, 4096  ;;  %p1133_p4 = scmp.lt.s32.totalorder %s31_s16, %s31_s16 }
   0xc   :  { %p1129_p3 = scmp.ne.s32.totalorder %s31_s16, %s1128_s26  ;;  %p1134_p5 = scmp.lt.s32.totalorder %s1128_s26, %s1128_s26 }
   0xe   :  { %p1135_p6 = por %p1134_p5, %p1133_p4 }
  0x10   :  { %p1136_p7 = pnand %p1135_p6, %p1129_p3 }
  0x12   :  { %1139 = shalt.err (!%p1136_p7)
}
  0x13   :  { %s1238_s27 = smov 128   ;;  %s1239_s28 = smov 8  }
  0x14   :  { %36 = dma.hbm_to_vmem [thread:$0]  %s1707_s1, 4096, %s31_s16, [#allocation6], %s1238_s27, %s1238_s27, %s1239_s28  }
  0x15   :  { %s1140_s7 = scalar_lea.hbm %s1706_s0, 4096 }
  0x16   :  { %p1141_p8 = scmp.ne.s32.totalorder %s1706_s0, %s1140_s7  ;;  %p1144_p9 = scmp.lt.u32.totalorder %s1140_s7, %s1706_s0 }
  0x18   :  { %p1146_p10 = pnand %p1144_p9, %p1141_p8 }
  0x1a   :  { %1149 = shalt.err (!%p1146_p10)
}
  0x1b   :  { %s1150_s12 = scalar_lea.vmem %s1270_s18, 4096  ;;  %p1155_p12 = scmp.lt.s32.totalorder %s1270_s18, %s1270_s18 }
  0x1c   :  { %p1151_p11 = scmp.ne.s32.totalorder %s1270_s18, %s1150_s12  ;;  %p1156_p13 = scmp.lt.s32.totalorder %s1150_s12, %s1150_s12 }
  0x1e   :  { %p1157_p0 = por %p1156_p13, %p1155_p12 }
  0x20   :  { %p1158_p1 = pnand %p1157_p0, %p1151_p11 }
  0x22   :  { %1161 = shalt.err (!%p1158_p1)
}
  0x23   :  { %24 = dma.hbm_to_vmem [thread:$0]  %s1706_s0, 4096, %s1270_s18, [#allocation3], %s1238_s27, %s1238_s27, %s1239_s28  }
  0x24   :  { %s1240_s14 = smov [#allocation7]   ;;  %s1162_s19 = scalar_lea.hbm %s1708_s2, 128 }
  0x25   :  { %s42_s15 = sshll.u32 %s1240_s14, 4  ;;  %p1163_p2 = scmp.ne.s32.totalorder %s1708_s2, %s1162_s19  ;;  %s43_s15 = int_to_ptr.vmem [resolvable:$true] %s42_s15 }
  0x26   :  { %p1166_p3 = scmp.lt.u32.totalorder %s1162_s19, %s1708_s2 }
  0x28   :  { %p1168_p4 = pnand %p1166_p3, %p1163_p2 }
  0x2a   :  { %1171 = shalt.err (!%p1168_p4)
}
  0x2b   :  { %s1172_s24 = scalar_lea.vmem %s43_s15, 128  ;;  %p1177_p6 = scmp.lt.s32.totalorder %s43_s15, %s43_s15 }
  0x2c   :  { %p1173_p5 = scmp.ne.s32.totalorder %s43_s15, %s1172_s24  ;;  %p1178_p7 = scmp.lt.s32.totalorder %s1172_s24, %s1172_s24 }
  0x2e   :  { %p1179_p8 = por %p1178_p7, %p1177_p6 }
  0x30   :  { %p1180_p9 = pnand %p1179_p8, %p1173_p5 }
  0x32   :  { %1183 = shalt.err (!%p1180_p9)
}
  0x33   :  { %s1241_s0 = smov 64   ;;  %s1242_s18 = smov 4  }
  0x34   :  { %48 = dma.hbm_to_vmem [thread:$0]  %s1708_s2, 128, %s43_s15, [#allocation6], %s1241_s0, %s1241_s0, %s1242_s18  }
  0x35   :  { %s1243_s27 = smov [#allocation8]   ;;  %s1184_s5 = scalar_lea.hbm %s1709_s3, 16 }
  0x36   :  { %s55_s28 = sshll.u32 %s1243_s27, 4  ;;  %p1185_p10 = scmp.ne.s32.totalorder %s1709_s3, %s1184_s5  ;;  %s56_s28 = int_to_ptr.vmem [resolvable:$true] %s55_s28 }
  0x37   :  { %p1188_p11 = scmp.lt.u32.totalorder %s1184_s5, %s1709_s3 }
  0x39   :  { %p1190_p12 = pnand %p1188_p11, %p1185_p10 }
  0x3b   :  { %1193 = shalt.err (!%p1190_p12)
}
  0x3c   :  { %s1194_s10 = scalar_lea.vmem %s56_s28, 16  ;;  %s1198_s2 = scalar_lea.vmem %s56_s28, 32 }
  0x3d   :  { %p1195_p13 = scmp.ne.s32.totalorder %s56_s28, %s1194_s10  ;;  %p1199_p0 = scmp.lt.s32.totalorder %s56_s28, %s56_s28 }
  0x3e   :  { %p1200_p1 = scmp.lt.s32.totalorder %s1198_s2, %s1194_s10 }
  0x40   :  { %p1201_p2 = por %p1200_p1, %p1199_p0 }
  0x42   :  { %p1202_p3 = pnand %p1201_p2, %p1195_p13 }
  0x44   :  { %1205 = shalt.err (!%p1202_p3)
}
  0x45   :  { %58 = dma.hbm_to_vmem [thread:$0]  %s1709_s3, 16, %s56_s28, [#allocation9]  }
  0x46   :  { %1228 = dma.done.wait [#allocation3], 4096  }
  0x47   :  { %1229 = vsyncadd [#allocation3], 4294963200 }
  0x48   :  { %1230 = dma.done.wait [#allocation6], 4224  }
  0x49   :  { %1231 = vsyncadd [#allocation6], 4294963072 }
  0x4a   :  { %1232 = dma.done.wait [#allocation9], 16  }
  0x4b   :  { %1233 = vsyncadd [#allocation9], 4294967280  ;;  %v1053_v0 = vld [vmem:[#allocation7] sm:$0xff]   ;;  %v73_v2 = vld [vmem:[#allocation5 + $0x8] sm:$0xff]  ;;  %vm160_vm0 = vcmask 130048   ;;  %vm857_vm1 = vcmask 257024  }
  0x4c   :  { %v72_v1 = vld [vmem:[#allocation5] sm:$0xff]  ;;  %1008 = vmatprep.subr.bf16.mxu0 %v1053_v0  ;;  %1042 = vmatprep.subr.bf16.mxu1 %v1053_v0  ;;  %v89_v5 = vld [vmem:[#allocation5 + $0x88] sm:$0xff]  ;;  %v74_v6 = vld [vmem:[#allocation5 + $0x10] sm:$0xff]  ;;  %s1244_s3 = smov [#allocation10]  }
  0x4d   :  { %v88_v3 = vld [vmem:[#allocation5 + $0x80] sm:$0xff]  ;;  %v104_v4 = vpack.c.bf16 %v73_v2, %v72_v1  ;;  %v75_v7 = vld [vmem:[#allocation5 + $0x18] sm:$0xff]  ;;  %1009 = vmatpush3.bf16.msra.mxu0 %v1053_v0  ;;  %1043 = vmatpush3.bf16.msra.mxu1 %v1053_v0  ;;  %v90_v10 = vld [vmem:[#allocation5 + $0x90] sm:$0xff]  ;;  %s895_s1 = sshll.u32 %s1244_s3, 4  ;;  %s896_s1 = int_to_ptr.vmem [resolvable:$true] %s895_s1 }
  0x4e   :  { %v112_v8 = vpack.c.bf16 %v89_v5, %v88_v3  ;;  %v105_v9 = vpack.c.bf16 %v75_v7, %v74_v6  ;;  %v91_v11 = vld [vmem:[#allocation5 + $0x98] sm:$0xff]  ;;  %v76_v12 = vld [vmem:[#allocation5 + $0x20] sm:$0xff]  ;;  %v77_v14 = vld [vmem:[#allocation5 + $0x28] sm:$0xff]  ;;  %s1206_s13 = scalar_lea.vmem %s896_s1, 2048  ;;  %p1211_p5 = scmp.lt.s32.totalorder %s896_s1, %s896_s1 }
  0x4f   :  { %1010 = vmatprep.mubr.msk.bf16.mxu0 %vm160_vm0, %v104_v4  ;;  %v113_v13 = vpack.c.bf16 %v91_v11, %v90_v10  ;;  %v92_v15 = vld [vmem:[#allocation5 + $0xa0] sm:$0xff]  ;;  %v93_v16 = vld [vmem:[#allocation5 + $0xa8] sm:$0xff]  ;;  %v106_v17 = vpack.c.bf16 %v77_v14, %v76_v12  ;;  %v78_v19 = vld [vmem:[#allocation5 + $0x30] sm:$0xff]  ;;  %p1207_p4 = scmp.ne.s32.totalorder %s896_s1, %s1206_s13  ;;  %p1212_p6 = scmp.lt.s32.totalorder %s1206_s13, %s1206_s13 }
  0x50   :  { %1026 = vmatprep.mubr.msk.bf16.mxu1 %vm160_vm0, %v112_v8  ;;  %v114_v18 = vpack.c.bf16 %v93_v16, %v92_v15  ;;  %1011 = vmatmul.mubr.msk.bf16.vlgmr.msra.gmra.mrb[0].mxu0 %vm160_vm0, %v105_v9  ;;  %v79_v20 = vld [vmem:[#allocation5 + $0x38] sm:$0xff]  ;;  %v94_v21 = vld [vmem:[#allocation5 + $0xb0] sm:$0xff]  ;;  %v80_v23 = vld [vmem:[#allocation5 + $0x40] sm:$0xff] }
  0x51   :  { %1027 = vmatmul.mubr.msk.bf16.vlgmr.msra.gmra.mrb[0].mxu1 %vm160_vm0, %v113_v13  ;;  %1014 = vmatprep.mubr.msk.bf16.mxu0 %vm160_vm0, %v106_v17  ;;  %v95_v22 = vld [vmem:[#allocation5 + $0xb8] sm:$0xff]  ;;  %v81_v24 = vld [vmem:[#allocation5 + $0x48] sm:$0xff]  ;;  %v96_v25 = vld [vmem:[#allocation5 + $0xc0] sm:$0xff]  ;;  %v107_v27 = vpack.c.bf16 %v79_v20, %v78_v19  ;;  %p1213_p7 = por %p1212_p6, %p1211_p5 }
  0x52   :  { %1030 = vmatprep.mubr.msk.bf16.mxu1 %vm160_vm0, %v114_v18  ;;  %v97_v26 = vld [vmem:[#allocation5 + $0xc8] sm:$0xff]  ;;  %v115_v28 = vpack.c.bf16 %v95_v22, %v94_v21  ;;  %v108_v29 = vpack.c.bf16 %v81_v24, %v80_v23  ;;  %v82_v31 = vld [vmem:[#allocation5 + $0x50] sm:$0xff]  ;;  %v83_v32 = vld [vmem:[#allocation5 + $0x58] sm:$0xff] }
  0x53   :  { %v116_v30 = vpack.c.bf16 %v97_v26, %v96_v25  ;;  %v98_v33 = vld [vmem:[#allocation5 + $0xd0] sm:$0xff]  ;;  %v99_v34 = vld [vmem:[#allocation5 + $0xd8] sm:$0xff]  ;;  %v84_v35 = vld [vmem:[#allocation5 + $0x60] sm:$0xff]  ;;  %v109_v39 = vpack.c.bf16 %v83_v32, %v82_v31  ;;  %p1214_p8 = pnand %p1213_p7, %p1207_p4 }
  0x54   :  { %v85_v36 = vld [vmem:[#allocation5 + $0x68] sm:$0xff]  ;;  %v100_v37 = vld [vmem:[#allocation5 + $0xe0] sm:$0xff]  ;;  %v117_v40 = vpack.c.bf16 %v99_v34, %v98_v33  ;;  %v86_v43 = vld [vmem:[#allocation5 + $0x70] sm:$0xff] }
  0x55   :  { %v101_v38 = vld [vmem:[#allocation5 + $0xe8] sm:$0xff]  ;;  %v110_v41 = vpack.c.bf16 %v85_v36, %v84_v35  ;;  %v87_v44 = vld [vmem:[#allocation5 + $0x78] sm:$0xff]  ;;  %v102_v45 = vld [vmem:[#allocation5 + $0xf0] sm:$0xff] }
  0x56   :  { %v118_v42 = vpack.c.bf16 %v101_v38, %v100_v37  ;;  %v103_v46 = vld [vmem:[#allocation5 + $0xf8] sm:$0xff]  ;;  %v111_v47 = vpack.c.bf16 %v87_v44, %v86_v43  ;;  %v122_v49 = vld [vmem:[#allocation2 + $0x10] sm:$0xff]  ;;  %v120_v51 = vld [vmem:[#allocation2] sm:$0xff] }
  0x57   :  { %v119_v48 = vpack.c.bf16 %v103_v46, %v102_v45  ;;  %v138_v50 = vld [vmem:[#allocation2 + $0x90] sm:$0xff]  ;;  %v136_v52 = vld [vmem:[#allocation2 + $0x80] sm:$0xff]  ;;  %v1344_v54 = vld [vmem:[#allocation8] ss:$0 sm:$0xff] }
  0x58   :  { %1015 = vmatmul.mubr.msk.bf16.gmra.mrb[4].mxu0 %vm160_vm0, %v107_v27  ;;  %v123_v56 = vld [vmem:[#allocation2 + $0x18] sm:$0xff]  ;;  %v121_v62 = vld [vmem:[#allocation2 + $0x8] sm:$0xff] }
  0x59   :  { %1031 = vmatmul.mubr.msk.bf16.gmra.mrb[4].mxu1 %vm160_vm0, %v115_v28  ;;  %1018 = vmatprep.mubr.msk.bf16.mxu0 %vm160_vm0, %v108_v29  ;;  %v139_v57 = vld [vmem:[#allocation2 + $0x98] sm:$0xff]  ;;  %v137_v8 = vld [vmem:[#allocation2 + $0x88] sm:$0xff] }
  0x5a   :  { %1034 = vmatprep.mubr.msk.bf16.mxu1 %vm160_vm0, %v116_v30 }
  0x60   :  { %1019 = vmatmul.mubr.msk.bf16.gmra.mrb[8].mxu0 %vm160_vm0, %v109_v39 }
  0x61   :  { %1035 = vmatmul.mubr.msk.bf16.gmra.mrb[8].mxu1 %vm160_vm0, %v117_v40  ;;  %1022 = vmatprep.mubr.msk.bf16.mxu0 %vm160_vm0, %v110_v41 }
  0x62   :  { %1038 = vmatprep.mubr.msk.bf16.mxu1 %vm160_vm0, %v118_v42 }
  0x68   :  { %1023 = vmatmul.mubr.msk.bf16.gmra.mrb[12].mxu0 %vm160_vm0, %v111_v47 }
  0x69   :  { %1039 = vmatmul.mubr.msk.bf16.gmra.mrb[12].mxu1 %vm160_vm0, %v119_v48  ;;  %v126_v48 = vld [vmem:[#allocation2 + $0x30] sm:$0xff] }
 0x123   :  { %v1012_v53 = vpop.f32.mrb[0].mxu0 }
 0x124   :  { %v1028_v55 = vpop.f32.mrb[0].mxu1  ;;  %v372_v58 = vadd.f32 %v1012_v53, %v122_v49  ;;  %v243_v60 = vpop.f32.mrb[1].mxu0  ;;  %v142_v53 = vld [vmem:[#allocation2 + $0xb0] sm:$0xff] }
 0x125   :  { %v388_v59 = vadd.f32 %v1028_v55, %v138_v50  ;;  %v307_v61 = vpop.f32.mrb[1].mxu1  ;;  %v370_v63 = vadd.f32 %v243_v60, %v120_v51  ;;  %v1013_v1 = vpop.f32.mrb[2].mxu0 }
 0x126   :  { %v386_v0 = vadd.f32 %v307_v61, %v136_v52  ;;  %v1029_v2 = vpop.f32.mrb[2].mxu1  ;;  %v411_v3 = vadd.f32 %v1344_v54, %v372_v58  ;;  %v373_v5 = vadd.f32 %v1013_v1, %v123_v56  ;;  %v246_v7 = vpop.f32.mrb[3].mxu0 }
 0x127   :  { %v427_v4 = vadd.f32 %v1344_v54, %v388_v59  ;;  %v389_v6 = vadd.f32 %v1029_v2, %v139_v57  ;;  %v310_v9 = vpop.f32.mrb[3].mxu1  ;;  %v1349_v10 = vadd.f32 %v1344_v54, %v370_v63  ;;  %v371_v12 = vadd.f32 %v246_v7, %v121_v62 }
 0x128   :  { %v1352_v11 = vadd.f32 %v1344_v54, %v386_v0  ;;  %v475_v13 = vmul.f32 0.044715, %v411_v3  ;;  %v387_v17 = vadd.f32 %v310_v9, %v137_v8  ;;  %v1357_v20 = vadd.f32 %v1344_v54, %v373_v5 }
 0x129   :  { %v491_v14 = vmul.f32 0.044715, %v427_v4  ;;  %v473_v15 = vmul.f32 0.044715, %v1349_v10  ;;  %v1360_v21 = vadd.f32 %v1344_v54, %v389_v6  ;;  %v1365_v24 = vadd.f32 %v1344_v54, %v371_v12  ;;  %v124_v6 = vld [vmem:[#allocation2 + $0x20] sm:$0xff] }
 0x12a   :  { %v489_v16 = vmul.f32 0.044715, %v1352_v11  ;;  %v507_v18 = vmul.f32 %v475_v13, %v411_v3  ;;  %v476_v29 = vmul.f32 0.044715, %v1357_v20  ;;  %v1372_v32 = vmul.f32 0.5, %v411_v3 }
 0x12b   :  { %v523_v19 = vmul.f32 %v491_v14, %v427_v4  ;;  %v505_v22 = vmul.f32 %v473_v15, %v1349_v10  ;;  %v1016_v25 = vpop.f32.mrb[4].mxu0  ;;  %v492_v35 = vmul.f32 0.044715, %v1360_v21  ;;  %v1383_v41 = vadd.f32 %v1344_v54, %v387_v17  ;;  %v140_v14 = vld [vmem:[#allocation2 + $0xa0] sm:$0xff]  ;;  %v127_v15 = vld [vmem:[#allocation2 + $0x38] sm:$0xff] }
 0x12c   :  { %v521_v23 = vmul.f32 %v489_v16, %v1352_v11  ;;  %v1032_v26 = vpop.f32.mrb[4].mxu1  ;;  %v539_v27 = vmul.f32 %v507_v18, %v411_v3  ;;  %v1368_v30 = vpop.f32.mrb[5].mxu0  ;;  %v508_v40 = vmul.f32 %v476_v29, %v1357_v20  ;;  %v474_v47 = vmul.f32 0.044715, %v1365_v24 }
 0x12d   :  { %v555_v28 = vmul.f32 %v523_v19, %v427_v4  ;;  %v1370_v31 = vpop.f32.mrb[5].mxu1  ;;  %v537_v33 = vmul.f32 %v505_v22, %v1349_v10  ;;  %v1377_v36 = vpop.f32.mrb[6].mxu0  ;;  %v524_v46 = vmul.f32 %v492_v35, %v1360_v21  ;;  %v1393_v50 = vmul.f32 0.5, %v427_v4 }
 0x12e   :  { %v553_v34 = vmul.f32 %v521_v23, %v1352_v11  ;;  %v1379_v37 = vpop.f32.mrb[6].mxu1  ;;  %v571_v38 = vadd.f32 %v539_v27, %v411_v3  ;;  %v1385_v42 = vpop.f32.mrb[7].mxu0  ;;  %v540_v52 = vmul.f32 %v508_v40, %v1357_v20  ;;  %v506_v58 = vmul.f32 %v474_v47, %v1365_v24  ;;  %v143_v23 = vld [vmem:[#allocation2 + $0xb8] sm:$0xff] }
 0x12f   :  { %v587_v39 = vadd.f32 %v555_v28, %v427_v4  ;;  %v1387_v43 = vpop.f32.mrb[7].mxu1  ;;  %v569_v44 = vadd.f32 %v537_v33, %v1349_v10  ;;  %v556_v57 = vmul.f32 %v524_v46, %v1360_v21  ;;  %v490_v60 = vmul.f32 0.044715, %v1383_v41 }
 0x130   :  { %v585_v45 = vadd.f32 %v553_v34, %v1352_v11  ;;  %v603_v49 = vmul.f32 0.7978846, %v571_v38  ;;  %v572_v59 = vadd.f32 %v540_v52, %v1357_v20  ;;  %v376_v61 = vadd.f32 %v1016_v25, %v126_v48  ;;  %v125_v48 = vld [vmem:[#allocation2 + $0x28] sm:$0xff] }
 0x131   :  { %v619_v51 = vmul.f32 0.7978846, %v587_v39  ;;  %v601_v55 = vmul.f32 0.7978846, %v569_v44  ;;  %v588_v62 = vadd.f32 %v556_v57, %v1360_v21  ;;  %v538_v63 = vmul.f32 %v506_v58, %v1365_v24 }
 0x132   :  { %v617_v56 = vmul.f32 0.7978846, %v585_v45  ;;  %1054 = vtanh.f32 %v603_v49  ;;  %v392_v0 = vadd.f32 %v1032_v26, %v142_v53  ;;  %v604_v3 = vmul.f32 0.7978846, %v572_v59 }
 0x133   :  { %1056 = vtanh.f32 %v619_v51  ;;  %v1402_v1 = vpop.f32.mrb[8].mxu0  ;;  %v522_v4 = vmul.f32 %v490_v60, %v1383_v41  ;;  %v1408_v5 = vadd.f32 %v1344_v54, %v376_v61  ;;  %v620_v9 = vmul.f32 0.7978846, %v588_v62 }
 0x134   :  { %v1404_v2 = vpop.f32.mrb[8].mxu1  ;;  %1058 = vtanh.f32 %v601_v55  ;;  %v1410_v7 = vpop.f32.mrb[9].mxu0  ;;  %v570_v12 = vadd.f32 %v538_v63, %v1365_v24  ;;  %v1416_v13 = vadd.f32 %v1344_v54, %v392_v0  ;;  %v1423_v18 = vmul.f32 0.5, %v1349_v10 }
 0x135   :  { %v1412_v8 = vpop.f32.mrb[9].mxu1  ;;  %1060 = vtanh.f32 %v617_v56  ;;  %v1418_v16 = vpop.f32.mrb[10].mxu0  ;;  %v554_v19 = vmul.f32 %v522_v4, %v1383_v41  ;;  %v479_v22 = vmul.f32 0.044715, %v1408_v5  ;;  %v457_v27 = vmul.f32 0.5, %v1352_v11 }
 0x136   :  { %v1420_v17 = vpop.f32.mrb[10].mxu1  ;;  %1062 = vtanh.f32 %v604_v3  ;;  %v1427_v25 = vpop.f32.mrb[11].mxu0  ;;  %v602_v28 = vmul.f32 0.7978846, %v570_v12  ;;  %v495_v29 = vmul.f32 0.044715, %v1416_v13  ;;  %v374_v34 = vadd.f32 %v1368_v30, %v124_v6 }
 0x137   :  { %v1429_v26 = vpop.f32.mrb[11].mxu1  ;;  %1064 = vtanh.f32 %v620_v9  ;;  %v586_v10 = vadd.f32 %v554_v19, %v1383_v41  ;;  %v511_v33 = vmul.f32 %v479_v22, %v1408_v5  ;;  %v390_v35 = vadd.f32 %v1370_v31, %v140_v14 }
 0x138   :  { %1066 = vtanh.f32 %v602_v28  ;;  %v527_v38 = vmul.f32 %v495_v29, %v1416_v13  ;;  %v377_v39 = vadd.f32 %v1377_v36, %v127_v15  ;;  %v393_v11 = vadd.f32 %v1379_v37, %v143_v23 }
 0x139   :  { %v618_v40 = vmul.f32 0.7978846, %v586_v10  ;;  %v543_v44 = vmul.f32 %v511_v33, %v1408_v5  ;;  %v1442_v45 = vadd.f32 %v1344_v54, %v374_v34  ;;  %v1445_v46 = vadd.f32 %v1344_v54, %v390_v35 }
 0x13a   :  { %v444_v30 = vmul.f32 0.5, %v1357_v20  ;;  %v460_v31 = vmul.f32 0.5, %v1360_v21  ;;  %v1450_v47 = vmul.f32 0.5, %v1365_v24  ;;  %v559_v36 = vmul.f32 %v527_v38, %v1416_v13 }
 0x13b   :  { %v1453_v37 = vpop.f32.mrb[12].mxu0  ;;  %1068 = vtanh.f32 %v618_v40  ;;  %v575_v52 = vadd.f32 %v543_v44, %v1408_v5  ;;  %v477_v53 = vmul.f32 0.044715, %v1442_v45  ;;  %v1460_v20 = vadd.f32 %v1344_v54, %v377_v39 }
 0x13c   :  { %v1455_v49 = vpop.f32.mrb[12].mxu1  ;;  %v1055_v51 = vpop.eup %1054  ;;  %v591_v57 = vadd.f32 %v559_v36, %v1416_v13  ;;  %v493_v58 = vmul.f32 0.044715, %v1445_v46  ;;  %v1469_v59 = vadd.f32 %v1344_v54, %v393_v11  ;;  %v375_v4 = vadd.f32 %v1385_v42, %v125_v48 }
 0x13d   :  { %v1462_v21 = vpop.f32.mrb[13].mxu0  ;;  %v1464_v24 = vpop.f32.mrb[13].mxu1  ;;  %v667_v56 = vadd.f32 1.0, %v1055_v51  ;;  %v607_v0 = vmul.f32 0.7978846, %v575_v52  ;;  %v509_v3 = vmul.f32 %v477_v53, %v1442_v45 }
 0x13e   :  { %v1057_v55 = vpop.eup %1056  ;;  %v1471_v60 = vpop.f32.mrb[14].mxu0  ;;  %v623_v19 = vmul.f32 0.7978846, %v591_v57  ;;  %v525_v22 = vmul.f32 %v493_v58, %v1445_v46  ;;  %v480_v48 = vmul.f32 0.044715, %v1460_v20  ;;  %v130_v58 = vld [vmem:[#allocation2 + $0x50] sm:$0xff] }
 0x13f   :  { %v1473_v61 = vpop.f32.mrb[14].mxu1  ;;  %v1059_v62 = vpop.eup %1058  ;;  %v683_v63 = vadd.f32 1.0, %v1057_v55  ;;  %v699_v14 = vmul.f32 %v667_v56, %v1372_v32  ;;  %1070 = vtanh.f32 %v607_v0  ;;  %v541_v10 = vmul.f32 %v509_v3, %v1442_v45 }
 0x140   :  { %v1477_v6 = vpop.f32.mrb[15].mxu0  ;;  %v1479_v9 = vpop.f32.mrb[15].mxu1  ;;  %v665_v15 = vadd.f32 1.0, %v1059_v62  ;;  %1072 = vtanh.f32 %v623_v19  ;;  %v557_v36 = vmul.f32 %v525_v22, %v1445_v46  ;;  %v458_v55 = vmul.f32 0.5, %v1383_v41 }
 0x141   :  { %v1061_v12 = vpop.eup %1060  ;;  %v715_v28 = vmul.f32 %v683_v63, %v1393_v50  ;;  %v961_v42 = vpack.c.bf16 %v699_v14, %v699_v14  ;;  %v573_v11 = vadd.f32 %v541_v10, %v1442_v45  ;;  %v512_v57 = vmul.f32 %v480_v48, %v1460_v20 }
 0x142   :  { %v1063_v23 = vpop.eup %1062  ;;  %v681_v29 = vadd.f32 1.0, %v1061_v12  ;;  %v697_v34 = vmul.f32 %v665_v15, %v1423_v18  ;;  %v589_v56 = vadd.f32 %v557_v36, %v1445_v46  ;;  %v1501_v14 = vadd.f32 %v1344_v54, %v375_v4 }
 0x143   :  { %v1065_v33 = vpop.eup %1064  ;;  %v668_v35 = vadd.f32 1.0, %v1063_v23  ;;  %v977_v38 = vpack.c.bf16 %v715_v28, %v715_v28  ;;  %860 = vst.msk [vmem:[#allocation10 + $0x8] sm:$0xf] %vm857_vm1, %v961_v42  ;;  %v605_v53 = vmul.f32 0.7978846, %v573_v11  ;;  %v544_v41 = vmul.f32 %v512_v57, %v1460_v20  ;;  %v146_v23 = vld [vmem:[#allocation2 + $0xd0] sm:$0xff] }
 0x144   :  { %v713_v39 = vmul.f32 %v681_v29, %v457_v27  ;;  %v684_v32 = vadd.f32 1.0, %v1065_v33  ;;  %v1067_v40 = vpop.eup %1066  ;;  %v959_v44 = vpack.c.bf16 %v697_v34, %v697_v34  ;;  %v621_v12 = vmul.f32 0.7978846, %v589_v56  ;;  %v144_v57 = vld [vmem:[#allocation2 + $0xc0] sm:$0xff] }
 0x145   :  { %v700_v50 = vmul.f32 %v668_v35, %v444_v30  ;;  %876 = vst.msk [vmem:[#allocation10 + $0x48] sm:$0xf] %vm857_vm1, %v977_v38  ;;  %v666_v52 = vadd.f32 1.0, %v1067_v40  ;;  %v141_v30 = vld [vmem:[#allocation2 + $0xa8] sm:$0xff]  ;;  %v1069_v62 = vpop.eup %1068  ;;  %1074 = vtanh.f32 %v605_v53  ;;  %v447_v29 = vmul.f32 0.5, %v1408_v5 }
 0x146   :  { %v975_v51 = vpack.c.bf16 %v713_v39, %v713_v39  ;;  %v716_v18 = vmul.f32 %v684_v32, %v460_v31  ;;  %858 = vst.msk [vmem:[#allocation10] sm:$0xf] %vm857_vm1, %v959_v44  ;;  %v496_v31 = vmul.f32 0.044715, %v1469_v59  ;;  %v682_v3 = vadd.f32 1.0, %v1069_v62 }
 0x147   :  { %v962_v27 = vpack.c.bf16 %v700_v50, %v700_v50  ;;  %v698_v0 = vmul.f32 %v666_v52, %v1450_v47  ;;  %v391_v22 = vadd.f32 %v1387_v43, %v141_v30  ;;  %v380_v47 = vadd.f32 %v1402_v1, %v130_v58  ;;  %v128_v50 = vld [vmem:[#allocation2 + $0x40] sm:$0xff] }
 0x148   :  { %874 = vst.msk [vmem:[#allocation10 + $0x40] sm:$0xf] %vm857_vm1, %v975_v51  ;;  %v978_v63 = vpack.c.bf16 %v716_v18, %v716_v18  ;;  %v528_v19 = vmul.f32 %v496_v31, %v1469_v59  ;;  %v714_v28 = vmul.f32 %v682_v3, %v458_v55  ;;  %1076 = vtanh.f32 %v621_v12 }
 0x149   :  { %861 = vst.msk [vmem:[#allocation10 + $0xc] sm:$0xf] %vm857_vm1, %v962_v27  ;;  %v960_v15 = vpack.c.bf16 %v698_v0, %v698_v0  ;;  %v576_v10 = vadd.f32 %v544_v41, %v1460_v20  ;;  %v1071_v33 = vpop.eup %1070  ;;  %v478_v42 = vmul.f32 0.044715, %v1501_v14  ;;  %v1513_v34 = vadd.f32 %v1344_v54, %v391_v22 }
 0x14a   :  { %877 = vst.msk [vmem:[#allocation10 + $0x4c] sm:$0xf] %vm857_vm1, %v978_v63  ;;  %v560_v4 = vmul.f32 %v528_v19, %v1469_v59  ;;  %v1516_v43 = vadd.f32 %v1344_v54, %v380_v47  ;;  %v1073_v1 = vpop.eup %1072  ;;  %v976_v35 = vpack.c.bf16 %v714_v28, %v714_v28  ;;  %v671_v38 = vadd.f32 1.0, %v1071_v33  ;;  %v131_v63 = vld [vmem:[#allocation2 + $0x58] sm:$0xff] }
 0x14b   :  { %859 = vst.msk [vmem:[#allocation10 + $0x4] sm:$0xf] %vm857_vm1, %v960_v15  ;;  %v608_v5 = vmul.f32 0.7978846, %v576_v10  ;;  %v396_v39 = vadd.f32 %v1404_v2, %v146_v23  ;;  %v463_v32 = vmul.f32 0.5, %v1416_v13  ;;  %v687_v11 = vadd.f32 1.0, %v1073_v1 }
 0x14c   :  { %v592_v40 = vadd.f32 %v560_v4, %v1469_v59  ;;  %v510_v44 = vmul.f32 %v478_v42, %v1501_v14  ;;  %875 = vst.msk [vmem:[#allocation10 + $0x44] sm:$0xf] %vm857_vm1, %v976_v35  ;;  %v703_v36 = vmul.f32 %v671_v38, %v447_v29  ;;  %v445_v48 = vmul.f32 0.5, %v1442_v45  ;;  %v147_v4 = vld [vmem:[#allocation2 + $0xd8] sm:$0xff] }
 0x14d   :  { %1078 = vtanh.f32 %v608_v5  ;;  %v494_v51 = vmul.f32 0.044715, %v1513_v34  ;;  %v719_v18 = vmul.f32 %v687_v11, %v463_v32  ;;  %v483_v13 = vmul.f32 0.044715, %v1516_v43 }
 0x14e   :  { %v624_v52 = vmul.f32 0.7978846, %v592_v40  ;;  %v542_v2 = vmul.f32 %v510_v44, %v1501_v14  ;;  %v965_v53 = vpack.c.bf16 %v703_v36, %v703_v36  ;;  %v1529_v55 = vadd.f32 %v1344_v54, %v396_v39  ;;  %v129_v44 = vld [vmem:[#allocation2 + $0x48] sm:$0xff] }
 0x14f   :  { %v526_v27 = vmul.f32 %v494_v51, %v1513_v34  ;;  %v378_v56 = vadd.f32 %v1410_v7, %v128_v50  ;;  %v1075_v30 = vpop.eup %1074  ;;  %v981_v45 = vpack.c.bf16 %v719_v18, %v719_v18  ;;  %v515_v62 = vmul.f32 %v483_v13, %v1516_v43 }
 0x150   :  { %1080 = vtanh.f32 %v624_v52  ;;  %v574_v58 = vadd.f32 %v542_v2, %v1501_v14  ;;  %864 = vst.msk [vmem:[#allocation10 + $0x18] sm:$0xf] %vm857_vm1, %v965_v53  ;;  %v669_v0 = vadd.f32 1.0, %v1075_v30  ;;  %v461_v31 = vmul.f32 0.5, %v1445_v46  ;;  %v145_v30 = vld [vmem:[#allocation2 + $0xc8] sm:$0xff] }
 0x151   :  { %v558_v3 = vmul.f32 %v526_v27, %v1513_v34  ;;  %v499_v12 = vmul.f32 0.044715, %v1529_v55  ;;  %880 = vst.msk [vmem:[#allocation10 + $0x58] sm:$0xf] %vm857_vm1, %v981_v45  ;;  %v547_v41 = vmul.f32 %v515_v62, %v1516_v43  ;;  %v1541_v15 = vadd.f32 %v1344_v54, %v378_v56  ;;  %v134_v45 = vld [vmem:[#allocation2 + $0x70] sm:$0xff] }
 0x152   :  { %v606_v7 = vmul.f32 0.7978846, %v574_v58  ;;  %v394_v19 = vadd.f32 %v1412_v8, %v144_v57  ;;  %v1077_v22 = vpop.eup %1076  ;;  %v701_v47 = vmul.f32 %v669_v0, %v445_v48  ;;  %v381_v28 = vadd.f32 %v1418_v16, %v131_v63 }
 0x153   :  { %v590_v23 = vadd.f32 %v558_v3, %v1513_v34  ;;  %v531_v46 = vmul.f32 %v499_v12, %v1529_v55  ;;  %v685_v29 = vadd.f32 1.0, %v1077_v22  ;;  %v448_v10 = vmul.f32 0.5, %v1460_v20 }
 0x154   :  { %1082 = vtanh.f32 %v606_v7  ;;  %v579_v33 = vadd.f32 %v547_v41, %v1516_v43  ;;  %v963_v42 = vpack.c.bf16 %v701_v47, %v701_v47  ;;  %v481_v8 = vmul.f32 0.044715, %v1541_v15 }
 0x155   :  { %v622_v1 = vmul.f32 0.7978846, %v590_v23  ;;  %v563_v35 = vmul.f32 %v531_v46, %v1529_v55  ;;  %v717_v38 = vmul.f32 %v685_v29, %v461_v31  ;;  %v1552_v39 = vadd.f32 %v1344_v54, %v394_v19 }
 0x156   :  { %v611_v5 = vmul.f32 0.7978846, %v579_v33  ;;  %v1555_v16 = vadd.f32 %v1344_v54, %v381_v28  ;;  %862 = vst.msk [vmem:[#allocation10 + $0x10] sm:$0xf] %vm857_vm1, %v963_v42  ;;  %v513_v11 = vmul.f32 %v481_v8, %v1541_v15  ;;  %v397_v40 = vadd.f32 %v1420_v17, %v147_v4 }
 0x157   :  { %v1079_v32 = vpop.eup %1078  ;;  %1084 = vtanh.f32 %v622_v1  ;;  %v595_v20 = vadd.f32 %v563_v35, %v1529_v55  ;;  %v979_v50 = vpack.c.bf16 %v717_v38, %v717_v38  ;;  %v464_v48 = vmul.f32 0.5, %v1469_v59 }
 0x158   :  { %v672_v36 = vadd.f32 1.0, %v1079_v32  ;;  %1086 = vtanh.f32 %v611_v5  ;;  %v446_v51 = vmul.f32 0.5, %v1501_v14  ;;  %v545_v52 = vmul.f32 %v513_v11, %v1541_v15 }
 0x159   :  { %v627_v18 = vmul.f32 0.7978846, %v595_v20  ;;  %v497_v2 = vmul.f32 0.044715, %v1552_v39  ;;  %878 = vst.msk [vmem:[#allocation10 + $0x50] sm:$0xf] %vm857_vm1, %v979_v50  ;;  %v1568_v17 = vadd.f32 %v1344_v54, %v397_v40  ;;  %v379_v56 = vadd.f32 %v1427_v25, %v129_v44 }
 0x15a   :  { %v1081_v13 = vpop.eup %1080  ;;  %v704_v53 = vmul.f32 %v672_v36, %v448_v10  ;;  %v484_v27 = vmul.f32 0.044715, %v1555_v16  ;;  %v577_v14 = vadd.f32 %v545_v52, %v1541_v15  ;;  %v462_v62 = vmul.f32 0.5, %v1513_v34  ;;  %v150_v36 = vld [vmem:[#allocation2 + $0xf0] sm:$0xff] }
 0x15b   :  { %v688_v59 = vadd.f32 1.0, %v1081_v13  ;;  %1088 = vtanh.f32 %v627_v18  ;;  %v529_v57 = vmul.f32 %v497_v2, %v1552_v39  ;;  %v500_v0 = vmul.f32 0.044715, %v1568_v17 }
 0x15c   :  { %v966_v58 = vpack.c.bf16 %v704_v53, %v704_v53  ;;  %v516_v63 = vmul.f32 %v484_v27, %v1555_v16  ;;  %v609_v3 = vmul.f32 0.7978846, %v577_v14  ;;  %v1578_v25 = vadd.f32 %v1344_v54, %v379_v56  ;;  %v148_v53 = vld [vmem:[#allocation2 + $0xe0] sm:$0xff] }
 0x15d   :  { %v720_v31 = vmul.f32 %v688_v59, %v464_v48  ;;  %v561_v12 = vmul.f32 %v529_v57, %v1552_v39  ;;  %v532_v19 = vmul.f32 %v500_v0, %v1568_v17  ;;  %v395_v34 = vadd.f32 %v1429_v26, %v145_v30  ;;  %v132_v48 = vld [vmem:[#allocation2 + $0x60] sm:$0xff]  ;;  %v135_v59 = vld [vmem:[#allocation2 + $0x78] sm:$0xff] }
 0x15e   :  { %v1083_v7 = vpop.eup %1082  ;;  %865 = vst.msk [vmem:[#allocation10 + $0x1c] sm:$0xf] %vm857_vm1, %v966_v58  ;;  %v548_v41 = vmul.f32 %v516_v63, %v1555_v16  ;;  %v384_v22 = vadd.f32 %v1453_v37, %v134_v45  ;;  %1090 = vtanh.f32 %v609_v3  ;;  %v451_v28 = vmul.f32 0.5, %v1516_v43 }
 0x15f   :  { %v982_v47 = vpack.c.bf16 %v720_v31, %v720_v31  ;;  %v670_v23 = vadd.f32 1.0, %v1083_v7  ;;  %v593_v46 = vadd.f32 %v561_v12, %v1552_v39  ;;  %v564_v10 = vmul.f32 %v532_v19, %v1568_v17 }
 0x160   :  { %v580_v29 = vadd.f32 %v548_v41, %v1555_v16  ;;  %v482_v33 = vmul.f32 0.044715, %v1578_v25  ;;  %v1592_v37 = vadd.f32 %v1344_v54, %v395_v34  ;;  %v1595_v1 = vadd.f32 %v1344_v54, %v384_v22 }
 0x161   :  { %v1085_v4 = vpop.eup %1084  ;;  %881 = vst.msk [vmem:[#allocation10 + $0x5c] sm:$0xf] %vm857_vm1, %v982_v47  ;;  %v702_v42 = vmul.f32 %v670_v23, %v446_v51  ;;  %v625_v26 = vmul.f32 0.7978846, %v593_v46  ;;  %v596_v38 = vadd.f32 %v564_v10, %v1568_v17  ;;  %v467_v11 = vmul.f32 0.5, %v1529_v55 }
 0x162   :  { %v1087_v35 = vpop.eup %1086  ;;  %v686_v8 = vadd.f32 1.0, %v1085_v4  ;;  %v612_v43 = vmul.f32 0.7978846, %v580_v29  ;;  %v514_v5 = vmul.f32 %v482_v33, %v1578_v25  ;;  %v449_v52 = vmul.f32 0.5, %v1541_v15 }
 0x163   :  { %v964_v32 = vpack.c.bf16 %v702_v42, %v702_v42  ;;  %v675_v20 = vadd.f32 1.0, %v1087_v35  ;;  %1092 = vtanh.f32 %v625_v26  ;;  %v628_v44 = vmul.f32 0.7978846, %v596_v38 }
 0x164   :  { %v718_v40 = vmul.f32 %v686_v8, %v462_v62  ;;  %1094 = vtanh.f32 %v612_v43  ;;  %v546_v50 = vmul.f32 %v514_v5, %v1578_v25  ;;  %v498_v2 = vmul.f32 0.044715, %v1592_v37  ;;  %v151_v5 = vld [vmem:[#allocation2 + $0xf8] sm:$0xff] }
 0x165   :  { %v1089_v51 = vpop.eup %1088  ;;  %863 = vst.msk [vmem:[#allocation10 + $0x14] sm:$0xf] %vm857_vm1, %v964_v32  ;;  %v707_v18 = vmul.f32 %v675_v20, %v451_v28  ;;  %v487_v13 = vmul.f32 0.044715, %v1595_v1  ;;  %1096 = vtanh.f32 %v628_v44  ;;  %v400_v45 = vadd.f32 %v1455_v49, %v150_v36 }
 0x166   :  { %v980_v55 = vpack.c.bf16 %v718_v40, %v718_v40  ;;  %v691_v27 = vadd.f32 1.0, %v1089_v51  ;;  %v578_v56 = vadd.f32 %v546_v50, %v1578_v25  ;;  %v530_v57 = vmul.f32 %v498_v2, %v1592_v37 }
 0x167   :  { %v969_v14 = vpack.c.bf16 %v707_v18, %v707_v18  ;;  %v519_v30 = vmul.f32 %v487_v13, %v1595_v1  ;;  %v382_v62 = vadd.f32 %v1462_v21, %v132_v48  ;;  %v398_v63 = vadd.f32 %v1464_v24, %v148_v53  ;;  %v133_v48 = vld [vmem:[#allocation2 + $0x68] sm:$0xff] }
 0x168   :  { %879 = vst.msk [vmem:[#allocation10 + $0x54] sm:$0xf] %vm857_vm1, %v980_v55  ;;  %v723_v15 = vmul.f32 %v691_v27, %v467_v11  ;;  %v610_v58 = vmul.f32 0.7978846, %v578_v56  ;;  %v1091_v0 = vpop.eup %1090  ;;  %v562_v31 = vmul.f32 %v530_v57, %v1592_v37  ;;  %v1616_v12 = vadd.f32 %v1344_v54, %v400_v45 }
 0x169   :  { %868 = vst.msk [vmem:[#allocation10 + $0x28] sm:$0xf] %vm857_vm1, %v969_v14  ;;  %v551_v3 = vmul.f32 %v519_v30, %v1595_v1  ;;  %v385_v49 = vadd.f32 %v1471_v60, %v135_v59  ;;  %v673_v41 = vadd.f32 1.0, %v1091_v0  ;;  %v1620_v19 = vadd.f32 %v1344_v54, %v382_v62  ;;  %v149_v30 = vld [vmem:[#allocation2 + $0xe8] sm:$0xff] }
 0x16a   :  { %v985_v7 = vpack.c.bf16 %v723_v15, %v723_v15  ;;  %1098 = vtanh.f32 %v610_v58  ;;  %v465_v21 = vmul.f32 0.5, %v1552_v39  ;;  %v594_v24 = vadd.f32 %v562_v31, %v1592_v37 }
 0x16b   :  { %v583_v34 = vadd.f32 %v551_v3, %v1595_v1  ;;  %v503_v22 = vmul.f32 0.044715, %v1616_v12  ;;  %v705_v47 = vmul.f32 %v673_v41, %v449_v52  ;;  %v452_v23 = vmul.f32 0.5, %v1555_v16 }
 0x16c   :  { %884 = vst.msk [vmem:[#allocation10 + $0x68] sm:$0xf] %vm857_vm1, %v985_v7  ;;  %v485_v60 = vmul.f32 0.044715, %v1620_v19  ;;  %v1630_v46 = vadd.f32 %v1344_v54, %v398_v63  ;;  %v468_v29 = vmul.f32 0.5, %v1568_v17  ;;  %v1636_v8 = vadd.f32 %v1344_v54, %v385_v49 }
 0x16d   :  { %v1093_v28 = vpop.eup %1092  ;;  %v626_v39 = vmul.f32 0.7978846, %v594_v24  ;;  %v615_v10 = vmul.f32 0.7978846, %v583_v34  ;;  %v535_v33 = vmul.f32 %v503_v22, %v1616_v12  ;;  %v967_v42 = vpack.c.bf16 %v705_v47, %v705_v47 }
 0x16e   :  { %v1095_v4 = vpop.eup %1094  ;;  %v689_v26 = vadd.f32 1.0, %v1093_v28  ;;  %v517_v35 = vmul.f32 %v485_v60, %v1620_v19  ;;  %v501_v38 = vmul.f32 0.044715, %v1630_v46  ;;  %v450_v20 = vmul.f32 0.5, %v1578_v25 }
 0x16f   :  { %v676_v16 = vadd.f32 1.0, %v1095_v4  ;;  %1100 = vtanh.f32 %v626_v39  ;;  %v567_v43 = vmul.f32 %v535_v33, %v1616_v12  ;;  %v1097_v17 = vpop.eup %1096  ;;  %866 = vst.msk [vmem:[#allocation10 + $0x20] sm:$0xf] %vm857_vm1, %v967_v42  ;;  %v488_v52 = vmul.f32 0.044715, %v1636_v8 }
 0x170   :  { %v721_v32 = vmul.f32 %v689_v26, %v465_v21  ;;  %1102 = vtanh.f32 %v615_v10  ;;  %v549_v11 = vmul.f32 %v517_v35, %v1620_v19  ;;  %v692_v44 = vadd.f32 1.0, %v1097_v17 }
 0x171   :  { %v708_v40 = vmul.f32 %v676_v16, %v452_v23  ;;  %v599_v50 = vadd.f32 %v567_v43, %v1616_v12  ;;  %v533_v36 = vmul.f32 %v501_v38, %v1630_v46  ;;  %v401_v2 = vadd.f32 %v1473_v61, %v151_v5 }
 0x172   :  { %v983_v51 = vpack.c.bf16 %v721_v32, %v721_v32  ;;  %v581_v18 = vadd.f32 %v549_v11, %v1620_v19  ;;  %v724_v53 = vmul.f32 %v692_v44, %v468_v29  ;;  %v520_v59 = vmul.f32 %v488_v52, %v1636_v8 }
 0x173   :  { %v970_v13 = vpack.c.bf16 %v708_v40, %v708_v40  ;;  %v631_v25 = vmul.f32 0.7978846, %v599_v50  ;;  %v565_v55 = vmul.f32 %v533_v36, %v1630_v46  ;;  %v1652_v14 = vadd.f32 %v1344_v54, %v401_v2 }
 0x174   :  { %v1099_v27 = vpop.eup %1098  ;;  %882 = vst.msk [vmem:[#allocation10 + $0x60] sm:$0xf] %vm857_vm1, %v983_v51  ;;  %v613_v56 = vmul.f32 0.7978846, %v581_v18  ;;  %v383_v57 = vadd.f32 %v1477_v6, %v133_v48  ;;  %v986_v61 = vpack.c.bf16 %v724_v53, %v724_v53  ;;  %v552_v58 = vmul.f32 %v520_v59, %v1636_v8 }
 0x175   :  { %869 = vst.msk [vmem:[#allocation10 + $0x2c] sm:$0xf] %vm857_vm1, %v970_v13  ;;  %v674_v45 = vadd.f32 1.0, %v1099_v27  ;;  %1104 = vtanh.f32 %v631_v25  ;;  %v597_v15 = vadd.f32 %v565_v55, %v1630_v46  ;;  %v504_v62 = vmul.f32 0.044715, %v1652_v14 }
 0x176   :  { %1106 = vtanh.f32 %v613_v56  ;;  %885 = vst.msk [vmem:[#allocation10 + $0x6c] sm:$0xf] %vm857_vm1, %v986_v61  ;;  %v1661_v31 = vadd.f32 %v1344_v54, %v383_v57  ;;  %v399_v6 = vadd.f32 %v1479_v9, %v149_v30  ;;  %v584_v3 = vadd.f32 %v552_v58, %v1636_v8 }
 0x177   :  { %v706_v63 = vmul.f32 %v674_v45, %v450_v20  ;;  %v629_v0 = vmul.f32 0.7978846, %v597_v15  ;;  %v536_v49 = vmul.f32 %v504_v62, %v1652_v14  ;;  %v466_v21 = vmul.f32 0.5, %v1592_v37 }
 0x178   :  { %v486_v24 = vmul.f32 0.044715, %v1661_v31  ;;  %v616_v47 = vmul.f32 0.7978846, %v584_v3  ;;  %v438_v60 = vadd.f32 %v1344_v54, %v399_v6  ;;  %v455_v9 = vmul.f32 0.5, %v1595_v1 }
 0x179   :  { %v1101_v7 = vpop.eup %1100  ;;  %v968_v41 = vpack.c.bf16 %v706_v63, %v706_v63  ;;  %1108 = vtanh.f32 %v629_v0  ;;  %v568_v23 = vmul.f32 %v536_v49, %v1652_v14  ;;  %v471_v1 = vmul.f32 0.5, %v1616_v12 }
 0x17a   :  { %v1103_v34 = vpop.eup %1102  ;;  %v690_v22 = vadd.f32 1.0, %v1101_v7  ;;  %v518_v29 = vmul.f32 %v486_v24, %v1661_v31  ;;  %1110 = vtanh.f32 %v616_v47  ;;  %v502_v4 = vmul.f32 0.044715, %v438_v60 }
 0x17b   :  { %867 = vst.msk [vmem:[#allocation10 + $0x24] sm:$0xf] %vm857_vm1, %v968_v41  ;;  %v679_v28 = vadd.f32 1.0, %v1103_v34  ;;  %v600_v37 = vadd.f32 %v568_v23, %v1652_v14  ;;  %v453_v17 = vmul.f32 0.5, %v1620_v19  ;;  %v469_v51 = vmul.f32 0.5, %v1630_v46 }
 0x17c   :  { %v722_v39 = vmul.f32 %v690_v22, %v466_v21  ;;  %v550_v33 = vmul.f32 %v518_v29, %v1661_v31  ;;  %v534_v43 = vmul.f32 %v502_v4, %v438_v60  ;;  %v456_v19 = vmul.f32 0.5, %v1636_v8 }
 0x17d   :  { %v711_v10 = vmul.f32 %v679_v28, %v455_v9  ;;  %v632_v26 = vmul.f32 0.7978846, %v600_v37  ;;  %v472_v46 = vmul.f32 0.5, %v1652_v14  ;;  %v454_v61 = vmul.f32 0.5, %v1661_v31 }
 0x17e   :  { %v984_v42 = vpack.c.bf16 %v722_v39, %v722_v39  ;;  %v582_v54 = vadd.f32 %v550_v33, %v1661_v31  ;;  %v566_v11 = vmul.f32 %v534_v43, %v438_v60  ;;  %v470_v63 = vmul.f32 0.5, %v438_v60 }
 0x17f   :  { %v1105_v35 = vpop.eup %1104  ;;  %v973_v16 = vpack.c.bf16 %v711_v10, %v711_v10  ;;  %1112 = vtanh.f32 %v632_v26 }
 0x180   :  { %v1107_v38 = vpop.eup %1106  ;;  %883 = vst.msk [vmem:[#allocation10 + $0x64] sm:$0xf] %vm857_vm1, %v984_v42  ;;  %v695_v5 = vadd.f32 1.0, %v1105_v35  ;;  %v614_v20 = vmul.f32 0.7978846, %v582_v54  ;;  %v598_v36 = vadd.f32 %v566_v11, %v438_v60 }
 0x181   :  { %872 = vst.msk [vmem:[#allocation10 + $0x38] sm:$0xf] %vm857_vm1, %v973_v16  ;;  %v677_v32 = vadd.f32 1.0, %v1107_v38 }
 0x182   :  { %v727_v40 = vmul.f32 %v695_v5, %v471_v1  ;;  %1114 = vtanh.f32 %v614_v20  ;;  %v630_v12 = vmul.f32 0.7978846, %v598_v36 }
 0x183   :  { %v1109_v44 = vpop.eup %1108  ;;  %v709_v50 = vmul.f32 %v677_v32, %v453_v17 }
 0x184   :  { %v989_v48 = vpack.c.bf16 %v727_v40, %v727_v40  ;;  %v693_v18 = vadd.f32 1.0, %v1109_v44  ;;  %v1111_v2 = vpop.eup %1110  ;;  %1116 = vtanh.f32 %v630_v12 }
 0x185   :  { %v971_v52 = vpack.c.bf16 %v709_v50, %v709_v50  ;;  %v680_v53 = vadd.f32 1.0, %v1111_v2 }
 0x186   :  { %888 = vst.msk [vmem:[#allocation10 + $0x78] sm:$0xf] %vm857_vm1, %v989_v48  ;;  %v725_v13 = vmul.f32 %v693_v18, %v469_v51 }
 0x187   :  { %870 = vst.msk [vmem:[#allocation10 + $0x30] sm:$0xf] %vm857_vm1, %v971_v52  ;;  %v712_v55 = vmul.f32 %v680_v53, %v456_v19 }
 0x188   :  { %v987_v25 = vpack.c.bf16 %v725_v13, %v725_v13 }
 0x189   :  { %v1113_v27 = vpop.eup %1112  ;;  %v974_v56 = vpack.c.bf16 %v712_v55, %v712_v55 }
 0x18a   :  { %886 = vst.msk [vmem:[#allocation10 + $0x70] sm:$0xf] %vm857_vm1, %v987_v25  ;;  %v696_v59 = vadd.f32 1.0, %v1113_v27 }
 0x18b   :  { %873 = vst.msk [vmem:[#allocation10 + $0x3c] sm:$0xf] %vm857_vm1, %v974_v56 }
 0x18c   :  { %v1115_v57 = vpop.eup %1114  ;;  %v728_v30 = vmul.f32 %v696_v59, %v472_v46 }
 0x18d   :  { %v678_v45 = vadd.f32 1.0, %v1115_v57 }
 0x18e   :  { %v990_v15 = vpack.c.bf16 %v728_v30, %v728_v30  ;;  %v1117_v58 = vpop.eup %1116 }
 0x18f   :  { %v710_v8 = vmul.f32 %v678_v45, %v454_v61  ;;  %v694_v0 = vadd.f32 1.0, %v1117_v58 }
 0x190   :  { %889 = vst.msk [vmem:[#allocation10 + $0x7c] sm:$0xf] %vm857_vm1, %v990_v15 }
 0x191   :  { %v972_v62 = vpack.c.bf16 %v710_v8, %v710_v8  ;;  %v726_v14 = vmul.f32 %v694_v0, %v470_v63 }
 0x193   :  { %871 = vst.msk [vmem:[#allocation10 + $0x34] sm:$0xf] %vm857_vm1, %v972_v62  ;;  %v988_v6 = vpack.c.bf16 %v726_v14, %v726_v14 }
 0x195   :  { %887 = vst.msk [vmem:[#allocation10 + $0x74] sm:$0xf] %vm857_vm1, %v988_v6 }
 0x196   :  { %1217 = shalt.err (!%p1214_p8)
}
 0x197   :  { %s1218_s16 = scalar_lea.hbm %s1710_s4, 2048 }
 0x198   :  { %p1219_p9 = scmp.ne.s32.totalorder %s1710_s4, %s1218_s16  ;;  %p1222_p10 = scmp.lt.u32.totalorder %s1218_s16, %s1710_s4 }
 0x19a   :  { %p1224_p11 = pnand %p1222_p10, %p1219_p9 }
 0x19c   :  { %1227 = shalt.err (!%p1224_p11)
}
 0x19d   :  { %901 = dma.vmem_to_hbm [thread:$0]  %s896_s1, 2048, %s1710_s4, [#allocation4], %s1241_s0, %s1241_s0, %s1242_s18  }
 0x19e   :  { %1234 = dma.done.wait [#allocation4], 2048  }
 0x19f   :  { %1235 = vsyncadd [#allocation4], 4294965248 }
 0x1a0   :  { %905 = vsyncpa [#allocation3], 1 }
 0x1a1   :  { %906 = vsyncpa [#allocation6], 1 }
 0x1a2   :  { %907 = vsyncpa [#allocation9], 1 }
 0x1a3   :  { %908 = vsyncpa [#allocation4], 1 }

// kernel: _lambda_.10
= control target key start
LH: loop header
LB: loop body
LE: loop exit
PB: predicated region body
PF: predicated region fallthrough
CT: control target
= control target key end

     0   :  { %8 = vsyncpa [#allocation3], 0  ;;  %s924_s0 = inlined_call_operand.hbm [shape: f32[256,32], index: 0, kind: input, shape index: {}]   ;;  %s925_s1 = inlined_call_operand.hbm [shape: bf16[32,32], index: 1, kind: input, shape index: {}]   ;;  %s926_s2 = inlined_call_operand.hbm [shape: f32[1,32], index: 2, kind: input, shape index: {}]   ;;  %s927_s3 = inlined_call_operand.hbm [shape: bf16[256,32], index: 3, kind: output, shape index: {}]  }
   0x1   :  { %9 = vsyncpa [#allocation6], 0 }
   0x2   :  { %10 = vsyncpa [#allocation4], 0  ;;  %s760_s12 = smov [#allocation5]   ;;  %s666_s16 = scalar_lea.hbm %s925_s1, 256 }
   0x3   :  { %s28_s13 = sshll.u32 %s760_s12, 4  ;;  %p667_p0 = scmp.ne.s32.totalorder %s925_s1, %s666_s16  ;;  %s29_s13 = int_to_ptr.vmem [resolvable:$true] %s28_s13 }
   0x4   :  { %p670_p1 = scmp.lt.u32.totalorder %s666_s16, %s925_s1 }
   0x6   :  { %p672_p2 = pnand %p670_p1, %p667_p0 }
   0x8   :  { %675 = shalt.err (!%p672_p2)
}
   0x9   :  { %s676_s21 = scalar_lea.vmem %s29_s13, 256  ;;  %p681_p4 = scmp.lt.s32.totalorder %s29_s13, %s29_s13 }
   0xa   :  { %p677_p3 = scmp.ne.s32.totalorder %s29_s13, %s676_s21  ;;  %p682_p5 = scmp.lt.s32.totalorder %s676_s21, %s676_s21 }
   0xc   :  { %p683_p6 = por %p682_p5, %p681_p4 }
   0xe   :  { %p684_p7 = pnand %p683_p6, %p677_p3 }
  0x10   :  { %687 = shalt.err (!%p684_p7)
}
  0x11   :  { %s761_s22 = smov 64   ;;  %s762_s23 = smov 4  }
  0x12   :  { %34 = dma.hbm_to_vmem [thread:$0]  %s925_s1, 256, %s29_s13, [#allocation6], %s761_s22, %s761_s22, %s762_s23  }
  0x13   :  { %s763_s26 = smov [#allocation2]   ;;  %s688_s30 = scalar_lea.hbm %s924_s0, 4096 }
  0x14   :  { %s16_s27 = sshll.u32 %s763_s26, 4  ;;  %p689_p8 = scmp.ne.s32.totalorder %s924_s0, %s688_s30  ;;  %s17_s27 = int_to_ptr.vmem [resolvable:$true] %s16_s27 }
  0x15   :  { %p692_p9 = scmp.lt.u32.totalorder %s688_s30, %s924_s0 }
  0x17   :  { %p694_p10 = pnand %p692_p9, %p689_p8 }
  0x19   :  { %697 = shalt.err (!%p694_p10)
}
  0x1a   :  { %s698_s8 = scalar_lea.vmem %s17_s27, 4096  ;;  %p703_p12 = scmp.lt.s32.totalorder %s17_s27, %s17_s27 }
  0x1b   :  { %p699_p11 = scmp.ne.s32.totalorder %s17_s27, %s698_s8  ;;  %p704_p13 = scmp.lt.s32.totalorder %s698_s8, %s698_s8 }
  0x1d   :  { %p705_p0 = por %p704_p13, %p703_p12 }
  0x1f   :  { %p706_p1 = pnand %p705_p0, %p699_p11 }
  0x21   :  { %709 = shalt.err (!%p706_p1)
}
  0x22   :  { %s764_s1 = smov 128   ;;  %s765_s9 = smov 8  }
  0x23   :  { %22 = dma.hbm_to_vmem [thread:$0]  %s924_s0, 4096, %s17_s27, [#allocation3], %s764_s1, %s764_s1, %s765_s9  }
  0x24   :  { %s766_s12 = smov [#allocation7]   ;;  %s710_s16 = scalar_lea.hbm %s926_s2, 16 }
  0x25   :  { %s41_s13 = sshll.u32 %s766_s12, 4  ;;  %p711_p2 = scmp.ne.s32.totalorder %s926_s2, %s710_s16  ;;  %s42_s13 = int_to_ptr.vmem [resolvable:$true] %s41_s13 }
  0x26   :  { %p714_p3 = scmp.lt.u32.totalorder %s710_s16, %s926_s2 }
  0x28   :  { %p716_p4 = pnand %p714_p3, %p711_p2 }
  0x2a   :  { %719 = shalt.err (!%p716_p4)
}
  0x2b   :  { %s720_s21 = scalar_lea.vmem %s42_s13, 16  ;;  %s724_s0 = scalar_lea.vmem %s42_s13, 32 }
  0x2c   :  { %p721_p5 = scmp.ne.s32.totalorder %s42_s13, %s720_s21  ;;  %p725_p6 = scmp.lt.s32.totalorder %s42_s13, %s42_s13 }
  0x2d   :  { %p726_p7 = scmp.lt.s32.totalorder %s724_s0, %s720_s21 }
  0x2f   :  { %p727_p8 = por %p726_p7, %p725_p6 }
  0x31   :  { %p728_p9 = pnand %p727_p8, %p721_p5 }
  0x33   :  { %731 = shalt.err (!%p728_p9)
}
  0x34   :  { %44 = dma.hbm_to_vmem [thread:$0]  %s926_s2, 16, %s42_s13, [#allocation6]  }
  0x35   :  { %754 = dma.done.wait [#allocation3], 4096  }
  0x36   :  { %755 = vsyncadd [#allocation3], 4294963200 }
  0x37   :  { %756 = dma.done.wait [#allocation6], 272  }
  0x38   :  { %757 = vsyncadd [#allocation6], 4294967024  ;;  %v664_v0 = vld [vmem:[#allocation5] sm:$0xff]   ;;  %v665_v1 = vld [vmem:[#allocation5 + $0x8] sm:$0xff]   ;;  %vm126_vm0 = vcmask 261120   ;;  %vm464_vm1 = vcmask 257024  }
  0x39   :  { %616 = vmatprep.subr.bf16.mxu0 %v664_v0  ;;  %652 = vmatprep.subr.bf16.mxu1 %v664_v0  ;;  %v55_v2 = vld [vmem:[#allocation2] sm:$0xff]  ;;  %v56_v3 = vld [vmem:[#allocation2 + $0x8] sm:$0xff]  ;;  %v57_v7 = vld [vmem:[#allocation2 + $0x10] sm:$0xff]  ;;  %s767_s2 = smov [#allocation8]  }
  0x3a   :  { %v71_v4 = vld [vmem:[#allocation2 + $0x80] sm:$0xff]  ;;  %617 = vmatpush3.bf16.msra.mxu0 %v664_v0  ;;  %654 = vmatpush3.bf16.msra.mxu1 %v664_v0  ;;  %v87_v5 = vpack.c.bf16 %v56_v3, %v55_v2  ;;  %v72_v6 = vld [vmem:[#allocation2 + $0x88] sm:$0xff]  ;;  %v58_v8 = vld [vmem:[#allocation2 + $0x18] sm:$0xff]  ;;  %s502_s26 = sshll.u32 %s767_s2, 4  ;;  %s503_s26 = int_to_ptr.vmem [resolvable:$true] %s502_s26 }
  0x3b   :  { %618 = vmatprep.subr.bf16.mxu0 %v665_v1  ;;  %653 = vmatprep.subr.bf16.mxu1 %v665_v1  ;;  %v95_v9 = vpack.c.bf16 %v72_v6, %v71_v4  ;;  %v73_v10 = vld [vmem:[#allocation2 + $0x90] sm:$0xff]  ;;  %v74_v11 = vld [vmem:[#allocation2 + $0x98] sm:$0xff]  ;;  %v59_v12 = vld [vmem:[#allocation2 + $0x20] sm:$0xff]  ;;  %v88_v16 = vpack.c.bf16 %v58_v8, %v57_v7  ;;  %s732_s27 = scalar_lea.vmem %s503_s26, 2048  ;;  %p737_p11 = scmp.lt.s32.totalorder %s503_s26, %s503_s26 }
  0x3c   :  { %620 = vmatprep.mubr.msk.bf16.mxu0 %vm126_vm0, %v87_v5  ;;  %v60_v13 = vld [vmem:[#allocation2 + $0x28] sm:$0xff]  ;;  %v75_v14 = vld [vmem:[#allocation2 + $0xa0] sm:$0xff]  ;;  %v96_v17 = vpack.c.bf16 %v74_v11, %v73_v10  ;;  %v61_v20 = vld [vmem:[#allocation2 + $0x30] sm:$0xff]  ;;  %p733_p10 = scmp.ne.s32.totalorder %s503_s26, %s732_s27  ;;  %p738_p12 = scmp.lt.s32.totalorder %s732_s27, %s732_s27 }
  0x3d   :  { %v76_v15 = vld [vmem:[#allocation2 + $0xa8] sm:$0xff]  ;;  %636 = vmatprep.mubr.msk.bf16.mxu1 %vm126_vm0, %v95_v9  ;;  %v89_v18 = vpack.c.bf16 %v60_v13, %v59_v12  ;;  %v62_v21 = vld [vmem:[#allocation2 + $0x38] sm:$0xff]  ;;  %v77_v22 = vld [vmem:[#allocation2 + $0xb0] sm:$0xff] }
  0x3e   :  { %619 = vmatpush3.bf16.msra.mxu0 %v665_v1  ;;  %655 = vmatpush3.bf16.msra.mxu1 %v665_v1  ;;  %v97_v19 = vpack.c.bf16 %v76_v15, %v75_v14  ;;  %v78_v23 = vld [vmem:[#allocation2 + $0xb8] sm:$0xff]  ;;  %v63_v24 = vld [vmem:[#allocation2 + $0x40] sm:$0xff]  ;;  %v64_v25 = vld [vmem:[#allocation2 + $0x48] sm:$0xff]  ;;  %v90_v28 = vpack.c.bf16 %v62_v21, %v61_v20  ;;  %p739_p13 = por %p738_p12, %p737_p11 }
  0x3f   :  { %v79_v26 = vld [vmem:[#allocation2 + $0xc0] sm:$0xff]  ;;  %v80_v27 = vld [vmem:[#allocation2 + $0xc8] sm:$0xff]  ;;  %v98_v29 = vpack.c.bf16 %v78_v23, %v77_v22  ;;  %v91_v30 = vpack.c.bf16 %v64_v25, %v63_v24  ;;  %v65_v32 = vld [vmem:[#allocation2 + $0x50] sm:$0xff] }
  0x40   :  { %v99_v31 = vpack.c.bf16 %v80_v27, %v79_v26  ;;  %v66_v33 = vld [vmem:[#allocation2 + $0x58] sm:$0xff]  ;;  %v81_v34 = vld [vmem:[#allocation2 + $0xd0] sm:$0xff]  ;;  %v67_v36 = vld [vmem:[#allocation2 + $0x60] sm:$0xff]  ;;  %p740_p0 = pnand %p739_p13, %p733_p10 }
  0x41   :  { %621 = vmatmul.mubr.msk.bf16.vlgmr.msra.gmra.mrb[0].mxu0 %vm126_vm0, %v88_v16  ;;  %637 = vmatmul.mubr.msk.bf16.vlgmr.msra.gmra.mrb[0].mxu1 %vm126_vm0, %v96_v17  ;;  %v82_v35 = vld [vmem:[#allocation2 + $0xd8] sm:$0xff]  ;;  %v68_v37 = vld [vmem:[#allocation2 + $0x68] sm:$0xff]  ;;  %v83_v38 = vld [vmem:[#allocation2 + $0xe0] sm:$0xff]  ;;  %v92_v40 = vpack.c.bf16 %v66_v33, %v65_v32 }
  0x42   :  { %624 = vmatprep.mubr.msk.bf16.mxu0 %vm126_vm0, %v89_v18  ;;  %640 = vmatprep.mubr.msk.bf16.mxu1 %vm126_vm0, %v97_v19  ;;  %v84_v39 = vld [vmem:[#allocation2 + $0xe8] sm:$0xff]  ;;  %v100_v41 = vpack.c.bf16 %v82_v35, %v81_v34  ;;  %v93_v42 = vpack.c.bf16 %v68_v37, %v67_v36  ;;  %v69_v44 = vld [vmem:[#allocation2 + $0x70] sm:$0xff]  ;;  %v70_v45 = vld [vmem:[#allocation2 + $0x78] sm:$0xff] }
  0x43   :  { %v101_v43 = vpack.c.bf16 %v84_v39, %v83_v38  ;;  %v85_v46 = vld [vmem:[#allocation2 + $0xf0] sm:$0xff]  ;;  %v86_v47 = vld [vmem:[#allocation2 + $0xf8] sm:$0xff]  ;;  %v94_v48 = vpack.c.bf16 %v70_v45, %v69_v44 }
  0x44   :  { %v102_v49 = vpack.c.bf16 %v86_v47, %v85_v46  ;;  %v843_v50 = vld [vmem:[#allocation7] ss:$0 sm:$0xff] }
  0x49   :  { %625 = vmatmul.mubr.msk.bf16.gmra.mrb[4].mxu0 %vm126_vm0, %v90_v28  ;;  %641 = vmatmul.mubr.msk.bf16.gmra.mrb[4].mxu1 %vm126_vm0, %v98_v29 }
  0x4a   :  { %628 = vmatprep.mubr.msk.bf16.mxu0 %vm126_vm0, %v91_v30  ;;  %644 = vmatprep.mubr.msk.bf16.mxu1 %vm126_vm0, %v99_v31 }
  0x51   :  { %629 = vmatmul.mubr.msk.bf16.gmra.mrb[8].mxu0 %vm126_vm0, %v92_v40  ;;  %645 = vmatmul.mubr.msk.bf16.gmra.mrb[8].mxu1 %vm126_vm0, %v100_v41 }
  0x52   :  { %632 = vmatprep.mubr.msk.bf16.mxu0 %vm126_vm0, %v93_v42  ;;  %648 = vmatprep.mubr.msk.bf16.mxu1 %vm126_vm0, %v101_v43 }
  0x59   :  { %633 = vmatmul.mubr.msk.bf16.gmra.mrb[12].mxu0 %vm126_vm0, %v94_v48  ;;  %649 = vmatmul.mubr.msk.bf16.gmra.mrb[12].mxu1 %vm126_vm0, %v102_v49 }
 0x114   :  { %v622_v51 = vpop.f32.mrb[0].mxu0  ;;  %v638_v52 = vpop.f32.mrb[0].mxu1 }
 0x115   :  { %v218_v53 = vadd.f32 %v622_v51, %v843_v50  ;;  %v282_v54 = vadd.f32 %v638_v52, %v843_v50  ;;  %v209_v55 = vpop.f32.mrb[1].mxu0  ;;  %v273_v56 = vpop.f32.mrb[1].mxu1 }
 0x116   :  { %v210_v57 = vadd.f32 %v843_v50, %v209_v55  ;;  %v274_v58 = vadd.f32 %v843_v50, %v273_v56  ;;  %v623_v59 = vpop.f32.mrb[2].mxu0  ;;  %v639_v60 = vpop.f32.mrb[2].mxu1 }
 0x117   :  { %v568_v61 = vpack.c.bf16 %v218_v53, %v218_v53  ;;  %v584_v62 = vpack.c.bf16 %v282_v54, %v282_v54  ;;  %v221_v63 = vadd.f32 %v623_v59, %v843_v50  ;;  %v285_v0 = vadd.f32 %v639_v60, %v843_v50  ;;  %v212_v1 = vpop.f32.mrb[3].mxu0  ;;  %v276_v2 = vpop.f32.mrb[3].mxu1 }
 0x118   :  { %v566_v3 = vpack.c.bf16 %v210_v57, %v210_v57  ;;  %v582_v4 = vpack.c.bf16 %v274_v58, %v274_v58  ;;  %v213_v5 = vadd.f32 %v843_v50, %v212_v1  ;;  %v277_v6 = vadd.f32 %v843_v50, %v276_v2 }
 0x119   :  { %467 = vst.msk [vmem:[#allocation8 + $0x8] sm:$0xf] %vm464_vm1, %v568_v61  ;;  %483 = vst.msk [vmem:[#allocation8 + $0x48] sm:$0xf] %vm464_vm1, %v584_v62  ;;  %v569_v7 = vpack.c.bf16 %v221_v63, %v221_v63  ;;  %v585_v8 = vpack.c.bf16 %v285_v0, %v285_v0 }
 0x11a   :  { %465 = vst.msk [vmem:[#allocation8] sm:$0xf] %vm464_vm1, %v566_v3  ;;  %481 = vst.msk [vmem:[#allocation8 + $0x40] sm:$0xf] %vm464_vm1, %v582_v4  ;;  %v567_v9 = vpack.c.bf16 %v213_v5, %v213_v5  ;;  %v583_v10 = vpack.c.bf16 %v277_v6, %v277_v6 }
 0x11b   :  { %468 = vst.msk [vmem:[#allocation8 + $0xc] sm:$0xf] %vm464_vm1, %v569_v7  ;;  %484 = vst.msk [vmem:[#allocation8 + $0x4c] sm:$0xf] %vm464_vm1, %v585_v8 }
 0x11c   :  { %466 = vst.msk [vmem:[#allocation8 + $0x4] sm:$0xf] %vm464_vm1, %v567_v9  ;;  %482 = vst.msk [vmem:[#allocation8 + $0x44] sm:$0xf] %vm464_vm1, %v583_v10  ;;  %v626_v11 = vpop.f32.mrb[4].mxu0  ;;  %v642_v12 = vpop.f32.mrb[4].mxu1 }
 0x11d   :  { %v234_v13 = vadd.f32 %v626_v11, %v843_v50  ;;  %v298_v14 = vadd.f32 %v642_v12, %v843_v50  ;;  %v225_v15 = vpop.f32.mrb[5].mxu0  ;;  %v289_v16 = vpop.f32.mrb[5].mxu1 }
 0x11e   :  { %v226_v17 = vadd.f32 %v843_v50, %v225_v15  ;;  %v290_v18 = vadd.f32 %v843_v50, %v289_v16  ;;  %v627_v19 = vpop.f32.mrb[6].mxu0  ;;  %v643_v20 = vpop.f32.mrb[6].mxu1 }
 0x11f   :  { %v572_v21 = vpack.c.bf16 %v234_v13, %v234_v13  ;;  %v588_v22 = vpack.c.bf16 %v298_v14, %v298_v14  ;;  %v237_v23 = vadd.f32 %v627_v19, %v843_v50  ;;  %v301_v24 = vadd.f32 %v643_v20, %v843_v50  ;;  %v228_v25 = vpop.f32.mrb[7].mxu0  ;;  %v292_v26 = vpop.f32.mrb[7].mxu1 }
 0x120   :  { %v570_v27 = vpack.c.bf16 %v226_v17, %v226_v17  ;;  %v586_v28 = vpack.c.bf16 %v290_v18, %v290_v18  ;;  %v229_v29 = vadd.f32 %v843_v50, %v228_v25  ;;  %v293_v30 = vadd.f32 %v843_v50, %v292_v26 }
 0x121   :  { %471 = vst.msk [vmem:[#allocation8 + $0x18] sm:$0xf] %vm464_vm1, %v572_v21  ;;  %487 = vst.msk [vmem:[#allocation8 + $0x58] sm:$0xf] %vm464_vm1, %v588_v22  ;;  %v573_v31 = vpack.c.bf16 %v237_v23, %v237_v23  ;;  %v589_v32 = vpack.c.bf16 %v301_v24, %v301_v24 }
 0x122   :  { %469 = vst.msk [vmem:[#allocation8 + $0x10] sm:$0xf] %vm464_vm1, %v570_v27  ;;  %485 = vst.msk [vmem:[#allocation8 + $0x50] sm:$0xf] %vm464_vm1, %v586_v28  ;;  %v571_v33 = vpack.c.bf16 %v229_v29, %v229_v29  ;;  %v587_v34 = vpack.c.bf16 %v293_v30, %v293_v30 }
 0x123   :  { %472 = vst.msk [vmem:[#allocation8 + $0x1c] sm:$0xf] %vm464_vm1, %v573_v31  ;;  %488 = vst.msk [vmem:[#allocation8 + $0x5c] sm:$0xf] %vm464_vm1, %v589_v32 }
 0x124   :  { %470 = vst.msk [vmem:[#allocation8 + $0x14] sm:$0xf] %vm464_vm1, %v571_v33  ;;  %486 = vst.msk [vmem:[#allocation8 + $0x54] sm:$0xf] %vm464_vm1, %v587_v34  ;;  %v630_v35 = vpop.f32.mrb[8].mxu0  ;;  %v646_v36 = vpop.f32.mrb[8].mxu1 }
 0x125   :  { %v250_v37 = vadd.f32 %v630_v35, %v843_v50  ;;  %v314_v38 = vadd.f32 %v646_v36, %v843_v50  ;;  %v241_v39 = vpop.f32.mrb[9].mxu0  ;;  %v305_v40 = vpop.f32.mrb[9].mxu1 }
 0x126   :  { %v242_v41 = vadd.f32 %v843_v50, %v241_v39  ;;  %v306_v42 = vadd.f32 %v843_v50, %v305_v40  ;;  %v631_v43 = vpop.f32.mrb[10].mxu0  ;;  %v647_v44 = vpop.f32.mrb[10].mxu1 }
 0x127   :  { %v576_v45 = vpack.c.bf16 %v250_v37, %v250_v37  ;;  %v592_v46 = vpack.c.bf16 %v314_v38, %v314_v38  ;;  %v253_v47 = vadd.f32 %v631_v43, %v843_v50  ;;  %v317_v48 = vadd.f32 %v647_v44, %v843_v50  ;;  %v244_v49 = vpop.f32.mrb[11].mxu0  ;;  %v308_v51 = vpop.f32.mrb[11].mxu1 }
 0x128   :  { %v574_v52 = vpack.c.bf16 %v242_v41, %v242_v41  ;;  %v590_v53 = vpack.c.bf16 %v306_v42, %v306_v42  ;;  %v245_v54 = vadd.f32 %v843_v50, %v244_v49  ;;  %v309_v55 = vadd.f32 %v843_v50, %v308_v51 }
 0x129   :  { %475 = vst.msk [vmem:[#allocation8 + $0x28] sm:$0xf] %vm464_vm1, %v576_v45  ;;  %491 = vst.msk [vmem:[#allocation8 + $0x68] sm:$0xf] %vm464_vm1, %v592_v46  ;;  %v577_v56 = vpack.c.bf16 %v253_v47, %v253_v47  ;;  %v593_v57 = vpack.c.bf16 %v317_v48, %v317_v48 }
 0x12a   :  { %473 = vst.msk [vmem:[#allocation8 + $0x20] sm:$0xf] %vm464_vm1, %v574_v52  ;;  %489 = vst.msk [vmem:[#allocation8 + $0x60] sm:$0xf] %vm464_vm1, %v590_v53  ;;  %v575_v58 = vpack.c.bf16 %v245_v54, %v245_v54  ;;  %v591_v59 = vpack.c.bf16 %v309_v55, %v309_v55 }
 0x12b   :  { %476 = vst.msk [vmem:[#allocation8 + $0x2c] sm:$0xf] %vm464_vm1, %v577_v56  ;;  %492 = vst.msk [vmem:[#allocation8 + $0x6c] sm:$0xf] %vm464_vm1, %v593_v57 }
 0x12c   :  { %474 = vst.msk [vmem:[#allocation8 + $0x24] sm:$0xf] %vm464_vm1, %v575_v58  ;;  %490 = vst.msk [vmem:[#allocation8 + $0x64] sm:$0xf] %vm464_vm1, %v591_v59  ;;  %v634_v60 = vpop.f32.mrb[12].mxu0  ;;  %v650_v61 = vpop.f32.mrb[12].mxu1 }
 0x12d   :  { %v266_v62 = vadd.f32 %v634_v60, %v843_v50  ;;  %v330_v63 = vadd.f32 %v650_v61, %v843_v50  ;;  %v257_v0 = vpop.f32.mrb[13].mxu0  ;;  %v321_v1 = vpop.f32.mrb[13].mxu1 }
 0x12e   :  { %v258_v2 = vadd.f32 %v843_v50, %v257_v0  ;;  %v322_v3 = vadd.f32 %v843_v50, %v321_v1  ;;  %v635_v4 = vpop.f32.mrb[14].mxu0  ;;  %v651_v5 = vpop.f32.mrb[14].mxu1 }
 0x12f   :  { %v580_v6 = vpack.c.bf16 %v266_v62, %v266_v62  ;;  %v596_v7 = vpack.c.bf16 %v330_v63, %v330_v63  ;;  %v269_v8 = vadd.f32 %v635_v4, %v843_v50  ;;  %v333_v9 = vadd.f32 %v651_v5, %v843_v50  ;;  %v260_v10 = vpop.f32.mrb[15].mxu0  ;;  %v324_v11 = vpop.f32.mrb[15].mxu1 }
 0x130   :  { %v578_v12 = vpack.c.bf16 %v258_v2, %v258_v2  ;;  %v594_v13 = vpack.c.bf16 %v322_v3, %v322_v3  ;;  %v261_v14 = vadd.f32 %v843_v50, %v260_v10  ;;  %v325_v15 = vadd.f32 %v843_v50, %v324_v11 }
 0x131   :  { %479 = vst.msk [vmem:[#allocation8 + $0x38] sm:$0xf] %vm464_vm1, %v580_v6  ;;  %495 = vst.msk [vmem:[#allocation8 + $0x78] sm:$0xf] %vm464_vm1, %v596_v7  ;;  %v581_v16 = vpack.c.bf16 %v269_v8, %v269_v8  ;;  %v597_v17 = vpack.c.bf16 %v333_v9, %v333_v9 }
 0x132   :  { %477 = vst.msk [vmem:[#allocation8 + $0x30] sm:$0xf] %vm464_vm1, %v578_v12  ;;  %493 = vst.msk [vmem:[#allocation8 + $0x70] sm:$0xf] %vm464_vm1, %v594_v13  ;;  %v579_v18 = vpack.c.bf16 %v261_v14, %v261_v14  ;;  %v595_v19 = vpack.c.bf16 %v325_v15, %v325_v15 }
 0x133   :  { %480 = vst.msk [vmem:[#allocation8 + $0x3c] sm:$0xf] %vm464_vm1, %v581_v16  ;;  %496 = vst.msk [vmem:[#allocation8 + $0x7c] sm:$0xf] %vm464_vm1, %v597_v17 }
 0x134   :  { %478 = vst.msk [vmem:[#allocation8 + $0x34] sm:$0xf] %vm464_vm1, %v579_v18  ;;  %494 = vst.msk [vmem:[#allocation8 + $0x74] sm:$0xf] %vm464_vm1, %v595_v19 }
 0x135   :  { %743 = shalt.err (!%p740_p0)
}
 0x136   :  { %s744_s30 = scalar_lea.hbm %s927_s3, 2048 }
 0x137   :  { %p745_p1 = scmp.ne.s32.totalorder %s927_s3, %s744_s30  ;;  %p748_p2 = scmp.lt.u32.totalorder %s744_s30, %s927_s3 }
 0x139   :  { %p750_p3 = pnand %p748_p2, %p745_p1 }
 0x13b   :  { %753 = shalt.err (!%p750_p3)
}
 0x13c   :  { %508 = dma.vmem_to_hbm [thread:$0]  %s503_s26, 2048, %s927_s3, [#allocation4], %s761_s22, %s761_s22, %s762_s23  }
 0x13d   :  { %758 = dma.done.wait [#allocation4], 2048  }
 0x13e   :  { %759 = vsyncadd [#allocation4], 4294965248 }
 0x13f   :  { %512 = vsyncpa [#allocation3], 1 }
 0x140   :  { %513 = vsyncpa [#allocation6], 1 }
 0x141   :  { %514 = vsyncpa [#allocation4], 1 }

// kernel: _lambda_.12
= control target key start
LH: loop header
LB: loop body
LE: loop exit
PB: predicated region body
PF: predicated region fallthrough
CT: control target
= control target key end

     0   :  { %17 = vsyncpa [#allocation3], 0  ;;  %s3128_s0 = inlined_call_operand.hbm [shape: bf16[256,32], index: 0, kind: input, shape index: {}]   ;;  %s3129_s1 = inlined_call_operand.hbm [shape: bf16[256,32], index: 1, kind: input, shape index: {}]   ;;  %s3130_s2 = inlined_call_operand.hbm [shape: bf16[256,32], index: 2, kind: input, shape index: {}]   ;;  %s3131_s3 = inlined_call_operand.hbm [shape: bf16[256,32], index: 3, kind: input, shape index: {}]   ;;  %s3132_s4 = inlined_call_operand.hbm [shape: bf16[32,32], index: 4, kind: input, shape index: {}]   ;;  %s3133_s5 = inlined_call_operand.hbm [shape: bf16[32,32], index: 5, kind: input, shape index: {}]   ;;  %s3134_s6 = inlined_call_operand.hbm [shape: f32[1,32], index: 6, kind: input, shape index: {}]   ;;  %s3135_s7 = inlined_call_operand.hbm [shape: f32[1,32], index: 7, kind: input, shape index: {}]   ;;  %s3136_s8 = inlined_call_operand.hbm [shape: f32[1,32], index: 8, kind: input, shape index: {}]   ;;  %s3137_s9 = inlined_call_operand.hbm [shape: bf16[32,128], index: 9, kind: input, shape index: {}]   ;;  %s3138_s10 = inlined_call_operand.hbm [shape: bf16[256,32], index: 10, kind: output, shape index: {0}]   ;;  %s3139_s11 = inlined_call_operand.hbm [shape: f32[256,128], index: 11, kind: output, shape index: {1}]  }
   0x1   :  { %18 = vsyncpa [#allocation6], 0 }
   0x2   :  { %19 = vsyncpa [#allocation9], 0 }
   0x3   :  { %20 = vsyncpa [#allocation12], 0 }
   0x4   :  { %21 = vsyncpa [#allocation15], 0 }
   0x5   :  { %22 = vsyncpa [#allocation18], 0 }
   0x6   :  { %23 = vsyncpa [#allocation4], 0 }
   0x7   :  { %24 = vsyncpa [#allocation21], 0  ;;  %s2420_s17 = smov [#allocation5]   ;;  %s2421_s19 = smov [#allocation8]  }
   0x8   :  { %s42_s18 = sshll.u32 %s2420_s17, 4  ;;  %s66_s20 = sshll.u32 %s2421_s19, 4  ;;  %s43_s18 = int_to_ptr.vmem [resolvable:$true] %s42_s18  ;;  %s2496_s20 = int_to_ptr.vmem [resolvable:$true] %s66_s20 }
   0x9   :  { %s2140_s23 = scalar_lea.hbm %s3129_s1, 2048 }
   0xa   :  { %p2141_p0 = scmp.ne.s32.totalorder %s3129_s1, %s2140_s23  ;;  %p2144_p1 = scmp.lt.u32.totalorder %s2140_s23, %s3129_s1 }
   0xc   :  { %p2146_p2 = pnand %p2144_p1, %p2141_p0 }
   0xe   :  { %2149 = shalt.err (!%p2146_p2)
}
   0xf   :  { %s2150_s28 = scalar_lea.vmem %s43_s18, 2048  ;;  %p2155_p4 = scmp.lt.s32.totalorder %s43_s18, %s43_s18 }
  0x10   :  { %p2151_p3 = scmp.ne.s32.totalorder %s43_s18, %s2150_s28  ;;  %p2156_p5 = scmp.lt.s32.totalorder %s2150_s28, %s2150_s28 }
  0x12   :  { %p2157_p6 = por %p2156_p5, %p2155_p4 }
  0x14   :  { %p2158_p7 = pnand %p2157_p6, %p2151_p3 }
  0x16   :  { %2161 = shalt.err (!%p2158_p7)
}
  0x17   :  { %s2422_s29 = smov 64   ;;  %s2423_s30 = smov 4  }
  0x18   :  { %48 = dma.hbm_to_vmem [thread:$0]  %s3129_s1, 2048, %s43_s18, [#allocation6], %s2422_s29, %s2422_s29, %s2423_s30  }
  0x19   :  { %s2162_s16 = scalar_lea.hbm %s3131_s3, 2048 }
  0x1a   :  { %p2163_p8 = scmp.ne.s32.totalorder %s3131_s3, %s2162_s16  ;;  %p2166_p9 = scmp.lt.u32.totalorder %s2162_s16, %s3131_s3 }
  0x1c   :  { %p2168_p10 = pnand %p2166_p9, %p2163_p8 }
  0x1e   :  { %2171 = shalt.err (!%p2168_p10)
}
  0x1f   :  { %s2172_s23 = scalar_lea.vmem %s2496_s20, 2048  ;;  %p2177_p12 = scmp.lt.s32.totalorder %s2496_s20, %s2496_s20 }
  0x20   :  { %p2173_p11 = scmp.ne.s32.totalorder %s2496_s20, %s2172_s23  ;;  %p2178_p13 = scmp.lt.s32.totalorder %s2172_s23, %s2172_s23 }
  0x22   :  { %p2179_p0 = por %p2178_p13, %p2177_p12 }
  0x24   :  { %p2180_p1 = pnand %p2179_p0, %p2173_p11 }
  0x26   :  { %2183 = shalt.err (!%p2180_p1)
}
  0x27   :  { %72 = dma.hbm_to_vmem [thread:$0]  %s3131_s3, 2048, %s2496_s20, [#allocation9], %s2422_s29, %s2422_s29, %s2423_s30  }
  0x28   :  { %s2424_s24 = smov [#allocation11]   ;;  %s2425_s26 = smov [#allocation14]  }
  0x29   :  { %s90_s25 = sshll.u32 %s2424_s24, 4  ;;  %s113_s27 = sshll.u32 %s2425_s26, 4  ;;  %s91_s25 = int_to_ptr.vmem [resolvable:$true] %s90_s25  ;;  %s114_s27 = int_to_ptr.vmem [resolvable:$true] %s113_s27 }
  0x2a   :  { %s2184_s13 = scalar_lea.hbm %s3133_s5, 256 }
  0x2b   :  { %p2185_p2 = scmp.ne.s32.totalorder %s3133_s5, %s2184_s13  ;;  %p2188_p3 = scmp.lt.u32.totalorder %s2184_s13, %s3133_s5 }
  0x2d   :  { %p2190_p4 = pnand %p2188_p3, %p2185_p2 }
  0x2f   :  { %2193 = shalt.err (!%p2190_p4)
}
  0x30   :  { %s2194_s3 = scalar_lea.vmem %s91_s25, 256  ;;  %p2199_p6 = scmp.lt.s32.totalorder %s91_s25, %s91_s25 }
  0x31   :  { %p2195_p5 = scmp.ne.s32.totalorder %s91_s25, %s2194_s3  ;;  %p2200_p7 = scmp.lt.s32.totalorder %s2194_s3, %s2194_s3 }
  0x33   :  { %p2201_p8 = por %p2200_p7, %p2199_p6 }
  0x35   :  { %p2202_p9 = pnand %p2201_p8, %p2195_p5 }
  0x37   :  { %2205 = shalt.err (!%p2202_p9)
}
  0x38   :  { %96 = dma.hbm_to_vmem [thread:$0]  %s3133_s5, 256, %s91_s25, [#allocation12], %s2422_s29, %s2422_s29, %s2423_s30  }
  0x39   :  { %s2206_s23 = scalar_lea.hbm %s3135_s7, 16 }
  0x3a   :  { %p2207_p10 = scmp.ne.s32.totalorder %s3135_s7, %s2206_s23  ;;  %p2210_p11 = scmp.lt.u32.totalorder %s2206_s23, %s3135_s7 }
  0x3c   :  { %p2212_p12 = pnand %p2210_p11, %p2207_p10 }
  0x3e   :  { %2215 = shalt.err (!%p2212_p12)
}
  0x3f   :  { %s2216_s28 = scalar_lea.vmem %s114_s27, 16  ;;  %s2220_s12 = scalar_lea.vmem %s114_s27, 32 }
  0x40   :  { %p2217_p13 = scmp.ne.s32.totalorder %s114_s27, %s2216_s28  ;;  %p2221_p0 = scmp.lt.s32.totalorder %s114_s27, %s114_s27 }
  0x41   :  { %p2222_p1 = scmp.lt.s32.totalorder %s2220_s12, %s2216_s28 }
  0x43   :  { %p2223_p2 = por %p2222_p1, %p2221_p0 }
  0x45   :  { %p2224_p3 = pnand %p2223_p2, %p2217_p13 }
  0x47   :  { %2227 = shalt.err (!%p2224_p3)
}
  0x48   :  { %116 = dma.hbm_to_vmem [thread:$0]  %s3135_s7, 16, %s114_s27, [#allocation15]  }
  0x49   :  { %s2426_s13 = smov [#allocation2]   ;;  %s2427_s15 = smov [#allocation7]  }
  0x4a   :  { %s30_s14 = sshll.u32 %s2426_s13, 4  ;;  %s54_s16 = sshll.u32 %s2427_s15, 4  ;;  %s31_s14 = int_to_ptr.vmem [resolvable:$true] %s30_s14  ;;  %s2560_s16 = int_to_ptr.vmem [resolvable:$true] %s54_s16 }
  0x4b   :  { %s2228_s20 = scalar_lea.hbm %s3128_s0, 2048 }
  0x4c   :  { %p2229_p4 = scmp.ne.s32.totalorder %s3128_s0, %s2228_s20  ;;  %p2232_p5 = scmp.lt.u32.totalorder %s2228_s20, %s3128_s0 }
  0x4e   :  { %p2234_p6 = pnand %p2232_p5, %p2229_p4 }
  0x50   :  { %2237 = shalt.err (!%p2234_p6)
}
  0x51   :  { %s2238_s7 = scalar_lea.vmem %s31_s14, 2048  ;;  %p2243_p8 = scmp.lt.s32.totalorder %s31_s14, %s31_s14 }
  0x52   :  { %p2239_p7 = scmp.ne.s32.totalorder %s31_s14, %s2238_s7  ;;  %p2244_p9 = scmp.lt.s32.totalorder %s2238_s7, %s2238_s7 }
  0x54   :  { %p2245_p10 = por %p2244_p9, %p2243_p8 }
  0x56   :  { %p2246_p11 = pnand %p2245_p10, %p2239_p7 }
  0x58   :  { %2249 = shalt.err (!%p2246_p11)
}
  0x59   :  { %36 = dma.hbm_to_vmem [thread:$0]  %s3128_s0, 2048, %s31_s14, [#allocation3], %s2422_s29, %s2422_s29, %s2423_s30  }
  0x5a   :  { %s2250_s26 = scalar_lea.hbm %s3130_s2, 2048 }
  0x5b   :  { %p2251_p12 = scmp.ne.s32.totalorder %s3130_s2, %s2250_s26  ;;  %p2254_p13 = scmp.lt.u32.totalorder %s2250_s26, %s3130_s2 }
  0x5d   :  { %p2256_p0 = pnand %p2254_p13, %p2251_p12 }
  0x5f   :  { %2259 = shalt.err (!%p2256_p0)
}
  0x60   :  { %s2260_s13 = scalar_lea.vmem %s2560_s16, 2048  ;;  %p2265_p2 = scmp.lt.s32.totalorder %s2560_s16, %s2560_s16 }
  0x61   :  { %p2261_p1 = scmp.ne.s32.totalorder %s2560_s16, %s2260_s13  ;;  %p2266_p3 = scmp.lt.s32.totalorder %s2260_s13, %s2260_s13 }
  0x63   :  { %p2267_p4 = por %p2266_p3, %p2265_p2 }
  0x65   :  { %p2268_p5 = pnand %p2267_p4, %p2261_p1 }
  0x67   :  { %2271 = shalt.err (!%p2268_p5)
}
  0x68   :  { %60 = dma.hbm_to_vmem [thread:$0]  %s3130_s2, 2048, %s2560_s16, [#allocation6], %s2422_s29, %s2422_s29, %s2423_s30  }
  0x69   :  { %s2428_s15 = smov [#allocation10]   ;;  %s2429_s3 = smov [#allocation13]  }
  0x6a   :  { %s78_s17 = sshll.u32 %s2428_s15, 4  ;;  %s103_s20 = sshll.u32 %s2429_s3, 4  ;;  %s79_s17 = int_to_ptr.vmem [resolvable:$true] %s78_s17  ;;  %s104_s20 = int_to_ptr.vmem [resolvable:$true] %s103_s20 }
  0x6b   :  { %s2272_s22 = scalar_lea.hbm %s3132_s4, 256 }
  0x6c   :  { %p2273_p6 = scmp.ne.s32.totalorder %s3132_s4, %s2272_s22  ;;  %p2276_p7 = scmp.lt.u32.totalorder %s2272_s22, %s3132_s4 }
  0x6e   :  { %p2278_p8 = pnand %p2276_p7, %p2273_p6 }
  0x70   :  { %2281 = shalt.err (!%p2278_p8)
}
  0x71   :  { %s2282_s2 = scalar_lea.vmem %s79_s17, 256  ;;  %p2287_p10 = scmp.lt.s32.totalorder %s79_s17, %s79_s17 }
  0x72   :  { %p2283_p9 = scmp.ne.s32.totalorder %s79_s17, %s2282_s2  ;;  %p2288_p11 = scmp.lt.s32.totalorder %s2282_s2, %s2282_s2 }
  0x74   :  { %p2289_p12 = por %p2288_p11, %p2287_p10 }
  0x76   :  { %p2290_p13 = pnand %p2289_p12, %p2283_p9 }
  0x78   :  { %2293 = shalt.err (!%p2290_p13)
}
  0x79   :  { %84 = dma.hbm_to_vmem [thread:$0]  %s3132_s4, 256, %s79_s17, [#allocation9], %s2422_s29, %s2422_s29, %s2423_s30  }
  0x7a   :  { %s2294_s28 = scalar_lea.hbm %s3134_s6, 16 }
  0x7b   :  { %p2295_p0 = scmp.ne.s32.totalorder %s3134_s6, %s2294_s28  ;;  %p2298_p1 = scmp.lt.u32.totalorder %s2294_s28, %s3134_s6 }
  0x7d   :  { %p2300_p2 = pnand %p2298_p1, %p2295_p0 }
  0x7f   :  { %2303 = shalt.err (!%p2300_p2)
}
  0x80   :  { %s2304_s0 = scalar_lea.vmem %s104_s20, 16  ;;  %s2308_s14 = scalar_lea.vmem %s104_s20, 32 }
  0x81   :  { %p2305_p3 = scmp.ne.s32.totalorder %s104_s20, %s2304_s0  ;;  %p2309_p4 = scmp.lt.s32.totalorder %s104_s20, %s104_s20 }
  0x82   :  { %p2310_p5 = scmp.lt.s32.totalorder %s2308_s14, %s2304_s0 }
  0x84   :  { %p2311_p6 = por %p2310_p5, %p2309_p4 }
  0x86   :  { %p2312_p7 = pnand %p2311_p6, %p2305_p3 }
  0x88   :  { %2315 = shalt.err (!%p2312_p7)
}
  0x89   :  { %106 = dma.hbm_to_vmem [thread:$0]  %s3134_s6, 16, %s104_s20, [#allocation12]  }
  0x8a   :  { %s2430_s17 = smov [#allocation16]   ;;  %s2431_s19 = smov [#allocation17]  }
  0x8b   :  { %s123_s3 = sshll.u32 %s2430_s17, 4  ;;  %s132_s21 = sshll.u32 %s2431_s19, 4  ;;  %s124_s3 = int_to_ptr.vmem [resolvable:$true] %s123_s3  ;;  %s2624_s21 = int_to_ptr.vmem [resolvable:$true] %s132_s21 }
  0x8c   :  { %s2316_s7 = scalar_lea.hbm %s3136_s8, 16 }
  0x8d   :  { %p2317_p8 = scmp.ne.s32.totalorder %s3136_s8, %s2316_s7  ;;  %p2320_p9 = scmp.lt.u32.totalorder %s2316_s7, %s3136_s8 }
  0x8f   :  { %p2322_p10 = pnand %p2320_p9, %p2317_p8 }
  0x91   :  { %2325 = shalt.err (!%p2322_p10)
}
  0x92   :  { %s2326_s6 = scalar_lea.vmem %s124_s3, 16  ;;  %s2330_s20 = scalar_lea.vmem %s124_s3, 32 }
  0x93   :  { %p2327_p11 = scmp.ne.s32.totalorder %s124_s3, %s2326_s6  ;;  %p2331_p12 = scmp.lt.s32.totalorder %s124_s3, %s124_s3 }
  0x94   :  { %p2332_p13 = scmp.lt.s32.totalorder %s2330_s20, %s2326_s6 }
  0x96   :  { %p2333_p0 = por %p2332_p13, %p2331_p12 }
  0x98   :  { %p2334_p1 = pnand %p2333_p0, %p2327_p11 }
  0x9a   :  { %2337 = shalt.err (!%p2334_p1)
}
  0x9b   :  { %126 = dma.hbm_to_vmem [thread:$0]  %s3136_s8, 16, %s124_s3, [#allocation15]  }
  0x9c   :  { %s2338_s12 = scalar_lea.hbm %s3137_s9, 256 }
  0x9d   :  { %p2339_p2 = scmp.ne.s32.totalorder %s3137_s9, %s2338_s12  ;;  %p2342_p3 = scmp.lt.u32.totalorder %s2338_s12, %s3137_s9 }
  0x9f   :  { %p2344_p4 = pnand %p2342_p3, %p2339_p2 }
  0xa1   :  { %2347 = shalt.err (!%p2344_p4)
}
  0xa2   :  { %s2348_s14 = scalar_lea.vmem %s2624_s21, 256  ;;  %p2353_p6 = scmp.lt.s32.totalorder %s2624_s21, %s2624_s21 }
  0xa3   :  { %p2349_p5 = scmp.ne.s32.totalorder %s2624_s21, %s2348_s14  ;;  %p2354_p7 = scmp.lt.s32.totalorder %s2348_s14, %s2348_s14 }
  0xa5   :  { %p2355_p8 = por %p2354_p7, %p2353_p6 }
  0xa7   :  { %p2356_p9 = pnand %p2355_p8, %p2349_p5 }
  0xa9   :  { %2359 = shalt.err (!%p2356_p9)
}
  0xaa   :  { %138 = dma.hbm_to_vmem [thread:$0]  %s3137_s9, 256, %s2624_s21, [#allocation18], %s2422_s29, %s2422_s29, %s2423_s30  }
  0xab   :  { %2404 = dma.done.wait [#allocation3], 2048  }
  0xac   :  { %2405 = vsyncadd [#allocation3], 4294965248 }
  0xad   :  { %2406 = dma.done.wait [#allocation6], 4096  }
  0xae   :  { %2407 = vsyncadd [#allocation6], 4294963200 }
  0xaf   :  { %2408 = dma.done.wait [#allocation9], 2304  }
  0xb0   :  { %2409 = vsyncadd [#allocation9], 4294964992 }
  0xb1   :  { %2410 = dma.done.wait [#allocation12], 272  }
  0xb2   :  { %2411 = vsyncadd [#allocation12], 4294967024 }
  0xb3   :  { %2412 = dma.done.wait [#allocation15], 32  }
  0xb4   :  { %2413 = vsyncadd [#allocation15], 4294967264 }
  0xb5   :  { %2414 = dma.done.wait [#allocation18], 256  }
  0xb6   :  { %2415 = vsyncadd [#allocation18], 4294967040  ;;  %v2118_v0 = vld [vmem:[#allocation10] sm:$0xff]   ;;  %v2119_v1 = vld [vmem:[#allocation10 + $0x8] sm:$0xff]   ;;  %vm362_vm0 = vcmask 261120   ;;  %vm1491_vm1 = vcmask 257024  }
  0xb7   :  { %1990 = vmatprep.subr.bf16.mxu0 %v2118_v0  ;;  %v2120_v2 = vld [vmem:[#allocation8] sm:$0xff]   ;;  %2098 = vmatprep.subr.bf16.mxu1 %v2118_v0  ;;  %v2121_v3 = vld [vmem:[#allocation8 + $0x8] sm:$0xff]   ;;  %v2122_v4 = vld [vmem:[#allocation8 + $0x10] sm:$0xff]   ;;  %s2432_s9 = smov [#allocation19]  }
  0xb8   :  { %1991 = vmatpush3.bf16.msra.mxu0 %v2118_v0  ;;  %2100 = vmatpush3.bf16.msra.mxu1 %v2118_v0  ;;  %v2128_v5 = vld [vmem:[#allocation8 + $0x40] sm:$0xff]   ;;  %v2129_v6 = vld [vmem:[#allocation8 + $0x48] sm:$0xff]   ;;  %v2130_v7 = vld [vmem:[#allocation8 + $0x50] sm:$0xff]   ;;  %s1529_s15 = sshll.u32 %s2432_s9, 4  ;;  %s1530_s15 = int_to_ptr.vmem [resolvable:$true] %s1529_s15 }
  0xb9   :  { %1992 = vmatprep.subr.bf16.mxu0 %v2119_v1  ;;  %1994 = vmatprep.mubr.msk.bf16.mxu0 %vm362_vm0, %v2120_v2  ;;  %v2123_v8 = vld [vmem:[#allocation8 + $0x18] sm:$0xff]   ;;  %v2124_v9 = vld [vmem:[#allocation8 + $0x20] sm:$0xff]   ;;  %v2136_v12 = vld [vmem:[#allocation11] sm:$0xff]   ;;  %s2360_s17 = scalar_lea.vmem %s1530_s15, 2048  ;;  %p2365_p11 = scmp.lt.s32.totalorder %s1530_s15, %s1530_s15 }
  0xba   :  { %2099 = vmatprep.subr.bf16.mxu1 %v2119_v1  ;;  %2010 = vmatprep.mubr.msk.bf16.mxu1 %vm362_vm0, %v2128_v5  ;;  %v2131_v10 = vld [vmem:[#allocation8 + $0x58] sm:$0xff]   ;;  %v2132_v11 = vld [vmem:[#allocation8 + $0x60] sm:$0xff]   ;;  %v2139_v15 = vld [vmem:[#allocation17 + $0x8] sm:$0xff]   ;;  %p2361_p10 = scmp.ne.s32.totalorder %s1530_s15, %s2360_s17  ;;  %p2366_p12 = scmp.lt.s32.totalorder %s2360_s17, %s2360_s17 }
  0xbb   :  { %v2137_v13 = vld [vmem:[#allocation17] sm:$0xff]   ;;  %v2138_v14 = vld [vmem:[#allocation11 + $0x8] sm:$0xff]   ;;  %v2126_v17 = vld [vmem:[#allocation8 + $0x30] sm:$0xff]  }
  0xbc   :  { %1993 = vmatpush3.bf16.msra.mxu0 %v2119_v1  ;;  %2101 = vmatpush3.bf16.msra.mxu1 %v2119_v1  ;;  %v2125_v16 = vld [vmem:[#allocation8 + $0x28] sm:$0xff]   ;;  %v2134_v19 = vld [vmem:[#allocation8 + $0x70] sm:$0xff]   ;;  %v2127_v20 = vld [vmem:[#allocation8 + $0x38] sm:$0xff]   ;;  %p2367_p13 = por %p2366_p12, %p2365_p11 }
  0xbd   :  { %2026 = vmatprep.subr.bf16.mxu1 %v2136_v12  ;;  %2062 = vmatprep.subr.bf16.mxu0 %v2137_v13  ;;  %v2133_v18 = vld [vmem:[#allocation8 + $0x68] sm:$0xff]   ;;  %v2135_v21 = vld [vmem:[#allocation8 + $0x78] sm:$0xff]   ;;  %v1828_v23 = vld [vmem:[#allocation7] sm:$0xff]  }
  0xbe   :  { %v1921_v22 = vld [vmem:[#allocation7 + $0x8] sm:$0xff]   ;;  %v2692_v26 = vld [vmem:[#allocation2] sm:$0xff]   ;;  %v1923_v27 = vld [vmem:[#allocation7 + $0x18] sm:$0xff]   ;;  %v1829_v29 = vunpack.c.l.bf16 %v1828_v23  ;;  %v1830_v31 = vunpack.c.h.bf16 %v1828_v23  ;;  %p2368_p0 = pnand %p2367_p13, %p2361_p10 }
  0xbf   :  { %1995 = vmatmul.mubr.msk.bf16.vlgmr.msra.gmra.mrb[0].mxu0 %vm362_vm0, %v2121_v3  ;;  %2011 = vmatmul.mubr.msk.bf16.vlgmr.msra.gmra.mrb[0].mxu1 %vm362_vm0, %v2129_v6  ;;  %v2690_v24 = vld [vmem:[#allocation2 + $0x8] sm:$0xff]   ;;  %v1833_v25 = vunpack.c.l.bf16 %v1921_v22  ;;  %v2694_v28 = vld [vmem:[#allocation16] ss:$0 sm:$0xff]  ;;  %v1834_v30 = vunpack.c.h.bf16 %v1921_v22  ;;  %v1922_v32 = vld [vmem:[#allocation7 + $0x10] sm:$0xff]   ;;  %v1701_v35 = vunpack.c.l.bf16 %v2692_v26  ;;  %v1702_v37 = vunpack.c.h.bf16 %v2692_v26 }
  0xc0   :  { %1998 = vmatprep.mubr.msk.bf16.mxu0 %vm362_vm0, %v2122_v4  ;;  %2014 = vmatprep.mubr.msk.bf16.mxu1 %vm362_vm0, %v2130_v7  ;;  %v1705_v33 = vunpack.c.l.bf16 %v2690_v24  ;;  %v2697_v34 = vld [vmem:[#allocation2 + $0x18] sm:$0xff]   ;;  %v1706_v36 = vunpack.c.h.bf16 %v2690_v24  ;;  %v1841_v38 = vunpack.c.l.bf16 %v1923_v27  ;;  %v2702_v39 = vld [vmem:[#allocation2 + $0x10] sm:$0xff]   ;;  %v1925_v40 = vld [vmem:[#allocation7 + $0x28] sm:$0xff]   ;;  %v1837_v42 = vunpack.c.l.bf16 %v1922_v32 }
  0xc1   :  { %2027 = vmatpush3.bf16.msra.mxu1 %v2136_v12  ;;  %2063 = vmatpush3.bf16.msra.mxu0 %v2137_v13  ;;  %v2705_v41 = vadd.f32 %v1833_v25, %v2694_v28  ;;  %v1842_v43 = vunpack.c.h.bf16 %v1923_v27  ;;  %v1838_v44 = vunpack.c.h.bf16 %v1922_v32  ;;  %v1924_v45 = vld [vmem:[#allocation7 + $0x20] sm:$0xff]   ;;  %v2708_v46 = vadd.f32 %v1829_v29, %v2694_v28  ;;  %v1927_v50 = vld [vmem:[#allocation7 + $0x38] sm:$0xff]   ;;  %v2720_v54 = vld [vmem:[#allocation2 + $0x28] sm:$0xff]  }
  0xc2   :  { %2028 = vmatprep.subr.bf16.mxu1 %v2138_v14  ;;  %2064 = vmatprep.subr.bf16.mxu0 %v2139_v15  ;;  %v2711_v47 = vadd.f32 %v1834_v30, %v2694_v28  ;;  %v2714_v48 = vadd.f32 %v1830_v31, %v2694_v28  ;;  %v1849_v55 = vunpack.c.l.bf16 %v1925_v40  ;;  %v2722_v56 = vld [vmem:[#allocation2 + $0x20] sm:$0xff]   ;;  %v2725_v57 = vadd.f32 %v1841_v38, %v2694_v28  ;;  %v1926_v61 = vld [vmem:[#allocation7 + $0x30] sm:$0xff]   ;;  %v2736_v1 = vld [vmem:[#allocation2 + $0x38] sm:$0xff]  }
  0xc3   :  { %v1845_v58 = vunpack.c.l.bf16 %v1924_v45  ;;  %v1850_v59 = vunpack.c.h.bf16 %v1925_v40  ;;  %v1846_v60 = vunpack.c.h.bf16 %v1924_v45  ;;  %v2728_v62 = vadd.f32 %v1837_v42, %v2694_v28  ;;  %v1929_v12 = vld [vmem:[#allocation7 + $0x48] sm:$0xff]   ;;  %v1928_v13 = vld [vmem:[#allocation7 + $0x40] sm:$0xff]   ;;  %v1931_v25 = vld [vmem:[#allocation7 + $0x58] sm:$0xff]  }
  0xc4   :  { %v2731_v63 = vadd.f32 %v1842_v43, %v2694_v28  ;;  %v2734_v0 = vadd.f32 %v1838_v44, %v2694_v28  ;;  %v2765_v23 = vld [vmem:[#allocation2 + $0x40] sm:$0xff]   ;;  %v1865_v27 = vunpack.c.l.bf16 %v1929_v12  ;;  %v1861_v29 = vunpack.c.l.bf16 %v1928_v13  ;;  %v1930_v32 = vld [vmem:[#allocation7 + $0x50] sm:$0xff]   ;;  %v1933_v38 = vld [vmem:[#allocation7 + $0x68] sm:$0xff]  }
  0xc5   :  { %2029 = vmatpush3.bf16.msra.mxu1 %v2138_v14  ;;  %2065 = vmatpush3.bf16.msra.mxu0 %v2139_v15  ;;  %v2748_v14 = vadd.f32 %v1845_v58, %v2694_v28  ;;  %v2751_v15 = vadd.f32 %v1850_v59, %v2694_v28  ;;  %v1866_v30 = vunpack.c.h.bf16 %v1929_v12  ;;  %v1862_v31 = vunpack.c.h.bf16 %v1928_v13  ;;  %v2781_v59 = vld [vmem:[#allocation2 + $0x50] sm:$0xff]  }
  0xc6   :  { %v1733_v45 = vunpack.c.l.bf16 %v2765_v23  ;;  %v1873_v58 = vunpack.c.l.bf16 %v1931_v25  ;;  %v1044_v12 = vadd.f32 %v1865_v27, %v2694_v28  ;;  %v1042_v13 = vadd.f32 %v1861_v29, %v2694_v28 }
  0xc7   :  { %1999 = vmatmul.mubr.msk.bf16.gmra.mrb[4].mxu0 %vm362_vm0, %v2123_v8  ;;  %2015 = vmatmul.mubr.msk.bf16.gmra.mrb[4].mxu1 %vm362_vm0, %v2131_v10  ;;  %v2789_v22 = vadd.f32 %v1866_v30, %v2694_v28 }
  0xc8   :  { %2002 = vmatprep.mubr.msk.bf16.mxu0 %vm362_vm0, %v2124_v9  ;;  %2018 = vmatprep.mubr.msk.bf16.mxu1 %vm362_vm0, %v2132_v11  ;;  %v2803_v29 = vadd.f32 %v1873_v58, %v2694_v28 }
  0xcf   :  { %2003 = vmatmul.mubr.msk.bf16.gmra.mrb[8].mxu0 %vm362_vm0, %v2125_v16  ;;  %2019 = vmatmul.mubr.msk.bf16.gmra.mrb[8].mxu1 %vm362_vm0, %v2133_v18 }
  0xd0   :  { %2006 = vmatprep.mubr.msk.bf16.mxu0 %vm362_vm0, %v2126_v17  ;;  %2022 = vmatprep.mubr.msk.bf16.mxu1 %vm362_vm0, %v2134_v19 }
  0xd7   :  { %2007 = vmatmul.mubr.msk.bf16.gmra.mrb[12].mxu0 %vm362_vm0, %v2127_v20  ;;  %2023 = vmatmul.mubr.msk.bf16.gmra.mrb[12].mxu1 %vm362_vm0, %v2135_v21 }
  0xd8   :  { %2030 = vmatprep.mubr.msk.bf16.mxu1 %vm362_vm0, %v2120_v2  ;;  %v1857_v2 = vunpack.c.l.bf16 %v1927_v50 }
  0xdf   :  { %2031 = vmatmul.mubr.msk.bf16.vlgmr.msra.gmra.mrb[16].mxu1 %vm362_vm0, %v2121_v3 }
  0xe0   :  { %2034 = vmatprep.mubr.msk.bf16.mxu1 %vm362_vm0, %v2122_v4 }
  0xe7   :  { %2035 = vmatmul.mubr.msk.bf16.gmra.mrb[20].mxu1 %vm362_vm0, %v2123_v8  ;;  %v2745_v8 = vadd.f32 %v1849_v55, %v2694_v28  ;;  %v2779_v55 = vld [vmem:[#allocation2 + $0x58] sm:$0xff]  }
  0xe8   :  { %2038 = vmatprep.mubr.msk.bf16.mxu1 %vm362_vm0, %v2124_v9  ;;  %v1853_v9 = vunpack.c.l.bf16 %v1926_v61 }
  0xea   :  { %v2768_v40 = vadd.f32 %v1853_v9, %v2694_v28  ;;  %v1870_v9 = vunpack.c.h.bf16 %v1930_v32 }
  0xef   :  { %2039 = vmatmul.mubr.msk.bf16.gmra.mrb[24].mxu1 %vm362_vm0, %v2125_v16  ;;  %v2754_v16 = vadd.f32 %v1846_v60, %v2694_v28  ;;  %v1874_v60 = vunpack.c.h.bf16 %v1931_v25 }
  0xf0   :  { %2042 = vmatprep.mubr.msk.bf16.mxu1 %vm362_vm0, %v2126_v17  ;;  %v1932_v17 = vld [vmem:[#allocation7 + $0x60] sm:$0xff]  }
  0xf1   :  { %v2806_v30 = vadd.f32 %v1874_v60, %v2694_v28 }
  0xf7   :  { %2043 = vmatmul.mubr.msk.bf16.gmra.mrb[28].mxu1 %vm362_vm0, %v2127_v20  ;;  %v2798_v20 = vld [vmem:[#allocation2 + $0x60] sm:$0xff]  }
  0xf8   :  { %2046 = vmatprep.mubr.msk.bf16.mxu1 %vm362_vm0, %v2128_v5  ;;  %v1882_v5 = vunpack.c.h.bf16 %v1933_v38 }
  0xfa   :  { %v2836_v49 = vadd.f32 %v1882_v5, %v2694_v28 }
  0xff   :  { %2047 = vmatmul.mubr.msk.bf16.gmra.mrb[32].mxu1 %vm362_vm0, %v2129_v6  ;;  %v2800_v6 = vld [vmem:[#allocation13] ss:$0 sm:$0xff] }
 0x100   :  { %2050 = vmatprep.mubr.msk.bf16.mxu1 %vm362_vm0, %v2130_v7  ;;  %v2742_v7 = vld [vmem:[#allocation2 + $0x30] sm:$0xff]  }
 0x107   :  { %2051 = vmatmul.mubr.msk.bf16.gmra.mrb[36].mxu1 %vm362_vm0, %v2131_v10  ;;  %v1858_v10 = vunpack.c.h.bf16 %v1927_v50 }
 0x108   :  { %2054 = vmatprep.mubr.msk.bf16.mxu1 %vm362_vm0, %v2132_v11  ;;  %v1854_v11 = vunpack.c.h.bf16 %v1926_v61  ;;  %v1734_v61 = vunpack.c.h.bf16 %v2765_v23  ;;  %v2815_v23 = vadd.f32 %v1870_v9, %v2694_v28 }
 0x109   :  { %v2771_v42 = vadd.f32 %v1858_v10, %v2694_v28  ;;  %v2784_v10 = vld [vmem:[#allocation2 + $0x68] sm:$0xff]  }
 0x10a   :  { %v2774_v43 = vadd.f32 %v1854_v11, %v2694_v28  ;;  %v1881_v11 = vunpack.c.l.bf16 %v1933_v38  ;;  %v1877_v38 = vunpack.c.l.bf16 %v1932_v17 }
 0x10c   :  { %3140 = vst [vmem:[#allocation30_spill] sm:$0xff] %v2774_v43  ;;  %v2818_v25 = vadd.f32 %v1881_v11, %v2694_v28 }
 0x10f   :  { %2055 = vmatmul.mubr.msk.bf16.gmra.mrb[40].mxu1 %vm362_vm0, %v2133_v18  ;;  %v2757_v18 = vld [vmem:[#allocation2 + $0x48] sm:$0xff]  }
 0x110   :  { %2058 = vmatprep.mubr.msk.bf16.mxu1 %vm362_vm0, %v2134_v19  ;;  %v2760_v19 = vadd.f32 %v1857_v2, %v2694_v28  ;;  %v1737_v44 = vunpack.c.l.bf16 %v2757_v18  ;;  %v1738_v50 = vunpack.c.h.bf16 %v2757_v18  ;;  %v1869_v2 = vunpack.c.l.bf16 %v1930_v32 }
 0x111   :  { %v2792_v18 = vadd.f32 %v1862_v31, %v2694_v28 }
 0x112   :  { %v2812_v32 = vadd.f32 %v1869_v2, %v2694_v28 }
 0x117   :  { %2059 = vmatmul.mubr.msk.bf16.gmra.mrb[44].mxu1 %vm362_vm0, %v2135_v21 }
 0x192   :  { %v1996_v27 = vpop.f32.mrb[0].mxu0  ;;  %v2012_v53 = vpop.f32.mrb[0].mxu1 }
 0x193   :  { %v574_v4 = vadd.f32 %v1996_v27, %v1705_v33  ;;  %v445_v3 = vpop.f32.mrb[1].mxu0  ;;  %v2824_v33 = vld [vmem:[#allocation2 + $0x78] sm:$0xff]   ;;  %v590_v21 = vadd.f32 %v2012_v53, %v1737_v44  ;;  %v509_v51 = vpop.f32.mrb[1].mxu1 }
 0x194   :  { %v572_v58 = vadd.f32 %v1701_v35, %v445_v3  ;;  %v1997_v60 = vpop.f32.mrb[2].mxu0  ;;  %v2826_v27 = vld [vmem:[#allocation7 + $0x78] sm:$0xff]   ;;  %v1878_v35 = vunpack.c.h.bf16 %v1932_v17  ;;  %v588_v43 = vadd.f32 %v1733_v45, %v509_v51  ;;  %v2013_v24 = vpop.f32.mrb[2].mxu1 }
 0x195   :  { %v613_v2 = vadd.f32 %v2800_v6, %v574_v4  ;;  %v575_v9 = vadd.f32 %v1997_v60, %v1706_v36  ;;  %v448_v11 = vpop.f32.mrb[3].mxu0  ;;  %v1889_v60 = vunpack.c.l.bf16 %v2826_v27  ;;  %v591_v52 = vadd.f32 %v2013_v24, %v1738_v50  ;;  %v512_v26 = vpop.f32.mrb[3].mxu1 }
 0x196   :  { %v611_v3 = vadd.f32 %v2800_v6, %v572_v58  ;;  %v573_v31 = vadd.f32 %v1702_v37, %v448_v11  ;;  %v629_v58 = vadd.f32 %v2800_v6, %v590_v21  ;;  %v2844_v37 = vadd.f32 %v1877_v38, %v2694_v28 }
 0x197   :  { %v614_v4 = vadd.f32 %v2800_v6, %v575_v9  ;;  %v1060_v53 = vmul.f32 %v2705_v41, %v613_v2  ;;  %v627_v51 = vadd.f32 %v2800_v6, %v588_v43  ;;  %v589_v44 = vadd.f32 %v1734_v61, %v512_v26 }
 0x198   :  { %v612_v17 = vadd.f32 %v2800_v6, %v573_v31  ;;  %v1058_v45 = vmul.f32 %v2708_v46, %v611_v3  ;;  %v2851_v31 = vmul.f32 %v1044_v12, %v629_v58  ;;  %v630_v21 = vadd.f32 %v2800_v6, %v591_v52 }
 0x199   :  { %v1061_v5 = vmul.f32 %v2711_v47, %v614_v4  ;;  %v3141_v38 = vunpack.c.l.bf16 %v2697_v34  ;;  %v2856_v41 = vmul.f32 %v1042_v13, %v627_v51  ;;  %v628_v47 = vadd.f32 %v2800_v6, %v589_v44 }
 0x19a   :  { %v1059_v9 = vmul.f32 %v2714_v48, %v612_v17  ;;  %v2000_v11 = vpop.f32.mrb[4].mxu0  ;;  %v3142_v61 = vunpack.c.l.bf16 %v2702_v39  ;;  %v2862_v48 = vmul.f32 %v2789_v22, %v630_v21  ;;  %v2865_v12 = vadd.f32 %v1878_v35, %v2694_v28  ;;  %v2016_v58 = vpop.f32.mrb[4].mxu1 }
 0x19b   :  { %v1091_v50 = vpack.c.bf16 %v1061_v5, %v1060_v53  ;;  %v578_v24 = vadd.f32 %v2000_v11, %v3141_v38  ;;  %v461_v36 = vpop.f32.mrb[5].mxu0  ;;  %v3143_v3 = vunpack.c.h.bf16 %v2697_v34  ;;  %v2871_v17 = vmul.f32 %v2792_v18, %v628_v47  ;;  %v525_v51 = vpop.f32.mrb[5].mxu1 }
 0x19c   :  { %v1090_v43 = vpack.c.bf16 %v1059_v9, %v1058_v45  ;;  %v576_v46 = vadd.f32 %v3142_v61, %v461_v36  ;;  %v2001_v2 = vpop.f32.mrb[6].mxu0  ;;  %v2874_v26 = vadd.f32 %v1889_v60, %v2694_v28  ;;  %v3144_v22 = vunpack.c.h.bf16 %v2702_v39  ;;  %v2017_v45 = vpop.f32.mrb[6].mxu1 }
 0x19d   :  { %v617_v52 = vadd.f32 %v2800_v6, %v578_v24  ;;  %v579_v4 = vadd.f32 %v2001_v2, %v3143_v3  ;;  %v464_v13 = vpop.f32.mrb[7].mxu0  ;;  %v1099_v35 = vpack.c.bf16 %v2862_v48, %v2851_v31  ;;  %v3145_v34 = vunpack.c.l.bf16 %v2779_v55  ;;  %v528_v47 = vpop.f32.mrb[7].mxu1 }
 0x19e   :  { %v615_v36 = vadd.f32 %v2800_v6, %v576_v46  ;;  %v577_v53 = vadd.f32 %v3144_v22, %v464_v13  ;;  %2066 = vmatprep.mubr.msk.bf16.mxu0 %vm362_vm0, %v1090_v43  ;;  %v1098_v60 = vpack.c.bf16 %v2871_v17, %v2856_v41  ;;  %v3146_v44 = vunpack.c.l.bf16 %v2781_v59 }
 0x19f   :  { %v594_v5 = vadd.f32 %v2016_v58, %v3145_v34  ;;  %v618_v18 = vadd.f32 %v2800_v6, %v579_v4  ;;  %2067 = vmatmul.mubr.msk.bf16.vlgmr.msra.gmra.mrb[16].mxu0 %vm362_vm0, %v1091_v50  ;;  %v1762_v9 = vunpack.c.h.bf16 %v2824_v33  ;;  %v3147_v38 = vunpack.c.h.bf16 %v2779_v55  ;;  %v2901_v4 = vld [vmem:[#allocation2 + $0x70] sm:$0xff]  }
 0x1a0   :  { %v592_v39 = vadd.f32 %v3146_v44, %v525_v51  ;;  %v616_v11 = vadd.f32 %v2800_v6, %v577_v53  ;;  %v1890_v43 = vunpack.c.h.bf16 %v2826_v27  ;;  %v1064_v50 = vmul.f32 %v2725_v57, %v617_v52  ;;  %v2909_v57 = vld [vmem:[#allocation7 + $0x70] sm:$0xff]  }
 0x1a1   :  { %v633_v21 = vadd.f32 %v2800_v6, %v594_v5  ;;  %v595_v24 = vadd.f32 %v2017_v45, %v3147_v38  ;;  %v1065_v61 = vmul.f32 %v2731_v63, %v618_v18  ;;  %v3148_v2 = vunpack.c.h.bf16 %v2781_v59 }
 0x1a2   :  { %v631_v46 = vadd.f32 %v2800_v6, %v592_v39  ;;  %v1062_v13 = vmul.f32 %v2728_v62, %v615_v36  ;;  %v1063_v58 = vmul.f32 %v2734_v0, %v616_v11  ;;  %v2004_v55 = vpop.f32.mrb[8].mxu0  ;;  %v3149_v52 = vunpack.c.l.bf16 %v2720_v54  ;;  %v2020_v38 = vpop.f32.mrb[8].mxu1 }
 0x1a3   :  { %v593_v3 = vadd.f32 %v3148_v2, %v528_v47  ;;  %v2906_v22 = vmul.f32 %v2803_v29, %v633_v21  ;;  %v634_v53 = vadd.f32 %v2800_v6, %v595_v24  ;;  %v1093_v63 = vpack.c.bf16 %v1065_v61, %v1064_v50  ;;  %v477_v59 = vpop.f32.mrb[9].mxu0  ;;  %v541_v2 = vpop.f32.mrb[9].mxu1 }
 0x1a4   :  { %v582_v34 = vadd.f32 %v2004_v55, %v3149_v52  ;;  %v2914_v5 = vmul.f32 %v2812_v32, %v631_v46  ;;  %v1092_v36 = vpack.c.bf16 %v1063_v58, %v1062_v13  ;;  %v3150_v0 = vunpack.c.l.bf16 %v2722_v56  ;;  %v2005_v29 = vpop.f32.mrb[10].mxu0  ;;  %v2021_v58 = vpop.f32.mrb[10].mxu1 }
 0x1a5   :  { %v632_v62 = vadd.f32 %v2800_v6, %v593_v3  ;;  %v2920_v18 = vmul.f32 %v2806_v30, %v634_v53  ;;  %v1757_v44 = vunpack.c.l.bf16 %v2901_v4  ;;  %v3151_v45 = vunpack.c.h.bf16 %v2720_v54  ;;  %v480_v21 = vpop.f32.mrb[11].mxu0 }
 0x1a6   :  { %v580_v51 = vadd.f32 %v3150_v0, %v477_v59  ;;  %v621_v39 = vadd.f32 %v2800_v6, %v582_v34  ;;  %v1885_v24 = vunpack.c.l.bf16 %v2909_v57  ;;  %v3152_v50 = vunpack.c.h.bf16 %v2722_v56  ;;  %2070 = vmatprep.mubr.msk.bf16.mxu0 %vm362_vm0, %v1092_v36 }
 0x1a7   :  { %v583_v11 = vadd.f32 %v2005_v29, %v3151_v45  ;;  %v2927_v32 = vmul.f32 %v2815_v23, %v632_v62  ;;  %v1101_v61 = vpack.c.bf16 %v2920_v18, %v2906_v22  ;;  %v3153_v54 = vunpack.c.l.bf16 %v2784_v10  ;;  %2071 = vmatmul.mubr.msk.bf16.gmra.mrb[20].mxu0 %vm362_vm0, %v1093_v63  ;;  %v544_v62 = vpop.f32.mrb[11].mxu1 }
 0x1a8   :  { %v619_v47 = vadd.f32 %v2800_v6, %v580_v51  ;;  %v581_v30 = vadd.f32 %v3152_v50, %v480_v21  ;;  %v3154_v13 = vunpack.c.l.bf16 %v2798_v20  ;;  %v1758_v55 = vunpack.c.h.bf16 %v2901_v4 }
 0x1a9   :  { %v598_v46 = vadd.f32 %v2020_v38, %v3153_v54  ;;  %v622_v23 = vadd.f32 %v2800_v6, %v583_v11  ;;  %v1100_v3 = vpack.c.bf16 %v2927_v32, %v2914_v5  ;;  %v3155_v34 = vunpack.c.h.bf16 %v2784_v10  ;;  %v1910_v32 = vld [vmem:[#allocation5 + $0x28] sm:$0xff]  }
 0x1aa   :  { %v596_v56 = vadd.f32 %v3154_v13, %v541_v2  ;;  %v620_v53 = vadd.f32 %v2800_v6, %v581_v30  ;;  %v1886_v36 = vunpack.c.h.bf16 %v2909_v57  ;;  %v1068_v63 = vmul.f32 %v2745_v8, %v621_v39  ;;  %v2008_v21 = vpop.f32.mrb[12].mxu0 }
 0x1ab   :  { %v637_v52 = vadd.f32 %v2800_v6, %v598_v46  ;;  %v599_v59 = vadd.f32 %v2021_v58, %v3155_v34  ;;  %v1069_v0 = vmul.f32 %v2751_v15, %v622_v23  ;;  %v3156_v29 = vunpack.c.h.bf16 %v2798_v20  ;;  %v493_v15 = vpop.f32.mrb[13].mxu0 }
 0x1ac   :  { %v635_v51 = vadd.f32 %v2800_v6, %v596_v56  ;;  %v1066_v4 = vmul.f32 %v2748_v14, %v619_v47  ;;  %v1067_v11 = vmul.f32 %v2754_v16, %v620_v53  ;;  %v3157_v8 = vunpack.c.l.bf16 %v2736_v1  ;;  %v2009_v47 = vpop.f32.mrb[14].mxu0  ;;  %v2024_v56 = vpop.f32.mrb[12].mxu1  ;;  %v1906_v53 = vld [vmem:[#allocation5 + $0x8] sm:$0xff]  }
 0x1ad   :  { %v597_v45 = vadd.f32 %v3156_v29, %v544_v62  ;;  %v2958_v10 = vmul.f32 %v2818_v25, %v637_v52  ;;  %v638_v38 = vadd.f32 %v2800_v6, %v599_v59  ;;  %v1095_v57 = vpack.c.bf16 %v1069_v0, %v1068_v63  ;;  %v496_v23 = vpop.f32.mrb[15].mxu0  ;;  %v557_v59 = vpop.f32.mrb[13].mxu1 }
 0x1ae   :  { %v586_v39 = vadd.f32 %v2008_v21, %v3157_v8  ;;  %v2964_v50 = vmul.f32 %v2844_v37, %v635_v51  ;;  %v1094_v30 = vpack.c.bf16 %v1067_v11, %v1066_v4  ;;  %v3158_v14 = vunpack.c.l.bf16 %v2742_v7  ;;  %v2025_v63 = vpop.f32.mrb[14].mxu1  ;;  %v1764_v11 = vld [vmem:[#allocation5] sm:$0xff]  }
 0x1af   :  { %v636_v20 = vadd.f32 %v2800_v6, %v597_v45  ;;  %v2970_v25 = vmul.f32 %v2836_v49, %v638_v38  ;;  %v1057_v54 = vadd.f32 %v1890_v43, %v2694_v28  ;;  %v3159_v2 = vunpack.c.h.bf16 %v2736_v1  ;;  %v560_v45 = vpop.f32.mrb[15].mxu1 }
 0x1b0   :  { %v584_v16 = vadd.f32 %v3158_v14, %v493_v15  ;;  %v625_v46 = vadd.f32 %v2800_v6, %v586_v39  ;;  %v1054_v58 = vadd.f32 %v1885_v24, %v2694_v28  ;;  %v3160_v52 = vunpack.c.h.bf16 %v2742_v7  ;;  %2074 = vmatprep.mubr.msk.bf16.mxu0 %vm362_vm0, %v1094_v30 }
 0x1b1   :  { %v587_v37 = vadd.f32 %v2009_v47, %v3159_v2  ;;  %v2979_v13 = vmul.f32 %v2865_v12, %v636_v20  ;;  %v1103_v27 = vpack.c.bf16 %v2970_v25, %v2958_v10  ;;  %v3161_v1 = vunpack.c.l.bf16 %v2824_v33  ;;  %2075 = vmatmul.mubr.msk.bf16.gmra.mrb[24].mxu0 %vm362_vm0, %v1095_v57 }
 0x1b2   :  { %v623_v49 = vadd.f32 %v2800_v6, %v584_v16  ;;  %v585_v34 = vadd.f32 %v3160_v52, %v496_v23  ;;  %v600_v62 = vadd.f32 %v1757_v44, %v557_v59  ;;  %v1055_v7 = vadd.f32 %v1886_v36, %v2694_v28  ;;  %v3162_v28 = vld [vmem:[#allocation30_spill] sm:$0xff]  ;;  %v2032_v47 = vpop.f32.mrb[16].mxu1 }
 0x1b3   :  { %v602_v43 = vadd.f32 %v2024_v56, %v3161_v1  ;;  %v626_v12 = vadd.f32 %v2800_v6, %v587_v37  ;;  %v1102_v24 = vpack.c.bf16 %v2979_v13, %v2964_v50  ;;  %v603_v29 = vadd.f32 %v2025_v63, %v1762_v9 }
 0x1b4   :  { %v624_v0 = vadd.f32 %v2800_v6, %v585_v34  ;;  %v1769_v4 = vunpack.c.l.bf16 %v1906_v53  ;;  %v1072_v21 = vmul.f32 %v2760_v19, %v625_v46  ;;  %v639_v57 = vadd.f32 %v2800_v6, %v600_v62  ;;  %v3007_v46 = vld [vmem:[#allocation14] ss:$0 sm:$0xff] }
 0x1b5   :  { %v641_v51 = vadd.f32 %v2800_v6, %v602_v43  ;;  %v1073_v38 = vmul.f32 %v2771_v42, %v626_v12  ;;  %v601_v44 = vadd.f32 %v1758_v55, %v560_v45  ;;  %v1070_v8 = vmul.f32 %v2768_v40, %v623_v49  ;;  %v1907_v49 = vld [vmem:[#allocation5 + $0x10] sm:$0xff]  }
 0x1b6   :  { %v1071_v36 = vmul.f32 %v3162_v28, %v624_v0  ;;  %v642_v15 = vadd.f32 %v2800_v6, %v603_v29  ;;  %v1086_v9 = vmul.f32 %v1054_v58, %v639_v57  ;;  %v1765_v30 = vunpack.c.l.bf16 %v1764_v11 }
 0x1b7   :  { %v1088_v39 = vmul.f32 %v2874_v26, %v641_v51  ;;  %v1097_v33 = vpack.c.bf16 %v1073_v38, %v1072_v21  ;;  %v640_v20 = vadd.f32 %v2800_v6, %v601_v44  ;;  %v1770_v16 = vunpack.c.h.bf16 %v1906_v53  ;;  %v757_v26 = vpop.f32.mrb[17].mxu1  ;;  %v1908_v6 = vld [vmem:[#allocation5 + $0x18] sm:$0xff]  }
 0x1b8   :  { %v1096_v14 = vpack.c.bf16 %v1071_v36, %v1070_v8  ;;  %v1089_v19 = vmul.f32 %v1057_v54, %v642_v15  ;;  %v1766_v55 = vunpack.c.h.bf16 %v1764_v11  ;;  %v886_v2 = vadd.f32 %v2032_v47, %v1769_v4  ;;  %v2033_v56 = vpop.f32.mrb[18].mxu1 }
 0x1b9   :  { %v1087_v42 = vmul.f32 %v1055_v7, %v640_v20  ;;  %v884_v23 = vadd.f32 %v1765_v30, %v757_v26  ;;  %v887_v58 = vadd.f32 %v2033_v56, %v1770_v16  ;;  %v760_v53 = vpop.f32.mrb[19].mxu1  ;;  %v1777_v59 = vunpack.c.l.bf16 %v1908_v6  ;;  %v1911_v16 = vld [vmem:[#allocation5 + $0x30] sm:$0xff]  }
 0x1ba   :  { %2078 = vmatprep.mubr.msk.bf16.mxu0 %vm362_vm0, %v1096_v14  ;;  %v1105_v40 = vpack.c.bf16 %v1089_v19, %v1088_v39  ;;  %v925_v54 = vadd.f32 %v3007_v46, %v886_v2  ;;  %v885_v34 = vadd.f32 %v1766_v55, %v760_v53  ;;  %v1773_v63 = vunpack.c.l.bf16 %v1907_v49  ;;  %v1912_v14 = vld [vmem:[#allocation5 + $0x38] sm:$0xff]  }
 0x1bb   :  { %2079 = vmatmul.mubr.msk.bf16.gmra.mrb[28].mxu0 %vm362_vm0, %v1097_v33  ;;  %v1104_v37 = vpack.c.bf16 %v1087_v42, %v1086_v9  ;;  %v923_v52 = vadd.f32 %v3007_v46, %v884_v23  ;;  %v926_v43 = vadd.f32 %v3007_v46, %v887_v58  ;;  %v1778_v31 = vunpack.c.h.bf16 %v1908_v6 }
 0x1bc   :  { %2082 = vmatprep.mubr.msk.bf16.mxu0 %vm362_vm0, %v1098_v60  ;;  %v1669_v1 = vpack.c.bf16 %v925_v54, %v925_v54  ;;  %v924_v62 = vadd.f32 %v3007_v46, %v885_v34  ;;  %v2036_v60 = vpop.f32.mrb[20].mxu1  ;;  %v1785_v10 = vunpack.c.l.bf16 %v1910_v32  ;;  %v1786_v28 = vunpack.c.h.bf16 %v1910_v32 }
 0x1bd   :  { %v1667_v12 = vpack.c.bf16 %v923_v52, %v923_v52  ;;  %v1670_v41 = vpack.c.bf16 %v926_v43, %v926_v43  ;;  %v890_v7 = vadd.f32 %v2036_v60, %v1777_v59  ;;  %v773_v0 = vpop.f32.mrb[21].mxu1  ;;  %v1793_v55 = vunpack.c.l.bf16 %v1912_v14 }
 0x1be   :  { %1494 = vst.msk [vmem:[#allocation19 + $0x8] sm:$0xf] %vm1491_vm1, %v1669_v1  ;;  %v1668_v17 = vpack.c.bf16 %v924_v62, %v924_v62  ;;  %v888_v51 = vadd.f32 %v1773_v63, %v773_v0  ;;  %v2037_v48 = vpop.f32.mrb[22].mxu1  ;;  %v1794_v58 = vunpack.c.h.bf16 %v1912_v14  ;;  %v1913_v63 = vld [vmem:[#allocation5 + $0x40] sm:$0xff]  }
 0x1bf   :  { %1492 = vst.msk [vmem:[#allocation19] sm:$0xf] %vm1491_vm1, %v1667_v12  ;;  %1495 = vst.msk [vmem:[#allocation19 + $0xc] sm:$0xf] %vm1491_vm1, %v1670_v41  ;;  %v929_v29 = vadd.f32 %v3007_v46, %v890_v7  ;;  %v776_v22 = vpop.f32.mrb[23].mxu1  ;;  %v891_v5 = vadd.f32 %v2037_v48, %v1778_v31  ;;  %v1914_v12 = vld [vmem:[#allocation5 + $0x48] sm:$0xff]   ;;  %v1797_v7 = vunpack.c.l.bf16 %v1913_v63 }
 0x1c0   :  { %1493 = vst.msk [vmem:[#allocation19 + $0x4] sm:$0xf] %vm1491_vm1, %v1668_v17  ;;  %v927_v45 = vadd.f32 %v3007_v46, %v888_v51  ;;  %v1801_v60 = vunpack.c.l.bf16 %v1914_v12  ;;  %v1802_v48 = vunpack.c.h.bf16 %v1914_v12 }
 0x1c1   :  { %v1673_v4 = vpack.c.bf16 %v929_v29, %v929_v29  ;;  %v930_v50 = vadd.f32 %v3007_v46, %v891_v5 }
 0x1c2   :  { %v1671_v11 = vpack.c.bf16 %v927_v45, %v927_v45 }
 0x1c3   :  { %2083 = vmatmul.mubr.msk.bf16.gmra.mrb[32].mxu0 %vm362_vm0, %v1099_v35  ;;  %1498 = vst.msk [vmem:[#allocation19 + $0x18] sm:$0xf] %vm1491_vm1, %v1673_v4  ;;  %v1774_v35 = vunpack.c.h.bf16 %v1907_v49  ;;  %v1790_v49 = vunpack.c.h.bf16 %v1911_v16 }
 0x1c4   :  { %2086 = vmatprep.mubr.msk.bf16.mxu0 %vm362_vm0, %v1100_v3  ;;  %1496 = vst.msk [vmem:[#allocation19 + $0x10] sm:$0xf] %vm1491_vm1, %v1671_v11  ;;  %v1909_v3 = vld [vmem:[#allocation5 + $0x20] sm:$0xff]  }
 0x1c5   :  { %v889_v18 = vadd.f32 %v1774_v35, %v776_v22  ;;  %v1781_v25 = vunpack.c.l.bf16 %v1909_v3  ;;  %v1782_v39 = vunpack.c.h.bf16 %v1909_v3  ;;  %v1798_v22 = vunpack.c.h.bf16 %v1913_v63 }
 0x1c7   :  { %v928_v13 = vadd.f32 %v3007_v46, %v889_v18 }
 0x1c9   :  { %v1672_v21 = vpack.c.bf16 %v928_v13, %v928_v13 }
 0x1cb   :  { %2087 = vmatmul.mubr.msk.bf16.gmra.mrb[36].mxu0 %vm362_vm0, %v1101_v61  ;;  %v2040_v61 = vpop.f32.mrb[24].mxu1  ;;  %1497 = vst.msk [vmem:[#allocation19 + $0x14] sm:$0xf] %vm1491_vm1, %v1672_v21 }
 0x1cc   :  { %2090 = vmatprep.mubr.msk.bf16.mxu0 %vm362_vm0, %v1102_v24  ;;  %v1674_v24 = vpack.c.bf16 %v930_v50, %v930_v50  ;;  %v894_v38 = vadd.f32 %v2040_v61, %v1785_v10  ;;  %v1916_v50 = vld [vmem:[#allocation5 + $0x58] sm:$0xff]   ;;  %v1915_v10 = vld [vmem:[#allocation5 + $0x50] sm:$0xff]  }
 0x1cd   :  { %v1805_v21 = vunpack.c.l.bf16 %v1915_v10 }
 0x1ce   :  { %1499 = vst.msk [vmem:[#allocation19 + $0x1c] sm:$0xf] %vm1491_vm1, %v1674_v24  ;;  %v933_v44 = vadd.f32 %v3007_v46, %v894_v38  ;;  %v1809_v24 = vunpack.c.l.bf16 %v1916_v50 }
 0x1d0   :  { %v1677_v33 = vpack.c.bf16 %v933_v44, %v933_v44 }
 0x1d2   :  { %1502 = vst.msk [vmem:[#allocation19 + $0x28] sm:$0xf] %vm1491_vm1, %v1677_v33 }
 0x1d3   :  { %2091 = vmatmul.mubr.msk.bf16.gmra.mrb[40].mxu0 %vm362_vm0, %v1103_v27  ;;  %v789_v27 = vpop.f32.mrb[25].mxu1 }
 0x1d4   :  { %2094 = vmatprep.mubr.msk.bf16.mxu0 %vm362_vm0, %v1104_v37  ;;  %v892_v57 = vadd.f32 %v1781_v25, %v789_v27  ;;  %v2041_v36 = vpop.f32.mrb[26].mxu1 }
 0x1d5   :  { %v792_v15 = vpop.f32.mrb[27].mxu1  ;;  %v895_v20 = vadd.f32 %v2041_v36, %v1786_v28 }
 0x1d6   :  { %v931_v8 = vadd.f32 %v3007_v46, %v892_v57  ;;  %v893_v30 = vadd.f32 %v1782_v39, %v792_v15  ;;  %v2044_v19 = vpop.f32.mrb[28].mxu1  ;;  %v1810_v15 = vunpack.c.h.bf16 %v1916_v50 }
 0x1d7   :  { %v934_v42 = vadd.f32 %v3007_v46, %v895_v20  ;;  %v805_v2 = vpop.f32.mrb[29].mxu1  ;;  %v898_v23 = vadd.f32 %v2044_v19, %v1793_v55  ;;  %v1917_v55 = vld [vmem:[#allocation5 + $0x60] sm:$0xff]  }
 0x1d8   :  { %v1675_v9 = vpack.c.bf16 %v931_v8, %v931_v8  ;;  %v932_v47 = vadd.f32 %v3007_v46, %v893_v30  ;;  %v2045_v53 = vpop.f32.mrb[30].mxu1 }
 0x1d9   :  { %v1678_v26 = vpack.c.bf16 %v934_v42, %v934_v42  ;;  %v937_v6 = vadd.f32 %v3007_v46, %v898_v23  ;;  %v808_v52 = vpop.f32.mrb[31].mxu1  ;;  %v899_v43 = vadd.f32 %v2045_v53, %v1794_v58  ;;  %v1918_v42 = vld [vmem:[#allocation5 + $0x68] sm:$0xff]  }
 0x1da   :  { %1500 = vst.msk [vmem:[#allocation19 + $0x20] sm:$0xf] %vm1491_vm1, %v1675_v9  ;;  %v1676_v37 = vpack.c.bf16 %v932_v47, %v932_v47  ;;  %v897_v59 = vadd.f32 %v1790_v49, %v808_v52  ;;  %v2048_v62 = vpop.f32.mrb[32].mxu1  ;;  %v1806_v9 = vunpack.c.h.bf16 %v1915_v10  ;;  %v1818_v52 = vunpack.c.h.bf16 %v1918_v42 }
 0x1db   :  { %2095 = vmatmul.mubr.msk.bf16.gmra.mrb[44].mxu0 %vm362_vm0, %v1105_v40  ;;  %v1789_v40 = vunpack.c.l.bf16 %v1911_v16  ;;  %1503 = vst.msk [vmem:[#allocation19 + $0x2c] sm:$0xf] %vm1491_vm1, %v1678_v26  ;;  %v1681_v34 = vpack.c.bf16 %v937_v6, %v937_v6  ;;  %v938_v41 = vadd.f32 %v3007_v46, %v899_v43  ;;  %v821_v0 = vpop.f32.mrb[33].mxu1  ;;  %v902_v45 = vadd.f32 %v2048_v62, %v1801_v60  ;;  %v1919_v60 = vld [vmem:[#allocation5 + $0x70] sm:$0xff]  }
 0x1dc   :  { %1501 = vst.msk [vmem:[#allocation19 + $0x24] sm:$0xf] %vm1491_vm1, %v1676_v37  ;;  %v936_v17 = vadd.f32 %v3007_v46, %v897_v59  ;;  %v900_v4 = vadd.f32 %v1797_v7, %v821_v0  ;;  %v2049_v35 = vpop.f32.mrb[34].mxu1  ;;  %v1817_v26 = vunpack.c.l.bf16 %v1918_v42  ;;  %v1813_v37 = vunpack.c.l.bf16 %v1917_v55 }
 0x1dd   :  { %v896_v56 = vadd.f32 %v1789_v40, %v805_v2  ;;  %1506 = vst.msk [vmem:[#allocation19 + $0x38] sm:$0xf] %vm1491_vm1, %v1681_v34  ;;  %v1682_v51 = vpack.c.bf16 %v938_v41, %v938_v41  ;;  %v941_v11 = vadd.f32 %v3007_v46, %v902_v45  ;;  %v824_v5 = vpop.f32.mrb[35].mxu1  ;;  %v903_v61 = vadd.f32 %v2049_v35, %v1802_v48  ;;  %v1920_v41 = vld [vmem:[#allocation5 + $0x78] sm:$0xff]  }
 0x1de   :  { %v1680_v29 = vpack.c.bf16 %v936_v17, %v936_v17  ;;  %v939_v31 = vadd.f32 %v3007_v46, %v900_v4  ;;  %v901_v3 = vadd.f32 %v1798_v22, %v824_v5  ;;  %v2052_v13 = vpop.f32.mrb[36].mxu1  ;;  %v1826_v5 = vunpack.c.h.bf16 %v1920_v41 }
 0x1df   :  { %v935_v54 = vadd.f32 %v3007_v46, %v896_v56  ;;  %1507 = vst.msk [vmem:[#allocation19 + $0x3c] sm:$0xf] %vm1491_vm1, %v1682_v51  ;;  %v1685_v18 = vpack.c.bf16 %v941_v11, %v941_v11  ;;  %v942_v25 = vadd.f32 %v3007_v46, %v903_v61  ;;  %v837_v38 = vpop.f32.mrb[37].mxu1  ;;  %v906_v8 = vadd.f32 %v2052_v13, %v1809_v24 }
 0x1e0   :  { %1505 = vst.msk [vmem:[#allocation19 + $0x34] sm:$0xf] %vm1491_vm1, %v1680_v29  ;;  %v1683_v32 = vpack.c.bf16 %v939_v31, %v939_v31  ;;  %v940_v27 = vadd.f32 %v3007_v46, %v901_v3  ;;  %v904_v28 = vadd.f32 %v1805_v21, %v837_v38  ;;  %v2053_v33 = vpop.f32.mrb[38].mxu1  ;;  %v1825_v51 = vunpack.c.l.bf16 %v1920_v41 }
 0x1e1   :  { %v1679_v1 = vpack.c.bf16 %v935_v54, %v935_v54  ;;  %1510 = vst.msk [vmem:[#allocation19 + $0x48] sm:$0xf] %vm1491_vm1, %v1685_v18  ;;  %v1686_v57 = vpack.c.bf16 %v942_v25, %v942_v25  ;;  %v945_v36 = vadd.f32 %v3007_v46, %v906_v8  ;;  %v840_v20 = vpop.f32.mrb[39].mxu1  ;;  %v907_v19 = vadd.f32 %v2053_v33, %v1810_v15 }
 0x1e2   :  { %1508 = vst.msk [vmem:[#allocation19 + $0x40] sm:$0xf] %vm1491_vm1, %v1683_v32  ;;  %v1684_v44 = vpack.c.bf16 %v940_v27, %v940_v27  ;;  %v943_v39 = vadd.f32 %v3007_v46, %v904_v28  ;;  %v905_v16 = vadd.f32 %v1806_v9, %v840_v20  ;;  %v2056_v47 = vpop.f32.mrb[40].mxu1  ;;  %v1821_v29 = vunpack.c.l.bf16 %v1919_v60 }
 0x1e3   :  { %1504 = vst.msk [vmem:[#allocation19 + $0x30] sm:$0xf] %vm1491_vm1, %v1679_v1  ;;  %1511 = vst.msk [vmem:[#allocation19 + $0x4c] sm:$0xf] %vm1491_vm1, %v1686_v57  ;;  %v1689_v30 = vpack.c.bf16 %v945_v36, %v945_v36  ;;  %v946_v40 = vadd.f32 %v3007_v46, %v907_v19  ;;  %v853_v23 = vpop.f32.mrb[41].mxu1  ;;  %v910_v54 = vadd.f32 %v2056_v47, %v1817_v26  ;;  %v1814_v1 = vunpack.c.h.bf16 %v1917_v55 }
 0x1e4   :  { %1509 = vst.msk [vmem:[#allocation19 + $0x44] sm:$0xf] %vm1491_vm1, %v1684_v44  ;;  %v1687_v14 = vpack.c.bf16 %v943_v39, %v943_v39  ;;  %v944_v2 = vadd.f32 %v3007_v46, %v905_v16  ;;  %v908_v58 = vadd.f32 %v1813_v37, %v853_v23  ;;  %v2057_v34 = vpop.f32.mrb[42].mxu1  ;;  %v1822_v32 = vunpack.c.h.bf16 %v1919_v60 }
 0x1e5   :  { %1514 = vst.msk [vmem:[#allocation19 + $0x58] sm:$0xf] %vm1491_vm1, %v1689_v30  ;;  %v1690_v56 = vpack.c.bf16 %v946_v40, %v946_v40  ;;  %v949_v53 = vadd.f32 %v3007_v46, %v910_v54  ;;  %v856_v43 = vpop.f32.mrb[43].mxu1  ;;  %v911_v62 = vadd.f32 %v2057_v34, %v1818_v52 }
 0x1e6   :  { %1512 = vst.msk [vmem:[#allocation19 + $0x50] sm:$0xf] %vm1491_vm1, %v1687_v14  ;;  %v1688_v6 = vpack.c.bf16 %v944_v2, %v944_v2  ;;  %v947_v49 = vadd.f32 %v3007_v46, %v908_v58  ;;  %v909_v63 = vadd.f32 %v1814_v1, %v856_v43 }
 0x1e7   :  { %1515 = vst.msk [vmem:[#allocation19 + $0x5c] sm:$0xf] %vm1491_vm1, %v1690_v56  ;;  %v1693_v59 = vpack.c.bf16 %v949_v53, %v949_v53  ;;  %v950_v7 = vadd.f32 %v3007_v46, %v911_v62 }
 0x1e8   :  { %1513 = vst.msk [vmem:[#allocation19 + $0x54] sm:$0xf] %vm1491_vm1, %v1688_v6  ;;  %v1691_v12 = vpack.c.bf16 %v947_v49, %v947_v49  ;;  %v948_v0 = vadd.f32 %v3007_v46, %v909_v63 }
 0x1e9   :  { %1518 = vst.msk [vmem:[#allocation19 + $0x68] sm:$0xf] %vm1491_vm1, %v1693_v59  ;;  %v1694_v4 = vpack.c.bf16 %v950_v7, %v950_v7 }
 0x1ea   :  { %v2060_v17 = vpop.f32.mrb[44].mxu1  ;;  %1516 = vst.msk [vmem:[#allocation19 + $0x60] sm:$0xf] %vm1491_vm1, %v1691_v12  ;;  %v1692_v11 = vpack.c.bf16 %v948_v0, %v948_v0 }
 0x1eb   :  { %v869_v45 = vpop.f32.mrb[45].mxu1  ;;  %v914_v31 = vadd.f32 %v2060_v17, %v1825_v51  ;;  %1519 = vst.msk [vmem:[#allocation19 + $0x6c] sm:$0xf] %vm1491_vm1, %v1694_v4 }
 0x1ec   :  { %v912_v48 = vadd.f32 %v1821_v29, %v869_v45  ;;  %1517 = vst.msk [vmem:[#allocation19 + $0x64] sm:$0xf] %vm1491_vm1, %v1692_v11  ;;  %v2061_v18 = vpop.f32.mrb[46].mxu1 }
 0x1ed   :  { %v953_v35 = vadd.f32 %v3007_v46, %v914_v31  ;;  %v872_v61 = vpop.f32.mrb[47].mxu1  ;;  %v915_v13 = vadd.f32 %v2061_v18, %v1826_v5 }
 0x1ee   :  { %v951_v22 = vadd.f32 %v3007_v46, %v912_v48  ;;  %v913_v10 = vadd.f32 %v1822_v32, %v872_v61 }
 0x1ef   :  { %v1697_v3 = vpack.c.bf16 %v953_v35, %v953_v35  ;;  %v954_v25 = vadd.f32 %v3007_v46, %v915_v13 }
 0x1f0   :  { %v1695_v50 = vpack.c.bf16 %v951_v22, %v951_v22  ;;  %v952_v27 = vadd.f32 %v3007_v46, %v913_v10 }
 0x1f1   :  { %1522 = vst.msk [vmem:[#allocation19 + $0x78] sm:$0xf] %vm1491_vm1, %v1697_v3  ;;  %v1698_v24 = vpack.c.bf16 %v954_v25, %v954_v25 }
 0x1f2   :  { %1520 = vst.msk [vmem:[#allocation19 + $0x70] sm:$0xf] %vm1491_vm1, %v1695_v50  ;;  %v1696_v21 = vpack.c.bf16 %v952_v27, %v952_v27 }
 0x1f3   :  { %1523 = vst.msk [vmem:[#allocation19 + $0x7c] sm:$0xf] %vm1491_vm1, %v1698_v24 }
 0x1f4   :  { %1521 = vst.msk [vmem:[#allocation19 + $0x74] sm:$0xf] %vm1491_vm1, %v1696_v21 }
 0x1f5   :  { %2371 = shalt.err (!%p2368_p0)
}
 0x1f6   :  { %s2372_s21 = scalar_lea.hbm %s3138_s10, 2048 }
 0x1f7   :  { %p2373_p1 = scmp.ne.s32.totalorder %s3138_s10, %s2372_s21  ;;  %p2376_p2 = scmp.lt.u32.totalorder %s2372_s21, %s3138_s10 }
 0x1f9   :  { %p2378_p3 = pnand %p2376_p2, %p2373_p1 }
 0x1fb   :  { %2381 = shalt.err (!%p2378_p3)
}
 0x1fc   :  { %1535 = dma.vmem_to_hbm [thread:$0]  %s1530_s15, 2048, %s3138_s10, [#allocation4], %s2422_s29, %s2422_s29, %s2423_s30  }
 0x1fd   :  { %s2433_s10 = smov [#allocation20]  }
 0x1fe   :  { %s1541_s29 = sshll.u32 %s2433_s10, 4  ;;  %s1542_s29 = int_to_ptr.vmem [resolvable:$true] %s1541_s29 }
 0x1ff   :  { %s2382_s30 = scalar_lea.vmem %s1542_s29, 4096  ;;  %p2387_p5 = scmp.lt.s32.totalorder %s1542_s29, %s1542_s29 }
 0x200   :  { %p2383_p4 = scmp.ne.s32.totalorder %s1542_s29, %s2382_s30  ;;  %p2388_p6 = scmp.lt.s32.totalorder %s2382_s30, %s2382_s30 }
 0x202   :  { %p2389_p7 = por %p2388_p6, %p2387_p5 }
 0x204   :  { %p2390_p8 = pnand %p2389_p7, %p2383_p4 }
 0x272   :  { %v2068_v46 = vpop.f32.mrb[16].mxu0 }
 0x273   :  { %1333 = vst [vmem:[#allocation20 + $0x10] sm:$0xff] %v2068_v46  ;;  %v1204_v38 = vpop.f32.mrb[17].mxu0 }
 0x274   :  { %1331 = vst [vmem:[#allocation20] sm:$0xff] %v1204_v38  ;;  %v2069_v57 = vpop.f32.mrb[18].mxu0 }
 0x275   :  { %1334 = vst [vmem:[#allocation20 + $0x18] sm:$0xff] %v2069_v57  ;;  %v1207_v44 = vpop.f32.mrb[19].mxu0 }
 0x276   :  { %1332 = vst [vmem:[#allocation20 + $0x8] sm:$0xff] %v1207_v44 }
 0x27a   :  { %v2072_v8 = vpop.f32.mrb[20].mxu0 }
 0x27b   :  { %1337 = vst [vmem:[#allocation20 + $0x30] sm:$0xff] %v2072_v8  ;;  %v1220_v28 = vpop.f32.mrb[21].mxu0 }
 0x27c   :  { %1335 = vst [vmem:[#allocation20 + $0x20] sm:$0xff] %v1220_v28  ;;  %v2073_v36 = vpop.f32.mrb[22].mxu0 }
 0x27d   :  { %1338 = vst [vmem:[#allocation20 + $0x38] sm:$0xff] %v2073_v36  ;;  %v1223_v39 = vpop.f32.mrb[23].mxu0 }
 0x27e   :  { %1336 = vst [vmem:[#allocation20 + $0x28] sm:$0xff] %v1223_v39 }
 0x284   :  { %v2076_v15 = vpop.f32.mrb[24].mxu0 }
 0x285   :  { %1341 = vst [vmem:[#allocation20 + $0x50] sm:$0xff] %v2076_v15  ;;  %v1236_v33 = vpop.f32.mrb[25].mxu0 }
 0x286   :  { %1339 = vst [vmem:[#allocation20 + $0x40] sm:$0xff] %v1236_v33  ;;  %v2077_v9 = vpop.f32.mrb[26].mxu0 }
 0x287   :  { %1342 = vst [vmem:[#allocation20 + $0x58] sm:$0xff] %v2077_v9  ;;  %v1239_v20 = vpop.f32.mrb[27].mxu0 }
 0x288   :  { %1340 = vst [vmem:[#allocation20 + $0x48] sm:$0xff] %v1239_v20 }
 0x28e   :  { %v2080_v30 = vpop.f32.mrb[28].mxu0 }
 0x28f   :  { %1345 = vst [vmem:[#allocation20 + $0x70] sm:$0xff] %v2080_v30  ;;  %v1252_v14 = vpop.f32.mrb[29].mxu0 }
 0x290   :  { %1343 = vst [vmem:[#allocation20 + $0x60] sm:$0xff] %v1252_v14  ;;  %v2081_v19 = vpop.f32.mrb[30].mxu0 }
 0x291   :  { %1346 = vst [vmem:[#allocation20 + $0x78] sm:$0xff] %v2081_v19  ;;  %v1255_v16 = vpop.f32.mrb[31].mxu0 }
 0x292   :  { %1344 = vst [vmem:[#allocation20 + $0x68] sm:$0xff] %v1255_v16 }
 0x296   :  { %v2084_v42 = vpop.f32.mrb[32].mxu0 }
 0x297   :  { %1349 = vst [vmem:[#allocation20 + $0x90] sm:$0xff] %v2084_v42  ;;  %v1268_v47 = vpop.f32.mrb[33].mxu0 }
 0x298   :  { %1347 = vst [vmem:[#allocation20 + $0x80] sm:$0xff] %v1268_v47  ;;  %v2085_v55 = vpop.f32.mrb[34].mxu0 }
 0x299   :  { %1350 = vst [vmem:[#allocation20 + $0x98] sm:$0xff] %v2085_v55  ;;  %v1271_v40 = vpop.f32.mrb[35].mxu0 }
 0x29a   :  { %1348 = vst [vmem:[#allocation20 + $0x88] sm:$0xff] %v1271_v40 }
 0x29e   :  { %v2088_v2 = vpop.f32.mrb[36].mxu0 }
 0x29f   :  { %1353 = vst [vmem:[#allocation20 + $0xb0] sm:$0xff] %v2088_v2  ;;  %v1284_v26 = vpop.f32.mrb[37].mxu0 }
 0x2a0   :  { %1351 = vst [vmem:[#allocation20 + $0xa0] sm:$0xff] %v1284_v26  ;;  %v2089_v37 = vpop.f32.mrb[38].mxu0 }
 0x2a1   :  { %1354 = vst [vmem:[#allocation20 + $0xb8] sm:$0xff] %v2089_v37  ;;  %v1287_v23 = vpop.f32.mrb[39].mxu0 }
 0x2a2   :  { %1352 = vst [vmem:[#allocation20 + $0xa8] sm:$0xff] %v1287_v23 }
 0x2a6   :  { %v2092_v56 = vpop.f32.mrb[40].mxu0 }
 0x2a7   :  { %1357 = vst [vmem:[#allocation20 + $0xd0] sm:$0xff] %v2092_v56  ;;  %v1300_v6 = vpop.f32.mrb[41].mxu0 }
 0x2a8   :  { %1355 = vst [vmem:[#allocation20 + $0xc0] sm:$0xff] %v1300_v6  ;;  %v2093_v54 = vpop.f32.mrb[42].mxu0 }
 0x2a9   :  { %1358 = vst [vmem:[#allocation20 + $0xd8] sm:$0xff] %v2093_v54  ;;  %v1303_v58 = vpop.f32.mrb[43].mxu0 }
 0x2aa   :  { %1356 = vst [vmem:[#allocation20 + $0xc8] sm:$0xff] %v1303_v58 }
 0x2ae   :  { %v2096_v53 = vpop.f32.mrb[44].mxu0 }
 0x2af   :  { %1361 = vst [vmem:[#allocation20 + $0xf0] sm:$0xff] %v2096_v53  ;;  %v1316_v49 = vpop.f32.mrb[45].mxu0 }
 0x2b0   :  { %1359 = vst [vmem:[#allocation20 + $0xe0] sm:$0xff] %v1316_v49  ;;  %v2097_v52 = vpop.f32.mrb[46].mxu0 }
 0x2b1   :  { %1362 = vst [vmem:[#allocation20 + $0xf8] sm:$0xff] %v2097_v52  ;;  %v1319_v34 = vpop.f32.mrb[47].mxu0 }
 0x2b2   :  { %1360 = vst [vmem:[#allocation20 + $0xe8] sm:$0xff] %v1319_v34 }
 0x2b3   :  { %2393 = shalt.err (!%p2390_p8)
}
 0x2b4   :  { %s2394_s20 = scalar_lea.hbm %s3139_s11, 4096 }
 0x2b5   :  { %p2395_p9 = scmp.ne.s32.totalorder %s3139_s11, %s2394_s20  ;;  %p2398_p10 = scmp.lt.u32.totalorder %s2394_s20, %s3139_s11 }
 0x2b7   :  { %p2400_p11 = pnand %p2398_p10, %p2395_p9 }
 0x2b9   :  { %2403 = shalt.err (!%p2400_p11)
}
 0x2ba   :  { %s2434_s12 = smov 128   ;;  %s2435_s5 = smov 8  }
 0x2bb   :  { %1547 = dma.vmem_to_hbm [thread:$0]  %s1542_s29, 4096, %s3139_s11, [#allocation21], %s2434_s12, %s2434_s12, %s2435_s5  }
 0x2bc   :  { %2416 = dma.done.wait [#allocation4], 2048  }
 0x2bd   :  { %2417 = vsyncadd [#allocation4], 4294965248 }
 0x2be   :  { %2418 = dma.done.wait [#allocation21], 4096  }
 0x2bf   :  { %2419 = vsyncadd [#allocation21], 4294963200 }
 0x2c0   :  { %1554 = vsyncpa [#allocation3], 1 }
 0x2c1   :  { %1555 = vsyncpa [#allocation6], 1 }
 0x2c2   :  { %1556 = vsyncpa [#allocation9], 1 }
 0x2c3   :  { %1557 = vsyncpa [#allocation12], 1 }
 0x2c4   :  { %1558 = vsyncpa [#allocation15], 1 }
 0x2c5   :  { %1559 = vsyncpa [#allocation18], 1 }
 0x2c6   :  { %1560 = vsyncpa [#allocation4], 1 }
 0x2c7   :  { %1561 = vsyncpa [#allocation21], 1 }

// kernel: _lambda_.13
= control target key start
LH: loop header
LB: loop body
LE: loop exit
PB: predicated region body
PF: predicated region fallthrough
CT: control target
= control target key end

     0   :  { %10 = vsyncpa [#allocation3], 0  ;;  %s2008_s0 = inlined_call_operand.hbm [shape: f32[256,32], index: 0, kind: input, shape index: {}]   ;;  %s2009_s1 = inlined_call_operand.hbm [shape: bf16[32,32], index: 1, kind: input, shape index: {}]   ;;  %s2010_s2 = inlined_call_operand.hbm [shape: f32[1,32], index: 2, kind: input, shape index: {}]   ;;  %s2011_s3 = inlined_call_operand.hbm [shape: bf16[32,32], index: 3, kind: input, shape index: {}]   ;;  %s2012_s4 = inlined_call_operand.hbm [shape: f32[1,32], index: 4, kind: input, shape index: {}]   ;;  %s2013_s5 = inlined_call_operand.hbm [shape: bf16[256,32], index: 5, kind: output, shape index: {}]  }
   0x1   :  { %11 = vsyncpa [#allocation6], 0 }
   0x2   :  { %12 = vsyncpa [#allocation9], 0 }
   0x3   :  { %13 = vsyncpa [#allocation4], 0  ;;  %s1543_s18 = smov [#allocation5]   ;;  %s1403_s22 = scalar_lea.hbm %s2009_s1, 256 }
   0x4   :  { %s31_s19 = sshll.u32 %s1543_s18, 4  ;;  %p1404_p0 = scmp.ne.s32.totalorder %s2009_s1, %s1403_s22  ;;  %s32_s19 = int_to_ptr.vmem [resolvable:$true] %s31_s19 }
   0x5   :  { %p1407_p1 = scmp.lt.u32.totalorder %s1403_s22, %s2009_s1 }
   0x7   :  { %p1409_p2 = pnand %p1407_p1, %p1404_p0 }
   0x9   :  { %1412 = shalt.err (!%p1409_p2)
}
   0xa   :  { %s1413_s27 = scalar_lea.vmem %s32_s19, 256  ;;  %p1418_p4 = scmp.lt.s32.totalorder %s32_s19, %s32_s19 }
   0xb   :  { %p1414_p3 = scmp.ne.s32.totalorder %s32_s19, %s1413_s27  ;;  %p1419_p5 = scmp.lt.s32.totalorder %s1413_s27, %s1413_s27 }
   0xd   :  { %p1420_p6 = por %p1419_p5, %p1418_p4 }
   0xf   :  { %p1421_p7 = pnand %p1420_p6, %p1414_p3 }
  0x11   :  { %1424 = shalt.err (!%p1421_p7)
}
  0x12   :  { %s1544_s28 = smov 64   ;;  %s1545_s29 = smov 4  }
  0x13   :  { %37 = dma.hbm_to_vmem [thread:$0]  %s2009_s1, 256, %s32_s19, [#allocation6], %s1544_s28, %s1544_s28, %s1545_s29  }
  0x14   :  { %s1546_s7 = smov [#allocation8]   ;;  %s1547_s9 = smov [#allocation2]  }
  0x15   :  { %s53_s8 = sshll.u32 %s1546_s7, 4  ;;  %s19_s10 = sshll.u32 %s1547_s9, 4  ;;  %s54_s8 = int_to_ptr.vmem [resolvable:$true] %s53_s8  ;;  %s20_s10 = int_to_ptr.vmem [resolvable:$true] %s19_s10 }
  0x16   :  { %s1425_s13 = scalar_lea.hbm %s2011_s3, 256 }
  0x17   :  { %p1426_p8 = scmp.ne.s32.totalorder %s2011_s3, %s1425_s13  ;;  %p1429_p9 = scmp.lt.u32.totalorder %s1425_s13, %s2011_s3 }
  0x19   :  { %p1431_p10 = pnand %p1429_p9, %p1426_p8 }
  0x1b   :  { %1434 = shalt.err (!%p1431_p10)
}
  0x1c   :  { %s1435_s1 = scalar_lea.vmem %s54_s8, 256  ;;  %p1440_p12 = scmp.lt.s32.totalorder %s54_s8, %s54_s8 }
  0x1d   :  { %p1436_p11 = scmp.ne.s32.totalorder %s54_s8, %s1435_s1  ;;  %p1441_p13 = scmp.lt.s32.totalorder %s1435_s1, %s1435_s1 }
  0x1f   :  { %p1442_p0 = por %p1441_p13, %p1440_p12 }
  0x21   :  { %p1443_p1 = pnand %p1442_p0, %p1436_p11 }
  0x23   :  { %1446 = shalt.err (!%p1443_p1)
}
  0x24   :  { %59 = dma.hbm_to_vmem [thread:$0]  %s2011_s3, 256, %s54_s8, [#allocation9], %s1544_s28, %s1544_s28, %s1545_s29  }
  0x25   :  { %s1447_s22 = scalar_lea.hbm %s2008_s0, 4096 }
  0x26   :  { %p1448_p2 = scmp.ne.s32.totalorder %s2008_s0, %s1447_s22  ;;  %p1451_p3 = scmp.lt.u32.totalorder %s1447_s22, %s2008_s0 }
  0x28   :  { %p1453_p4 = pnand %p1451_p3, %p1448_p2 }
  0x2a   :  { %1456 = shalt.err (!%p1453_p4)
}
  0x2b   :  { %s1457_s27 = scalar_lea.vmem %s20_s10, 4096  ;;  %p1462_p6 = scmp.lt.s32.totalorder %s20_s10, %s20_s10 }
  0x2c   :  { %p1458_p5 = scmp.ne.s32.totalorder %s20_s10, %s1457_s27  ;;  %p1463_p7 = scmp.lt.s32.totalorder %s1457_s27, %s1457_s27 }
  0x2e   :  { %p1464_p8 = por %p1463_p7, %p1462_p6 }
  0x30   :  { %p1465_p9 = pnand %p1464_p8, %p1458_p5 }
  0x32   :  { %1468 = shalt.err (!%p1465_p9)
}
  0x33   :  { %s1548_s3 = smov 128   ;;  %s1549_s30 = smov 8  }
  0x34   :  { %25 = dma.hbm_to_vmem [thread:$0]  %s2008_s0, 4096, %s20_s10, [#allocation3], %s1548_s3, %s1548_s3, %s1549_s30  }
  0x35   :  { %s1550_s8 = smov [#allocation7]   ;;  %s1551_s11 = smov [#allocation10]  }
  0x36   :  { %s44_s9 = sshll.u32 %s1550_s8, 4  ;;  %s66_s12 = sshll.u32 %s1551_s11, 4  ;;  %s45_s9 = int_to_ptr.vmem [resolvable:$true] %s44_s9  ;;  %s67_s12 = int_to_ptr.vmem [resolvable:$true] %s66_s12 }
  0x37   :  { %s1469_s15 = scalar_lea.hbm %s2010_s2, 16 }
  0x38   :  { %p1470_p10 = scmp.ne.s32.totalorder %s2010_s2, %s1469_s15  ;;  %p1473_p11 = scmp.lt.u32.totalorder %s1469_s15, %s2010_s2 }
  0x3a   :  { %p1475_p12 = pnand %p1473_p11, %p1470_p10 }
  0x3c   :  { %1478 = shalt.err (!%p1475_p12)
}
  0x3d   :  { %s1479_s0 = scalar_lea.vmem %s45_s9, 16  ;;  %s1483_s10 = scalar_lea.vmem %s45_s9, 32 }
  0x3e   :  { %p1480_p13 = scmp.ne.s32.totalorder %s45_s9, %s1479_s0  ;;  %p1484_p0 = scmp.lt.s32.totalorder %s45_s9, %s45_s9 }
  0x3f   :  { %p1485_p1 = scmp.lt.s32.totalorder %s1483_s10, %s1479_s0 }
  0x41   :  { %p1486_p2 = por %p1485_p1, %p1484_p0 }
  0x43   :  { %p1487_p3 = pnand %p1486_p2, %p1480_p13 }
  0x45   :  { %1490 = shalt.err (!%p1487_p3)
}
  0x46   :  { %47 = dma.hbm_to_vmem [thread:$0]  %s2010_s2, 16, %s45_s9, [#allocation6]  }
  0x47   :  { %s1491_s23 = scalar_lea.hbm %s2012_s4, 16 }
  0x48   :  { %p1492_p4 = scmp.ne.s32.totalorder %s2012_s4, %s1491_s23  ;;  %p1495_p5 = scmp.lt.u32.totalorder %s1491_s23, %s2012_s4 }
  0x4a   :  { %p1497_p6 = pnand %p1495_p5, %p1492_p4 }
  0x4c   :  { %1500 = shalt.err (!%p1497_p6)
}
  0x4d   :  { %s1501_s3 = scalar_lea.vmem %s67_s12, 16  ;;  %s1505_s30 = scalar_lea.vmem %s67_s12, 32 }
  0x4e   :  { %p1502_p7 = scmp.ne.s32.totalorder %s67_s12, %s1501_s3  ;;  %p1506_p8 = scmp.lt.s32.totalorder %s67_s12, %s67_s12 }
  0x4f   :  { %p1507_p9 = scmp.lt.s32.totalorder %s1505_s30, %s1501_s3 }
  0x51   :  { %p1508_p10 = por %p1507_p9, %p1506_p8 }
  0x53   :  { %p1509_p11 = pnand %p1508_p10, %p1502_p7 }
  0x55   :  { %1512 = shalt.err (!%p1509_p11)
}
  0x56   :  { %69 = dma.hbm_to_vmem [thread:$0]  %s2012_s4, 16, %s67_s12, [#allocation9]  }
  0x57   :  { %1535 = dma.done.wait [#allocation3], 4096  }
  0x58   :  { %1536 = vsyncadd [#allocation3], 4294963200 }
  0x59   :  { %1537 = dma.done.wait [#allocation6], 272  }
  0x5a   :  { %1538 = vsyncadd [#allocation6], 4294967024 }
  0x5b   :  { %1539 = dma.done.wait [#allocation9], 272  }
  0x5c   :  { %1540 = vsyncadd [#allocation9], 4294967024  ;;  %v1335_v0 = vld [vmem:[#allocation5] sm:$0xff]   ;;  %v1336_v1 = vld [vmem:[#allocation5 + $0x8] sm:$0xff]   ;;  %vm157_vm0 = vcmask 261120   ;;  %vm1063_vm1 = vcmask 257024  }
  0x5d   :  { %1253 = vmatprep.subr.bf16.mxu0 %v1335_v0  ;;  %v86_v2 = vld [vmem:[#allocation2] sm:$0xff]  ;;  %v87_v3 = vld [vmem:[#allocation2 + $0x8] sm:$0xff]  ;;  %v88_v5 = vld [vmem:[#allocation2 + $0x10] sm:$0xff]  ;;  %s1552_s4 = smov [#allocation11]  }
  0x5e   :  { %1254 = vmatpush3.bf16.msra.mxu0 %v1335_v0  ;;  %v118_v4 = vpack.c.bf16 %v87_v3, %v86_v2  ;;  %v89_v6 = vld [vmem:[#allocation2 + $0x18] sm:$0xff]  ;;  %v90_v7 = vld [vmem:[#allocation2 + $0x20] sm:$0xff]  ;;  %v91_v8 = vld [vmem:[#allocation2 + $0x28] sm:$0xff]  ;;  %s1101_s7 = sshll.u32 %s1552_s4, 4  ;;  %s1102_s7 = int_to_ptr.vmem [resolvable:$true] %s1101_s7 }
  0x5f   :  { %1255 = vmatprep.subr.bf16.mxu0 %v1336_v1  ;;  %v119_v9 = vpack.c.bf16 %v89_v6, %v88_v5  ;;  %v120_v10 = vpack.c.bf16 %v91_v8, %v90_v7  ;;  %v92_v11 = vld [vmem:[#allocation2 + $0x30] sm:$0xff]  ;;  %v93_v12 = vld [vmem:[#allocation2 + $0x38] sm:$0xff]  ;;  %v94_v13 = vld [vmem:[#allocation2 + $0x40] sm:$0xff]  ;;  %s1513_s8 = scalar_lea.vmem %s1102_s7, 2048  ;;  %p1518_p13 = scmp.lt.s32.totalorder %s1102_s7, %s1102_s7 }
  0x60   :  { %1257 = vmatprep.mubr.msk.bf16.mxu0 %vm157_vm0, %v118_v4  ;;  %v95_v14 = vld [vmem:[#allocation2 + $0x48] sm:$0xff]  ;;  %v121_v15 = vpack.c.bf16 %v93_v12, %v92_v11  ;;  %v96_v17 = vld [vmem:[#allocation2 + $0x50] sm:$0xff]  ;;  %v97_v18 = vld [vmem:[#allocation2 + $0x58] sm:$0xff]  ;;  %p1514_p12 = scmp.ne.s32.totalorder %s1102_s7, %s1513_s8  ;;  %p1519_p0 = scmp.lt.s32.totalorder %s1513_s8, %s1513_s8 }
  0x61   :  { %v122_v16 = vpack.c.bf16 %v95_v14, %v94_v13  ;;  %v98_v19 = vld [vmem:[#allocation2 + $0x60] sm:$0xff]  ;;  %v99_v20 = vld [vmem:[#allocation2 + $0x68] sm:$0xff]  ;;  %v123_v21 = vpack.c.bf16 %v97_v18, %v96_v17  ;;  %v100_v23 = vld [vmem:[#allocation2 + $0x70] sm:$0xff] }
  0x62   :  { %1256 = vmatpush3.bf16.msra.mxu0 %v1336_v1  ;;  %v124_v22 = vpack.c.bf16 %v99_v20, %v98_v19  ;;  %v101_v24 = vld [vmem:[#allocation2 + $0x78] sm:$0xff]  ;;  %v102_v25 = vld [vmem:[#allocation2 + $0x80] sm:$0xff]  ;;  %v103_v26 = vld [vmem:[#allocation2 + $0x88] sm:$0xff]  ;;  %p1520_p1 = por %p1519_p0, %p1518_p13 }
  0x63   :  { %v125_v27 = vpack.c.bf16 %v101_v24, %v100_v23  ;;  %v126_v28 = vpack.c.bf16 %v103_v26, %v102_v25  ;;  %v104_v29 = vld [vmem:[#allocation2 + $0x90] sm:$0xff]  ;;  %v105_v30 = vld [vmem:[#allocation2 + $0x98] sm:$0xff]  ;;  %v106_v31 = vld [vmem:[#allocation2 + $0xa0] sm:$0xff] }
  0x64   :  { %v107_v32 = vld [vmem:[#allocation2 + $0xa8] sm:$0xff]  ;;  %v127_v33 = vpack.c.bf16 %v105_v30, %v104_v29  ;;  %v108_v35 = vld [vmem:[#allocation2 + $0xb0] sm:$0xff]  ;;  %v109_v36 = vld [vmem:[#allocation2 + $0xb8] sm:$0xff]  ;;  %p1521_p2 = pnand %p1520_p1, %p1514_p12 }
  0x65   :  { %1258 = vmatmul.mubr.msk.bf16.vlgmr.msra.gmra.mrb[0].mxu0 %vm157_vm0, %v119_v9  ;;  %v128_v34 = vpack.c.bf16 %v107_v32, %v106_v31  ;;  %v110_v37 = vld [vmem:[#allocation2 + $0xc0] sm:$0xff]  ;;  %v111_v38 = vld [vmem:[#allocation2 + $0xc8] sm:$0xff]  ;;  %v129_v39 = vpack.c.bf16 %v109_v36, %v108_v35  ;;  %v112_v41 = vld [vmem:[#allocation2 + $0xd0] sm:$0xff] }
  0x66   :  { %1261 = vmatprep.mubr.msk.bf16.mxu0 %vm157_vm0, %v120_v10  ;;  %v130_v40 = vpack.c.bf16 %v111_v38, %v110_v37  ;;  %v113_v42 = vld [vmem:[#allocation2 + $0xd8] sm:$0xff]  ;;  %v114_v43 = vld [vmem:[#allocation2 + $0xe0] sm:$0xff]  ;;  %v115_v44 = vld [vmem:[#allocation2 + $0xe8] sm:$0xff] }
  0x67   :  { %v131_v45 = vpack.c.bf16 %v113_v42, %v112_v41  ;;  %v132_v46 = vpack.c.bf16 %v115_v44, %v114_v43  ;;  %v116_v47 = vld [vmem:[#allocation2 + $0xf0] sm:$0xff]  ;;  %v117_v48 = vld [vmem:[#allocation2 + $0xf8] sm:$0xff] }
  0x68   :  { %v133_v49 = vpack.c.bf16 %v117_v48, %v116_v47  ;;  %v1337_v50 = vld [vmem:[#allocation8] sm:$0xff]   ;;  %v1338_v51 = vld [vmem:[#allocation8 + $0x8] sm:$0xff]   ;;  %v1665_v52 = vld [vmem:[#allocation7] ss:$0 sm:$0xff] }
  0x69   :  { %1289 = vmatprep.subr.bf16.mxu1 %v1337_v50 }
  0x6a   :  { %1290 = vmatpush3.bf16.msra.mxu1 %v1337_v50 }
  0x6b   :  { %1291 = vmatprep.subr.bf16.mxu1 %v1338_v51 }
  0x6d   :  { %1262 = vmatmul.mubr.msk.bf16.gmra.mrb[4].mxu0 %vm157_vm0, %v121_v15 }
  0x6e   :  { %1265 = vmatprep.mubr.msk.bf16.mxu0 %vm157_vm0, %v122_v16  ;;  %1292 = vmatpush3.bf16.msra.mxu1 %v1338_v51 }
  0x75   :  { %1266 = vmatmul.mubr.msk.bf16.gmra.mrb[8].mxu0 %vm157_vm0, %v123_v21 }
  0x76   :  { %1269 = vmatprep.mubr.msk.bf16.mxu0 %vm157_vm0, %v124_v22 }
  0x7d   :  { %1270 = vmatmul.mubr.msk.bf16.gmra.mrb[12].mxu0 %vm157_vm0, %v125_v27 }
  0x7e   :  { %1273 = vmatprep.mubr.msk.bf16.mxu0 %vm157_vm0, %v126_v28 }
  0x85   :  { %1274 = vmatmul.mubr.msk.bf16.gmra.mrb[16].mxu0 %vm157_vm0, %v127_v33 }
  0x86   :  { %1277 = vmatprep.mubr.msk.bf16.mxu0 %vm157_vm0, %v128_v34 }
  0x8d   :  { %1278 = vmatmul.mubr.msk.bf16.gmra.mrb[20].mxu0 %vm157_vm0, %v129_v39 }
  0x8e   :  { %1281 = vmatprep.mubr.msk.bf16.mxu0 %vm157_vm0, %v130_v40 }
  0x95   :  { %1282 = vmatmul.mubr.msk.bf16.gmra.mrb[24].mxu0 %vm157_vm0, %v131_v45 }
  0x96   :  { %1285 = vmatprep.mubr.msk.bf16.mxu0 %vm157_vm0, %v132_v46 }
  0x9d   :  { %1286 = vmatmul.mubr.msk.bf16.gmra.mrb[28].mxu0 %vm157_vm0, %v133_v49 }
 0x138   :  { %v1259_v53 = vpop.f32.mrb[0].mxu0 }
 0x139   :  { %v249_v54 = vadd.f32 %v1259_v53, %v1665_v52  ;;  %v240_v55 = vpop.f32.mrb[1].mxu0 }
 0x13a   :  { %v241_v56 = vadd.f32 %v1665_v52, %v240_v55  ;;  %v1260_v57 = vpop.f32.mrb[2].mxu0 }
 0x13b   :  { %v252_v58 = vadd.f32 %v1260_v57, %v1665_v52  ;;  %v243_v59 = vpop.f32.mrb[3].mxu0  ;;  %v369_v61 = vmax.f32 %v249_v54, 0.0 }
 0x13c   :  { %v244_v60 = vadd.f32 %v1665_v52, %v243_v59  ;;  %v367_v63 = vmax.f32 %v241_v56, 0.0 }
 0x13d   :  { %v370_v62 = vmax.f32 %v252_v58, 0.0 }
 0x13e   :  { %v368_v0 = vmax.f32 %v244_v60, 0.0 }
 0x13f   :  { %v400_v1 = vpack.c.bf16 %v370_v62, %v369_v61 }
 0x140   :  { %v1263_v2 = vpop.f32.mrb[4].mxu0  ;;  %v399_v3 = vpack.c.bf16 %v368_v0, %v367_v63 }
 0x141   :  { %v265_v4 = vadd.f32 %v1263_v2, %v1665_v52  ;;  %v256_v5 = vpop.f32.mrb[5].mxu0 }
 0x142   :  { %v257_v6 = vadd.f32 %v1665_v52, %v256_v5  ;;  %v1264_v7 = vpop.f32.mrb[6].mxu0  ;;  %1293 = vmatprep.mubr.msk.bf16.mxu1 %vm157_vm0, %v399_v3 }
 0x143   :  { %v268_v8 = vadd.f32 %v1264_v7, %v1665_v52  ;;  %v259_v9 = vpop.f32.mrb[7].mxu0  ;;  %1294 = vmatmul.mubr.msk.bf16.vlgmr.msra.gmra.mrb[0].mxu1 %vm157_vm0, %v400_v1  ;;  %v373_v11 = vmax.f32 %v265_v4, 0.0 }
 0x144   :  { %v260_v10 = vadd.f32 %v1665_v52, %v259_v9  ;;  %v371_v13 = vmax.f32 %v257_v6, 0.0 }
 0x145   :  { %v374_v12 = vmax.f32 %v268_v8, 0.0 }
 0x146   :  { %v372_v14 = vmax.f32 %v260_v10, 0.0 }
 0x147   :  { %v402_v15 = vpack.c.bf16 %v374_v12, %v373_v11 }
 0x148   :  { %v401_v16 = vpack.c.bf16 %v372_v14, %v371_v13  ;;  %v1267_v17 = vpop.f32.mrb[8].mxu0 }
 0x149   :  { %v281_v18 = vadd.f32 %v1267_v17, %v1665_v52  ;;  %v272_v19 = vpop.f32.mrb[9].mxu0 }
 0x14a   :  { %v273_v20 = vadd.f32 %v1665_v52, %v272_v19  ;;  %v1268_v21 = vpop.f32.mrb[10].mxu0  ;;  %1297 = vmatprep.mubr.msk.bf16.mxu1 %vm157_vm0, %v401_v16 }
 0x14b   :  { %v284_v22 = vadd.f32 %v1268_v21, %v1665_v52  ;;  %v275_v23 = vpop.f32.mrb[11].mxu0  ;;  %1298 = vmatmul.mubr.msk.bf16.gmra.mrb[4].mxu1 %vm157_vm0, %v402_v15  ;;  %v377_v25 = vmax.f32 %v281_v18, 0.0 }
 0x14c   :  { %v276_v24 = vadd.f32 %v1665_v52, %v275_v23  ;;  %v375_v27 = vmax.f32 %v273_v20, 0.0 }
 0x14d   :  { %v378_v26 = vmax.f32 %v284_v22, 0.0 }
 0x14e   :  { %v376_v28 = vmax.f32 %v276_v24, 0.0 }
 0x14f   :  { %v404_v29 = vpack.c.bf16 %v378_v26, %v377_v25 }
 0x150   :  { %v403_v30 = vpack.c.bf16 %v376_v28, %v375_v27  ;;  %v1271_v31 = vpop.f32.mrb[12].mxu0 }
 0x151   :  { %v297_v32 = vadd.f32 %v1271_v31, %v1665_v52  ;;  %v288_v33 = vpop.f32.mrb[13].mxu0 }
 0x152   :  { %v289_v34 = vadd.f32 %v1665_v52, %v288_v33  ;;  %v1272_v35 = vpop.f32.mrb[14].mxu0  ;;  %1301 = vmatprep.mubr.msk.bf16.mxu1 %vm157_vm0, %v403_v30 }
 0x153   :  { %v300_v36 = vadd.f32 %v1272_v35, %v1665_v52  ;;  %v291_v37 = vpop.f32.mrb[15].mxu0  ;;  %1302 = vmatmul.mubr.msk.bf16.gmra.mrb[8].mxu1 %vm157_vm0, %v404_v29  ;;  %v381_v39 = vmax.f32 %v297_v32, 0.0 }
 0x154   :  { %v292_v38 = vadd.f32 %v1665_v52, %v291_v37  ;;  %v379_v41 = vmax.f32 %v289_v34, 0.0 }
 0x155   :  { %v382_v40 = vmax.f32 %v300_v36, 0.0 }
 0x156   :  { %v380_v42 = vmax.f32 %v292_v38, 0.0  ;;  %v1715_v38 = vld [vmem:[#allocation10] ss:$0 sm:$0xff] }
 0x157   :  { %v406_v43 = vpack.c.bf16 %v382_v40, %v381_v39 }
 0x158   :  { %v405_v44 = vpack.c.bf16 %v380_v42, %v379_v41  ;;  %v1275_v45 = vpop.f32.mrb[16].mxu0 }
 0x159   :  { %v313_v46 = vadd.f32 %v1275_v45, %v1665_v52  ;;  %v304_v47 = vpop.f32.mrb[17].mxu0 }
 0x15a   :  { %v305_v48 = vadd.f32 %v1665_v52, %v304_v47  ;;  %v1276_v49 = vpop.f32.mrb[18].mxu0  ;;  %1305 = vmatprep.mubr.msk.bf16.mxu1 %vm157_vm0, %v405_v44 }
 0x15b   :  { %v316_v50 = vadd.f32 %v1276_v49, %v1665_v52  ;;  %v307_v51 = vpop.f32.mrb[19].mxu0  ;;  %1306 = vmatmul.mubr.msk.bf16.gmra.mrb[12].mxu1 %vm157_vm0, %v406_v43  ;;  %v385_v54 = vmax.f32 %v313_v46, 0.0 }
 0x15c   :  { %v308_v53 = vadd.f32 %v1665_v52, %v307_v51  ;;  %v383_v56 = vmax.f32 %v305_v48, 0.0 }
 0x15d   :  { %v386_v55 = vmax.f32 %v316_v50, 0.0 }
 0x15e   :  { %v384_v57 = vmax.f32 %v308_v53, 0.0 }
 0x15f   :  { %v408_v58 = vpack.c.bf16 %v386_v55, %v385_v54 }
 0x160   :  { %v407_v59 = vpack.c.bf16 %v384_v57, %v383_v56  ;;  %v1279_v60 = vpop.f32.mrb[20].mxu0 }
 0x161   :  { %v329_v61 = vadd.f32 %v1279_v60, %v1665_v52  ;;  %v320_v62 = vpop.f32.mrb[21].mxu0 }
 0x162   :  { %v321_v63 = vadd.f32 %v1665_v52, %v320_v62  ;;  %v1280_v0 = vpop.f32.mrb[22].mxu0  ;;  %1309 = vmatprep.mubr.msk.bf16.mxu1 %vm157_vm0, %v407_v59 }
 0x163   :  { %v332_v1 = vadd.f32 %v1280_v0, %v1665_v52  ;;  %v323_v2 = vpop.f32.mrb[23].mxu0  ;;  %1310 = vmatmul.mubr.msk.bf16.gmra.mrb[16].mxu1 %vm157_vm0, %v408_v58  ;;  %v389_v4 = vmax.f32 %v329_v61, 0.0 }
 0x164   :  { %v324_v3 = vadd.f32 %v1665_v52, %v323_v2  ;;  %v387_v6 = vmax.f32 %v321_v63, 0.0 }
 0x165   :  { %v390_v5 = vmax.f32 %v332_v1, 0.0 }
 0x166   :  { %v388_v7 = vmax.f32 %v324_v3, 0.0 }
 0x167   :  { %v410_v8 = vpack.c.bf16 %v390_v5, %v389_v4 }
 0x168   :  { %v409_v9 = vpack.c.bf16 %v388_v7, %v387_v6  ;;  %v1283_v10 = vpop.f32.mrb[24].mxu0 }
 0x169   :  { %v345_v11 = vadd.f32 %v1283_v10, %v1665_v52  ;;  %v336_v12 = vpop.f32.mrb[25].mxu0 }
 0x16a   :  { %v337_v13 = vadd.f32 %v1665_v52, %v336_v12  ;;  %v1284_v14 = vpop.f32.mrb[26].mxu0  ;;  %1313 = vmatprep.mubr.msk.bf16.mxu1 %vm157_vm0, %v409_v9 }
 0x16b   :  { %v348_v15 = vadd.f32 %v1284_v14, %v1665_v52  ;;  %v339_v16 = vpop.f32.mrb[27].mxu0  ;;  %1314 = vmatmul.mubr.msk.bf16.gmra.mrb[20].mxu1 %vm157_vm0, %v410_v8  ;;  %v393_v18 = vmax.f32 %v345_v11, 0.0 }
 0x16c   :  { %v340_v17 = vadd.f32 %v1665_v52, %v339_v16  ;;  %v391_v20 = vmax.f32 %v337_v13, 0.0 }
 0x16d   :  { %v394_v19 = vmax.f32 %v348_v15, 0.0 }
 0x16e   :  { %v392_v21 = vmax.f32 %v340_v17, 0.0 }
 0x16f   :  { %v412_v22 = vpack.c.bf16 %v394_v19, %v393_v18 }
 0x170   :  { %v411_v23 = vpack.c.bf16 %v392_v21, %v391_v20  ;;  %v1287_v24 = vpop.f32.mrb[28].mxu0 }
 0x171   :  { %v361_v25 = vadd.f32 %v1287_v24, %v1665_v52  ;;  %v352_v26 = vpop.f32.mrb[29].mxu0 }
 0x172   :  { %v353_v27 = vadd.f32 %v1665_v52, %v352_v26  ;;  %v1288_v28 = vpop.f32.mrb[30].mxu0  ;;  %1317 = vmatprep.mubr.msk.bf16.mxu1 %vm157_vm0, %v411_v23 }
 0x173   :  { %v364_v29 = vadd.f32 %v1288_v28, %v1665_v52  ;;  %v355_v30 = vpop.f32.mrb[31].mxu0  ;;  %1318 = vmatmul.mubr.msk.bf16.gmra.mrb[24].mxu1 %vm157_vm0, %v412_v22  ;;  %v397_v32 = vmax.f32 %v361_v25, 0.0 }
 0x174   :  { %v356_v31 = vadd.f32 %v1665_v52, %v355_v30  ;;  %v395_v34 = vmax.f32 %v353_v27, 0.0 }
 0x175   :  { %v398_v33 = vmax.f32 %v364_v29, 0.0 }
 0x176   :  { %v396_v35 = vmax.f32 %v356_v31, 0.0 }
 0x177   :  { %v414_v36 = vpack.c.bf16 %v398_v33, %v397_v32 }
 0x178   :  { %v413_v37 = vpack.c.bf16 %v396_v35, %v395_v34 }
 0x17a   :  { %1321 = vmatprep.mubr.msk.bf16.mxu1 %vm157_vm0, %v413_v37 }
 0x17b   :  { %1322 = vmatmul.mubr.msk.bf16.gmra.mrb[28].mxu1 %vm157_vm0, %v414_v36 }
 0x216   :  { %v1295_v39 = vpop.f32.mrb[0].mxu1 }
 0x217   :  { %v529_v40 = vadd.f32 %v1295_v39, %v1715_v38  ;;  %v520_v41 = vpop.f32.mrb[1].mxu1 }
 0x218   :  { %v521_v42 = vadd.f32 %v1715_v38, %v520_v41  ;;  %v1296_v43 = vpop.f32.mrb[2].mxu1 }
 0x219   :  { %v681_v52 = vmul.f32 0.044715, %v529_v40  ;;  %v532_v44 = vadd.f32 %v1296_v43, %v1715_v38  ;;  %v523_v45 = vpop.f32.mrb[3].mxu1  ;;  %v649_v20 = vmul.f32 0.5, %v529_v40 }
 0x21a   :  { %v679_v46 = vmul.f32 0.044715, %v521_v42  ;;  %v524_v47 = vadd.f32 %v1715_v38, %v523_v45  ;;  %v647_v25 = vmul.f32 0.5, %v521_v42 }
 0x21b   :  { %v713_v48 = vmul.f32 %v681_v52, %v529_v40  ;;  %v682_v49 = vmul.f32 0.044715, %v532_v44  ;;  %v650_v30 = vmul.f32 0.5, %v532_v44 }
 0x21c   :  { %v711_v50 = vmul.f32 %v679_v46, %v521_v42  ;;  %v680_v51 = vmul.f32 0.044715, %v524_v47  ;;  %v648_v35 = vmul.f32 0.5, %v524_v47 }
 0x21d   :  { %v745_v53 = vmul.f32 %v713_v48, %v529_v40  ;;  %v714_v54 = vmul.f32 %v682_v49, %v532_v44 }
 0x21e   :  { %v743_v55 = vmul.f32 %v711_v50, %v521_v42  ;;  %v712_v56 = vmul.f32 %v680_v51, %v524_v47  ;;  %v1299_v57 = vpop.f32.mrb[4].mxu1 }
 0x21f   :  { %v777_v58 = vadd.f32 %v745_v53, %v529_v40  ;;  %v746_v59 = vmul.f32 %v714_v54, %v532_v44  ;;  %v545_v60 = vadd.f32 %v1299_v57, %v1715_v38  ;;  %v536_v61 = vpop.f32.mrb[5].mxu1 }
 0x220   :  { %v775_v62 = vadd.f32 %v743_v55, %v521_v42  ;;  %v744_v63 = vmul.f32 %v712_v56, %v524_v47  ;;  %v537_v0 = vadd.f32 %v1715_v38, %v536_v61  ;;  %v1300_v1 = vpop.f32.mrb[6].mxu1 }
 0x221   :  { %v809_v2 = vmul.f32 0.7978846, %v777_v58  ;;  %v778_v3 = vadd.f32 %v746_v59, %v532_v44  ;;  %v685_v4 = vmul.f32 0.044715, %v545_v60  ;;  %v539_v5 = vpop.f32.mrb[7].mxu1  ;;  %v1724_v11 = vadd.f32 %v1300_v1, %v1715_v38 }
 0x222   :  { %v807_v6 = vmul.f32 0.7978846, %v775_v62  ;;  %v776_v7 = vadd.f32 %v744_v63, %v524_v47  ;;  %v683_v8 = vmul.f32 0.044715, %v537_v0  ;;  %v1727_v14 = vadd.f32 %v1715_v38, %v539_v5 }
 0x223   :  { %1339 = vtanh.f32 %v809_v2  ;;  %v810_v9 = vmul.f32 0.7978846, %v778_v3  ;;  %v717_v10 = vmul.f32 %v685_v4, %v545_v60  ;;  %v686_v16 = vmul.f32 0.044715, %v1724_v11 }
 0x224   :  { %1341 = vtanh.f32 %v807_v6  ;;  %v808_v12 = vmul.f32 0.7978846, %v776_v7  ;;  %v715_v13 = vmul.f32 %v683_v8, %v537_v0  ;;  %v684_v18 = vmul.f32 0.044715, %v1727_v14 }
 0x225   :  { %1343 = vtanh.f32 %v810_v9  ;;  %v749_v15 = vmul.f32 %v717_v10, %v545_v60  ;;  %v718_v22 = vmul.f32 %v686_v16, %v1724_v11  ;;  %v1748_v43 = vmul.f32 0.5, %v545_v60 }
 0x226   :  { %1345 = vtanh.f32 %v808_v12  ;;  %v747_v17 = vmul.f32 %v715_v13, %v537_v0  ;;  %v1303_v19 = vpop.f32.mrb[8].mxu1  ;;  %v716_v27 = vmul.f32 %v684_v18, %v1727_v14  ;;  %v1752_v46 = vmul.f32 0.5, %v537_v0 }
 0x227   :  { %v781_v21 = vadd.f32 %v749_v15, %v545_v60  ;;  %v1733_v23 = vadd.f32 %v1303_v19, %v1715_v38  ;;  %v552_v24 = vpop.f32.mrb[9].mxu1  ;;  %v750_v32 = vmul.f32 %v718_v22, %v1724_v11 }
 0x228   :  { %v779_v26 = vadd.f32 %v747_v17, %v537_v0  ;;  %v1737_v28 = vadd.f32 %v1715_v38, %v552_v24  ;;  %v1304_v29 = vpop.f32.mrb[10].mxu1  ;;  %v748_v37 = vmul.f32 %v716_v27, %v1727_v14 }
 0x229   :  { %v813_v31 = vmul.f32 0.7978846, %v781_v21  ;;  %v689_v33 = vmul.f32 0.044715, %v1733_v23  ;;  %v555_v34 = vpop.f32.mrb[11].mxu1  ;;  %v782_v40 = vadd.f32 %v750_v32, %v1724_v11  ;;  %v1746_v42 = vadd.f32 %v1304_v29, %v1715_v38 }
 0x22a   :  { %v811_v36 = vmul.f32 0.7978846, %v779_v26  ;;  %v687_v39 = vmul.f32 0.044715, %v1737_v28  ;;  %v780_v52 = vadd.f32 %v748_v37, %v1727_v14  ;;  %v1758_v55 = vadd.f32 %v1715_v38, %v555_v34 }
 0x22b   :  { %1347 = vtanh.f32 %v813_v31  ;;  %v721_v41 = vmul.f32 %v689_v33, %v1733_v23  ;;  %v814_v47 = vmul.f32 0.7978846, %v782_v40  ;;  %v690_v49 = vmul.f32 0.044715, %v1746_v42 }
 0x22c   :  { %1349 = vtanh.f32 %v811_v36  ;;  %v719_v44 = vmul.f32 %v687_v39, %v1737_v28  ;;  %v812_v53 = vmul.f32 0.7978846, %v780_v52  ;;  %v688_v12 = vmul.f32 0.044715, %v1758_v55 }
 0x22d   :  { %v1340_v45 = vpop.eup %1339  ;;  %v753_v48 = vmul.f32 %v721_v41, %v1733_v23  ;;  %1351 = vtanh.f32 %v814_v47  ;;  %v722_v60 = vmul.f32 %v690_v49, %v1746_v42  ;;  %v654_v29 = vmul.f32 0.5, %v1724_v11 }
 0x22e   :  { %v1342_v50 = vpop.eup %1341  ;;  %v873_v51 = vadd.f32 1.0, %v1340_v45  ;;  %v751_v54 = vmul.f32 %v719_v44, %v1737_v28  ;;  %v1307_v56 = vpop.f32.mrb[12].mxu1  ;;  %1353 = vtanh.f32 %v812_v53  ;;  %v720_v18 = vmul.f32 %v688_v12, %v1758_v55 }
 0x22f   :  { %v1344_v57 = vpop.eup %1343  ;;  %v871_v58 = vadd.f32 1.0, %v1342_v50  ;;  %v785_v59 = vadd.f32 %v753_v48, %v1733_v23  ;;  %v568_v61 = vpop.f32.mrb[13].mxu1  ;;  %v754_v6 = vmul.f32 %v722_v60, %v1746_v42  ;;  %v1769_v19 = vadd.f32 %v1307_v56, %v1715_v38 }
 0x230   :  { %v1346_v62 = vpop.eup %1345  ;;  %v905_v63 = vmul.f32 %v873_v51, %v649_v20  ;;  %v874_v0 = vadd.f32 1.0, %v1344_v57  ;;  %v783_v1 = vadd.f32 %v751_v54, %v1737_v28  ;;  %v1308_v2 = vpop.f32.mrb[14].mxu1  ;;  %v1773_v24 = vadd.f32 %v1715_v38, %v568_v61 }
 0x231   :  { %v903_v3 = vmul.f32 %v871_v58, %v647_v25  ;;  %v872_v4 = vadd.f32 1.0, %v1346_v62  ;;  %v817_v5 = vmul.f32 0.7978846, %v785_v59  ;;  %v571_v7 = vpop.f32.mrb[15].mxu1  ;;  %v786_v16 = vadd.f32 %v754_v6, %v1746_v42 }
 0x232   :  { %v1187_v8 = vpack.c.bf16 %v905_v63, %v905_v63  ;;  %v906_v9 = vmul.f32 %v874_v0, %v650_v30  ;;  %v815_v10 = vmul.f32 0.7978846, %v783_v1  ;;  %v1776_v25 = vadd.f32 %v1308_v2, %v1715_v38 }
 0x233   :  { %v1185_v13 = vpack.c.bf16 %v903_v3, %v903_v3  ;;  %v904_v15 = vmul.f32 %v872_v4, %v648_v35  ;;  %1355 = vtanh.f32 %v817_v5  ;;  %v818_v22 = vmul.f32 0.7978846, %v786_v16 }
 0x234   :  { %1066 = vst.msk [vmem:[#allocation11 + $0x8] sm:$0xf] %vm1063_vm1, %v1187_v8  ;;  %v1188_v17 = vpack.c.bf16 %v906_v9, %v906_v9  ;;  %1357 = vtanh.f32 %v815_v10  ;;  %v752_v30 = vmul.f32 %v720_v18, %v1758_v55  ;;  %v693_v31 = vmul.f32 0.044715, %v1769_v19 }
 0x235   :  { %v1348_v20 = vpop.eup %1347  ;;  %1064 = vst.msk [vmem:[#allocation11] sm:$0xf] %vm1063_vm1, %v1185_v13  ;;  %v1186_v21 = vpack.c.bf16 %v904_v15, %v904_v15  ;;  %v652_v34 = vmul.f32 0.5, %v1727_v14  ;;  %1359 = vtanh.f32 %v818_v22  ;;  %v691_v35 = vmul.f32 0.044715, %v1773_v24 }
 0x236   :  { %v1350_v26 = vpop.eup %1349  ;;  %1067 = vst.msk [vmem:[#allocation11 + $0xc] sm:$0xf] %vm1063_vm1, %v1188_v17  ;;  %v877_v27 = vadd.f32 1.0, %v1348_v20  ;;  %v1311_v32 = vpop.f32.mrb[16].mxu1  ;;  %v657_v39 = vmul.f32 0.5, %v1733_v23  ;;  %v784_v11 = vadd.f32 %v752_v30, %v1758_v55  ;;  %v725_v40 = vmul.f32 %v693_v31, %v1769_v19 }
 0x237   :  { %1065 = vst.msk [vmem:[#allocation11 + $0x4] sm:$0xf] %vm1063_vm1, %v1186_v21  ;;  %v875_v33 = vadd.f32 1.0, %v1350_v26  ;;  %v584_v36 = vpop.f32.mrb[17].mxu1  ;;  %v1352_v52 = vpop.eup %1351  ;;  %v723_v45 = vmul.f32 %v691_v35, %v1773_v24  ;;  %v694_v14 = vmul.f32 0.044715, %v1776_v25  ;;  %v1793_v47 = vadd.f32 %v1715_v38, %v571_v7 }
 0x238   :  { %v909_v37 = vmul.f32 %v877_v27, %v1748_v43  ;;  %v1312_v41 = vpop.f32.mrb[18].mxu1  ;;  %v1354_v49 = vpop.eup %1353  ;;  %v878_v50 = vadd.f32 1.0, %v1352_v52  ;;  %v816_v23 = vmul.f32 0.7978846, %v784_v11  ;;  %v757_v51 = vmul.f32 %v725_v40, %v1769_v19 }
 0x239   :  { %v907_v44 = vmul.f32 %v875_v33, %v1752_v46  ;;  %v587_v48 = vpop.f32.mrb[19].mxu1  ;;  %v876_v54 = vadd.f32 1.0, %v1354_v49  ;;  %v755_v56 = vmul.f32 %v723_v45, %v1773_v24  ;;  %v726_v46 = vmul.f32 %v694_v14, %v1776_v25 }
 0x23a   :  { %v1191_v43 = vpack.c.bf16 %v909_v37, %v909_v37  ;;  %v910_v57 = vmul.f32 %v878_v50, %v654_v29  ;;  %v655_v58 = vmul.f32 0.5, %v1737_v28  ;;  %1361 = vtanh.f32 %v816_v23 }
 0x23b   :  { %v1189_v53 = vpack.c.bf16 %v907_v44, %v907_v44  ;;  %v789_v59 = vadd.f32 %v757_v51, %v1769_v19  ;;  %v908_v61 = vmul.f32 %v876_v54, %v652_v34  ;;  %v787_v62 = vadd.f32 %v755_v56, %v1773_v24 }
 0x23c   :  { %1070 = vst.msk [vmem:[#allocation11 + $0x18] sm:$0xf] %vm1063_vm1, %v1191_v43  ;;  %v758_v63 = vmul.f32 %v726_v46, %v1776_v25  ;;  %v692_v0 = vmul.f32 0.044715, %v1793_v47  ;;  %v1192_v2 = vpack.c.bf16 %v910_v57, %v910_v57  ;;  %v1806_v5 = vadd.f32 %v1311_v32, %v1715_v38 }
 0x23d   :  { %v1356_v60 = vpop.eup %1355  ;;  %1068 = vst.msk [vmem:[#allocation11 + $0x10] sm:$0xf] %vm1063_vm1, %v1189_v53  ;;  %v821_v4 = vmul.f32 0.7978846, %v789_v59  ;;  %v1190_v6 = vpack.c.bf16 %v908_v61, %v908_v61  ;;  %v819_v8 = vmul.f32 0.7978846, %v787_v62  ;;  %v1824_v32 = vadd.f32 %v1312_v41, %v1715_v38 }
 0x23e   :  { %v1358_v1 = vpop.eup %1357  ;;  %v881_v3 = vadd.f32 1.0, %v1356_v60  ;;  %v1315_v28 = vpop.f32.mrb[20].mxu1  ;;  %v790_v9 = vadd.f32 %v758_v63, %v1776_v25  ;;  %1071 = vst.msk [vmem:[#allocation11 + $0x1c] sm:$0xf] %vm1063_vm1, %v1192_v2  ;;  %v658_v13 = vmul.f32 0.5, %v1746_v42  ;;  %v724_v15 = vmul.f32 %v692_v0, %v1793_v47 }
 0x23f   :  { %v879_v7 = vadd.f32 1.0, %v1358_v1  ;;  %v600_v10 = vpop.f32.mrb[21].mxu1  ;;  %1363 = vtanh.f32 %v821_v4  ;;  %v1360_v17 = vpop.eup %1359  ;;  %1069 = vst.msk [vmem:[#allocation11 + $0x14] sm:$0xf] %vm1063_vm1, %v1190_v6  ;;  %v697_v21 = vmul.f32 0.044715, %v1806_v5  ;;  %v1820_v42 = vadd.f32 %v1715_v38, %v584_v36 }
 0x240   :  { %v913_v12 = vmul.f32 %v881_v3, %v657_v39  ;;  %v1812_v16 = vpop.f32.mrb[22].mxu1  ;;  %1365 = vtanh.f32 %v819_v8  ;;  %v822_v20 = vmul.f32 0.7978846, %v790_v9  ;;  %v882_v27 = vadd.f32 1.0, %v1360_v17 }
 0x241   :  { %v911_v18 = vmul.f32 %v879_v7, %v655_v58  ;;  %v1816_v22 = vpop.f32.mrb[23].mxu1  ;;  %v756_v29 = vmul.f32 %v724_v15, %v1793_v47  ;;  %v729_v31 = vmul.f32 %v697_v21, %v1806_v5  ;;  %v695_v35 = vmul.f32 0.044715, %v1820_v42 }
 0x242   :  { %v1195_v26 = vpack.c.bf16 %v913_v12, %v913_v12  ;;  %1367 = vtanh.f32 %v822_v20  ;;  %v914_v33 = vmul.f32 %v882_v27, %v658_v13  ;;  %v656_v37 = vmul.f32 0.5, %v1758_v55 }
 0x243   :  { %v1193_v30 = vpack.c.bf16 %v911_v18, %v911_v18  ;;  %v788_v34 = vadd.f32 %v756_v29, %v1793_v47  ;;  %v761_v36 = vmul.f32 %v729_v31, %v1806_v5  ;;  %v698_v39 = vmul.f32 0.044715, %v1824_v32 }
 0x244   :  { %1074 = vst.msk [vmem:[#allocation11 + $0x28] sm:$0xf] %vm1063_vm1, %v1195_v26  ;;  %v1834_v11 = vadd.f32 %v1715_v38, %v587_v48  ;;  %v1362_v40 = vpop.eup %1361  ;;  %v1196_v41 = vpack.c.bf16 %v914_v33, %v914_v33  ;;  %v727_v44 = vmul.f32 %v695_v35, %v1820_v42  ;;  %v1838_v45 = vadd.f32 %v1315_v28, %v1715_v38 }
 0x245   :  { %1072 = vst.msk [vmem:[#allocation11 + $0x20] sm:$0xf] %vm1063_vm1, %v1193_v30  ;;  %v820_v52 = vmul.f32 0.7978846, %v788_v34  ;;  %v880_v49 = vadd.f32 1.0, %v1362_v40  ;;  %v661_v43 = vmul.f32 0.5, %v1769_v19  ;;  %v793_v55 = vadd.f32 %v761_v36, %v1806_v5 }
 0x246   :  { %v1319_v14 = vpop.f32.mrb[24].mxu1  ;;  %v730_v50 = vmul.f32 %v698_v39, %v1824_v32  ;;  %1075 = vst.msk [vmem:[#allocation11 + $0x2c] sm:$0xf] %vm1063_vm1, %v1196_v41  ;;  %v659_v48 = vmul.f32 0.5, %v1773_v24  ;;  %v759_v51 = vmul.f32 %v727_v44, %v1820_v42  ;;  %v696_v53 = vmul.f32 0.044715, %v1834_v11 }
 0x247   :  { %v616_v23 = vpop.f32.mrb[25].mxu1  ;;  %1369 = vtanh.f32 %v820_v52  ;;  %v912_v56 = vmul.f32 %v880_v49, %v656_v37  ;;  %v825_v46 = vmul.f32 0.7978846, %v793_v55  ;;  %v701_v57 = vmul.f32 0.044715, %v1838_v45 }
 0x248   :  { %v1847_v54 = vpop.f32.mrb[26].mxu1  ;;  %v762_v19 = vmul.f32 %v730_v50, %v1824_v32  ;;  %v662_v60 = vmul.f32 0.5, %v1776_v25  ;;  %v791_v24 = vadd.f32 %v759_v51, %v1820_v42  ;;  %v728_v61 = vmul.f32 %v696_v53, %v1834_v11 }
 0x249   :  { %v1851_v58 = vpop.f32.mrb[27].mxu1  ;;  %v1364_v59 = vpop.eup %1363  ;;  %v1857_v62 = vadd.f32 %v1715_v38, %v600_v10  ;;  %v1194_v0 = vpack.c.bf16 %v912_v56, %v912_v56  ;;  %1371 = vtanh.f32 %v825_v46  ;;  %v733_v6 = vmul.f32 %v701_v57, %v1838_v45 }
 0x24a   :  { %v1366_v63 = vpop.eup %1365  ;;  %v885_v1 = vadd.f32 1.0, %v1364_v59  ;;  %v794_v2 = vadd.f32 %v762_v19, %v1824_v32  ;;  %v823_v4 = vmul.f32 0.7978846, %v791_v24  ;;  %v760_v28 = vmul.f32 %v728_v61, %v1834_v11 }
 0x24b   :  { %v883_v3 = vadd.f32 1.0, %v1366_v63  ;;  %1073 = vst.msk [vmem:[#allocation11 + $0x24] sm:$0xf] %vm1063_vm1, %v1194_v0  ;;  %v699_v9 = vmul.f32 0.044715, %v1857_v62  ;;  %v1866_v10 = vadd.f32 %v1812_v16, %v1715_v38  ;;  %v765_v20 = vmul.f32 %v733_v6, %v1838_v45 }
 0x24c   :  { %v1368_v25 = vpop.eup %1367  ;;  %v917_v7 = vmul.f32 %v885_v1, %v661_v43  ;;  %v826_v8 = vmul.f32 0.7978846, %v794_v2  ;;  %1373 = vtanh.f32 %v823_v4  ;;  %v792_v15 = vadd.f32 %v760_v28, %v1834_v11 }
 0x24d   :  { %v915_v12 = vmul.f32 %v883_v3, %v659_v48  ;;  %v886_v13 = vadd.f32 1.0, %v1368_v25  ;;  %v731_v21 = vmul.f32 %v699_v9, %v1857_v62  ;;  %v660_v16 = vmul.f32 0.5, %v1793_v47 }
 0x24e   :  { %v1869_v17 = vpop.f32.mrb[28].mxu1  ;;  %v1199_v18 = vpack.c.bf16 %v917_v7, %v917_v7  ;;  %1375 = vtanh.f32 %v826_v8  ;;  %v824_v30 = vmul.f32 0.7978846, %v792_v15  ;;  %v797_v33 = vadd.f32 %v765_v20, %v1838_v45 }
 0x24f   :  { %v1873_v26 = vpop.f32.mrb[29].mxu1  ;;  %v1197_v27 = vpack.c.bf16 %v915_v12, %v915_v12  ;;  %v918_v29 = vmul.f32 %v886_v13, %v662_v60  ;;  %v763_v34 = vmul.f32 %v731_v21, %v1857_v62  ;;  %v702_v35 = vmul.f32 0.044715, %v1866_v10 }
 0x250   :  { %v1876_v31 = vpop.f32.mrb[30].mxu1  ;;  %1078 = vst.msk [vmem:[#allocation11 + $0x38] sm:$0xf] %vm1063_vm1, %v1199_v18  ;;  %v1884_v37 = vadd.f32 %v1715_v38, %v1816_v22  ;;  %1377 = vtanh.f32 %v824_v30  ;;  %v1890_v40 = vadd.f32 %v1319_v14, %v1715_v38  ;;  %v1893_v41 = vadd.f32 %v1715_v38, %v616_v23 }
 0x251   :  { %v1886_v36 = vpop.f32.mrb[31].mxu1  ;;  %v1370_v39 = vpop.eup %1369  ;;  %1076 = vst.msk [vmem:[#allocation11 + $0x30] sm:$0xf] %vm1063_vm1, %v1197_v27  ;;  %v1200_v47 = vpack.c.bf16 %v918_v29, %v918_v29  ;;  %v829_v44 = vmul.f32 0.7978846, %v797_v33  ;;  %v795_v49 = vadd.f32 %v763_v34, %v1857_v62  ;;  %v734_v22 = vmul.f32 %v702_v35, %v1866_v10 }
 0x252   :  { %v884_v52 = vadd.f32 1.0, %v1370_v39  ;;  %v665_v43 = vmul.f32 0.5, %v1806_v5  ;;  %v663_v55 = vmul.f32 0.5, %v1820_v42  ;;  %v700_v50 = vmul.f32 0.044715, %v1884_v37 }
 0x253   :  { %1079 = vst.msk [vmem:[#allocation11 + $0x3c] sm:$0xf] %vm1063_vm1, %v1200_v47  ;;  %v705_v14 = vmul.f32 0.044715, %v1890_v40  ;;  %v1372_v48 = vpop.eup %1371  ;;  %1379 = vtanh.f32 %v829_v44  ;;  %v827_v23 = vmul.f32 0.7978846, %v795_v49  ;;  %v766_v53 = vmul.f32 %v734_v22, %v1866_v10 }
 0x254   :  { %v916_v51 = vmul.f32 %v884_v52, %v660_v16  ;;  %v889_v56 = vadd.f32 1.0, %v1372_v48  ;;  %v666_v46 = vmul.f32 0.5, %v1824_v32  ;;  %v732_v19 = vmul.f32 %v700_v50, %v1884_v37 }
 0x255   :  { %v737_v57 = vmul.f32 %v705_v14, %v1890_v40  ;;  %1381 = vtanh.f32 %v827_v23  ;;  %v798_v42 = vadd.f32 %v766_v53, %v1866_v10  ;;  %v703_v59 = vmul.f32 0.044715, %v1893_v41 }
 0x256   :  { %v1198_v5 = vpack.c.bf16 %v916_v51, %v916_v51  ;;  %v1374_v60 = vpop.eup %1373  ;;  %v921_v24 = vmul.f32 %v889_v56, %v665_v43  ;;  %v764_v61 = vmul.f32 %v732_v19, %v1884_v37  ;;  %v1912_v0 = vadd.f32 %v1847_v54, %v1715_v38 }
 0x257   :  { %v769_v63 = vmul.f32 %v737_v57, %v1890_v40  ;;  %v887_v1 = vadd.f32 1.0, %v1374_v60  ;;  %v830_v2 = vmul.f32 0.7978846, %v798_v42  ;;  %v735_v3 = vmul.f32 %v703_v59, %v1893_v41 }
 0x258   :  { %v1376_v32 = vpop.eup %1375  ;;  %1077 = vst.msk [vmem:[#allocation11 + $0x34] sm:$0xf] %vm1063_vm1, %v1198_v5  ;;  %v1918_v4 = vadd.f32 %v1715_v38, %v1851_v58  ;;  %v1203_v28 = vpack.c.bf16 %v921_v24, %v921_v24  ;;  %v796_v25 = vadd.f32 %v764_v61, %v1884_v37  ;;  %v664_v54 = vmul.f32 0.5, %v1834_v11 }
 0x259   :  { %v890_v6 = vadd.f32 1.0, %v1376_v32  ;;  %v801_v7 = vadd.f32 %v769_v63, %v1890_v40  ;;  %v919_v8 = vmul.f32 %v887_v1, %v663_v55  ;;  %1383 = vtanh.f32 %v830_v2 }
 0x25a   :  { %v767_v9 = vmul.f32 %v735_v3, %v1893_v41  ;;  %v1378_v12 = vpop.eup %1377  ;;  %1082 = vst.msk [vmem:[#allocation11 + $0x48] sm:$0xf] %vm1063_vm1, %v1203_v28  ;;  %v828_v15 = vmul.f32 0.7978846, %v796_v25  ;;  %v706_v58 = vmul.f32 0.044715, %v1912_v0  ;;  %v1933_v39 = vadd.f32 %v1869_v17, %v1715_v38 }
 0x25b   :  { %v922_v13 = vmul.f32 %v890_v6, %v666_v46  ;;  %v833_v18 = vmul.f32 0.7978846, %v801_v7  ;;  %v1201_v20 = vpack.c.bf16 %v919_v8, %v919_v8  ;;  %v888_v21 = vadd.f32 1.0, %v1378_v12 }
 0x25c   :  { %v669_v27 = vmul.f32 0.5, %v1838_v45  ;;  %v799_v29 = vadd.f32 %v767_v9, %v1893_v41  ;;  %1385 = vtanh.f32 %v828_v15  ;;  %v738_v11 = vmul.f32 %v706_v58, %v1912_v0 }
 0x25d   :  { %v1204_v16 = vpack.c.bf16 %v922_v13, %v922_v13  ;;  %v704_v30 = vmul.f32 0.044715, %v1918_v4  ;;  %v1380_v33 = vpop.eup %1379  ;;  %1080 = vst.msk [vmem:[#allocation11 + $0x40] sm:$0xf] %vm1063_vm1, %v1201_v20  ;;  %v920_v34 = vmul.f32 %v888_v21, %v664_v54  ;;  %1387 = vtanh.f32 %v833_v18 }
 0x25e   :  { %v831_v35 = vmul.f32 0.7978846, %v799_v29  ;;  %v893_v45 = vadd.f32 1.0, %v1380_v33  ;;  %v770_v47 = vmul.f32 %v738_v11, %v1912_v0  ;;  %v1940_v44 = vadd.f32 %v1715_v38, %v1873_v26 }
 0x25f   :  { %1083 = vst.msk [vmem:[#allocation11 + $0x4c] sm:$0xf] %vm1063_vm1, %v1204_v16  ;;  %v736_v52 = vmul.f32 %v704_v30, %v1918_v4  ;;  %v1382_v49 = vpop.eup %1381  ;;  %v1202_v22 = vpack.c.bf16 %v920_v34, %v920_v34  ;;  %v667_v43 = vmul.f32 0.5, %v1857_v62  ;;  %v709_v55 = vmul.f32 0.044715, %v1933_v39 }
 0x260   :  { %1389 = vtanh.f32 %v831_v35  ;;  %v925_v17 = vmul.f32 %v893_v45, %v669_v27  ;;  %v891_v50 = vadd.f32 1.0, %v1382_v49  ;;  %v802_v14 = vadd.f32 %v770_v47, %v1912_v0 }
 0x261   :  { %v768_v48 = vmul.f32 %v736_v52, %v1918_v4  ;;  %1081 = vst.msk [vmem:[#allocation11 + $0x44] sm:$0xf] %vm1063_vm1, %v1202_v22  ;;  %v741_v51 = vmul.f32 %v709_v55, %v1933_v39  ;;  %v707_v26 = vmul.f32 0.044715, %v1940_v44  ;;  %v1951_v23 = vadd.f32 %v1876_v31, %v1715_v38 }
 0x262   :  { %v1207_v62 = vpack.c.bf16 %v925_v17, %v925_v17  ;;  %v923_v53 = vmul.f32 %v891_v50, %v667_v43  ;;  %v834_v56 = vmul.f32 0.7978846, %v802_v14  ;;  %v670_v57 = vmul.f32 0.5, %v1866_v10 }
 0x263   :  { %v800_v46 = vadd.f32 %v768_v48, %v1918_v4  ;;  %v1384_v19 = vpop.eup %1383  ;;  %v773_v5 = vmul.f32 %v741_v51, %v1933_v39  ;;  %v739_v42 = vmul.f32 %v707_v26, %v1940_v44  ;;  %v710_v59 = vmul.f32 0.044715, %v1951_v23 }
 0x264   :  { %1086 = vst.msk [vmem:[#allocation11 + $0x58] sm:$0xf] %vm1063_vm1, %v1207_v62  ;;  %v1205_v60 = vpack.c.bf16 %v923_v53, %v923_v53  ;;  %v894_v24 = vadd.f32 1.0, %v1384_v19  ;;  %1391 = vtanh.f32 %v834_v56  ;;  %v1964_v10 = vadd.f32 %v1715_v38, %v1886_v36 }
 0x265   :  { %v832_v31 = vmul.f32 0.7978846, %v800_v46  ;;  %v805_v61 = vadd.f32 %v773_v5, %v1933_v39  ;;  %v771_v63 = vmul.f32 %v739_v42, %v1940_v44  ;;  %v742_v32 = vmul.f32 %v710_v59, %v1951_v23 }
 0x266   :  { %v1386_v1 = vpop.eup %1385  ;;  %1084 = vst.msk [vmem:[#allocation11 + $0x50] sm:$0xf] %vm1063_vm1, %v1205_v60  ;;  %v926_v2 = vmul.f32 %v894_v24, %v670_v57  ;;  %v668_v3 = vmul.f32 0.5, %v1884_v37  ;;  %v673_v9 = vmul.f32 0.5, %v1890_v40  ;;  %v708_v38 = vmul.f32 0.044715, %v1964_v10 }
 0x267   :  { %1393 = vtanh.f32 %v832_v31  ;;  %v1388_v28 = vpop.eup %1387  ;;  %v892_v6 = vadd.f32 1.0, %v1386_v1  ;;  %v837_v25 = vmul.f32 0.7978846, %v805_v61  ;;  %v803_v7 = vadd.f32 %v771_v63, %v1940_v44 }
 0x268   :  { %v774_v8 = vmul.f32 %v742_v32, %v1951_v23  ;;  %v1208_v54 = vpack.c.bf16 %v926_v2, %v926_v2  ;;  %v897_v12 = vadd.f32 1.0, %v1388_v28  ;;  %v671_v58 = vmul.f32 0.5, %v1893_v41 }
 0x269   :  { %v924_v13 = vmul.f32 %v892_v6, %v668_v3  ;;  %1395 = vtanh.f32 %v837_v25  ;;  %v835_v15 = vmul.f32 0.7978846, %v803_v7  ;;  %v740_v21 = vmul.f32 %v708_v38, %v1964_v10 }
 0x26a   :  { %v1390_v36 = vpop.eup %1389  ;;  %v806_v37 = vadd.f32 %v774_v8, %v1951_v23  ;;  %1087 = vst.msk [vmem:[#allocation11 + $0x5c] sm:$0xf] %vm1063_vm1, %v1208_v54  ;;  %v929_v18 = vmul.f32 %v897_v12, %v673_v9  ;;  %v674_v41 = vmul.f32 0.5, %v1912_v0  ;;  %v672_v49 = vmul.f32 0.5, %v1918_v4 }
 0x26b   :  { %v895_v20 = vadd.f32 1.0, %v1390_v36  ;;  %v1206_v27 = vpack.c.bf16 %v924_v13, %v924_v13  ;;  %1397 = vtanh.f32 %v835_v15  ;;  %v772_v11 = vmul.f32 %v740_v21, %v1964_v10 }
 0x26c   :  { %v838_v40 = vmul.f32 0.7978846, %v806_v37  ;;  %v1211_v29 = vpack.c.bf16 %v929_v18, %v929_v18  ;;  %v677_v50 = vmul.f32 0.5, %v1933_v39  ;;  %v675_v26 = vmul.f32 0.5, %v1940_v44 }
 0x26d   :  { %v927_v16 = vmul.f32 %v895_v20, %v671_v58  ;;  %1085 = vst.msk [vmem:[#allocation11 + $0x54] sm:$0xf] %vm1063_vm1, %v1206_v27  ;;  %v804_v34 = vadd.f32 %v772_v11, %v1964_v10  ;;  %v678_v46 = vmul.f32 0.5, %v1951_v23  ;;  %v676_v59 = vmul.f32 0.5, %v1964_v10 }
 0x26e   :  { %1399 = vtanh.f32 %v838_v40  ;;  %v1392_v30 = vpop.eup %1391  ;;  %1090 = vst.msk [vmem:[#allocation11 + $0x68] sm:$0xf] %vm1063_vm1, %v1211_v29 }
 0x26f   :  { %v1209_v33 = vpack.c.bf16 %v927_v16, %v927_v16  ;;  %v898_v35 = vadd.f32 1.0, %v1392_v30  ;;  %v836_v47 = vmul.f32 0.7978846, %v804_v34 }
 0x271   :  { %v1394_v45 = vpop.eup %1393  ;;  %1088 = vst.msk [vmem:[#allocation11 + $0x60] sm:$0xf] %vm1063_vm1, %v1209_v33  ;;  %v930_v52 = vmul.f32 %v898_v35, %v674_v41  ;;  %1401 = vtanh.f32 %v836_v47 }
 0x272   :  { %v896_v22 = vadd.f32 1.0, %v1394_v45 }
 0x273   :  { %v1396_v43 = vpop.eup %1395  ;;  %v1212_v55 = vpack.c.bf16 %v930_v52, %v930_v52 }
 0x274   :  { %v928_v17 = vmul.f32 %v896_v22, %v672_v49  ;;  %v901_v14 = vadd.f32 1.0, %v1396_v43 }
 0x275   :  { %v1398_v48 = vpop.eup %1397  ;;  %1091 = vst.msk [vmem:[#allocation11 + $0x6c] sm:$0xf] %vm1063_vm1, %v1212_v55 }
 0x276   :  { %v1210_v0 = vpack.c.bf16 %v928_v17, %v928_v17  ;;  %v933_v51 = vmul.f32 %v901_v14, %v677_v50  ;;  %v899_v62 = vadd.f32 1.0, %v1398_v48 }
 0x278   :  { %v1400_v53 = vpop.eup %1399  ;;  %1089 = vst.msk [vmem:[#allocation11 + $0x64] sm:$0xf] %vm1063_vm1, %v1210_v0  ;;  %v1215_v4 = vpack.c.bf16 %v933_v51, %v933_v51  ;;  %v931_v56 = vmul.f32 %v899_v62, %v675_v26 }
 0x279   :  { %v902_v19 = vadd.f32 1.0, %v1400_v53 }
 0x27a   :  { %1094 = vst.msk [vmem:[#allocation11 + $0x78] sm:$0xf] %vm1063_vm1, %v1215_v4  ;;  %v1213_v39 = vpack.c.bf16 %v931_v56, %v931_v56 }
 0x27b   :  { %v934_v57 = vmul.f32 %v902_v19, %v678_v46  ;;  %v1402_v5 = vpop.eup %1401 }
 0x27c   :  { %1092 = vst.msk [vmem:[#allocation11 + $0x70] sm:$0xf] %vm1063_vm1, %v1213_v39  ;;  %v900_v44 = vadd.f32 1.0, %v1402_v5 }
 0x27d   :  { %v1216_v42 = vpack.c.bf16 %v934_v57, %v934_v57 }
 0x27e   :  { %v932_v60 = vmul.f32 %v900_v44, %v676_v59 }
 0x27f   :  { %1095 = vst.msk [vmem:[#allocation11 + $0x7c] sm:$0xf] %vm1063_vm1, %v1216_v42 }
 0x280   :  { %v1214_v24 = vpack.c.bf16 %v932_v60, %v932_v60 }
 0x282   :  { %1093 = vst.msk [vmem:[#allocation11 + $0x74] sm:$0xf] %vm1063_vm1, %v1214_v24 }
 0x283   :  { %1524 = shalt.err (!%p1521_p2)
}
 0x284   :  { %s1525_s12 = scalar_lea.hbm %s2013_s5, 2048 }
 0x285   :  { %p1526_p3 = scmp.ne.s32.totalorder %s2013_s5, %s1525_s12  ;;  %p1529_p4 = scmp.lt.u32.totalorder %s1525_s12, %s2013_s5 }
 0x287   :  { %p1531_p5 = pnand %p1529_p4, %p1526_p3 }
 0x289   :  { %1534 = shalt.err (!%p1531_p5)
}
 0x28a   :  { %1107 = dma.vmem_to_hbm [thread:$0]  %s1102_s7, 2048, %s2013_s5, [#allocation4], %s1544_s28, %s1544_s28, %s1545_s29  }
 0x28b   :  { %1541 = dma.done.wait [#allocation4], 2048  }
 0x28c   :  { %1542 = vsyncadd [#allocation4], 4294965248 }
 0x28d   :  { %1111 = vsyncpa [#allocation3], 1 }
 0x28e   :  { %1112 = vsyncpa [#allocation6], 1 }
 0x28f   :  { %1113 = vsyncpa [#allocation9], 1 }
 0x290   :  { %1114 = vsyncpa [#allocation4], 1 }

// kernel: _lambda_.14
= control target key start
LH: loop header
LB: loop body
LE: loop exit
PB: predicated region body
PF: predicated region fallthrough
CT: control target
= control target key end

     0   :  { %10 = vsyncpa [#allocation3], 0  ;;  %s1676_s0 = inlined_call_operand.hbm [shape: bf16[256,32], index: 0, kind: input, shape index: {}]   ;;  %s1677_s1 = inlined_call_operand.hbm [shape: bf16[32,96], index: 1, kind: input, shape index: {}]   ;;  %s1678_s2 = inlined_call_operand.hbm [shape: bf16[256,32], index: 2, kind: input, shape index: {}]   ;;  %s1679_s3 = inlined_call_operand.hbm [shape: bf16[32,96], index: 3, kind: input, shape index: {}]   ;;  %s1680_s4 = inlined_call_operand.hbm [shape: f32[1,96], index: 4, kind: input, shape index: {}]   ;;  %s1681_s5 = inlined_call_operand.hbm [shape: bf16[256,96], index: 5, kind: output, shape index: {}]  }
   0x1   :  { %11 = vsyncpa [#allocation6], 0 }
   0x2   :  { %12 = vsyncpa [#allocation9], 0 }
   0x3   :  { %13 = vsyncpa [#allocation4], 0  ;;  %s1439_s18 = smov [#allocation5]   ;;  %s1440_s20 = smov [#allocation8]  }
   0x4   :  { %s31_s19 = sshll.u32 %s1439_s18, 4  ;;  %s55_s21 = sshll.u32 %s1440_s20, 4  ;;  %s32_s19 = int_to_ptr.vmem [resolvable:$true] %s31_s19  ;;  %s1477_s21 = int_to_ptr.vmem [resolvable:$true] %s55_s21 }
   0x5   :  { %s1299_s24 = scalar_lea.hbm %s1677_s1, 256 }
   0x6   :  { %p1300_p0 = scmp.ne.s32.totalorder %s1677_s1, %s1299_s24  ;;  %p1303_p1 = scmp.lt.u32.totalorder %s1299_s24, %s1677_s1 }
   0x8   :  { %p1305_p2 = pnand %p1303_p1, %p1300_p0 }
   0xa   :  { %1308 = shalt.err (!%p1305_p2)
}
   0xb   :  { %s1309_s29 = scalar_lea.vmem %s32_s19, 256  ;;  %p1314_p4 = scmp.lt.s32.totalorder %s32_s19, %s32_s19 }
   0xc   :  { %p1310_p3 = scmp.ne.s32.totalorder %s32_s19, %s1309_s29  ;;  %p1315_p5 = scmp.lt.s32.totalorder %s1309_s29, %s1309_s29 }
   0xe   :  { %p1316_p6 = por %p1315_p5, %p1314_p4 }
  0x10   :  { %p1317_p7 = pnand %p1316_p6, %p1310_p3 }
  0x12   :  { %1320 = shalt.err (!%p1317_p7)
}
  0x13   :  { %s1441_s30 = smov 64   ;;  %s1442_s6 = smov 4  }
  0x14   :  { %37 = dma.hbm_to_vmem [thread:$0]  %s1677_s1, 256, %s32_s19, [#allocation6], %s1441_s30, %s1441_s30, %s1442_s6  }
  0x15   :  { %s1321_s11 = scalar_lea.hbm %s1679_s3, 256 }
  0x16   :  { %p1322_p8 = scmp.ne.s32.totalorder %s1679_s3, %s1321_s11  ;;  %p1325_p9 = scmp.lt.u32.totalorder %s1321_s11, %s1679_s3 }
  0x18   :  { %p1327_p10 = pnand %p1325_p9, %p1322_p8 }
  0x1a   :  { %1330 = shalt.err (!%p1327_p10)
}
  0x1b   :  { %s1331_s16 = scalar_lea.vmem %s1477_s21, 256  ;;  %p1336_p12 = scmp.lt.s32.totalorder %s1477_s21, %s1477_s21 }
  0x1c   :  { %p1332_p11 = scmp.ne.s32.totalorder %s1477_s21, %s1331_s16  ;;  %p1337_p13 = scmp.lt.s32.totalorder %s1331_s16, %s1331_s16 }
  0x1e   :  { %p1338_p0 = por %p1337_p13, %p1336_p12 }
  0x20   :  { %p1339_p1 = pnand %p1338_p0, %p1332_p11 }
  0x22   :  { %1342 = shalt.err (!%p1339_p1)
}
  0x23   :  { %61 = dma.hbm_to_vmem [thread:$0]  %s1679_s3, 256, %s1477_s21, [#allocation9], %s1441_s30, %s1441_s30, %s1442_s6  }
  0x24   :  { %s1443_s18 = smov [#allocation2]   ;;  %s1444_s20 = smov [#allocation7]  }
  0x25   :  { %s19_s19 = sshll.u32 %s1443_s18, 4  ;;  %s43_s22 = sshll.u32 %s1444_s20, 4  ;;  %s20_s19 = int_to_ptr.vmem [resolvable:$true] %s19_s19  ;;  %s1514_s22 = int_to_ptr.vmem [resolvable:$true] %s43_s22 }
  0x26   :  { %s1343_s25 = scalar_lea.hbm %s1676_s0, 2048 }
  0x27   :  { %p1344_p2 = scmp.ne.s32.totalorder %s1676_s0, %s1343_s25  ;;  %p1347_p3 = scmp.lt.u32.totalorder %s1343_s25, %s1676_s0 }
  0x29   :  { %p1349_p4 = pnand %p1347_p3, %p1344_p2 }
  0x2b   :  { %1352 = shalt.err (!%p1349_p4)
}
  0x2c   :  { %s1353_s3 = scalar_lea.vmem %s20_s19, 2048  ;;  %p1358_p6 = scmp.lt.s32.totalorder %s20_s19, %s20_s19 }
  0x2d   :  { %p1354_p5 = scmp.ne.s32.totalorder %s20_s19, %s1353_s3  ;;  %p1359_p7 = scmp.lt.s32.totalorder %s1353_s3, %s1353_s3 }
  0x2f   :  { %p1360_p8 = por %p1359_p7, %p1358_p6 }
  0x31   :  { %p1361_p9 = pnand %p1360_p8, %p1354_p5 }
  0x33   :  { %1364 = shalt.err (!%p1361_p9)
}
  0x34   :  { %25 = dma.hbm_to_vmem [thread:$0]  %s1676_s0, 2048, %s20_s19, [#allocation3], %s1441_s30, %s1441_s30, %s1442_s6  }
  0x35   :  { %s1365_s10 = scalar_lea.hbm %s1678_s2, 2048 }
  0x36   :  { %p1366_p10 = scmp.ne.s32.totalorder %s1678_s2, %s1365_s10  ;;  %p1369_p11 = scmp.lt.u32.totalorder %s1365_s10, %s1678_s2 }
  0x38   :  { %p1371_p12 = pnand %p1369_p11, %p1366_p10 }
  0x3a   :  { %1374 = shalt.err (!%p1371_p12)
}
  0x3b   :  { %s1375_s15 = scalar_lea.vmem %s1514_s22, 2048  ;;  %p1380_p0 = scmp.lt.s32.totalorder %s1514_s22, %s1514_s22 }
  0x3c   :  { %p1376_p13 = scmp.ne.s32.totalorder %s1514_s22, %s1375_s15  ;;  %p1381_p1 = scmp.lt.s32.totalorder %s1375_s15, %s1375_s15 }
  0x3e   :  { %p1382_p2 = por %p1381_p1, %p1380_p0 }
  0x40   :  { %p1383_p3 = pnand %p1382_p2, %p1376_p13 }
  0x42   :  { %1386 = shalt.err (!%p1383_p3)
}
  0x43   :  { %49 = dma.hbm_to_vmem [thread:$0]  %s1678_s2, 2048, %s1514_s22, [#allocation6], %s1441_s30, %s1441_s30, %s1442_s6  }
  0x44   :  { %s1445_s1 = smov [#allocation10]   ;;  %s1387_s20 = scalar_lea.hbm %s1680_s4, 16 }
  0x45   :  { %s68_s17 = sshll.u32 %s1445_s1, 4  ;;  %p1388_p4 = scmp.ne.s32.totalorder %s1680_s4, %s1387_s20  ;;  %s69_s17 = int_to_ptr.vmem [resolvable:$true] %s68_s17 }
  0x46   :  { %p1391_p5 = scmp.lt.u32.totalorder %s1387_s20, %s1680_s4 }
  0x48   :  { %p1393_p6 = pnand %p1391_p5, %p1388_p4 }
  0x4a   :  { %1396 = shalt.err (!%p1393_p6)
}
  0x4b   :  { %s1397_s27 = scalar_lea.vmem %s69_s17, 16  ;;  %s1401_s2 = scalar_lea.vmem %s69_s17, 32 }
  0x4c   :  { %p1398_p7 = scmp.ne.s32.totalorder %s69_s17, %s1397_s27  ;;  %p1402_p8 = scmp.lt.s32.totalorder %s69_s17, %s69_s17 }
  0x4d   :  { %p1403_p9 = scmp.lt.s32.totalorder %s1401_s2, %s1397_s27 }
  0x4f   :  { %p1404_p10 = por %p1403_p9, %p1402_p8 }
  0x51   :  { %p1405_p11 = pnand %p1404_p10, %p1398_p7 }
  0x53   :  { %1408 = shalt.err (!%p1405_p11)
}
  0x54   :  { %71 = dma.hbm_to_vmem [thread:$0]  %s1680_s4, 16, %s69_s17, [#allocation9]  }
  0x55   :  { %1431 = dma.done.wait [#allocation3], 2048  }
  0x56   :  { %1432 = vsyncadd [#allocation3], 4294965248 }
  0x57   :  { %1433 = dma.done.wait [#allocation6], 2304  }
  0x58   :  { %1434 = vsyncadd [#allocation6], 4294964992 }
  0x59   :  { %1435 = dma.done.wait [#allocation9], 272  }
  0x5a   :  { %1436 = vsyncadd [#allocation9], 4294967024  ;;  %v1263_v0 = vld [vmem:[#allocation8] sm:$0xff]   ;;  %v1264_v1 = vld [vmem:[#allocation5] sm:$0xff]   ;;  %vm252_vm0 = vcmask 261120   ;;  %vm930_vm1 = vcmask 781312  }
  0x5b   :  { %1151 = vmatprep.subr.bf16.mxu1 %v1263_v0  ;;  %v1265_v2 = vld [vmem:[#allocation8 + $0x8] sm:$0xff]   ;;  %1187 = vmatprep.subr.bf16.mxu0 %v1264_v1  ;;  %v1266_v3 = vld [vmem:[#allocation5 + $0x8] sm:$0xff]   ;;  %v1267_v4 = vld [vmem:[#allocation7] sm:$0xff]   ;;  %s1446_s4 = smov [#allocation11]  }
  0x5c   :  { %1152 = vmatpush3.bf16.msra.mxu1 %v1263_v0  ;;  %1188 = vmatpush3.bf16.msra.mxu0 %v1264_v1  ;;  %v1268_v5 = vld [vmem:[#allocation2] sm:$0xff]   ;;  %v1269_v6 = vld [vmem:[#allocation7 + $0x8] sm:$0xff]   ;;  %v1270_v7 = vld [vmem:[#allocation2 + $0x8] sm:$0xff]   ;;  %s968_s29 = sshll.u32 %s1446_s4, 4  ;;  %s969_s29 = int_to_ptr.vmem [resolvable:$true] %s968_s29 }
  0x5d   :  { %1153 = vmatprep.subr.bf16.mxu1 %v1265_v2  ;;  %1189 = vmatprep.subr.bf16.mxu0 %v1266_v3  ;;  %v1271_v8 = vld [vmem:[#allocation7 + $0x10] sm:$0xff]   ;;  %v1272_v9 = vld [vmem:[#allocation2 + $0x10] sm:$0xff]   ;;  %v1273_v10 = vld [vmem:[#allocation7 + $0x18] sm:$0xff]   ;;  %s1409_s3 = scalar_lea.vmem %s969_s29, 2048  ;;  %p1414_p13 = scmp.lt.s32.totalorder %s969_s29, %s969_s29 }
  0x5e   :  { %1155 = vmatprep.mubr.msk.bf16.mxu1 %vm252_vm0, %v1267_v4  ;;  %1191 = vmatprep.mubr.msk.bf16.mxu0 %vm252_vm0, %v1268_v5  ;;  %v1274_v11 = vld [vmem:[#allocation2 + $0x18] sm:$0xff]   ;;  %v1275_v12 = vld [vmem:[#allocation7 + $0x20] sm:$0xff]   ;;  %v1276_v13 = vld [vmem:[#allocation2 + $0x20] sm:$0xff]   ;;  %p1410_p12 = scmp.ne.s32.totalorder %s969_s29, %s1409_s3  ;;  %p1415_p0 = scmp.lt.s32.totalorder %s1409_s3, %s1409_s3 }
  0x5f   :  { %v1277_v14 = vld [vmem:[#allocation7 + $0x28] sm:$0xff]   ;;  %v1278_v15 = vld [vmem:[#allocation2 + $0x28] sm:$0xff]   ;;  %v1279_v16 = vld [vmem:[#allocation7 + $0x30] sm:$0xff]  }
  0x60   :  { %1154 = vmatpush3.bf16.msra.mxu1 %v1265_v2  ;;  %1190 = vmatpush3.bf16.msra.mxu0 %v1266_v3  ;;  %v1280_v17 = vld [vmem:[#allocation2 + $0x30] sm:$0xff]   ;;  %v1281_v18 = vld [vmem:[#allocation7 + $0x38] sm:$0xff]   ;;  %v1282_v19 = vld [vmem:[#allocation2 + $0x38] sm:$0xff]   ;;  %p1416_p1 = por %p1415_p0, %p1414_p13 }
  0x61   :  { %v1283_v20 = vld [vmem:[#allocation7 + $0x40] sm:$0xff]   ;;  %v1284_v21 = vld [vmem:[#allocation2 + $0x40] sm:$0xff]   ;;  %v1285_v22 = vld [vmem:[#allocation7 + $0x48] sm:$0xff]  }
  0x62   :  { %v1286_v23 = vld [vmem:[#allocation2 + $0x48] sm:$0xff]   ;;  %v1287_v24 = vld [vmem:[#allocation7 + $0x50] sm:$0xff]   ;;  %v1288_v25 = vld [vmem:[#allocation2 + $0x50] sm:$0xff]   ;;  %p1417_p2 = pnand %p1416_p1, %p1410_p12 }
  0x63   :  { %1156 = vmatmul.mubr.msk.bf16.vlgmr.msra.gmra.mrb[0].mxu1 %vm252_vm0, %v1269_v6  ;;  %1192 = vmatmul.mubr.msk.bf16.vlgmr.msra.gmra.mrb[0].mxu0 %vm252_vm0, %v1270_v7  ;;  %v1289_v26 = vld [vmem:[#allocation7 + $0x58] sm:$0xff]   ;;  %v1290_v27 = vld [vmem:[#allocation2 + $0x58] sm:$0xff]   ;;  %v1291_v28 = vld [vmem:[#allocation7 + $0x60] sm:$0xff]  }
  0x64   :  { %1159 = vmatprep.mubr.msk.bf16.mxu1 %vm252_vm0, %v1271_v8  ;;  %1195 = vmatprep.mubr.msk.bf16.mxu0 %vm252_vm0, %v1272_v9  ;;  %v1292_v29 = vld [vmem:[#allocation2 + $0x60] sm:$0xff]   ;;  %v1293_v30 = vld [vmem:[#allocation7 + $0x68] sm:$0xff]   ;;  %v1294_v31 = vld [vmem:[#allocation2 + $0x68] sm:$0xff]  }
  0x65   :  { %v1295_v32 = vld [vmem:[#allocation7 + $0x70] sm:$0xff]   ;;  %v1296_v33 = vld [vmem:[#allocation2 + $0x70] sm:$0xff]   ;;  %v1297_v34 = vld [vmem:[#allocation7 + $0x78] sm:$0xff]  }
  0x66   :  { %v1298_v35 = vld [vmem:[#allocation2 + $0x78] sm:$0xff]   ;;  %v1595_v38 = vld [vmem:[#allocation10] ss:$0 sm:$0xff] }
  0x6b   :  { %1160 = vmatmul.mubr.msk.bf16.gmra.mrb[4].mxu1 %vm252_vm0, %v1273_v10  ;;  %1196 = vmatmul.mubr.msk.bf16.gmra.mrb[4].mxu0 %vm252_vm0, %v1274_v11 }
  0x6c   :  { %1163 = vmatprep.mubr.msk.bf16.mxu1 %vm252_vm0, %v1275_v12  ;;  %1199 = vmatprep.mubr.msk.bf16.mxu0 %vm252_vm0, %v1276_v13 }
  0x73   :  { %1164 = vmatmul.mubr.msk.bf16.gmra.mrb[8].mxu1 %vm252_vm0, %v1277_v14  ;;  %1200 = vmatmul.mubr.msk.bf16.gmra.mrb[8].mxu0 %vm252_vm0, %v1278_v15 }
  0x74   :  { %1167 = vmatprep.mubr.msk.bf16.mxu1 %vm252_vm0, %v1279_v16  ;;  %1203 = vmatprep.mubr.msk.bf16.mxu0 %vm252_vm0, %v1280_v17 }
  0x7b   :  { %1168 = vmatmul.mubr.msk.bf16.gmra.mrb[12].mxu1 %vm252_vm0, %v1281_v18  ;;  %1204 = vmatmul.mubr.msk.bf16.gmra.mrb[12].mxu0 %vm252_vm0, %v1282_v19 }
  0x7c   :  { %1171 = vmatprep.mubr.msk.bf16.mxu1 %vm252_vm0, %v1283_v20  ;;  %1207 = vmatprep.mubr.msk.bf16.mxu0 %vm252_vm0, %v1284_v21 }
  0x83   :  { %1172 = vmatmul.mubr.msk.bf16.gmra.mrb[16].mxu1 %vm252_vm0, %v1285_v22  ;;  %1208 = vmatmul.mubr.msk.bf16.gmra.mrb[16].mxu0 %vm252_vm0, %v1286_v23 }
  0x84   :  { %1175 = vmatprep.mubr.msk.bf16.mxu1 %vm252_vm0, %v1287_v24  ;;  %1211 = vmatprep.mubr.msk.bf16.mxu0 %vm252_vm0, %v1288_v25 }
  0x8b   :  { %1176 = vmatmul.mubr.msk.bf16.gmra.mrb[20].mxu1 %vm252_vm0, %v1289_v26  ;;  %1212 = vmatmul.mubr.msk.bf16.gmra.mrb[20].mxu0 %vm252_vm0, %v1290_v27 }
  0x8c   :  { %1179 = vmatprep.mubr.msk.bf16.mxu1 %vm252_vm0, %v1291_v28  ;;  %1215 = vmatprep.mubr.msk.bf16.mxu0 %vm252_vm0, %v1292_v29 }
  0x93   :  { %1180 = vmatmul.mubr.msk.bf16.gmra.mrb[24].mxu1 %vm252_vm0, %v1293_v30  ;;  %1216 = vmatmul.mubr.msk.bf16.gmra.mrb[24].mxu0 %vm252_vm0, %v1294_v31 }
  0x94   :  { %1183 = vmatprep.mubr.msk.bf16.mxu1 %vm252_vm0, %v1295_v32  ;;  %1219 = vmatprep.mubr.msk.bf16.mxu0 %vm252_vm0, %v1296_v33 }
  0x9b   :  { %1184 = vmatmul.mubr.msk.bf16.gmra.mrb[28].mxu1 %vm252_vm0, %v1297_v34  ;;  %1220 = vmatmul.mubr.msk.bf16.gmra.mrb[28].mxu0 %vm252_vm0, %v1298_v35 }
 0x136   :  { %v1157_v36 = vpop.f32.mrb[0].mxu1  ;;  %v1193_v37 = vpop.f32.mrb[0].mxu0 }
 0x137   :  { %v335_v39 = vpop.f32.mrb[1].mxu1  ;;  %v645_v40 = vadd.f32 %v1193_v37, %v1157_v36  ;;  %v636_v41 = vpop.f32.mrb[1].mxu0 }
 0x138   :  { %v1158_v42 = vpop.f32.mrb[2].mxu1  ;;  %v637_v43 = vadd.f32 %v636_v41, %v335_v39  ;;  %v1194_v44 = vpop.f32.mrb[2].mxu0 }
 0x139   :  { %v338_v45 = vpop.f32.mrb[3].mxu1  ;;  %v772_v46 = vadd.f32 %v1595_v38, %v645_v40  ;;  %v648_v47 = vadd.f32 %v1194_v44, %v1158_v42  ;;  %v639_v48 = vpop.f32.mrb[3].mxu0 }
 0x13a   :  { %v770_v49 = vadd.f32 %v1595_v38, %v637_v43  ;;  %v640_v50 = vadd.f32 %v639_v48, %v338_v45 }
 0x13b   :  { %v1085_v51 = vpack.c.bf16 %v772_v46, %v772_v46  ;;  %v773_v52 = vadd.f32 %v1595_v38, %v648_v47 }
 0x13c   :  { %v1083_v53 = vpack.c.bf16 %v770_v49, %v770_v49  ;;  %v771_v54 = vadd.f32 %v1595_v38, %v640_v50 }
 0x13d   :  { %933 = vst.msk [vmem:[#allocation11 + $0x8] sm:$0xf] %vm930_vm1, %v1085_v51  ;;  %v1086_v55 = vpack.c.bf16 %v773_v52, %v773_v52 }
 0x13e   :  { %v1161_v56 = vpop.f32.mrb[4].mxu1  ;;  %931 = vst.msk [vmem:[#allocation11] sm:$0xf] %vm930_vm1, %v1083_v53  ;;  %v1084_v57 = vpack.c.bf16 %v771_v54, %v771_v54  ;;  %v1197_v58 = vpop.f32.mrb[4].mxu0 }
 0x13f   :  { %v351_v59 = vpop.f32.mrb[5].mxu1  ;;  %934 = vst.msk [vmem:[#allocation11 + $0xc] sm:$0xf] %vm930_vm1, %v1086_v55  ;;  %v661_v60 = vadd.f32 %v1197_v58, %v1161_v56  ;;  %v652_v61 = vpop.f32.mrb[5].mxu0 }
 0x140   :  { %v1162_v62 = vpop.f32.mrb[6].mxu1  ;;  %932 = vst.msk [vmem:[#allocation11 + $0x4] sm:$0xf] %vm930_vm1, %v1084_v57  ;;  %v653_v63 = vadd.f32 %v652_v61, %v351_v59  ;;  %v1198_v0 = vpop.f32.mrb[6].mxu0 }
 0x141   :  { %v354_v1 = vpop.f32.mrb[7].mxu1  ;;  %v776_v2 = vadd.f32 %v1595_v38, %v661_v60  ;;  %v664_v3 = vadd.f32 %v1198_v0, %v1162_v62  ;;  %v655_v4 = vpop.f32.mrb[7].mxu0 }
 0x142   :  { %v774_v5 = vadd.f32 %v1595_v38, %v653_v63  ;;  %v656_v6 = vadd.f32 %v655_v4, %v354_v1 }
 0x143   :  { %v1089_v7 = vpack.c.bf16 %v776_v2, %v776_v2  ;;  %v777_v8 = vadd.f32 %v1595_v38, %v664_v3 }
 0x144   :  { %v1087_v9 = vpack.c.bf16 %v774_v5, %v774_v5  ;;  %v775_v10 = vadd.f32 %v1595_v38, %v656_v6 }
 0x145   :  { %937 = vst.msk [vmem:[#allocation11 + $0x18] sm:$0xf] %vm930_vm1, %v1089_v7  ;;  %v1090_v11 = vpack.c.bf16 %v777_v8, %v777_v8 }
 0x146   :  { %v1165_v12 = vpop.f32.mrb[8].mxu1  ;;  %935 = vst.msk [vmem:[#allocation11 + $0x10] sm:$0xf] %vm930_vm1, %v1087_v9  ;;  %v1088_v13 = vpack.c.bf16 %v775_v10, %v775_v10  ;;  %v1201_v14 = vpop.f32.mrb[8].mxu0 }
 0x147   :  { %v367_v15 = vpop.f32.mrb[9].mxu1  ;;  %938 = vst.msk [vmem:[#allocation11 + $0x1c] sm:$0xf] %vm930_vm1, %v1090_v11  ;;  %v677_v16 = vadd.f32 %v1201_v14, %v1165_v12  ;;  %v668_v17 = vpop.f32.mrb[9].mxu0 }
 0x148   :  { %v1166_v18 = vpop.f32.mrb[10].mxu1  ;;  %936 = vst.msk [vmem:[#allocation11 + $0x14] sm:$0xf] %vm930_vm1, %v1088_v13  ;;  %v669_v19 = vadd.f32 %v668_v17, %v367_v15  ;;  %v1202_v20 = vpop.f32.mrb[10].mxu0 }
 0x149   :  { %v370_v21 = vpop.f32.mrb[11].mxu1  ;;  %v780_v22 = vadd.f32 %v1595_v38, %v677_v16  ;;  %v680_v23 = vadd.f32 %v1202_v20, %v1166_v18  ;;  %v671_v24 = vpop.f32.mrb[11].mxu0 }
 0x14a   :  { %v778_v25 = vadd.f32 %v1595_v38, %v669_v19  ;;  %v672_v26 = vadd.f32 %v671_v24, %v370_v21 }
 0x14b   :  { %v1093_v27 = vpack.c.bf16 %v780_v22, %v780_v22  ;;  %v781_v28 = vadd.f32 %v1595_v38, %v680_v23 }
 0x14c   :  { %v1091_v29 = vpack.c.bf16 %v778_v25, %v778_v25  ;;  %v779_v30 = vadd.f32 %v1595_v38, %v672_v26 }
 0x14d   :  { %941 = vst.msk [vmem:[#allocation11 + $0x28] sm:$0xf] %vm930_vm1, %v1093_v27  ;;  %v1094_v31 = vpack.c.bf16 %v781_v28, %v781_v28 }
 0x14e   :  { %v1169_v32 = vpop.f32.mrb[12].mxu1  ;;  %939 = vst.msk [vmem:[#allocation11 + $0x20] sm:$0xf] %vm930_vm1, %v1091_v29  ;;  %v1092_v33 = vpack.c.bf16 %v779_v30, %v779_v30  ;;  %v1205_v34 = vpop.f32.mrb[12].mxu0 }
 0x14f   :  { %v383_v35 = vpop.f32.mrb[13].mxu1  ;;  %942 = vst.msk [vmem:[#allocation11 + $0x2c] sm:$0xf] %vm930_vm1, %v1094_v31  ;;  %v693_v36 = vadd.f32 %v1205_v34, %v1169_v32  ;;  %v684_v37 = vpop.f32.mrb[13].mxu0 }
 0x150   :  { %v1170_v39 = vpop.f32.mrb[14].mxu1  ;;  %940 = vst.msk [vmem:[#allocation11 + $0x24] sm:$0xf] %vm930_vm1, %v1092_v33  ;;  %v685_v40 = vadd.f32 %v684_v37, %v383_v35  ;;  %v1206_v41 = vpop.f32.mrb[14].mxu0 }
 0x151   :  { %v386_v42 = vpop.f32.mrb[15].mxu1  ;;  %v784_v43 = vadd.f32 %v1595_v38, %v693_v36  ;;  %v696_v44 = vadd.f32 %v1206_v41, %v1170_v39  ;;  %v687_v45 = vpop.f32.mrb[15].mxu0 }
 0x152   :  { %v782_v46 = vadd.f32 %v1595_v38, %v685_v40  ;;  %v688_v47 = vadd.f32 %v687_v45, %v386_v42 }
 0x153   :  { %v1097_v48 = vpack.c.bf16 %v784_v43, %v784_v43  ;;  %v785_v49 = vadd.f32 %v1595_v38, %v696_v44 }
 0x154   :  { %v1095_v50 = vpack.c.bf16 %v782_v46, %v782_v46  ;;  %v783_v51 = vadd.f32 %v1595_v38, %v688_v47 }
 0x155   :  { %945 = vst.msk [vmem:[#allocation11 + $0x38] sm:$0xf] %vm930_vm1, %v1097_v48  ;;  %v1098_v52 = vpack.c.bf16 %v785_v49, %v785_v49 }
 0x156   :  { %v1173_v53 = vpop.f32.mrb[16].mxu1  ;;  %943 = vst.msk [vmem:[#allocation11 + $0x30] sm:$0xf] %vm930_vm1, %v1095_v50  ;;  %v1096_v54 = vpack.c.bf16 %v783_v51, %v783_v51  ;;  %v1209_v55 = vpop.f32.mrb[16].mxu0 }
 0x157   :  { %v399_v56 = vpop.f32.mrb[17].mxu1  ;;  %946 = vst.msk [vmem:[#allocation11 + $0x3c] sm:$0xf] %vm930_vm1, %v1098_v52  ;;  %v709_v57 = vadd.f32 %v1209_v55, %v1173_v53  ;;  %v700_v58 = vpop.f32.mrb[17].mxu0 }
 0x158   :  { %v1174_v59 = vpop.f32.mrb[18].mxu1  ;;  %944 = vst.msk [vmem:[#allocation11 + $0x34] sm:$0xf] %vm930_vm1, %v1096_v54  ;;  %v701_v60 = vadd.f32 %v700_v58, %v399_v56  ;;  %v1210_v61 = vpop.f32.mrb[18].mxu0 }
 0x159   :  { %v402_v62 = vpop.f32.mrb[19].mxu1  ;;  %v788_v63 = vadd.f32 %v1595_v38, %v709_v57  ;;  %v712_v0 = vadd.f32 %v1210_v61, %v1174_v59  ;;  %v703_v1 = vpop.f32.mrb[19].mxu0 }
 0x15a   :  { %v786_v2 = vadd.f32 %v1595_v38, %v701_v60  ;;  %v704_v3 = vadd.f32 %v703_v1, %v402_v62 }
 0x15b   :  { %v1101_v4 = vpack.c.bf16 %v788_v63, %v788_v63  ;;  %v789_v5 = vadd.f32 %v1595_v38, %v712_v0 }
 0x15c   :  { %v1099_v6 = vpack.c.bf16 %v786_v2, %v786_v2  ;;  %v787_v7 = vadd.f32 %v1595_v38, %v704_v3 }
 0x15d   :  { %949 = vst.msk [vmem:[#allocation11 + $0x48] sm:$0xf] %vm930_vm1, %v1101_v4  ;;  %v1102_v8 = vpack.c.bf16 %v789_v5, %v789_v5 }
 0x15e   :  { %v1177_v9 = vpop.f32.mrb[20].mxu1  ;;  %947 = vst.msk [vmem:[#allocation11 + $0x40] sm:$0xf] %vm930_vm1, %v1099_v6  ;;  %v1100_v10 = vpack.c.bf16 %v787_v7, %v787_v7  ;;  %v1213_v11 = vpop.f32.mrb[20].mxu0 }
 0x15f   :  { %v415_v12 = vpop.f32.mrb[21].mxu1  ;;  %950 = vst.msk [vmem:[#allocation11 + $0x4c] sm:$0xf] %vm930_vm1, %v1102_v8  ;;  %v725_v13 = vadd.f32 %v1213_v11, %v1177_v9  ;;  %v716_v14 = vpop.f32.mrb[21].mxu0 }
 0x160   :  { %v1178_v15 = vpop.f32.mrb[22].mxu1  ;;  %948 = vst.msk [vmem:[#allocation11 + $0x44] sm:$0xf] %vm930_vm1, %v1100_v10  ;;  %v717_v16 = vadd.f32 %v716_v14, %v415_v12  ;;  %v1214_v17 = vpop.f32.mrb[22].mxu0 }
 0x161   :  { %v418_v18 = vpop.f32.mrb[23].mxu1  ;;  %v792_v19 = vadd.f32 %v1595_v38, %v725_v13  ;;  %v728_v20 = vadd.f32 %v1214_v17, %v1178_v15  ;;  %v719_v21 = vpop.f32.mrb[23].mxu0 }
 0x162   :  { %v790_v22 = vadd.f32 %v1595_v38, %v717_v16  ;;  %v720_v23 = vadd.f32 %v719_v21, %v418_v18 }
 0x163   :  { %v1105_v24 = vpack.c.bf16 %v792_v19, %v792_v19  ;;  %v793_v25 = vadd.f32 %v1595_v38, %v728_v20 }
 0x164   :  { %v1103_v26 = vpack.c.bf16 %v790_v22, %v790_v22  ;;  %v791_v27 = vadd.f32 %v1595_v38, %v720_v23 }
 0x165   :  { %953 = vst.msk [vmem:[#allocation11 + $0x58] sm:$0xf] %vm930_vm1, %v1105_v24  ;;  %v1106_v28 = vpack.c.bf16 %v793_v25, %v793_v25 }
 0x166   :  { %v1181_v29 = vpop.f32.mrb[24].mxu1  ;;  %951 = vst.msk [vmem:[#allocation11 + $0x50] sm:$0xf] %vm930_vm1, %v1103_v26  ;;  %v1104_v30 = vpack.c.bf16 %v791_v27, %v791_v27  ;;  %v1217_v31 = vpop.f32.mrb[24].mxu0 }
 0x167   :  { %v431_v32 = vpop.f32.mrb[25].mxu1  ;;  %954 = vst.msk [vmem:[#allocation11 + $0x5c] sm:$0xf] %vm930_vm1, %v1106_v28  ;;  %v741_v33 = vadd.f32 %v1217_v31, %v1181_v29  ;;  %v732_v34 = vpop.f32.mrb[25].mxu0 }
 0x168   :  { %v1182_v35 = vpop.f32.mrb[26].mxu1  ;;  %952 = vst.msk [vmem:[#allocation11 + $0x54] sm:$0xf] %vm930_vm1, %v1104_v30  ;;  %v733_v36 = vadd.f32 %v732_v34, %v431_v32  ;;  %v1218_v37 = vpop.f32.mrb[26].mxu0 }
 0x169   :  { %v434_v39 = vpop.f32.mrb[27].mxu1  ;;  %v796_v40 = vadd.f32 %v1595_v38, %v741_v33  ;;  %v744_v41 = vadd.f32 %v1218_v37, %v1182_v35  ;;  %v735_v42 = vpop.f32.mrb[27].mxu0 }
 0x16a   :  { %v794_v43 = vadd.f32 %v1595_v38, %v733_v36  ;;  %v736_v44 = vadd.f32 %v735_v42, %v434_v39 }
 0x16b   :  { %v1109_v45 = vpack.c.bf16 %v796_v40, %v796_v40  ;;  %v797_v46 = vadd.f32 %v1595_v38, %v744_v41 }
 0x16c   :  { %v1107_v47 = vpack.c.bf16 %v794_v43, %v794_v43  ;;  %v795_v48 = vadd.f32 %v1595_v38, %v736_v44 }
 0x16d   :  { %957 = vst.msk [vmem:[#allocation11 + $0x68] sm:$0xf] %vm930_vm1, %v1109_v45  ;;  %v1110_v49 = vpack.c.bf16 %v797_v46, %v797_v46 }
 0x16e   :  { %v1185_v50 = vpop.f32.mrb[28].mxu1  ;;  %955 = vst.msk [vmem:[#allocation11 + $0x60] sm:$0xf] %vm930_vm1, %v1107_v47  ;;  %v1108_v51 = vpack.c.bf16 %v795_v48, %v795_v48  ;;  %v1221_v52 = vpop.f32.mrb[28].mxu0 }
 0x16f   :  { %v447_v53 = vpop.f32.mrb[29].mxu1  ;;  %958 = vst.msk [vmem:[#allocation11 + $0x6c] sm:$0xf] %vm930_vm1, %v1110_v49  ;;  %v757_v54 = vadd.f32 %v1221_v52, %v1185_v50  ;;  %v748_v55 = vpop.f32.mrb[29].mxu0 }
 0x170   :  { %v1186_v56 = vpop.f32.mrb[30].mxu1  ;;  %956 = vst.msk [vmem:[#allocation11 + $0x64] sm:$0xf] %vm930_vm1, %v1108_v51  ;;  %v749_v57 = vadd.f32 %v748_v55, %v447_v53  ;;  %v1222_v58 = vpop.f32.mrb[30].mxu0 }
 0x171   :  { %v450_v59 = vpop.f32.mrb[31].mxu1  ;;  %v800_v60 = vadd.f32 %v1595_v38, %v757_v54  ;;  %v760_v61 = vadd.f32 %v1222_v58, %v1186_v56  ;;  %v751_v62 = vpop.f32.mrb[31].mxu0 }
 0x172   :  { %v798_v63 = vadd.f32 %v1595_v38, %v749_v57  ;;  %v752_v0 = vadd.f32 %v751_v62, %v450_v59 }
 0x173   :  { %v1113_v1 = vpack.c.bf16 %v800_v60, %v800_v60  ;;  %v801_v2 = vadd.f32 %v1595_v38, %v760_v61 }
 0x174   :  { %v1111_v3 = vpack.c.bf16 %v798_v63, %v798_v63  ;;  %v799_v4 = vadd.f32 %v1595_v38, %v752_v0 }
 0x175   :  { %961 = vst.msk [vmem:[#allocation11 + $0x78] sm:$0xf] %vm930_vm1, %v1113_v1  ;;  %v1114_v5 = vpack.c.bf16 %v801_v2, %v801_v2 }
 0x176   :  { %959 = vst.msk [vmem:[#allocation11 + $0x70] sm:$0xf] %vm930_vm1, %v1111_v3  ;;  %v1112_v6 = vpack.c.bf16 %v799_v4, %v799_v4 }
 0x177   :  { %962 = vst.msk [vmem:[#allocation11 + $0x7c] sm:$0xf] %vm930_vm1, %v1114_v5 }
 0x178   :  { %960 = vst.msk [vmem:[#allocation11 + $0x74] sm:$0xf] %vm930_vm1, %v1112_v6 }
 0x179   :  { %1420 = shalt.err (!%p1417_p2)
}
 0x17a   :  { %s1421_s8 = scalar_lea.hbm %s1681_s5, 2048 }
 0x17b   :  { %p1422_p3 = scmp.ne.s32.totalorder %s1681_s5, %s1421_s8  ;;  %p1425_p4 = scmp.lt.u32.totalorder %s1421_s8, %s1681_s5 }
 0x17d   :  { %p1427_p5 = pnand %p1425_p4, %p1422_p3 }
 0x17f   :  { %1430 = shalt.err (!%p1427_p5)
}
 0x180   :  { %974 = dma.vmem_to_hbm [thread:$0]  %s969_s29, 2048, %s1681_s5, [#allocation4], %s1441_s30, %s1441_s30, %s1442_s6  }
 0x181   :  { %1437 = dma.done.wait [#allocation4], 2048  }
 0x182   :  { %1438 = vsyncadd [#allocation4], 4294965248 }
 0x183   :  { %978 = vsyncpa [#allocation3], 1 }
 0x184   :  { %979 = vsyncpa [#allocation6], 1 }
 0x185   :  { %980 = vsyncpa [#allocation9], 1 }
 0x186   :  { %981 = vsyncpa [#allocation4], 1 }

// kernel: _lambda_.17
= control target key start
LH: loop header
LB: loop body
LE: loop exit
PB: predicated region body
PF: predicated region fallthrough
CT: control target
= control target key end

     0   :  { %10 = vsyncpa [#allocation3], 0  ;;  %s1993_s0 = inlined_call_operand.hbm [shape: f32[256,32], index: 0, kind: input, shape index: {}]   ;;  %s1994_s1 = inlined_call_operand.hbm [shape: bf16[32,32], index: 1, kind: input, shape index: {}]   ;;  %s1995_s2 = inlined_call_operand.hbm [shape: bf16[256,32], index: 2, kind: input, shape index: {}]   ;;  %s1996_s3 = inlined_call_operand.hbm [shape: bf16[32,32], index: 3, kind: input, shape index: {}]   ;;  %s1997_s4 = inlined_call_operand.hbm [shape: f32[1,32], index: 4, kind: input, shape index: {}]   ;;  %s1998_s5 = inlined_call_operand.hbm [shape: f32[256,32], index: 5, kind: output, shape index: {}]  }
   0x1   :  { %11 = vsyncpa [#allocation6], 0 }
   0x2   :  { %12 = vsyncpa [#allocation9], 0 }
   0x3   :  { %13 = vsyncpa [#allocation4], 0  ;;  %s1504_s18 = smov [#allocation5]   ;;  %s1364_s22 = scalar_lea.hbm %s1994_s1, 256 }
   0x4   :  { %s31_s19 = sshll.u32 %s1504_s18, 4  ;;  %p1365_p0 = scmp.ne.s32.totalorder %s1994_s1, %s1364_s22  ;;  %s32_s19 = int_to_ptr.vmem [resolvable:$true] %s31_s19 }
   0x5   :  { %p1368_p1 = scmp.lt.u32.totalorder %s1364_s22, %s1994_s1 }
   0x7   :  { %p1370_p2 = pnand %p1368_p1, %p1365_p0 }
   0x9   :  { %1373 = shalt.err (!%p1370_p2)
}
   0xa   :  { %s1374_s27 = scalar_lea.vmem %s32_s19, 256  ;;  %p1379_p4 = scmp.lt.s32.totalorder %s32_s19, %s32_s19 }
   0xb   :  { %p1375_p3 = scmp.ne.s32.totalorder %s32_s19, %s1374_s27  ;;  %p1380_p5 = scmp.lt.s32.totalorder %s1374_s27, %s1374_s27 }
   0xd   :  { %p1381_p6 = por %p1380_p5, %p1379_p4 }
   0xf   :  { %p1382_p7 = pnand %p1381_p6, %p1375_p3 }
  0x11   :  { %1385 = shalt.err (!%p1382_p7)
}
  0x12   :  { %s1505_s28 = smov 64   ;;  %s1506_s29 = smov 4  }
  0x13   :  { %37 = dma.hbm_to_vmem [thread:$0]  %s1994_s1, 256, %s32_s19, [#allocation6], %s1505_s28, %s1505_s28, %s1506_s29  }
  0x14   :  { %s1507_s7 = smov [#allocation8]   ;;  %s1508_s9 = smov [#allocation2]  }
  0x15   :  { %s55_s8 = sshll.u32 %s1507_s7, 4  ;;  %s19_s10 = sshll.u32 %s1508_s9, 4  ;;  %s56_s8 = int_to_ptr.vmem [resolvable:$true] %s55_s8  ;;  %s20_s10 = int_to_ptr.vmem [resolvable:$true] %s19_s10 }
  0x16   :  { %s1386_s13 = scalar_lea.hbm %s1996_s3, 256 }
  0x17   :  { %p1387_p8 = scmp.ne.s32.totalorder %s1996_s3, %s1386_s13  ;;  %p1390_p9 = scmp.lt.u32.totalorder %s1386_s13, %s1996_s3 }
  0x19   :  { %p1392_p10 = pnand %p1390_p9, %p1387_p8 }
  0x1b   :  { %1395 = shalt.err (!%p1392_p10)
}
  0x1c   :  { %s1396_s1 = scalar_lea.vmem %s56_s8, 256  ;;  %p1401_p12 = scmp.lt.s32.totalorder %s56_s8, %s56_s8 }
  0x1d   :  { %p1397_p11 = scmp.ne.s32.totalorder %s56_s8, %s1396_s1  ;;  %p1402_p13 = scmp.lt.s32.totalorder %s1396_s1, %s1396_s1 }
  0x1f   :  { %p1403_p0 = por %p1402_p13, %p1401_p12 }
  0x21   :  { %p1404_p1 = pnand %p1403_p0, %p1397_p11 }
  0x23   :  { %1407 = shalt.err (!%p1404_p1)
}
  0x24   :  { %61 = dma.hbm_to_vmem [thread:$0]  %s1996_s3, 256, %s56_s8, [#allocation9], %s1505_s28, %s1505_s28, %s1506_s29  }
  0x25   :  { %s1408_s22 = scalar_lea.hbm %s1993_s0, 4096 }
  0x26   :  { %p1409_p2 = scmp.ne.s32.totalorder %s1993_s0, %s1408_s22  ;;  %p1412_p3 = scmp.lt.u32.totalorder %s1408_s22, %s1993_s0 }
  0x28   :  { %p1414_p4 = pnand %p1412_p3, %p1409_p2 }
  0x2a   :  { %1417 = shalt.err (!%p1414_p4)
}
  0x2b   :  { %s1418_s27 = scalar_lea.vmem %s20_s10, 4096  ;;  %p1423_p6 = scmp.lt.s32.totalorder %s20_s10, %s20_s10 }
  0x2c   :  { %p1419_p5 = scmp.ne.s32.totalorder %s20_s10, %s1418_s27  ;;  %p1424_p7 = scmp.lt.s32.totalorder %s1418_s27, %s1418_s27 }
  0x2e   :  { %p1425_p8 = por %p1424_p7, %p1423_p6 }
  0x30   :  { %p1426_p9 = pnand %p1425_p8, %p1419_p5 }
  0x32   :  { %1429 = shalt.err (!%p1426_p9)
}
  0x33   :  { %s1509_s3 = smov 128   ;;  %s1510_s30 = smov 8  }
  0x34   :  { %25 = dma.hbm_to_vmem [thread:$0]  %s1993_s0, 4096, %s20_s10, [#allocation3], %s1509_s3, %s1509_s3, %s1510_s30  }
  0x35   :  { %s1511_s8 = smov [#allocation7]   ;;  %s1512_s11 = smov [#allocation10]  }
  0x36   :  { %s43_s9 = sshll.u32 %s1511_s8, 4  ;;  %s68_s12 = sshll.u32 %s1512_s11, 4  ;;  %s44_s9 = int_to_ptr.vmem [resolvable:$true] %s43_s9  ;;  %s69_s12 = int_to_ptr.vmem [resolvable:$true] %s68_s12 }
  0x37   :  { %s1430_s15 = scalar_lea.hbm %s1995_s2, 2048 }
  0x38   :  { %p1431_p10 = scmp.ne.s32.totalorder %s1995_s2, %s1430_s15  ;;  %p1434_p11 = scmp.lt.u32.totalorder %s1430_s15, %s1995_s2 }
  0x3a   :  { %p1436_p12 = pnand %p1434_p11, %p1431_p10 }
  0x3c   :  { %1439 = shalt.err (!%p1436_p12)
}
  0x3d   :  { %s1440_s0 = scalar_lea.vmem %s44_s9, 2048  ;;  %p1445_p0 = scmp.lt.s32.totalorder %s44_s9, %s44_s9 }
  0x3e   :  { %p1441_p13 = scmp.ne.s32.totalorder %s44_s9, %s1440_s0  ;;  %p1446_p1 = scmp.lt.s32.totalorder %s1440_s0, %s1440_s0 }
  0x40   :  { %p1447_p2 = por %p1446_p1, %p1445_p0 }
  0x42   :  { %p1448_p3 = pnand %p1447_p2, %p1441_p13 }
  0x44   :  { %1451 = shalt.err (!%p1448_p3)
}
  0x45   :  { %49 = dma.hbm_to_vmem [thread:$0]  %s1995_s2, 2048, %s44_s9, [#allocation6], %s1505_s28, %s1505_s28, %s1506_s29  }
  0x46   :  { %s1452_s22 = scalar_lea.hbm %s1997_s4, 16 }
  0x47   :  { %p1453_p4 = scmp.ne.s32.totalorder %s1997_s4, %s1452_s22  ;;  %p1456_p5 = scmp.lt.u32.totalorder %s1452_s22, %s1997_s4 }
  0x49   :  { %p1458_p6 = pnand %p1456_p5, %p1453_p4 }
  0x4b   :  { %1461 = shalt.err (!%p1458_p6)
}
  0x4c   :  { %s1462_s27 = scalar_lea.vmem %s69_s12, 16  ;;  %s1466_s6 = scalar_lea.vmem %s69_s12, 32 }
  0x4d   :  { %p1463_p7 = scmp.ne.s32.totalorder %s69_s12, %s1462_s27  ;;  %p1467_p8 = scmp.lt.s32.totalorder %s69_s12, %s69_s12 }
  0x4e   :  { %p1468_p9 = scmp.lt.s32.totalorder %s1466_s6, %s1462_s27 }
  0x50   :  { %p1469_p10 = por %p1468_p9, %p1467_p8 }
  0x52   :  { %p1470_p11 = pnand %p1469_p10, %p1463_p7 }
  0x54   :  { %1473 = shalt.err (!%p1470_p11)
}
  0x55   :  { %71 = dma.hbm_to_vmem [thread:$0]  %s1997_s4, 16, %s69_s12, [#allocation9]  }
  0x56   :  { %1496 = dma.done.wait [#allocation3], 4096  }
  0x57   :  { %1497 = vsyncadd [#allocation3], 4294963200 }
  0x58   :  { %1498 = dma.done.wait [#allocation6], 2304  }
  0x59   :  { %1499 = vsyncadd [#allocation6], 4294964992 }
  0x5a   :  { %1500 = dma.done.wait [#allocation9], 272  }
  0x5b   :  { %1501 = vsyncadd [#allocation9], 4294967024  ;;  %v1280_v0 = vld [vmem:[#allocation8] sm:$0xff]   ;;  %v1281_v1 = vld [vmem:[#allocation5] sm:$0xff]   ;;  %vm268_vm0 = vcmask 261120   ;;  %s1513_s4 = smov [#allocation11]  }
  0x5c   :  { %1166 = vmatprep.subr.bf16.mxu1 %v1280_v0  ;;  %v1282_v2 = vld [vmem:[#allocation8 + $0x8] sm:$0xff]   ;;  %1202 = vmatprep.subr.bf16.mxu0 %v1281_v1  ;;  %v1283_v3 = vld [vmem:[#allocation5 + $0x8] sm:$0xff]   ;;  %v1284_v4 = vld [vmem:[#allocation7] sm:$0xff]   ;;  %s1063_s29 = sshll.u32 %s1513_s4, 4  ;;  %s1064_s29 = int_to_ptr.vmem [resolvable:$true] %s1063_s29 }
  0x5d   :  { %1167 = vmatpush3.bf16.msra.mxu1 %v1280_v0  ;;  %1203 = vmatpush3.bf16.msra.mxu0 %v1281_v1  ;;  %v88_v5 = vld [vmem:[#allocation2] sm:$0xff]  ;;  %v89_v6 = vld [vmem:[#allocation2 + $0x8] sm:$0xff]  ;;  %v1285_v8 = vld [vmem:[#allocation7 + $0x8] sm:$0xff]   ;;  %s1474_s7 = scalar_lea.vmem %s1064_s29, 4096  ;;  %p1479_p13 = scmp.lt.s32.totalorder %s1064_s29, %s1064_s29 }
  0x5e   :  { %1168 = vmatprep.subr.bf16.mxu1 %v1282_v2  ;;  %1204 = vmatprep.subr.bf16.mxu0 %v1283_v3  ;;  %v120_v7 = vpack.c.bf16 %v89_v6, %v88_v5  ;;  %v90_v9 = vld [vmem:[#allocation2 + $0x10] sm:$0xff]  ;;  %v91_v10 = vld [vmem:[#allocation2 + $0x18] sm:$0xff]  ;;  %v1286_v12 = vld [vmem:[#allocation7 + $0x10] sm:$0xff]   ;;  %p1475_p12 = scmp.ne.s32.totalorder %s1064_s29, %s1474_s7  ;;  %p1480_p0 = scmp.lt.s32.totalorder %s1474_s7, %s1474_s7 }
  0x5f   :  { %1170 = vmatprep.mubr.msk.bf16.mxu1 %vm268_vm0, %v1284_v4  ;;  %v121_v11 = vpack.c.bf16 %v91_v10, %v90_v9  ;;  %v92_v13 = vld [vmem:[#allocation2 + $0x20] sm:$0xff]  ;;  %v93_v14 = vld [vmem:[#allocation2 + $0x28] sm:$0xff]  ;;  %v94_v16 = vld [vmem:[#allocation2 + $0x30] sm:$0xff] }
  0x60   :  { %1206 = vmatprep.mubr.msk.bf16.mxu0 %vm268_vm0, %v120_v7  ;;  %v122_v15 = vpack.c.bf16 %v93_v14, %v92_v13  ;;  %v95_v17 = vld [vmem:[#allocation2 + $0x38] sm:$0xff]  ;;  %v96_v18 = vld [vmem:[#allocation2 + $0x40] sm:$0xff]  ;;  %v97_v19 = vld [vmem:[#allocation2 + $0x48] sm:$0xff]  ;;  %p1481_p1 = por %p1480_p0, %p1479_p13 }
  0x61   :  { %1169 = vmatpush3.bf16.msra.mxu1 %v1282_v2  ;;  %1205 = vmatpush3.bf16.msra.mxu0 %v1283_v3  ;;  %v1287_v20 = vld [vmem:[#allocation7 + $0x18] sm:$0xff]   ;;  %v123_v21 = vpack.c.bf16 %v95_v17, %v94_v16  ;;  %v1288_v22 = vld [vmem:[#allocation7 + $0x20] sm:$0xff]   ;;  %v124_v23 = vpack.c.bf16 %v97_v19, %v96_v18  ;;  %v99_v25 = vld [vmem:[#allocation2 + $0x58] sm:$0xff] }
  0x62   :  { %v98_v24 = vld [vmem:[#allocation2 + $0x50] sm:$0xff]  ;;  %v100_v26 = vld [vmem:[#allocation2 + $0x60] sm:$0xff]  ;;  %v101_v27 = vld [vmem:[#allocation2 + $0x68] sm:$0xff]  ;;  %p1482_p2 = pnand %p1481_p1, %p1475_p12 }
  0x63   :  { %v1289_v28 = vld [vmem:[#allocation7 + $0x28] sm:$0xff]   ;;  %v125_v29 = vpack.c.bf16 %v99_v25, %v98_v24  ;;  %v1290_v30 = vld [vmem:[#allocation7 + $0x30] sm:$0xff]   ;;  %v126_v31 = vpack.c.bf16 %v101_v27, %v100_v26  ;;  %v102_v32 = vld [vmem:[#allocation2 + $0x70] sm:$0xff] }
  0x64   :  { %1171 = vmatmul.mubr.msk.bf16.vlgmr.msra.gmra.mrb[0].mxu1 %vm268_vm0, %v1285_v8  ;;  %1207 = vmatmul.mubr.msk.bf16.vlgmr.msra.gmra.mrb[0].mxu0 %vm268_vm0, %v121_v11  ;;  %v103_v33 = vld [vmem:[#allocation2 + $0x78] sm:$0xff]  ;;  %v104_v34 = vld [vmem:[#allocation2 + $0x80] sm:$0xff]  ;;  %v105_v35 = vld [vmem:[#allocation2 + $0x88] sm:$0xff] }
  0x65   :  { %1174 = vmatprep.mubr.msk.bf16.mxu1 %vm268_vm0, %v1286_v12  ;;  %1210 = vmatprep.mubr.msk.bf16.mxu0 %vm268_vm0, %v122_v15  ;;  %v1291_v36 = vld [vmem:[#allocation7 + $0x38] sm:$0xff]   ;;  %v127_v37 = vpack.c.bf16 %v103_v33, %v102_v32  ;;  %v1292_v38 = vld [vmem:[#allocation7 + $0x40] sm:$0xff]   ;;  %v128_v39 = vpack.c.bf16 %v105_v35, %v104_v34  ;;  %v107_v41 = vld [vmem:[#allocation2 + $0x98] sm:$0xff] }
  0x66   :  { %v106_v40 = vld [vmem:[#allocation2 + $0x90] sm:$0xff]  ;;  %v108_v42 = vld [vmem:[#allocation2 + $0xa0] sm:$0xff]  ;;  %v109_v43 = vld [vmem:[#allocation2 + $0xa8] sm:$0xff] }
  0x67   :  { %v1293_v44 = vld [vmem:[#allocation7 + $0x48] sm:$0xff]   ;;  %v129_v45 = vpack.c.bf16 %v107_v41, %v106_v40  ;;  %v1294_v46 = vld [vmem:[#allocation7 + $0x50] sm:$0xff]   ;;  %v130_v47 = vpack.c.bf16 %v109_v43, %v108_v42  ;;  %v110_v48 = vld [vmem:[#allocation2 + $0xb0] sm:$0xff] }
  0x68   :  { %v111_v49 = vld [vmem:[#allocation2 + $0xb8] sm:$0xff]  ;;  %v112_v50 = vld [vmem:[#allocation2 + $0xc0] sm:$0xff]  ;;  %v113_v51 = vld [vmem:[#allocation2 + $0xc8] sm:$0xff] }
  0x69   :  { %v1295_v52 = vld [vmem:[#allocation7 + $0x58] sm:$0xff]   ;;  %v131_v53 = vpack.c.bf16 %v111_v49, %v110_v48  ;;  %v1296_v54 = vld [vmem:[#allocation7 + $0x60] sm:$0xff]   ;;  %v132_v55 = vpack.c.bf16 %v113_v51, %v112_v50  ;;  %v115_v57 = vld [vmem:[#allocation2 + $0xd8] sm:$0xff] }
  0x6a   :  { %v114_v56 = vld [vmem:[#allocation2 + $0xd0] sm:$0xff]  ;;  %v116_v58 = vld [vmem:[#allocation2 + $0xe0] sm:$0xff]  ;;  %v117_v59 = vld [vmem:[#allocation2 + $0xe8] sm:$0xff] }
  0x6b   :  { %v1297_v60 = vld [vmem:[#allocation7 + $0x68] sm:$0xff]   ;;  %v133_v61 = vpack.c.bf16 %v115_v57, %v114_v56  ;;  %v1298_v62 = vld [vmem:[#allocation7 + $0x70] sm:$0xff]   ;;  %v134_v63 = vpack.c.bf16 %v117_v59, %v116_v58  ;;  %v118_v0 = vld [vmem:[#allocation2 + $0xf0] sm:$0xff] }
  0x6c   :  { %1175 = vmatmul.mubr.msk.bf16.gmra.mrb[4].mxu1 %vm268_vm0, %v1287_v20  ;;  %1211 = vmatmul.mubr.msk.bf16.gmra.mrb[4].mxu0 %vm268_vm0, %v123_v21  ;;  %v119_v1 = vld [vmem:[#allocation2 + $0xf8] sm:$0xff]  ;;  %v1299_v2 = vld [vmem:[#allocation7 + $0x78] sm:$0xff]   ;;  %v1648_v6 = vld [vmem:[#allocation10] ss:$0 sm:$0xff] }
  0x6d   :  { %1178 = vmatprep.mubr.msk.bf16.mxu1 %vm268_vm0, %v1288_v22  ;;  %1214 = vmatprep.mubr.msk.bf16.mxu0 %vm268_vm0, %v124_v23  ;;  %v135_v3 = vpack.c.bf16 %v119_v1, %v118_v0 }
  0x74   :  { %1179 = vmatmul.mubr.msk.bf16.gmra.mrb[8].mxu1 %vm268_vm0, %v1289_v28  ;;  %1215 = vmatmul.mubr.msk.bf16.gmra.mrb[8].mxu0 %vm268_vm0, %v125_v29 }
  0x75   :  { %1182 = vmatprep.mubr.msk.bf16.mxu1 %vm268_vm0, %v1290_v30  ;;  %1218 = vmatprep.mubr.msk.bf16.mxu0 %vm268_vm0, %v126_v31 }
  0x7c   :  { %1183 = vmatmul.mubr.msk.bf16.gmra.mrb[12].mxu1 %vm268_vm0, %v1291_v36  ;;  %1219 = vmatmul.mubr.msk.bf16.gmra.mrb[12].mxu0 %vm268_vm0, %v127_v37 }
  0x7d   :  { %1186 = vmatprep.mubr.msk.bf16.mxu1 %vm268_vm0, %v1292_v38  ;;  %1222 = vmatprep.mubr.msk.bf16.mxu0 %vm268_vm0, %v128_v39 }
  0x84   :  { %1187 = vmatmul.mubr.msk.bf16.gmra.mrb[16].mxu1 %vm268_vm0, %v1293_v44  ;;  %1223 = vmatmul.mubr.msk.bf16.gmra.mrb[16].mxu0 %vm268_vm0, %v129_v45 }
  0x85   :  { %1190 = vmatprep.mubr.msk.bf16.mxu1 %vm268_vm0, %v1294_v46  ;;  %1226 = vmatprep.mubr.msk.bf16.mxu0 %vm268_vm0, %v130_v47 }
  0x8c   :  { %1191 = vmatmul.mubr.msk.bf16.gmra.mrb[20].mxu1 %vm268_vm0, %v1295_v52  ;;  %1227 = vmatmul.mubr.msk.bf16.gmra.mrb[20].mxu0 %vm268_vm0, %v131_v53 }
  0x8d   :  { %1194 = vmatprep.mubr.msk.bf16.mxu1 %vm268_vm0, %v1296_v54  ;;  %1230 = vmatprep.mubr.msk.bf16.mxu0 %vm268_vm0, %v132_v55 }
  0x94   :  { %1195 = vmatmul.mubr.msk.bf16.gmra.mrb[24].mxu1 %vm268_vm0, %v1297_v60  ;;  %1231 = vmatmul.mubr.msk.bf16.gmra.mrb[24].mxu0 %vm268_vm0, %v133_v61 }
  0x95   :  { %1198 = vmatprep.mubr.msk.bf16.mxu1 %vm268_vm0, %v1298_v62  ;;  %1234 = vmatprep.mubr.msk.bf16.mxu0 %vm268_vm0, %v134_v63 }
  0x9c   :  { %1199 = vmatmul.mubr.msk.bf16.gmra.mrb[28].mxu1 %vm268_vm0, %v1299_v2  ;;  %1235 = vmatmul.mubr.msk.bf16.gmra.mrb[28].mxu0 %vm268_vm0, %v135_v3 }
 0x137   :  { %v1172_v4 = vpop.f32.mrb[0].mxu1  ;;  %v1208_v5 = vpop.f32.mrb[0].mxu0 }
 0x138   :  { %v351_v7 = vpop.f32.mrb[1].mxu1  ;;  %v581_v8 = vadd.f32 %v1208_v5, %v1172_v4  ;;  %v572_v9 = vpop.f32.mrb[1].mxu0 }
 0x139   :  { %v1173_v10 = vpop.f32.mrb[2].mxu1  ;;  %v573_v11 = vadd.f32 %v572_v9, %v351_v7  ;;  %v1209_v12 = vpop.f32.mrb[2].mxu0 }
 0x13a   :  { %v354_v13 = vpop.f32.mrb[3].mxu1  ;;  %v708_v14 = vadd.f32 %v1648_v6, %v581_v8  ;;  %v584_v15 = vadd.f32 %v1209_v12, %v1173_v10  ;;  %v575_v16 = vpop.f32.mrb[3].mxu0 }
 0x13b   :  { %v706_v17 = vadd.f32 %v1648_v6, %v573_v11  ;;  %v576_v18 = vadd.f32 %v575_v16, %v354_v13 }
 0x13c   :  { %v772_v19 = vmul.f32 0.044715, %v708_v14  ;;  %v1653_v20 = vadd.f32 %v1648_v6, %v584_v15  ;;  %v740_v0 = vmul.f32 0.5, %v708_v14 }
 0x13d   :  { %v770_v21 = vmul.f32 0.044715, %v706_v17  ;;  %v1656_v22 = vadd.f32 %v1648_v6, %v576_v18  ;;  %v738_v5 = vmul.f32 0.5, %v706_v17 }
 0x13e   :  { %v804_v23 = vmul.f32 %v772_v19, %v708_v14  ;;  %v773_v24 = vmul.f32 0.044715, %v1653_v20 }
 0x13f   :  { %v1176_v25 = vpop.f32.mrb[4].mxu1  ;;  %v802_v26 = vmul.f32 %v770_v21, %v706_v17  ;;  %v771_v27 = vmul.f32 0.044715, %v1656_v22  ;;  %v1212_v28 = vpop.f32.mrb[4].mxu0 }
 0x140   :  { %v367_v29 = vpop.f32.mrb[5].mxu1  ;;  %v836_v30 = vmul.f32 %v804_v23, %v708_v14  ;;  %v805_v31 = vmul.f32 %v773_v24, %v1653_v20  ;;  %v597_v32 = vadd.f32 %v1212_v28, %v1176_v25  ;;  %v588_v33 = vpop.f32.mrb[5].mxu0 }
 0x141   :  { %v1177_v34 = vpop.f32.mrb[6].mxu1  ;;  %v834_v35 = vmul.f32 %v802_v26, %v706_v17  ;;  %v803_v36 = vmul.f32 %v771_v27, %v1656_v22  ;;  %v589_v37 = vadd.f32 %v588_v33, %v367_v29  ;;  %v1213_v38 = vpop.f32.mrb[6].mxu0  ;;  %v741_v26 = vmul.f32 0.5, %v1653_v20 }
 0x142   :  { %v370_v39 = vpop.f32.mrb[7].mxu1  ;;  %v868_v40 = vadd.f32 %v836_v30, %v708_v14  ;;  %v837_v41 = vmul.f32 %v805_v31, %v1653_v20  ;;  %v712_v42 = vadd.f32 %v1648_v6, %v597_v32  ;;  %v600_v43 = vadd.f32 %v1213_v38, %v1177_v34  ;;  %v591_v44 = vpop.f32.mrb[7].mxu0 }
 0x143   :  { %v866_v45 = vadd.f32 %v834_v35, %v706_v17  ;;  %v835_v46 = vmul.f32 %v803_v36, %v1656_v22  ;;  %v710_v47 = vadd.f32 %v1648_v6, %v589_v37  ;;  %v592_v48 = vadd.f32 %v591_v44, %v370_v39 }
 0x144   :  { %v900_v49 = vmul.f32 0.7978846, %v868_v40  ;;  %v869_v50 = vadd.f32 %v837_v41, %v1653_v20  ;;  %v776_v51 = vmul.f32 0.044715, %v712_v42  ;;  %v1669_v57 = vadd.f32 %v1648_v6, %v600_v43 }
 0x145   :  { %v898_v52 = vmul.f32 0.7978846, %v866_v45  ;;  %v867_v53 = vadd.f32 %v835_v46, %v1656_v22  ;;  %v774_v54 = vmul.f32 0.044715, %v710_v47  ;;  %v1672_v61 = vadd.f32 %v1648_v6, %v592_v48 }
 0x146   :  { %1300 = vtanh.f32 %v900_v49  ;;  %v901_v55 = vmul.f32 0.7978846, %v869_v50  ;;  %v808_v56 = vmul.f32 %v776_v51, %v712_v42  ;;  %v777_v2 = vmul.f32 0.044715, %v1669_v57 }
 0x147   :  { %v1180_v58 = vpop.f32.mrb[8].mxu1  ;;  %1302 = vtanh.f32 %v898_v52  ;;  %v899_v59 = vmul.f32 0.7978846, %v867_v53  ;;  %v806_v60 = vmul.f32 %v774_v54, %v710_v47  ;;  %v1216_v62 = vpop.f32.mrb[8].mxu0  ;;  %v775_v8 = vmul.f32 0.044715, %v1672_v61 }
 0x148   :  { %v383_v63 = vpop.f32.mrb[9].mxu1  ;;  %1304 = vtanh.f32 %v901_v55  ;;  %v840_v1 = vmul.f32 %v808_v56, %v712_v42  ;;  %v604_v3 = vpop.f32.mrb[9].mxu0  ;;  %v809_v12 = vmul.f32 %v777_v2, %v1669_v57  ;;  %v613_v13 = vadd.f32 %v1216_v62, %v1180_v58 }
 0x149   :  { %v1181_v4 = vpop.f32.mrb[10].mxu1  ;;  %1306 = vtanh.f32 %v899_v59  ;;  %v838_v7 = vmul.f32 %v806_v60, %v710_v47  ;;  %v1217_v9 = vpop.f32.mrb[10].mxu0  ;;  %v605_v15 = vadd.f32 %v604_v3, %v383_v63  ;;  %v807_v18 = vmul.f32 %v775_v8, %v1672_v61 }
 0x14a   :  { %v386_v10 = vpop.f32.mrb[11].mxu1  ;;  %v872_v11 = vadd.f32 %v840_v1, %v712_v42  ;;  %v607_v16 = vpop.f32.mrb[11].mxu0  ;;  %v616_v19 = vadd.f32 %v1217_v9, %v1181_v4  ;;  %v841_v17 = vmul.f32 %v809_v12, %v1669_v57  ;;  %v1680_v24 = vadd.f32 %v1648_v6, %v613_v13 }
 0x14b   :  { %v870_v14 = vadd.f32 %v838_v7, %v710_v47  ;;  %v608_v21 = vadd.f32 %v607_v16, %v386_v10  ;;  %v1683_v25 = vadd.f32 %v1648_v6, %v605_v15  ;;  %v839_v28 = vmul.f32 %v807_v18, %v1672_v61 }
 0x14c   :  { %v904_v23 = vmul.f32 0.7978846, %v872_v11  ;;  %v1688_v29 = vadd.f32 %v1648_v6, %v616_v19  ;;  %v739_v30 = vmul.f32 0.5, %v1656_v22  ;;  %v873_v31 = vadd.f32 %v841_v17, %v1669_v57 }
 0x14d   :  { %v902_v27 = vmul.f32 0.7978846, %v870_v14  ;;  %v780_v32 = vmul.f32 0.044715, %v1680_v24  ;;  %v1693_v34 = vmul.f32 0.5, %v712_v42  ;;  %v871_v35 = vadd.f32 %v839_v28, %v1672_v61 }
 0x14e   :  { %1308 = vtanh.f32 %v904_v23  ;;  %v778_v20 = vmul.f32 0.044715, %v1683_v25  ;;  %v1697_v39 = vmul.f32 0.5, %v710_v47  ;;  %v905_v40 = vmul.f32 0.7978846, %v873_v31 }
 0x14f   :  { %v1184_v33 = vpop.f32.mrb[12].mxu1  ;;  %1310 = vtanh.f32 %v902_v27  ;;  %v1220_v36 = vpop.f32.mrb[12].mxu0  ;;  %v812_v22 = vmul.f32 %v780_v32, %v1680_v24  ;;  %v781_v41 = vmul.f32 0.044715, %v1688_v29  ;;  %v903_v42 = vmul.f32 0.7978846, %v871_v35 }
 0x150   :  { %v399_v37 = vpop.f32.mrb[13].mxu1  ;;  %v1301_v38 = vpop.eup %1300  ;;  %v810_v46 = vmul.f32 %v778_v20, %v1683_v25  ;;  %v1703_v48 = vadd.f32 %v1648_v6, %v608_v21  ;;  %1312 = vtanh.f32 %v905_v40  ;;  %v629_v8 = vadd.f32 %v1220_v36, %v1184_v33 }
 0x151   :  { %v620_v43 = vpop.f32.mrb[13].mxu0  ;;  %v1303_v44 = vpop.eup %1302  ;;  %v964_v45 = vadd.f32 1.0, %v1301_v38  ;;  %v844_v47 = vmul.f32 %v812_v22, %v1680_v24  ;;  %v813_v53 = vmul.f32 %v781_v41, %v1688_v29  ;;  %1314 = vtanh.f32 %v903_v42 }
 0x152   :  { %v1185_v49 = vpop.f32.mrb[14].mxu1  ;;  %v1221_v50 = vpop.f32.mrb[14].mxu0  ;;  %v962_v52 = vadd.f32 1.0, %v1303_v44  ;;  %v842_v60 = vmul.f32 %v810_v46, %v1683_v25  ;;  %v779_v7 = vmul.f32 0.044715, %v1703_v48  ;;  %v1718_v15 = vadd.f32 %v1648_v6, %v629_v8 }
 0x153   :  { %v1305_v51 = vpop.eup %1304  ;;  %v402_v54 = vpop.f32.mrb[15].mxu1  ;;  %v996_v58 = vmul.f32 %v964_v45, %v740_v0  ;;  %v876_v1 = vadd.f32 %v844_v47, %v1680_v24  ;;  %v845_v2 = vmul.f32 %v813_v53, %v1688_v29  ;;  %v632_v16 = vadd.f32 %v1221_v50, %v1185_v49 }
 0x154   :  { %v623_v55 = vpop.f32.mrb[15].mxu0  ;;  %v1307_v56 = vpop.eup %1306  ;;  %v965_v59 = vadd.f32 1.0, %v1305_v51  ;;  %v994_v62 = vmul.f32 %v962_v52, %v738_v5  ;;  %v874_v4 = vadd.f32 %v842_v60, %v1683_v25  ;;  %v621_v5 = vadd.f32 %v620_v43, %v399_v37 }
 0x155   :  { %v963_v63 = vadd.f32 1.0, %v1307_v56  ;;  %1028 = vst.msk [vmem:[#allocation11 + $0x10] sm:$0xff] %vm268_vm0, %v996_v58  ;;  %v908_v9 = vmul.f32 0.7978846, %v876_v1  ;;  %v877_v10 = vadd.f32 %v845_v2, %v1688_v29  ;;  %v811_v13 = vmul.f32 %v779_v7, %v1703_v48 }
 0x156   :  { %v997_v3 = vmul.f32 %v965_v59, %v741_v26  ;;  %1026 = vst.msk [vmem:[#allocation11] sm:$0xff] %vm268_vm0, %v994_v62  ;;  %v906_v12 = vmul.f32 0.7978846, %v874_v4  ;;  %v1722_v23 = vadd.f32 %v1648_v6, %v621_v5  ;;  %v624_v17 = vadd.f32 %v623_v55, %v402_v54 }
 0x157   :  { %v995_v0 = vmul.f32 %v963_v63, %v739_v30  ;;  %v1188_v11 = vpop.f32.mrb[16].mxu1  ;;  %v1224_v14 = vpop.f32.mrb[16].mxu0  ;;  %1316 = vtanh.f32 %v908_v9  ;;  %v909_v21 = vmul.f32 0.7978846, %v877_v10  ;;  %v745_v31 = vmul.f32 0.5, %v1669_v57 }
 0x158   :  { %1029 = vst.msk [vmem:[#allocation11 + $0x18] sm:$0xff] %vm268_vm0, %v997_v3  ;;  %v415_v18 = vpop.f32.mrb[17].mxu1  ;;  %v1309_v19 = vpop.eup %1308  ;;  %1318 = vtanh.f32 %v906_v12  ;;  %v843_v32 = vmul.f32 %v811_v13, %v1703_v48  ;;  %v743_v36 = vmul.f32 0.5, %v1672_v61  ;;  %v784_v37 = vmul.f32 0.044715, %v1718_v15 }
 0x159   :  { %1027 = vst.msk [vmem:[#allocation11 + $0x8] sm:$0xff] %vm268_vm0, %v995_v0  ;;  %v636_v26 = vpop.f32.mrb[17].mxu0  ;;  %v1189_v27 = vpop.f32.mrb[18].mxu1  ;;  %v968_v30 = vadd.f32 1.0, %v1309_v19  ;;  %1320 = vtanh.f32 %v909_v21  ;;  %v782_v57 = vmul.f32 0.044715, %v1722_v23  ;;  %v1736_v41 = vadd.f32 %v1648_v6, %v632_v16 }
 0x15a   :  { %v1311_v28 = vpop.eup %1310  ;;  %v1225_v33 = vpop.f32.mrb[18].mxu0  ;;  %v875_v22 = vadd.f32 %v843_v32, %v1703_v48  ;;  %v816_v45 = vmul.f32 %v784_v37, %v1718_v15  ;;  %v1741_v61 = vadd.f32 %v1648_v6, %v624_v17  ;;  %v645_v42 = vadd.f32 %v1224_v14, %v1188_v11 }
 0x15b   :  { %v1726_v35 = vpop.f32.mrb[19].mxu1  ;;  %v966_v20 = vadd.f32 1.0, %v1311_v28  ;;  %v1730_v38 = vpop.f32.mrb[19].mxu0  ;;  %v1000_v40 = vmul.f32 %v968_v30, %v1693_v34  ;;  %v748_v49 = vmul.f32 0.5, %v1680_v24  ;;  %v814_v51 = vmul.f32 %v782_v57, %v1722_v23 }
 0x15c   :  { %v1313_v43 = vpop.eup %1312  ;;  %v907_v50 = vmul.f32 0.7978846, %v875_v22  ;;  %v848_v47 = vmul.f32 %v816_v45, %v1718_v15  ;;  %v785_v53 = vmul.f32 0.044715, %v1736_v41  ;;  %v783_v58 = vmul.f32 0.044715, %v1741_v61 }
 0x15d   :  { %v998_v44 = vmul.f32 %v966_v20, %v1697_v39  ;;  %v1315_v46 = vpop.eup %1314  ;;  %1032 = vst.msk [vmem:[#allocation11 + $0x30] sm:$0xff] %vm268_vm0, %v1000_v40  ;;  %v969_v34 = vadd.f32 1.0, %v1313_v43  ;;  %v746_v39 = vmul.f32 0.5, %v1683_v25  ;;  %v846_v56 = vmul.f32 %v814_v51, %v1722_v23 }
 0x15e   :  { %v967_v52 = vadd.f32 1.0, %v1315_v46  ;;  %1322 = vtanh.f32 %v907_v50  ;;  %v880_v62 = vadd.f32 %v848_v47, %v1718_v15  ;;  %v817_v63 = vmul.f32 %v785_v53, %v1736_v41 }
 0x15f   :  { %1030 = vst.msk [vmem:[#allocation11 + $0x20] sm:$0xff] %vm268_vm0, %v998_v44  ;;  %v1192_v54 = vpop.f32.mrb[20].mxu1  ;;  %v1001_v55 = vmul.f32 %v969_v34, %v745_v31  ;;  %v1228_v24 = vpop.f32.mrb[20].mxu0  ;;  %v1757_v25 = vadd.f32 %v1648_v6, %v645_v42  ;;  %v878_v3 = vadd.f32 %v846_v56, %v1722_v23  ;;  %v815_v4 = vmul.f32 %v783_v58, %v1741_v61 }
 0x160   :  { %v1752_v59 = vpop.f32.mrb[21].mxu1  ;;  %v999_v60 = vmul.f32 %v967_v52, %v743_v36  ;;  %v1759_v1 = vpop.f32.mrb[21].mxu0  ;;  %v637_v7 = vadd.f32 %v636_v26, %v415_v18  ;;  %v648_v8 = vadd.f32 %v1225_v33, %v1189_v27  ;;  %v749_v5 = vmul.f32 0.5, %v1688_v29 }
 0x161   :  { %v1761_v2 = vpop.f32.mrb[22].mxu1  ;;  %1033 = vst.msk [vmem:[#allocation11 + $0x38] sm:$0xff] %vm268_vm0, %v1001_v55  ;;  %v1229_v0 = vpop.f32.mrb[22].mxu0  ;;  %v912_v11 = vmul.f32 0.7978846, %v880_v62  ;;  %v849_v12 = vmul.f32 %v817_v63, %v1736_v41  ;;  %v847_v18 = vmul.f32 %v815_v4, %v1741_v61  ;;  %v640_v46 = vadd.f32 %v1730_v38, %v1726_v35 }
 0x162   :  { %v1766_v9 = vpop.f32.mrb[23].mxu1  ;;  %v1317_v10 = vpop.eup %1316  ;;  %1031 = vst.msk [vmem:[#allocation11 + $0x28] sm:$0xff] %vm268_vm0, %v999_v60  ;;  %v788_v13 = vmul.f32 0.044715, %v1757_v25  ;;  %v1776_v17 = vadd.f32 %v1648_v6, %v637_v7  ;;  %v1787_v43 = vadd.f32 %v1648_v6, %v648_v8  ;;  %v661_v34 = vadd.f32 %v1228_v24, %v1192_v54 }
 0x163   :  { %v1772_v16 = vpop.f32.mrb[23].mxu0  ;;  %v1319_v14 = vpop.eup %1318  ;;  %v972_v19 = vadd.f32 1.0, %v1317_v10  ;;  %v910_v21 = vmul.f32 0.7978846, %v878_v3  ;;  %1324 = vtanh.f32 %v912_v11  ;;  %v881_v29 = vadd.f32 %v849_v12, %v1736_v41 }
 0x164   :  { %v1321_v26 = vpop.eup %1320  ;;  %v970_v27 = vadd.f32 1.0, %v1319_v14  ;;  %v820_v28 = vmul.f32 %v788_v13, %v1757_v25  ;;  %v879_v32 = vadd.f32 %v847_v18, %v1741_v61  ;;  %v786_v57 = vmul.f32 0.044715, %v1776_v17 }
 0x165   :  { %v1004_v30 = vmul.f32 %v972_v19, %v748_v49  ;;  %v973_v31 = vadd.f32 1.0, %v1321_v26  ;;  %1326 = vtanh.f32 %v910_v21  ;;  %v913_v20 = vmul.f32 0.7978846, %v881_v29 }
 0x166   :  { %v1002_v33 = vmul.f32 %v970_v27, %v746_v39  ;;  %v852_v36 = vmul.f32 %v820_v28, %v1757_v25  ;;  %v911_v22 = vmul.f32 0.7978846, %v879_v32  ;;  %v747_v52 = vmul.f32 0.5, %v1703_v48 }
 0x167   :  { %v1782_v37 = vpop.f32.mrb[24].mxu1  ;;  %1036 = vst.msk [vmem:[#allocation11 + $0x50] sm:$0xff] %vm268_vm0, %v1004_v30  ;;  %v1005_v40 = vmul.f32 %v973_v31, %v749_v5  ;;  %v1789_v44 = vpop.f32.mrb[24].mxu0  ;;  %1328 = vtanh.f32 %v913_v20  ;;  %v818_v39 = vmul.f32 %v786_v57, %v1776_v17  ;;  %v789_v47 = vmul.f32 0.044715, %v1787_v43 }
 0x168   :  { %v1791_v45 = vpop.f32.mrb[25].mxu1  ;;  %1034 = vst.msk [vmem:[#allocation11 + $0x40] sm:$0xff] %vm268_vm0, %v1002_v33  ;;  %v884_v42 = vadd.f32 %v852_v36, %v1757_v25  ;;  %v1797_v49 = vpop.f32.mrb[25].mxu0  ;;  %1330 = vtanh.f32 %v911_v22  ;;  %v1810_v54 = vadd.f32 %v1648_v6, %v640_v46  ;;  %v1813_v56 = vadd.f32 %v1648_v6, %v661_v34 }
 0x169   :  { %v1799_v50 = vpop.f32.mrb[26].mxu1  ;;  %v1323_v51 = vpop.eup %1322  ;;  %1037 = vst.msk [vmem:[#allocation11 + $0x58] sm:$0xff] %vm268_vm0, %v1005_v40  ;;  %v850_v48 = vmul.f32 %v818_v39, %v1776_v17  ;;  %v821_v24 = vmul.f32 %v789_v47, %v1787_v43  ;;  %v653_v60 = vadd.f32 %v1759_v1, %v1752_v59  ;;  %v664_v62 = vadd.f32 %v1229_v0, %v1761_v2 }
 0x16a   :  { %v1805_v53 = vpop.f32.mrb[26].mxu0  ;;  %v1807_v55 = vpop.f32.mrb[27].mxu1  ;;  %v971_v35 = vadd.f32 1.0, %v1323_v51  ;;  %v916_v38 = vmul.f32 0.7978846, %v884_v42  ;;  %v752_v3 = vmul.f32 0.5, %v1718_v15 }
 0x16b   :  { %v1815_v58 = vpop.f32.mrb[27].mxu0  ;;  %v787_v4 = vmul.f32 0.044715, %v1810_v54  ;;  %v750_v7 = vmul.f32 0.5, %v1722_v23  ;;  %v882_v8 = vadd.f32 %v850_v48, %v1776_v17  ;;  %v853_v10 = vmul.f32 %v821_v24, %v1787_v43 }
 0x16c   :  { %v1003_v63 = vmul.f32 %v971_v35, %v747_v52  ;;  %1332 = vtanh.f32 %v916_v38  ;;  %v792_v5 = vmul.f32 0.044715, %v1813_v56  ;;  %v1831_v1 = vadd.f32 %v1648_v6, %v653_v60 }
 0x16d   :  { %v1325_v11 = vpop.eup %1324  ;;  %v819_v59 = vmul.f32 %v787_v4, %v1810_v54  ;;  %v1834_v15 = vadd.f32 %v1648_v6, %v664_v62  ;;  %v656_v23 = vadd.f32 %v1772_v16, %v1766_v9  ;;  %v914_v13 = vmul.f32 0.7978846, %v882_v8 }
 0x16e   :  { %1035 = vst.msk [vmem:[#allocation11 + $0x48] sm:$0xff] %vm268_vm0, %v1003_v63  ;;  %v976_v12 = vadd.f32 1.0, %v1325_v11  ;;  %v885_v14 = vadd.f32 %v853_v10, %v1787_v43  ;;  %v824_v19 = vmul.f32 %v792_v5, %v1813_v56  ;;  %v753_v27 = vmul.f32 0.5, %v1736_v41 }
 0x16f   :  { %v1838_v2 = vpop.f32.mrb[28].mxu1  ;;  %v1327_v0 = vpop.eup %1326  ;;  %v851_v29 = vmul.f32 %v819_v59, %v1810_v54  ;;  %v790_v9 = vmul.f32 0.044715, %v1831_v1  ;;  %1334 = vtanh.f32 %v914_v13  ;;  %v751_v41 = vmul.f32 0.5, %v1741_v61 }
 0x170   :  { %v1842_v21 = vpop.f32.mrb[28].mxu0  ;;  %v1844_v18 = vpop.f32.mrb[29].mxu1  ;;  %v974_v26 = vadd.f32 1.0, %v1327_v0  ;;  %v1008_v30 = vmul.f32 %v976_v12, %v752_v3  ;;  %v917_v31 = vmul.f32 0.7978846, %v885_v14  ;;  %v856_v32 = vmul.f32 %v824_v19, %v1813_v56 }
 0x171   :  { %v1849_v16 = vpop.f32.mrb[29].mxu0  ;;  %v1851_v28 = vpop.f32.mrb[30].mxu1  ;;  %v883_v22 = vadd.f32 %v851_v29, %v1810_v54  ;;  %v822_v57 = vmul.f32 %v790_v9, %v1831_v1  ;;  %v793_v52 = vmul.f32 0.044715, %v1834_v15  ;;  %v1869_v35 = vadd.f32 %v1648_v6, %v656_v23 }
 0x172   :  { %v1854_v33 = vpop.f32.mrb[30].mxu0  ;;  %v1856_v20 = vpop.f32.mrb[31].mxu1  ;;  %v1006_v40 = vmul.f32 %v974_v26, %v750_v7  ;;  %1040 = vst.msk [vmem:[#allocation11 + $0x70] sm:$0xff] %vm268_vm0, %v1008_v30  ;;  %1336 = vtanh.f32 %v917_v31  ;;  %v888_v51 = vadd.f32 %v856_v32, %v1813_v56  ;;  %v677_v60 = vadd.f32 %v1789_v44, %v1782_v37 }
 0x173   :  { %v1329_v36 = vpop.eup %1328  ;;  %v1861_v42 = vpop.f32.mrb[31].mxu0  ;;  %v915_v47 = vmul.f32 0.7978846, %v883_v22  ;;  %v854_v61 = vmul.f32 %v822_v57, %v1831_v1  ;;  %v825_v24 = vmul.f32 %v793_v52, %v1834_v15  ;;  %v756_v3 = vmul.f32 0.5, %v1757_v25 }
 0x174   :  { %v1331_v46 = vpop.eup %1330  ;;  %v977_v34 = vadd.f32 1.0, %v1329_v36  ;;  %1038 = vst.msk [vmem:[#allocation11 + $0x60] sm:$0xff] %vm268_vm0, %v1006_v40  ;;  %v920_v48 = vmul.f32 0.7978846, %v888_v51  ;;  %v791_v10 = vmul.f32 0.044715, %v1869_v35  ;;  %v1881_v37 = vadd.f32 %v1648_v6, %v677_v60 }
 0x175   :  { %v975_v39 = vadd.f32 1.0, %v1331_v46  ;;  %1338 = vtanh.f32 %v915_v47  ;;  %v886_v4 = vadd.f32 %v854_v61, %v1831_v1  ;;  %v857_v8 = vmul.f32 %v825_v24, %v1834_v15 }
 0x176   :  { %v1009_v38 = vmul.f32 %v977_v34, %v753_v27  ;;  %v1333_v62 = vpop.eup %1332  ;;  %1340 = vtanh.f32 %v920_v48  ;;  %v669_v25 = vadd.f32 %v1797_v49, %v1791_v45  ;;  %v680_v44 = vadd.f32 %v1805_v53, %v1799_v50 }
 0x177   :  { %v1007_v63 = vmul.f32 %v975_v39, %v751_v41  ;;  %v980_v7 = vadd.f32 1.0, %v1333_v62  ;;  %v918_v5 = vmul.f32 0.7978846, %v886_v4  ;;  %v889_v59 = vadd.f32 %v857_v8, %v1834_v15 }
 0x178   :  { %1041 = vst.msk [vmem:[#allocation11 + $0x78] sm:$0xff] %vm268_vm0, %v1009_v38  ;;  %v823_v23 = vmul.f32 %v791_v10, %v1869_v35  ;;  %v672_v0 = vadd.f32 %v1815_v58, %v1807_v55  ;;  %v754_v12 = vmul.f32 0.5, %v1776_v17  ;;  %v796_v13 = vmul.f32 0.044715, %v1881_v37 }
 0x179   :  { %1039 = vst.msk [vmem:[#allocation11 + $0x68] sm:$0xff] %vm268_vm0, %v1007_v63  ;;  %v1012_v11 = vmul.f32 %v980_v7, %v756_v3  ;;  %1342 = vtanh.f32 %v918_v5  ;;  %v1894_v14 = vadd.f32 %v1648_v6, %v669_v25  ;;  %v1335_v45 = vpop.eup %1334  ;;  %v921_v49 = vmul.f32 0.7978846, %v889_v59 }
 0x17a   :  { %v855_v50 = vmul.f32 %v823_v23, %v1869_v35  ;;  %v1899_v53 = vadd.f32 %v1648_v6, %v680_v44  ;;  %v1902_v19 = vadd.f32 %v1648_v6, %v672_v0  ;;  %v978_v55 = vadd.f32 1.0, %v1335_v45 }
 0x17b   :  { %1044 = vst.msk [vmem:[#allocation11 + $0x90] sm:$0xff] %vm268_vm0, %v1012_v11  ;;  %v757_v17 = vmul.f32 0.5, %v1787_v43  ;;  %v828_v58 = vmul.f32 %v796_v13, %v1881_v37  ;;  %v794_v26 = vmul.f32 0.044715, %v1894_v14  ;;  %v755_v29 = vmul.f32 0.5, %v1810_v54 }
 0x17c   :  { %v1337_v27 = vpop.eup %1336  ;;  %1344 = vtanh.f32 %v921_v49  ;;  %v887_v9 = vadd.f32 %v855_v50, %v1869_v35  ;;  %v797_v30 = vmul.f32 0.044715, %v1899_v53  ;;  %v1010_v31 = vmul.f32 %v978_v55, %v754_v12 }
 0x17d   :  { %v981_v32 = vadd.f32 1.0, %v1337_v27  ;;  %v860_v36 = vmul.f32 %v828_v58, %v1881_v37  ;;  %v826_v40 = vmul.f32 %v794_v26, %v1894_v14  ;;  %v760_v43 = vmul.f32 0.5, %v1813_v56 }
 0x17e   :  { %v919_v41 = vmul.f32 0.7978846, %v887_v9  ;;  %v829_v22 = vmul.f32 %v797_v30, %v1899_v53  ;;  %v795_v57 = vmul.f32 0.044715, %v1902_v19  ;;  %1042 = vst.msk [vmem:[#allocation11 + $0x80] sm:$0xff] %vm268_vm0, %v1010_v31  ;;  %v693_v52 = vadd.f32 %v1842_v21, %v1838_v2 }
 0x17f   :  { %v1339_v46 = vpop.eup %1338  ;;  %v1013_v54 = vmul.f32 %v981_v32, %v757_v17  ;;  %v892_v34 = vadd.f32 %v860_v36, %v1881_v37  ;;  %v858_v51 = vmul.f32 %v826_v40, %v1894_v14  ;;  %v685_v21 = vadd.f32 %v1849_v16, %v1844_v18 }
 0x180   :  { %v1341_v39 = vpop.eup %1340  ;;  %v979_v47 = vadd.f32 1.0, %v1339_v46  ;;  %1346 = vtanh.f32 %v919_v41  ;;  %v861_v56 = vmul.f32 %v829_v22, %v1899_v53  ;;  %v827_v61 = vmul.f32 %v795_v57, %v1902_v19 }
 0x181   :  { %1045 = vst.msk [vmem:[#allocation11 + $0x98] sm:$0xff] %vm268_vm0, %v1013_v54  ;;  %v984_v38 = vadd.f32 1.0, %v1341_v39  ;;  %v924_v48 = vmul.f32 0.7978846, %v892_v34  ;;  %v890_v24 = vadd.f32 %v858_v51, %v1894_v14  ;;  %v1925_v60 = vadd.f32 %v1648_v6, %v693_v52 }
 0x182   :  { %v1011_v62 = vmul.f32 %v979_v47, %v755_v29  ;;  %v893_v63 = vadd.f32 %v861_v56, %v1899_v53  ;;  %v859_v2 = vmul.f32 %v827_v61, %v1902_v19  ;;  %v758_v7 = vmul.f32 0.5, %v1831_v1 }
 0x183   :  { %v1343_v3 = vpop.eup %1342  ;;  %v1016_v4 = vmul.f32 %v984_v38, %v760_v43  ;;  %1348 = vtanh.f32 %v924_v48  ;;  %v922_v8 = vmul.f32 0.7978846, %v890_v24  ;;  %v800_v44 = vmul.f32 0.044715, %v1925_v60 }
 0x184   :  { %1043 = vst.msk [vmem:[#allocation11 + $0x88] sm:$0xff] %vm268_vm0, %v1011_v62  ;;  %v982_v10 = vadd.f32 1.0, %v1343_v3  ;;  %v925_v5 = vmul.f32 0.7978846, %v893_v63  ;;  %v891_v25 = vadd.f32 %v859_v2, %v1902_v19  ;;  %v1937_v11 = vadd.f32 %v1648_v6, %v685_v21 }
 0x185   :  { %1048 = vst.msk [vmem:[#allocation11 + $0xb0] sm:$0xff] %vm268_vm0, %v1016_v4  ;;  %1350 = vtanh.f32 %v922_v8  ;;  %v696_v18 = vadd.f32 %v1854_v33, %v1851_v28  ;;  %v688_v1 = vadd.f32 %v1861_v42, %v1856_v20  ;;  %v832_v0 = vmul.f32 %v800_v44, %v1925_v60 }
 0x186   :  { %v1345_v16 = vpop.eup %1344  ;;  %v1014_v59 = vmul.f32 %v982_v10, %v758_v7  ;;  %1352 = vtanh.f32 %v925_v5  ;;  %v923_v23 = vmul.f32 0.7978846, %v891_v25  ;;  %v761_v12 = vmul.f32 0.5, %v1834_v15 }
 0x187   :  { %v985_v13 = vadd.f32 1.0, %v1345_v16  ;;  %v798_v45 = vmul.f32 0.044715, %v1937_v11  ;;  %v1947_v49 = vadd.f32 %v1648_v6, %v696_v18  ;;  %v864_v28 = vmul.f32 %v832_v0, %v1925_v60 }
 0x188   :  { %1046 = vst.msk [vmem:[#allocation11 + $0xa0] sm:$0xff] %vm268_vm0, %v1014_v59  ;;  %1354 = vtanh.f32 %v923_v23  ;;  %v735_v33 = vadd.f32 %v1648_v6, %v688_v1  ;;  %v759_v58 = vmul.f32 0.5, %v1869_v35  ;;  %v764_v40 = vmul.f32 0.5, %v1881_v37 }
 0x189   :  { %v1017_v20 = vmul.f32 %v985_v13, %v761_v12  ;;  %v830_v42 = vmul.f32 %v798_v45, %v1937_v11  ;;  %v801_v50 = vmul.f32 0.044715, %v1947_v49  ;;  %v896_v15 = vadd.f32 %v864_v28, %v1925_v60 }
 0x18a   :  { %v1347_v55 = vpop.eup %1346  ;;  %v799_v17 = vmul.f32 0.044715, %v735_v33  ;;  %v762_v34 = vmul.f32 0.5, %v1894_v14  ;;  %v765_v39 = vmul.f32 0.5, %v1899_v53  ;;  %v763_v24 = vmul.f32 0.5, %v1902_v19 }
 0x18b   :  { %1049 = vst.msk [vmem:[#allocation11 + $0xb8] sm:$0xff] %vm268_vm0, %v1017_v20  ;;  %v983_v26 = vadd.f32 1.0, %v1347_v55  ;;  %v862_v27 = vmul.f32 %v830_v42, %v1937_v11  ;;  %v833_v29 = vmul.f32 %v801_v50, %v1947_v49  ;;  %v928_v9 = vmul.f32 0.7978846, %v896_v15 }
 0x18c   :  { %v831_v6 = vmul.f32 %v799_v17, %v735_v33  ;;  %v768_v63 = vmul.f32 0.5, %v1925_v60  ;;  %v766_v4 = vmul.f32 0.5, %v1937_v11  ;;  %v769_v5 = vmul.f32 0.5, %v1947_v49 }
 0x18d   :  { %v1349_v30 = vpop.eup %1348  ;;  %v1015_v31 = vmul.f32 %v983_v26, %v759_v58  ;;  %v894_v32 = vadd.f32 %v862_v27, %v1937_v11  ;;  %v865_v36 = vmul.f32 %v833_v29, %v1947_v49  ;;  %1356 = vtanh.f32 %v928_v9 }
 0x18e   :  { %v988_v43 = vadd.f32 1.0, %v1349_v30  ;;  %v863_v41 = vmul.f32 %v831_v6, %v735_v33  ;;  %v767_v44 = vmul.f32 0.5, %v735_v33 }
 0x18f   :  { %v1351_v22 = vpop.eup %1350  ;;  %1047 = vst.msk [vmem:[#allocation11 + $0xa8] sm:$0xff] %vm268_vm0, %v1015_v31  ;;  %v926_v35 = vmul.f32 0.7978846, %v894_v32  ;;  %v897_v57 = vadd.f32 %v865_v36, %v1947_v49 }
 0x190   :  { %v1353_v46 = vpop.eup %1352  ;;  %v1020_v54 = vmul.f32 %v988_v43, %v764_v40  ;;  %v986_v51 = vadd.f32 1.0, %v1351_v22  ;;  %v895_v52 = vadd.f32 %v863_v41, %v735_v33 }
 0x191   :  { %v989_v47 = vadd.f32 1.0, %v1353_v46  ;;  %1358 = vtanh.f32 %v926_v35  ;;  %v929_v37 = vmul.f32 0.7978846, %v897_v57 }
 0x192   :  { %v1355_v56 = vpop.eup %1354  ;;  %1052 = vst.msk [vmem:[#allocation11 + $0xd0] sm:$0xff] %vm268_vm0, %v1020_v54  ;;  %v1018_v61 = vmul.f32 %v986_v51, %v762_v34  ;;  %v927_v38 = vmul.f32 0.7978846, %v895_v52 }
 0x193   :  { %v1021_v48 = vmul.f32 %v989_v47, %v765_v39  ;;  %v987_v62 = vadd.f32 1.0, %v1355_v56  ;;  %1360 = vtanh.f32 %v929_v37 }
 0x194   :  { %1050 = vst.msk [vmem:[#allocation11 + $0xc0] sm:$0xff] %vm268_vm0, %v1018_v61  ;;  %1362 = vtanh.f32 %v927_v38 }
 0x195   :  { %1053 = vst.msk [vmem:[#allocation11 + $0xd8] sm:$0xff] %vm268_vm0, %v1021_v48  ;;  %v1019_v14 = vmul.f32 %v987_v62, %v763_v24 }
 0x197   :  { %1051 = vst.msk [vmem:[#allocation11 + $0xc8] sm:$0xff] %vm268_vm0, %v1019_v14  ;;  %v1357_v53 = vpop.eup %1356 }
 0x198   :  { %v992_v2 = vadd.f32 1.0, %v1357_v53 }
 0x19a   :  { %v1024_v3 = vmul.f32 %v992_v2, %v768_v63 }
 0x19b   :  { %v1359_v21 = vpop.eup %1358 }
 0x19c   :  { %v990_v7 = vadd.f32 1.0, %v1359_v21  ;;  %1056 = vst.msk [vmem:[#allocation11 + $0xf0] sm:$0xff] %vm268_vm0, %v1024_v3 }
 0x19d   :  { %v1361_v19 = vpop.eup %1360 }
 0x19e   :  { %v1363_v8 = vpop.eup %1362  ;;  %v1022_v10 = vmul.f32 %v990_v7, %v766_v4  ;;  %v993_v25 = vadd.f32 1.0, %v1361_v19 }
 0x19f   :  { %v991_v18 = vadd.f32 1.0, %v1363_v8 }
 0x1a0   :  { %1054 = vst.msk [vmem:[#allocation11 + $0xe0] sm:$0xff] %vm268_vm0, %v1022_v10  ;;  %v1025_v60 = vmul.f32 %v993_v25, %v769_v5 }
 0x1a1   :  { %v1023_v1 = vmul.f32 %v991_v18, %v767_v44 }
 0x1a2   :  { %1057 = vst.msk [vmem:[#allocation11 + $0xf8] sm:$0xff] %vm268_vm0, %v1025_v60 }
 0x1a3   :  { %1055 = vst.msk [vmem:[#allocation11 + $0xe8] sm:$0xff] %vm268_vm0, %v1023_v1 }
 0x1a4   :  { %1485 = shalt.err (!%p1482_p2)
}
 0x1a5   :  { %s1486_s11 = scalar_lea.hbm %s1998_s5, 4096 }
 0x1a6   :  { %p1487_p3 = scmp.ne.s32.totalorder %s1998_s5, %s1486_s11  ;;  %p1490_p4 = scmp.lt.u32.totalorder %s1486_s11, %s1998_s5 }
 0x1a8   :  { %p1492_p5 = pnand %p1490_p4, %p1487_p3 }
 0x1aa   :  { %1495 = shalt.err (!%p1492_p5)
}
 0x1ab   :  { %1069 = dma.vmem_to_hbm [thread:$0]  %s1064_s29, 4096, %s1998_s5, [#allocation4], %s1509_s3, %s1509_s3, %s1510_s30  }
 0x1ac   :  { %1502 = dma.done.wait [#allocation4], 4096  }
 0x1ad   :  { %1503 = vsyncadd [#allocation4], 4294963200 }
 0x1ae   :  { %1073 = vsyncpa [#allocation3], 1 }
 0x1af   :  { %1074 = vsyncpa [#allocation6], 1 }
 0x1b0   :  { %1075 = vsyncpa [#allocation9], 1 }
 0x1b1   :  { %1076 = vsyncpa [#allocation4], 1 }

</bundles_post_ra>
